<compile_context>
chip_gen: v7x
topology: tpu7x:2x2x1
jax: 0.10.0
libtpu: 0.0.40
codegen_flags: <defaults>
</compile_context>

<pallas_src>
import functools

import jax
import jax.numpy as jnp
from jax import lax
from jax.experimental import pallas as pl
from jax.experimental.pallas import tpu as pltpu

ALPHA = 62                    # conv kernel height == input height (alphabet)
KW = 3                        # conv kernel width
L = 1022                      # input length -> conv out 1020 -> pooled 340
C_OUT = 128
L_CONV = L - KW + 1           # 1020
L_POOL = L_CONV // 3          # 340
FLAT = C_OUT * L_POOL         # 43520  (matches nn.Linear(43520, 1024))
H1 = 1024
H2 = 1024


# ----------------- fused conv + bias + ReLU + MaxPool1d(3, 3) -----------------
def conv_relu_pool_kernel(y_ref, w_ref, b_ref, o_ref, *, tb):
    # y_ref: (tb, 5, 62, 340) bf16 with y[b, s, a, q] = x[b, a, 3q + s]
    # w_ref: (3, 128, 62)     bf16 with w[kw, c, a]   = conv_w[c, 0, a, kw]
    # b_ref: (128, 1)         f32
    # o_ref: (tb, 128, 340)   bf16 pooled activations, PyTorch (B, C, Lp) layout
    w0 = w_ref[0]
    w1 = w_ref[1]
    w2 = w_ref[2]
    b = b_ref[...]

    def mm(a, v):
        return jnp.dot(a, v, preferred_element_type=jnp.float32)

    def body(i, carry):
        y = y_ref[i]                          # (5, 62, 340) bf16
        y0, y1, y2, y3, y4 = y[0], y[1], y[2], y[3], y[4]
        # conv at p = 3q, 3q+1, 3q+2 ; running max keeps only 2 large temps live.
        r = jnp.maximum(mm(w0, y0) + mm(w1, y1) + mm(w2, y2) + b, 0.0)
        r = jnp.maximum(r, jnp.maximum(mm(w0, y1) + mm(w1, y2) + mm(w2, y3) + b, 0.0))
        r = jnp.maximum(r, jnp.maximum(mm(w0, y2) + mm(w1, y3) + mm(w2, y4) + b, 0.0))
        o_ref[i] = r.astype(o_ref.dtype)
        return carry

    lax.fori_loop(0, tb, body, 0)


def conv_relu_pool(y, wc, bc, *, tb):
    B = y.shape[0]
    assert B % tb == 0
    flops = B * L_CONV * 2 * C_OUT * ALPHA * KW
    bytes_accessed = (y.size * 2 + wc.size * 2 + bc.size * 4
                      + B * C_OUT * L_POOL * 2)
    return pl.pallas_call(
        functools.partial(conv_relu_pool_kernel, tb=tb),
        out_shape=jax.ShapeDtypeStruct((B, C_OUT, L_POOL), jnp.bfloat16),
        grid_spec=pltpu.PrefetchScalarGridSpec(
            num_scalar_prefetch=0,
            grid=(B // tb,),
            in_specs=[
                pl.BlockSpec((tb, 5, ALPHA, L_POOL), lambda i: (i, 0, 0, 0)),
                pl.BlockSpec((KW, C_OUT, ALPHA), lambda i: (0, 0, 0)),
                pl.BlockSpec((C_OUT, 1), lambda i: (0, 0)),
            ],
            out_specs=pl.BlockSpec((tb, C_OUT, L_POOL), lambda i: (i, 0, 0))),
        compiler_params=pltpu.CompilerParams(
            dimension_semantics=("parallel",)),
        cost_estimate=pl.CostEstimate(flops=flops, transcendentals=0,
                                      bytes_accessed=bytes_accessed),
    )(y, wc, bc)


# ------------------------ fc1: tiled matmul + bias + ReLU ---------------------
def linear_relu_kernel(x_ref, w_ref, b_ref, o_ref):
    k = pl.program_id(1)

    @pl.when(k == 0)
    def _():
        o_ref[...] = jnp.zeros_like(o_ref)

    # bf16 x bf16 MXU matmul with f32 accumulation directly into the K-resident
    # output block (no scratch accumulator).
    o_ref[...] += jnp.dot(x_ref[...], w_ref[...],
                          preferred_element_type=jnp.float32)

    @pl.when(k == pl.num_programs(1) - 1)
    def _():
        o_ref[...] = jnp.maximum(o_ref[...] + b_ref[...], 0.0)


def linear_relu(x, w, b2d, *, tk, tn):
    M, K = x.shape
    K2, N = w.shape
    assert K == K2 and K % tk == 0 and N % tn == 0
    flops = 2 * M * K * N
    bytes_accessed = (K * N * 2                 # w1 streamed once (bf16)
                      + (N // tn) * M * K * 2   # x re-streamed per N block (bf16)
                      + M * N * 4 + N * 4)
    return pl.pallas_call(
        linear_relu_kernel,
        out_shape=jax.ShapeDtypeStruct((M, N), jnp.float32),
        grid_spec=pltpu.PrefetchScalarGridSpec(
            num_scalar_prefetch=0,
            grid=(N // tn, K // tk),
            in_specs=[
                pl.BlockSpec((M, tk), lambda n, k: (0, k)),
                pl.BlockSpec((tk, tn), lambda n, k: (k, n)),
                pl.BlockSpec((1, tn), lambda n, k: (0, n)),
            ],
            out_specs=pl.BlockSpec((M, tn), lambda n, k: (0, n))),
        compiler_params=pltpu.CompilerParams(
            dimension_semantics=("parallel", "arbitrary"),
            vmem_limit_bytes=48 << 20),
        cost_estimate=pl.CostEstimate(flops=flops, transcendentals=0,
                                      bytes_accessed=bytes_accessed),
    )(x, w, b2d)


# ---------------- fc2 (+ReLU) fused with fc3 (1024 -> 1) ----------------------
def fc2_fc3_kernel(h_ref, w2_ref, b2_ref, w3t_ref, b3_ref, o_ref, acc_ref):
    k = pl.program_id(0)

    @pl.when(k == 0)
    def _():
        acc_ref[...] = jnp.zeros_like(acc_ref)

    acc_ref[...] += jnp.dot(h_ref[...].astype(jnp.bfloat16), w2_ref[...],
                            preferred_element_type=jnp.float32)

    @pl.when(k == pl.num_programs(0) - 1)
    def _():
        h2 = jnp.maximum(acc_ref[...] + b2_ref[...], 0.0)          # (M, 1024)
        # fc3 as a VPU multiply + lane reduction (avoids a 1-lane MXU matmul,
        # an extra kernel launch and an HBM round trip of h2).
        o_ref[...] = (jnp.sum(h2 * w3t_ref[...], axis=-1, keepdims=True)
                      + b3_ref[...])


def fc2_fc3(h, w2, b2_2d, w3t, b3_2d, *, tk=1024):
    M, K = h.shape
    _, N = w2.shape
    assert K % tk == 0
    flops = 2 * M * K * N + 2 * M * N
    bytes_accessed = M * K * 4 + K * N * 2 + 2 * N * 4 + M * 4 + 4
    return pl.pallas_call(
        fc2_fc3_kernel,
        out_shape=jax.ShapeDtypeStruct((M, 1), jnp.float32),
        grid_spec=pltpu.PrefetchScalarGridSpec(
            num_scalar_prefetch=0,
            grid=(K // tk,),
            in_specs=[
                pl.BlockSpec((M, tk), lambda k: (0, k)),
                pl.BlockSpec((tk, N), lambda k: (k, 0)),
                pl.BlockSpec((1, N), lambda k: (0, 0)),
                pl.BlockSpec((1, N), lambda k: (0, 0)),
                pl.BlockSpec((1, 1), lambda k: (0, 0)),
            ],
            out_specs=pl.BlockSpec((M, 1), lambda k: (0, 0)),
            scratch_shapes=[pltpu.VMEM((M, N), jnp.float32)]),
        compiler_params=pltpu.CompilerParams(
            dimension_semantics=("arbitrary",)),
        cost_estimate=pl.CostEstimate(flops=flops, transcendentals=0,
                                      bytes_accessed=bytes_accessed),
    )(h, w2, b2_2d, w3t, b3_2d)


# ------------------------------- parameters -----------------------------------
def init_params(key):
    ks = jax.random.split(key, 8)
    # conv1: torch.nn.init.normal_(weight) -> std=1; bias ~ U(+/- 1/sqrt(fan_in))
    conv_w = jax.random.normal(ks[0], (C_OUT, 1, ALPHA, KW), jnp.float32)
    bnd_c = 1.0 / jnp.sqrt(float(ALPHA * KW))
    conv_b = jax.random.uniform(ks[1], (C_OUT,), jnp.float32, -bnd_c, bnd_c)

    def lin(kw_, kb_, fan_in, fan_out):
        bnd = 1.0 / jnp.sqrt(float(fan_in))
        w = jax.random.uniform(kw_, (fan_in, fan_out), jnp.float32, -bnd, bnd)
        b = jax.random.uniform(kb_, (fan_out,), jnp.float32, -bnd, bnd)
        return w, b

    w1, b1 = lin(ks[2], ks[3], FLAT, H1)
    w2, b2 = lin(ks[4], ks[5], H1, H2)
    w3, b3 = lin(ks[6], ks[7], H2, 1)
    # Large FC weights stored in bf16: fc1/fc2 are pure HBM weight streaming, so
    # bf16 halves the dominant byte stream; accumulation stays f32 in-kernel.
    return dict(conv_w=conv_w, conv_b=conv_b,
                w1=w1.astype(jnp.bfloat16), b1=b1,
                w2=w2.astype(jnp.bfloat16), b2=b2,
                w3=w3, b3=b3)


def prepare_params(params):
    """One-time layout plumbing so the forward pass does no weight reshuffling."""
    wc = jnp.transpose(params["conv_w"][:, 0], (2, 0, 1))       # (3, 128, 62)
    return dict(
        wc=wc.astype(jnp.bfloat16),
        bc=params["conv_b"].reshape(C_OUT, 1),
        w1=params["w1"], b1=params["b1"].reshape(1, H1),
        w2=params["w2"], b2=params["b2"].reshape(1, H2),
        w3t=params["w3"].reshape(1, H2),                        # (1024,1) -> (1,1024)
        b3=params["b3"].reshape(1, 1),
    )


def _pick_tb(B):
    # Keep >= 2 programs on the conv's "parallel" grid axis (v7x megacore) while
    # bounding per-tile VMEM / vreg pressure.
    for d in (4, 2, 1):
        if B % d == 0 and B // d >= 2:
            return d
    return 1


# --------------------------------- forward ------------------------------------
def char_cnn_forward(x, p):
    B = x.shape[0]
    xb = x.astype(jnp.bfloat16)
    # Five stride-3-shifted slabs: y[b, s, a, q] = x[b, a, 3q + s], s = 0..4.
    # This folds MaxPool1d(3,3) and the KW=3 shifted conv windows into lane-aligned
    # in-kernel slices (no im2col patches in HBM, no cross-lane shifts in-kernel).
    y = jnp.stack([xb[:, :, s:s + 3 * L_POOL:3] for s in range(5)], axis=1)

    tb = _pick_tb(B)
    pooled = conv_relu_pool(y, p["wc"], p["bc"], tb=tb)              # (B, 128, 340) bf16

    # PyTorch flatten order is (B, 128, 340) -> contiguous reshape (free).
    feat = pooled.reshape(B, FLAT)                                   # bf16

    # Dropout(p=0.5) layers are identity at inference (eval mode).
    h1 = linear_relu(feat, p["w1"], p["b1"], tk=4352, tn=512)        # (B, 1024)
    return fc2_fc3(h1, p["w2"], p["b2"], p["w3t"], p["b3"], tk=1024)  # (B, 1)


# ---------------------------- pure-JAX reference ------------------------------
def reference_forward(x, params):
    B = x.shape[0]
    conv = jax.lax.conv_general_dilated(
        x[:, None, :, :], params["conv_w"], window_strides=(1, 1),
        padding="VALID", dimension_numbers=("NCHW", "OIHW", "NCHW"))
    conv = jax.nn.relu(conv + params["conv_b"][None, :, None, None])
    conv = jnp.squeeze(conv, axis=2)                                 # (B, 128, 1020)
    pooled = jnp.max(conv.reshape(B, C_OUT, L_POOL, 3), axis=-1)
    feat = pooled.reshape(B, FLAT)
    w1 = params["w1"].astype(jnp.float32)
    w2 = params["w2"].astype(jnp.float32)
    h = jax.nn.relu(feat @ w1 + params["b1"])
    h = jax.nn.relu(h @ w2 + params["b2"])
    return h @ params["w3"] + params["b3"]


if __name__ == "__main__":
    key = jax.random.PRNGKey(0)
    k_x, k_p = jax.random.split(key)
    B = 2
    x = jax.random.normal(k_x, (B, ALPHA, L), jnp.float32)
    params = init_params(k_p)
    prep = prepare_params(params)

    fwd = jax.jit(char_cnn_forward)
    out = jax.block_until_ready(fwd(x, prep))
    ref = jax.block_until_ready(reference_forward(x, params))

    assert out.shape == (B, 1), out.shape
    assert bool(jnp.all(jnp.isfinite(out)))
    # Kernels run conv/fc1/fc2 as bf16 x bf16 MXU matmuls (f32 accumulation) and keep
    # activations in bf16 between conv and fc1, while the reference is pure f32, so
    # the tolerance is loosened accordingly.
    assert bool(jnp.allclose(out, ref, rtol=5e-2, atol=5e-2)), (out, ref)
    print("KERNEL_OK")
</pallas_src>

<mosaic_0001>
module attributes {stable_mosaic.version = 11 : i64} {
  func.func @conv_relu_pool_kernel(%arg0: i32, %arg1: memref<1x5x62x340xbf16, #tpu.memory_space<vmem>>, %arg2: memref<3x128x62xbf16, #tpu.memory_space<vmem>>, %arg3: memref<128x1xf32, #tpu.memory_space<vmem>>, %arg4: memref<1x128x340xbf16, #tpu.memory_space<vmem>>) attributes {dimension_semantics = [#tpu.dimension_semantics<parallel>], iteration_bounds = array<i64: 2>, scalar_prefetch = 0 : i64, scratch_operands = 0 : i64, tpu.core_type = #tpu.core_type<tc>, window_params = [{transform_indices = @transform_0, window_bounds = array<i64: 1, 5, 62, 340>}, {pipeline_mode = #tpu.pipeline_mode<synchronous>, transform_indices = @transform_1, window_bounds = array<i64: 3, 128, 62>}, {pipeline_mode = #tpu.pipeline_mode<synchronous>, transform_indices = @transform_2, window_bounds = array<i64: 128, 1>}, {transform_indices = @transform_3, window_bounds = array<i64: 1, 128, 340>}]} {
    %c0 = arith.constant 0 : index
    %c0_0 = arith.constant 0 : index
    %c0_1 = arith.constant 0 : index
    %0 = vector.load %arg2[%c0, %c0_0, %c0_1] : memref<3x128x62xbf16, #tpu.memory_space<vmem>>, vector<1x128x62xbf16>
    %1 = vector.shape_cast %0 : vector<1x128x62xbf16> to vector<128x62xbf16>
    %c1 = arith.constant 1 : index
    %c0_2 = arith.constant 0 : index
    %c0_3 = arith.constant 0 : index
    %2 = vector.load %arg2[%c1, %c0_2, %c0_3] : memref<3x128x62xbf16, #tpu.memory_space<vmem>>, vector<1x128x62xbf16>
    %3 = vector.shape_cast %2 : vector<1x128x62xbf16> to vector<128x62xbf16>
    %c2 = arith.constant 2 : index
    %c0_4 = arith.constant 0 : index
    %c0_5 = arith.constant 0 : index
    %4 = vector.load %arg2[%c2, %c0_4, %c0_5] : memref<3x128x62xbf16, #tpu.memory_space<vmem>>, vector<1x128x62xbf16>
    %5 = vector.shape_cast %4 : vector<1x128x62xbf16> to vector<128x62xbf16>
    %c0_6 = arith.constant 0 : index
    %c0_7 = arith.constant 0 : index
    %6 = vector.load %arg3[%c0_6, %c0_7] : memref<128x1xf32, #tpu.memory_space<vmem>>, vector<128x1xf32>
    %c0_i32 = arith.constant 0 : i32
    %7 = arith.index_cast %c0_i32 : i32 to index
    %c0_8 = arith.constant 0 : index
    %c0_9 = arith.constant 0 : index
    %c0_10 = arith.constant 0 : index
    %8 = vector.load %arg1[%7, %c0_8, %c0_9, %c0_10] : memref<1x5x62x340xbf16, #tpu.memory_space<vmem>>, vector<1x5x62x340xbf16>
    %9 = vector.shape_cast %8 : vector<1x5x62x340xbf16> to vector<5x62x340xbf16>
    %10 = vector.extract_strided_slice %9 {offsets = [0, 0, 0], sizes = [1, 62, 340], strides = [1, 1, 1]} : vector<5x62x340xbf16> to vector<1x62x340xbf16>
    %11 = vector.shape_cast %10 : vector<1x62x340xbf16> to vector<62x340xbf16>
    %12 = vector.extract_strided_slice %9 {offsets = [1, 0, 0], sizes = [1, 62, 340], strides = [1, 1, 1]} : vector<5x62x340xbf16> to vector<1x62x340xbf16>
    %13 = vector.shape_cast %12 : vector<1x62x340xbf16> to vector<62x340xbf16>
    %14 = vector.extract_strided_slice %9 {offsets = [2, 0, 0], sizes = [1, 62, 340], strides = [1, 1, 1]} : vector<5x62x340xbf16> to vector<1x62x340xbf16>
    %15 = vector.shape_cast %14 : vector<1x62x340xbf16> to vector<62x340xbf16>
    %16 = vector.extract_strided_slice %9 {offsets = [3, 0, 0], sizes = [1, 62, 340], strides = [1, 1, 1]} : vector<5x62x340xbf16> to vector<1x62x340xbf16>
    %17 = vector.shape_cast %16 : vector<1x62x340xbf16> to vector<62x340xbf16>
    %18 = vector.extract_strided_slice %9 {offsets = [4, 0, 0], sizes = [1, 62, 340], strides = [1, 1, 1]} : vector<5x62x340xbf16> to vector<1x62x340xbf16>
    %19 = vector.shape_cast %18 : vector<1x62x340xbf16> to vector<62x340xbf16>
    %cst = arith.constant dense<0.000000e+00> : vector<128x340xf32>
    %20 = tpu.matmul %1, %11, %cst {dimension_numbers = #tpu.dot_dimension_numbers<[1], [0], [0], [1], [0, 0, 1, 1], [], []>} : vector<128x62xbf16>, vector<62x340xbf16>, vector<128x340xf32> -> vector<128x340xf32>
    %cst_11 = arith.constant dense<0.000000e+00> : vector<128x340xf32>
    %21 = tpu.matmul %3, %13, %cst_11 {dimension_numbers = #tpu.dot_dimension_numbers<[1], [0], [0], [1], [0, 0, 1, 1], [], []>} : vector<128x62xbf16>, vector<62x340xbf16>, vector<128x340xf32> -> vector<128x340xf32>
    %22 = arith.addf %20, %21 : vector<128x340xf32>
    %cst_12 = arith.constant dense<0.000000e+00> : vector<128x340xf32>
    %23 = tpu.matmul %5, %15, %cst_12 {dimension_numbers = #tpu.dot_dimension_numbers<[1], [0], [0], [1], [0, 0, 1, 1], [], []>} : vector<128x62xbf16>, vector<62x340xbf16>, vector<128x340xf32> -> vector<128x340xf32>
    %24 = arith.addf %22, %23 : vector<128x340xf32>
    %25 = vector.broadcast %6 : vector<128x1xf32> to vector<128x340xf32>
    %26 = arith.addf %24, %25 : vector<128x340xf32>
    %cst_13 = arith.constant 0.000000e+00 : f32
    %27 = vector.broadcast %cst_13 : f32 to vector<128x340xf32>
    %28 = arith.maximumf %26, %27 : vector<128x340xf32>
    %cst_14 = arith.constant dense<0.000000e+00> : vector<128x340xf32>
    %29 = tpu.matmul %1, %13, %cst_14 {dimension_numbers = #tpu.dot_dimension_numbers<[1], [0], [0], [1], [0, 0, 1, 1], [], []>} : vector<128x62xbf16>, vector<62x340xbf16>, vector<128x340xf32> -> vector<128x340xf32>
    %cst_15 = arith.constant dense<0.000000e+00> : vector<128x340xf32>
    %30 = tpu.matmul %3, %15, %cst_15 {dimension_numbers = #tpu.dot_dimension_numbers<[1], [0], [0], [1], [0, 0, 1, 1], [], []>} : vector<128x62xbf16>, vector<62x340xbf16>, vector<128x340xf32> -> vector<128x340xf32>
    %31 = arith.addf %29, %30 : vector<128x340xf32>
    %cst_16 = arith.constant dense<0.000000e+00> : vector<128x340xf32>
    %32 = tpu.matmul %5, %17, %cst_16 {dimension_numbers = #tpu.dot_dimension_numbers<[1], [0], [0], [1], [0, 0, 1, 1], [], []>} : vector<128x62xbf16>, vector<62x340xbf16>, vector<128x340xf32> -> vector<128x340xf32>
    %33 = arith.addf %31, %32 : vector<128x340xf32>
    %34 = vector.broadcast %6 : vector<128x1xf32> to vector<128x340xf32>
    %35 = arith.addf %33, %34 : vector<128x340xf32>
    %cst_17 = arith.constant 0.000000e+00 : f32
    %36 = vector.broadcast %cst_17 : f32 to vector<128x340xf32>
    %37 = arith.maximumf %35, %36 : vector<128x340xf32>
    %38 = arith.maximumf %28, %37 : vector<128x340xf32>
    %cst_18 = arith.constant dense<0.000000e+00> : vector<128x340xf32>
    %39 = tpu.matmul %1, %15, %cst_18 {dimension_numbers = #tpu.dot_dimension_numbers<[1], [0], [0], [1], [0, 0, 1, 1], [], []>} : vector<128x62xbf16>, vector<62x340xbf16>, vector<128x340xf32> -> vector<128x340xf32>
    %cst_19 = arith.constant dense<0.000000e+00> : vector<128x340xf32>
    %40 = tpu.matmul %3, %17, %cst_19 {dimension_numbers = #tpu.dot_dimension_numbers<[1], [0], [0], [1], [0, 0, 1, 1], [], []>} : vector<128x62xbf16>, vector<62x340xbf16>, vector<128x340xf32> -> vector<128x340xf32>
    %41 = arith.addf %39, %40 : vector<128x340xf32>
    %cst_20 = arith.constant dense<0.000000e+00> : vector<128x340xf32>
    %42 = tpu.matmul %5, %19, %cst_20 {dimension_numbers = #tpu.dot_dimension_numbers<[1], [0], [0], [1], [0, 0, 1, 1], [], []>} : vector<128x62xbf16>, vector<62x340xbf16>, vector<128x340xf32> -> vector<128x340xf32>
    %43 = arith.addf %41, %42 : vector<128x340xf32>
    %44 = vector.broadcast %6 : vector<128x1xf32> to vector<128x340xf32>
    %45 = arith.addf %43, %44 : vector<128x340xf32>
    %cst_21 = arith.constant 0.000000e+00 : f32
    %46 = vector.broadcast %cst_21 : f32 to vector<128x340xf32>
    %47 = arith.maximumf %45, %46 : vector<128x340xf32>
    %48 = arith.maximumf %38, %47 : vector<128x340xf32>
    %49 = arith.truncf %48 : vector<128x340xf32> to vector<128x340xbf16>
    %50 = arith.index_cast %c0_i32 : i32 to index
    %c0_22 = arith.constant 0 : index
    %c0_23 = arith.constant 0 : index
    %51 = vector.load %arg4[%50, %c0_22, %c0_23] : memref<1x128x340xbf16, #tpu.memory_space<vmem>>, vector<1x128x340xbf16>
    %52 = vector.shape_cast %51 : vector<1x128x340xbf16> to vector<128x340xbf16>
    %53 = vector.shape_cast %49 : vector<128x340xbf16> to vector<1x128x340xbf16>
    tpu.vector_store %arg4[%50, %c0_22, %c0_23], %53 {strides = array<i32>} : memref<1x128x340xbf16, #tpu.memory_space<vmem>>, vector<1x128x340xbf16>,
    %c1_i32 = arith.constant 1 : i32
    return
  }
  func.func @transform_0(%arg0: i32) -> (i32, i32, i32, i32) {
    %c0_i32 = arith.constant 0 : i32
    %c0_i32_0 = arith.constant 0 : i32
    %c0_i32_1 = arith.constant 0 : i32
    %c0_i32_2 = arith.constant 0 : i32
    return %arg0, %c0_i32, %c0_i32_0, %c0_i32_1 : i32, i32, i32, i32
  }
  func.func @transform_1(%arg0: i32) -> (i32, i32, i32) {
    %c0_i32 = arith.constant 0 : i32
    %c0_i32_0 = arith.constant 0 : i32
    %c0_i32_1 = arith.constant 0 : i32
    %c0_i32_2 = arith.constant 0 : i32
    return %c0_i32, %c0_i32_0, %c0_i32_1 : i32, i32, i32
  }
  func.func @transform_2(%arg0: i32) -> (i32, i32) {
    %c0_i32 = arith.constant 0 : i32
    %c0_i32_0 = arith.constant 0 : i32
    %c0_i32_1 = arith.constant 0 : i32
    return %c0_i32, %c0_i32_0 : i32, i32
  }
  func.func @transform_3(%arg0: i32) -> (i32, i32, i32) {
    %c0_i32 = arith.constant 0 : i32
    %c0_i32_0 = arith.constant 0 : i32
    %c0_i32_1 = arith.constant 0 : i32
    return %arg0, %c0_i32, %c0_i32_0 : i32, i32, i32
  }
}

module attributes {stable_mosaic.version = 11 : i64} {
  func.func @linear_relu_kernel(%arg0: i32, %arg1: i32, %arg2: memref<2x4352xbf16, #tpu.memory_space<vmem>>, %arg3: memref<4352x512xbf16, #tpu.memory_space<vmem>>, %arg4: memref<1x512xf32, #tpu.memory_space<vmem>>, %arg5: memref<2x512xf32, #tpu.memory_space<vmem>>) attributes {dimension_semantics = [#tpu.dimension_semantics<parallel>, #tpu.dimension_semantics<arbitrary>], iteration_bounds = array<i64: 2, 10>, scalar_prefetch = 0 : i64, scratch_operands = 0 : i64, tpu.core_type = #tpu.core_type<tc>, window_params = [{transform_indices = @transform_0, window_bounds = array<i64: 2, 4352>}, {transform_indices = @transform_1, window_bounds = array<i64: 4352, 512>}, {transform_indices = @transform_2, window_bounds = array<i64: 1, 512>}, {transform_indices = @transform_3, window_bounds = array<i64: 2, 512>}]} {
    %c0_i32 = arith.constant 0 : i32
    %0 = arith.cmpi eq, %arg1, %c0_i32 : i32
    %1 = arith.extui %0 : i1 to i32
    %c0_i32_0 = arith.constant 0 : i32
    %2 = arith.cmpi ne, %1, %c0_i32_0 : i32
    scf.if %2 {
      %cst_9 = arith.constant 0.000000e+00 : f32
      %12 = vector.broadcast %cst_9 : f32 to vector<2x512xf32>
      %c0_10 = arith.constant 0 : index
      %c0_11 = arith.constant 0 : index
      %13 = vector.load %arg5[%c0_10, %c0_11] : memref<2x512xf32, #tpu.memory_space<vmem>>, vector<2x512xf32>
      tpu.vector_store %arg5[%c0_10, %c0_11], %12 {strides = array<i32>} : memref<2x512xf32, #tpu.memory_space<vmem>>, vector<2x512xf32>,
    } else {
    }
    %c0 = arith.constant 0 : index
    %c0_1 = arith.constant 0 : index
    %3 = vector.load %arg5[%c0, %c0_1] : memref<2x512xf32, #tpu.memory_space<vmem>>, vector<2x512xf32>
    %c0_2 = arith.constant 0 : index
    %c0_3 = arith.constant 0 : index
    %4 = vector.load %arg2[%c0_2, %c0_3] : memref<2x4352xbf16, #tpu.memory_space<vmem>>, vector<2x4352xbf16>
    %c0_4 = arith.constant 0 : index
    %c0_5 = arith.constant 0 : index
    %5 = vector.load %arg3[%c0_4, %c0_5] : memref<4352x512xbf16, #tpu.memory_space<vmem>>, vector<4352x512xbf16>
    %cst = arith.constant dense<0.000000e+00> : vector<2x512xf32>
    %6 = tpu.matmul %4, %5, %cst {dimension_numbers = #tpu.dot_dimension_numbers<[1], [0], [0], [1], [0, 0, 1, 1], [], []>} : vector<2x4352xbf16>, vector<4352x512xbf16>, vector<2x512xf32> -> vector<2x512xf32>
    %7 = arith.addf %3, %6 : vector<2x512xf32>
    %c0_6 = arith.constant 0 : index
    %c0_7 = arith.constant 0 : index
    %8 = vector.load %arg5[%c0_6, %c0_7] : memref<2x512xf32, #tpu.memory_space<vmem>>, vector<2x512xf32>
    tpu.vector_store %arg5[%c0_6, %c0_7], %7 {strides = array<i32>} : memref<2x512xf32, #tpu.memory_space<vmem>>, vector<2x512xf32>,
    %c9_i32 = arith.constant 9 : i32
    %9 = arith.cmpi eq, %arg1, %c9_i32 : i32
    %10 = arith.extui %9 : i1 to i32
    %c0_i32_8 = arith.constant 0 : i32
    %11 = arith.cmpi ne, %10, %c0_i32_8 : i32
    scf.if %11 {
      %c0_9 = arith.constant 0 : index
      %c0_10 = arith.constant 0 : index
      %12 = vector.load %arg5[%c0_9, %c0_10] : memref<2x512xf32, #tpu.memory_space<vmem>>, vector<2x512xf32>
      %c0_11 = arith.constant 0 : index
      %c0_12 = arith.constant 0 : index
      %13 = vector.load %arg4[%c0_11, %c0_12] : memref<1x512xf32, #tpu.memory_space<vmem>>, vector<1x512xf32>
      %14 = vector.broadcast %13 : vector<1x512xf32> to vector<2x512xf32>
      %15 = arith.addf %12, %14 : vector<2x512xf32>
      %cst_13 = arith.constant 0.000000e+00 : f32
      %16 = vector.broadcast %cst_13 : f32 to vector<2x512xf32>
      %17 = arith.maximumf %15, %16 : vector<2x512xf32>
      %c0_14 = arith.constant 0 : index
      %c0_15 = arith.constant 0 : index
      %18 = vector.load %arg5[%c0_14, %c0_15] : memref<2x512xf32, #tpu.memory_space<vmem>>, vector<2x512xf32>
      tpu.vector_store %arg5[%c0_14, %c0_15], %17 {strides = array<i32>} : memref<2x512xf32, #tpu.memory_space<vmem>>, vector<2x512xf32>,
    } else {
    }
    return
  }
  func.func @transform_0(%arg0: i32, %arg1: i32) -> (i32, i32) {
    %c0_i32 = arith.constant 0 : i32
    %c0_i32_0 = arith.constant 0 : i32
    return %c0_i32, %arg1 : i32, i32
  }
  func.func @transform_1(%arg0: i32, %arg1: i32) -> (i32, i32) {
    %c0_i32 = arith.constant 0 : i32
    return %arg1, %arg0 : i32, i32
  }
  func.func @transform_2(%arg0: i32, %arg1: i32) -> (i32, i32) {
    %c0_i32 = arith.constant 0 : i32
    %c0_i32_0 = arith.constant 0 : i32
    return %c0_i32, %arg0 : i32, i32
  }
  func.func @transform_3(%arg0: i32, %arg1: i32) -> (i32, i32) {
    %c0_i32 = arith.constant 0 : i32
    %c0_i32_0 = arith.constant 0 : i32
    return %c0_i32, %arg0 : i32, i32
  }
}

module attributes {stable_mosaic.version = 11 : i64} {
  func.func @fc2_fc3_kernel(%arg0: i32, %arg1: memref<2x1024xf32, #tpu.memory_space<vmem>>, %arg2: memref<1024x1024xbf16, #tpu.memory_space<vmem>>, %arg3: memref<1x1024xf32, #tpu.memory_space<vmem>>, %arg4: memref<1x1024xf32, #tpu.memory_space<vmem>>, %arg5: memref<1x1xf32, #tpu.memory_space<vmem>>, %arg6: memref<2x1xf32, #tpu.memory_space<vmem>>, %arg7: memref<2x1024xf32, #tpu.memory_space<vmem>>) attributes {dimension_semantics = [#tpu.dimension_semantics<arbitrary>], iteration_bounds = array<i64: 1>, scalar_prefetch = 0 : i64, scratch_operands = 1 : i64, tpu.core_type = #tpu.core_type<tc>, window_params = [{transform_indices = @transform_0, window_bounds = array<i64: 2, 1024>}, {transform_indices = @transform_1, window_bounds = array<i64: 1024, 1024>}, {pipeline_mode = #tpu.pipeline_mode<synchronous>, transform_indices = @transform_2, window_bounds = array<i64: 1, 1024>}, {pipeline_mode = #tpu.pipeline_mode<synchronous>, transform_indices = @transform_3, window_bounds = array<i64: 1, 1024>}, {pipeline_mode = #tpu.pipeline_mode<synchronous>, transform_indices = @transform_4, window_bounds = array<i64: 1, 1>}, {pipeline_mode = #tpu.pipeline_mode<synchronous>, transform_indices = @transform_5, window_bounds = array<i64: 2, 1>}]} {
    %c0_i32 = arith.constant 0 : i32
    %0 = arith.cmpi eq, %arg0, %c0_i32 : i32
    %1 = arith.extui %0 : i1 to i32
    %c0_i32_0 = arith.constant 0 : i32
    %2 = arith.cmpi ne, %1, %c0_i32_0 : i32
    scf.if %2 {
      %cst_10 = arith.constant 0.000000e+00 : f32
      %13 = vector.broadcast %cst_10 : f32 to vector<2x1024xf32>
      %c0_11 = arith.constant 0 : index
      %c0_12 = arith.constant 0 : index
      %14 = vector.load %arg7[%c0_11, %c0_12] : memref<2x1024xf32, #tpu.memory_space<vmem>>, vector<2x1024xf32>
      tpu.vector_store %arg7[%c0_11, %c0_12], %13 {strides = array<i32>} : memref<2x1024xf32, #tpu.memory_space<vmem>>, vector<2x1024xf32>,
    } else {
    }
    %c0 = arith.constant 0 : index
    %c0_1 = arith.constant 0 : index
    %3 = vector.load %arg7[%c0, %c0_1] : memref<2x1024xf32, #tpu.memory_space<vmem>>, vector<2x1024xf32>
    %c0_2 = arith.constant 0 : index
    %c0_3 = arith.constant 0 : index
    %4 = vector.load %arg1[%c0_2, %c0_3] : memref<2x1024xf32, #tpu.memory_space<vmem>>, vector<2x1024xf32>
    %5 = arith.truncf %4 : vector<2x1024xf32> to vector<2x1024xbf16>
    %c0_4 = arith.constant 0 : index
    %c0_5 = arith.constant 0 : index
    %6 = vector.load %arg2[%c0_4, %c0_5] : memref<1024x1024xbf16, #tpu.memory_space<vmem>>, vector<1024x1024xbf16>
    %cst = arith.constant dense<0.000000e+00> : vector<2x1024xf32>
    %7 = tpu.matmul %5, %6, %cst {dimension_numbers = #tpu.dot_dimension_numbers<[1], [0], [0], [1], [0, 0, 1, 1], [], []>} : vector<2x1024xbf16>, vector<1024x1024xbf16>, vector<2x1024xf32> -> vector<2x1024xf32>
    %8 = arith.addf %3, %7 : vector<2x1024xf32>
    %c0_6 = arith.constant 0 : index
    %c0_7 = arith.constant 0 : index
    %9 = vector.load %arg7[%c0_6, %c0_7] : memref<2x1024xf32, #tpu.memory_space<vmem>>, vector<2x1024xf32>
    tpu.vector_store %arg7[%c0_6, %c0_7], %8 {strides = array<i32>} : memref<2x1024xf32, #tpu.memory_space<vmem>>, vector<2x1024xf32>,
    %c0_i32_8 = arith.constant 0 : i32
    %10 = arith.cmpi eq, %arg0, %c0_i32_8 : i32
    %11 = arith.extui %10 : i1 to i32
    %c0_i32_9 = arith.constant 0 : i32
    %12 = arith.cmpi ne, %11, %c0_i32_9 : i32
    scf.if %12 {
      %c0_10 = arith.constant 0 : index
      %c0_11 = arith.constant 0 : index
      %13 = vector.load %arg7[%c0_10, %c0_11] : memref<2x1024xf32, #tpu.memory_space<vmem>>, vector<2x1024xf32>
      %c0_12 = arith.constant 0 : index
      %c0_13 = arith.constant 0 : index
      %14 = vector.load %arg3[%c0_12, %c0_13] : memref<1x1024xf32, #tpu.memory_space<vmem>>, vector<1x1024xf32>
      %15 = vector.broadcast %14 : vector<1x1024xf32> to vector<2x1024xf32>
      %16 = arith.addf %13, %15 : vector<2x1024xf32>
      %cst_14 = arith.constant 0.000000e+00 : f32
      %17 = vector.broadcast %cst_14 : f32 to vector<2x1024xf32>
      %18 = arith.maximumf %16, %17 : vector<2x1024xf32>
      %c0_15 = arith.constant 0 : index
      %c0_16 = arith.constant 0 : index
      %19 = vector.load %arg4[%c0_15, %c0_16] : memref<1x1024xf32, #tpu.memory_space<vmem>>, vector<1x1024xf32>
      %20 = vector.broadcast %19 : vector<1x1024xf32> to vector<2x1024xf32>
      %21 = arith.mulf %18, %20 : vector<2x1024xf32>
      %cst_17 = arith.constant dense<0.000000e+00> : vector<2xf32>
      %22 = vector.multi_reduction <add>, %21, %cst_17 [1] : vector<2x1024xf32> to vector<2xf32>
      %23 = vector.shape_cast %22 : vector<2xf32> to vector<2x1xf32>
      %c0_18 = arith.constant 0 : index
      %c0_19 = arith.constant 0 : index
      %24 = vector.load %arg5[%c0_18, %c0_19] : memref<1x1xf32, #tpu.memory_space<vmem>>, vector<1x1xf32>
      %25 = vector.broadcast %24 : vector<1x1xf32> to vector<2x1xf32>
      %26 = arith.addf %23, %25 : vector<2x1xf32>
      %c0_20 = arith.constant 0 : index
      %c0_21 = arith.constant 0 : index
      %27 = vector.load %arg6[%c0_20, %c0_21] : memref<2x1xf32, #tpu.memory_space<vmem>>, vector<2x1xf32>
      tpu.vector_store %arg6[%c0_20, %c0_21], %26 {strides = array<i32>} : memref<2x1xf32, #tpu.memory_space<vmem>>, vector<2x1xf32>,
    } else {
    }
    return
  }
  func.func @transform_0(%arg0: i32) -> (i32, i32) {
    %c0_i32 = arith.constant 0 : i32
    %c0_i32_0 = arith.constant 0 : i32
    return %c0_i32, %arg0 : i32, i32
  }
  func.func @transform_1(%arg0: i32) -> (i32, i32) {
    %c0_i32 = arith.constant 0 : i32
    %c0_i32_0 = arith.constant 0 : i32
    return %arg0, %c0_i32 : i32, i32
  }
  func.func @transform_2(%arg0: i32) -> (i32, i32) {
    %c0_i32 = arith.constant 0 : i32
    %c0_i32_0 = arith.constant 0 : i32
    %c0_i32_1 = arith.constant 0 : i32
    return %c0_i32, %c0_i32_0 : i32, i32
  }
  func.func @transform_3(%arg0: i32) -> (i32, i32) {
    %c0_i32 = arith.constant 0 : i32
    %c0_i32_0 = arith.constant 0 : i32
    %c0_i32_1 = arith.constant 0 : i32
    return %c0_i32, %c0_i32_0 : i32, i32
  }
  func.func @transform_4(%arg0: i32) -> (i32, i32) {
    %c0_i32 = arith.constant 0 : i32
    %c0_i32_0 = arith.constant 0 : i32
    %c0_i32_1 = arith.constant 0 : i32
    return %c0_i32, %c0_i32_0 : i32, i32
  }
  func.func @transform_5(%arg0: i32) -> (i32, i32) {
    %c0_i32 = arith.constant 0 : i32
    %c0_i32_0 = arith.constant 0 : i32
    %c0_i32_1 = arith.constant 0 : i32
    return %c0_i32, %c0_i32_0 : i32, i32
  }
}

</mosaic_0001>

<bundles_post_ra>
// kernel: char_cnn_forward.3
= control target key start
LH: loop header
LB: loop body
LE: loop exit
PB: predicated region body
PF: predicated region fallthrough
CT: control target
= control target key end

     0   :  { %s4725_s12 = smov 0   ;;  %s6162_s0 = inlined_call_operand.vmem [shape: bf16[2,5,62,340], index: 0, kind: input, shape index: {}]   ;;  %s6163_s1 = inlined_call_operand.vmem [shape: bf16[3,128,62], index: 1, kind: input, shape index: {}]   ;;  %s6164_s2 = inlined_call_operand.vmem [shape: f32[128,1], index: 2, kind: input, shape index: {}]   ;;  %s6165_s3 = inlined_call_operand.vmem [shape: bf16[2,128,340], index: 3, kind: output, shape index: {}]  }
   0x1 LB: > { %s3608_s13 = sadd.s32 4294967295, %s4702_s12   ;;  %p3612_p0 = scmp.ge.s32.totalorder %s4702_s12, 1  ;;  %s4702_s12 = sphi %s4725_s12, %s13_s12  }
   0x2   : > { %p137_p1 = scmp.lt.s32.totalorder %s4702_s12, 3 }
   0x4   : > { %p138_p2 = pnand %p3612_p0, %p137_p1 }
   0x6   : > { %141 = sbr.rel (%p138_p2) target bundleno = 690 (0x2b2), region = 32 }
   0xd   : > { %p161_p3 = scmp.lt.s32.totalorder %s3608_s13, 1  ;;  %v6166_v0 = vmov 0   ;;  %vm444_vm0 = vcmask 1046528   ;;  %v4793_v12 = vld [vmem:[%s6163_s1 + $0x40] sm:$0xff]   ;;  %vm419_vm1 = vcmask 506880   ;;  %v4798_v13 = vld [vmem:[%s6163_s1 + $0x50] sm:$0xff]  }
   0xe   : > { %486 = vmatprep.mubr.bf16.mxu0 %v6166_v0  ;;  %506 = vmatprep.mubr.bf16.mxu1 %v6166_v0  ;;  %v4823_v20 = vld [vmem:[%s6163_s1 + $0x48] sm:$0xff]   ;;  %v4830_v22 = vld [vmem:[%s6163_s1 + $0x58] sm:$0xff]   ;;  %v4853_v28 = vld [vmem:[%s6163_s1 + $0x60] sm:$0xff]   ;;  %vm3521_vm2 = vcmask 683008  }
   0xf   : > { %s6219_s13 = smov (!%p161_p3, %s3608_s13), 1  ;;  %4590 = vset.pattern.permute.xlu0 %v6166_v0  ;;  %4591 = vset.pattern.permute.xlu1 %v6166_v0  ;;  %v4859_v29 = vld [vmem:[%s6163_s1] sm:$0xff]   ;;  %v4893_v36 = vld [vmem:[%s6163_s1 + $0x68] sm:$0xff]   ;;  %v4927_v43 = vld [vmem:[%s6163_s1 + $0x70] sm:$0xff]  }
  0x10   : > { %s4579_s14 = smul.u32 480, %s6219_s13  ;;  %v4898_v37 = vld [vmem:[%s6163_s1 + $0x8] sm:$0xff]   ;;  %v4932_v44 = vld [vmem:[%s6163_s1 + $0x10] sm:$0xff]   ;;  %v4945_v45 = vld [vmem:[%s6163_s1 + $0x78] sm:$0xff]  }
  0x11   : > { %v222_v46 = vld [vmem:[%s6164_s2] sm:$0xff]  ;;  %v4953_v47 = vld [vmem:[%s6163_s1 + $0x18] sm:$0xff]   ;;  %v223_v48 = vld [vmem:[%s6164_s2 + $0x8] sm:$0xff] }
  0x12   : > { %s4743_s17 = scalar_lea.vmem %s6162_s0, %s4579_s14  ;;  %1402 = vperm.xlu0 %4590, %v222_v46   ;;  %v224_v49 = vld [vmem:[%s6164_s2 + $0x10] sm:$0xff]  ;;  %v225_v50 = vld [vmem:[%s6164_s2 + $0x18] sm:$0xff]  ;;  %v4974_v51 = vld [vmem:[%s6163_s1 + $0x20] sm:$0xff]  }
  0x13   : > { %v4746_v1 = vld [vmem:[%s4743_s17 + $0x64] ss:$12 sps:$4 sm:$0xff]   ;;  %v4749_v2 = vld [vmem:[%s4743_s17 + $0x60] ss:$12 sps:$4 sm:$0xff]   ;;  %v4754_v3 = vld [vmem:[%s4743_s17 + $0x7c] ss:$12 sps:$4 sm:$0xff]   ;;  %1412 = vperm.xlu1 %4591, %v224_v49  }
  0x14   : > { %454 = vmatprep.subr.bf16.mxu0 %v4746_v1  ;;  %4274 = vmatprep.subr.bf16.mxu1 %v4746_v1  ;;  %v4759_v4 = vld [vmem:[%s4743_s17 + $0x78] ss:$12 sps:$4 sm:$0xff]   ;;  %v4764_v5 = vld [vmem:[%s4743_s17 + $0x94] ss:$12 sps:$4 sm:$0xff]   ;;  %v4769_v6 = vld [vmem:[%s4743_s17 + $0x90] ss:$12 sps:$4 sm:$0xff]  }
  0x15   : > { %455 = vmatpush1.bf16.msra.mxu0 %v4749_v2  ;;  %4278 = vmatpush1.bf16.msra.mxu1 %v4749_v2  ;;  %v4772_v7 = vld [vmem:[%s4743_s17 + $0xac] ss:$12 sps:$4 sm:$0x7f]   ;;  %v4603_v8 = vld [vmem:[%s4743_s17 + $0xa8] ss:$12 sps:$4 sm:$0x7f]  }
  0x16   : > { %456 = vmatprep.subr.bf16.mxu0 %v4754_v3  ;;  %4275 = vmatprep.subr.bf16.mxu1 %v4754_v3  ;;  %v4784_v9 = vsel %vm444_vm0, %v4603_v8, 0  ;;  %v4787_v10 = vld [vmem:[%s4743_s17 + $0x68] ss:$12 sps:$4 sm:$0xff]   ;;  %v4609_v11 = vld [vmem:[%s4743_s17 + $0x4] ss:$12 sps:$4 sm:$0xff]   ;;  %v229_v59 = vld [vmem:[%s6164_s2 + $0x38] sm:$0xff] }
  0x17   : > { %v4607_v14 = vld [vmem:[%s4743_s17] ss:$12 sps:$4 sm:$0xff]   ;;  %v4612_v15 = vld [vmem:[%s4743_s17 + $0x1c] ss:$12 sps:$4 sm:$0xff]   ;;  %v4610_v17 = vld [vmem:[%s4743_s17 + $0x18] ss:$12 sps:$4 sm:$0xff]   ;;  %1407 = vperm.xlu0 %4590, %v223_v48   ;;  %1417 = vperm.xlu1 %4591, %v225_v50  }
  0x18   : > { %v4806_v16 = vld [vmem:[%s4743_s17 + $0x80] ss:$12 sps:$4 sm:$0xff]   ;;  %v4816_v19 = vld [vmem:[%s4743_s17 + $0x98] ss:$12 sps:$4 sm:$0xff]   ;;  %v4615_v24 = vld [vmem:[%s4743_s17 + $0x30] ss:$12 sps:$4 sm:$0xff]  }
  0x19   : > { %457 = vmatpush1.bf16.msra.mxu0 %v4759_v4  ;;  %4279 = vmatpush1.bf16.msra.mxu1 %v4759_v4  ;;  %v4617_v18 = vld [vmem:[%s4743_s17 + $0x34] ss:$12 sps:$4 sm:$0xff]   ;;  %v4619_v23 = vld [vmem:[%s4743_s17 + $0x4c] ss:$12 sps:$4 sm:$0x7f]  }
  0x1a   : > { %458 = vmatprep.subr.bf16.mxu0 %v4764_v5  ;;  %4276 = vmatprep.subr.bf16.mxu1 %v4764_v5  ;;  %v4621_v21 = vld [vmem:[%s4743_s17 + $0x48] ss:$12 sps:$4 sm:$0x7f]   ;;  %v4837_v25 = vld [vmem:[%s4743_s17 + $0xb0] ss:$12 sps:$4 sm:$0x7f]  }
  0x1b   : > { %v790_v26 = vsel %vm444_vm0, %v4621_v21, 0  ;;  %v4848_v27 = vld [vmem:[%s4743_s17 + $0xc4] ss:$12 sps:$4 sm:$0xff]   ;;  %v4865_v30 = vsel %vm444_vm0, %v4837_v25, 0  ;;  %v4868_v31 = vld [vmem:[%s4743_s17 + $0xc0] ss:$12 sps:$4 sm:$0xff]  }
  0x1c   : > { %v4872_v32 = vld [vmem:[%s4743_s17 + $0xdc] ss:$12 sps:$4 sm:$0xff]   ;;  %v4881_v34 = vld [vmem:[%s4743_s17 + $0xd8] ss:$12 sps:$4 sm:$0xff]   ;;  %v4888_v35 = vld [vmem:[%s4743_s17 + $0xf4] ss:$12 sps:$4 sm:$0xff]  }
  0x1d   : > { %459 = vmatpush1.bf16.msra.mxu0 %v4769_v6  ;;  %4280 = vmatpush1.bf16.msra.mxu1 %v4769_v6  ;;  %v4639_v33 = vld [vmem:[%s4743_s17 + $0x8] ss:$12 sps:$4 sm:$0xff]   ;;  %v4902_v38 = vld [vmem:[%s4743_s17 + $0x10c] ss:$12 sps:$4 sm:$0x7f]   ;;  %v226_v53 = vld [vmem:[%s6164_s2 + $0x20] sm:$0xff] }
  0x1e   : > { %3667 = vmatprep.subr.msk.bf16.mxu0 %vm444_vm0, %v4772_v7  ;;  %4277 = vmatprep.subr.msk.bf16.mxu1 %vm444_vm0, %v4772_v7  ;;  %v4905_v39 = vld [vmem:[%s4743_s17 + $0xf0] ss:$12 sps:$4 sm:$0xff]   ;;  %v4649_v40 = vld [vmem:[%s4743_s17 + $0x108] ss:$12 sps:$4 sm:$0x7f]   ;;  %v230_v63 = vld [vmem:[%s6164_s2 + $0x40] sm:$0xff] }
  0x1f   : > { %v4917_v41 = vld [vmem:[%s4743_s17 + $0x124] ss:$12 sps:$4 sm:$0xff]   ;;  %v4922_v42 = vsel %vm444_vm0, %v4649_v40, 0  ;;  %v4644_v52 = vld [vmem:[%s4743_s17 + $0x20] ss:$12 sps:$4 sm:$0xff]   ;;  %1422 = vperm.xlu0 %4590, %v226_v53  }
  0x20   : > { %v227_v54 = vld [vmem:[%s6164_s2 + $0x28] sm:$0xff]  ;;  %v4646_v55 = vld [vmem:[%s4743_s17 + $0x38] ss:$12 sps:$4 sm:$0xff]   ;;  %v4651_v57 = vld [vmem:[%s4743_s17 + $0x50] ss:$12 sps:$4 sm:$0x7f]  }
  0x21   : > { %461 = vmatpush1.bf16.msra.mxu0 %v4784_v9  ;;  %4281 = vmatpush1.bf16.msra.mxu1 %v4784_v9  ;;  %v4994_v56 = vld [vmem:[%s6163_s1 + $0x28] sm:$0xff]   ;;  %v228_v58 = vld [vmem:[%s6164_s2 + $0x30] sm:$0xff]  ;;  %v796_v60 = vsel %vm444_vm0, %v4651_v57, 0  ;;  %v234_v46 = vld [vmem:[%s6164_s2 + $0x60] sm:$0xff] }
  0x22   : > { %4058 = vmatprep.subr.bf16.mxu1 %v4787_v10  ;;  %798 = vmatprep.subr.bf16.mxu0 %v4609_v11  ;;  %v5013_v61 = vld [vmem:[%s4743_s17 + $0xc8] ss:$12 sps:$4 sm:$0xff]   ;;  %v5037_v11 = vld [vmem:[%s6163_s1 + $0x38] sm:$0xff]   ;;  %v5061_v21 = vld [vmem:[%s4743_s17 + $0xe0] ss:$12 sps:$4 sm:$0xff]  }
  0x23   : > { %1427 = vperm.xlu1 %4591, %v227_v54   ;;  %1432 = vperm.xlu0 %4590, %v228_v58   ;;  %v5018_v62 = vld [vmem:[%s6163_s1 + $0x30] sm:$0xff]   ;;  %v231_v8 = vld [vmem:[%s6164_s2 + $0x48] sm:$0xff] }
  0x24   : > { %3668 = vmatmul.mubr.msk.bf16.vlgmr.msra.gmra.mrb[0].mxu0 %vm419_vm1, %v4793_v12  ;;  %3670 = vmatmul.mubr.msk.bf16.vlgmr.msra.gmra.mrb[0].mxu1 %vm419_vm1, %v4798_v13  ;;  %v5089_v40 = vld [vmem:[%s6163_s1 + $0x88] sm:$0xff]   ;;  %v5098_v48 = vld [vmem:[%s4743_s17 + $0x110] ss:$12 sps:$4 sm:$0x7f]  }
  0x25   : > { %4059 = vmatpush3.bf16.msra.mxu1 %v4787_v10  ;;  %799 = vmatpush1.bf16.msra.mxu0 %v4607_v14  ;;  %v232_v14 = vld [vmem:[%s6164_s2 + $0x50] sm:$0xff]  ;;  %v235_v50 = vld [vmem:[%s6164_s2 + $0x68] sm:$0xff]  ;;  %v5124_v54 = vsel %vm444_vm0, %v5098_v48, 0 }
  0x26   : > { %800 = vmatprep.subr.bf16.mxu0 %v4612_v15  ;;  %496 = vmatprep.mubr.bf16.mxu0 %v6166_v0  ;;  %v233_v15 = vld [vmem:[%s6164_s2 + $0x58] sm:$0xff]  ;;  %v4674_v53 = vld [vmem:[%s4743_s17 + $0x168] ss:$12 sps:$4 sm:$0x7f]  }
  0x27   : > { %516 = vmatprep.mubr.bf16.mxu1 %v6166_v0  ;;  %4060 = vmatprep.subr.bf16.mxu1 %v4806_v16  ;;  %v5101_v49 = vld [vmem:[%s4743_s17 + $0x150] ss:$12 sps:$4 sm:$0xff]  }
  0x28   : > { %1437 = vperm.xlu1 %4591, %v229_v59   ;;  %1442 = vperm.xlu0 %4590, %v230_v63   ;;  %v236_v58 = vld [vmem:[%s6164_s2 + $0x70] sm:$0xff]  ;;  %v5159_v63 = vld [vmem:[%s6163_s1 + $0x98] sm:$0xff]  }
  0x29   : > { %801 = vmatpush1.bf16.msra.mxu0 %v4610_v17  ;;  %4061 = vmatpush3.bf16.msra.mxu1 %v4806_v16  ;;  %v5055_v17 = vld [vmem:[%s6163_s1 + $0x80] sm:$0xff]   ;;  %v5140_v59 = vld [vmem:[%s6163_s1 + $0x90] sm:$0xff]  }
  0x2a   : > { %802 = vmatprep.subr.bf16.mxu0 %v4617_v18  ;;  %4062 = vmatprep.subr.bf16.mxu1 %v4816_v19  ;;  %v5058_v18 = vld [vmem:[%s4743_s17 + $0x120] ss:$12 sps:$4 sm:$0xff]  }
  0x2c   : > { %3669 = vmatmul.mubr.msk.bf16.gmra.mrb[4].mxu0 %vm419_vm1, %v4823_v20  ;;  %3671 = vmatmul.mubr.msk.bf16.gmra.mrb[4].mxu1 %vm419_vm1, %v4830_v22 }
  0x2d   : > { %803 = vmatpush1.bf16.msra.mxu0 %v4615_v24  ;;  %526 = vmatprep.mubr.bf16.mxu1 %v6166_v0  ;;  %v5073_v24 = vld [vmem:[%s4743_s17 + $0x138] ss:$12 sps:$4 sm:$0xff]  }
  0x2e   : > { %3704 = vmatprep.subr.msk.bf16.mxu0 %vm444_vm0, %v4619_v23  ;;  %830 = vmatprep.mubr.bf16.mxu0 %v6166_v0  ;;  %v5064_v23 = vld [vmem:[%s4743_s17 + $0x13c] ss:$12 sps:$4 sm:$0xff]  }
  0x2f   : > { %4063 = vmatpush3.bf16.msra.mxu1 %v4816_v19  ;;  %1447 = vperm.xlu1 %4591, %v231_v8   ;;  %v5171_v8 = vld [vmem:[%s6163_s1 + $0xa0] sm:$0xff]  }
  0x30   : > { %4570 = vmatprep.subr.msk.bf16.mxu1 %vm444_vm0, %v4837_v25  ;;  %1452 = vperm.xlu0 %4590, %v232_v14   ;;  %v5185_v14 = vld [vmem:[%s6163_s1 + $0xa8] sm:$0xff]  }
  0x31   : > { %805 = vmatpush1.bf16.msra.mxu0 %v790_v26  ;;  %v5079_v26 = vld [vmem:[%s4743_s17 + $0xf8] ss:$12 sps:$4 sm:$0xff]  }
  0x32   : > { %1142 = vmatprep.subr.bf16.mxu0 %v4848_v27 }
  0x33   : > { %4065 = vmatpush3.bf16.msra.mxu1 %v4865_v30  ;;  %1457 = vperm.xlu1 %4591, %v233_v15   ;;  %v5202_v15 = vld [vmem:[%s6163_s1 + $0xb0] sm:$0xff]  }
  0x34   : > { %3672 = vmatmul.mubr.msk.bf16.gmra.mrb[8].mxu1 %vm419_vm1, %v4853_v28  ;;  %3705 = vmatmul.mubr.msk.bf16.vlgmr.msra.gmra.mrb[0].mxu0 %vm419_vm1, %v4859_v29 }
  0x35   : > { %1143 = vmatpush1.bf16.msra.mxu0 %v4868_v31  ;;  %536 = vmatprep.mubr.bf16.mxu1 %v6166_v0 }
  0x36   : > { %840 = vmatprep.mubr.bf16.mxu0 %v6166_v0  ;;  %1144 = vmatprep.subr.bf16.mxu0 %v4872_v32 }
  0x37   : > { %4082 = vmatprep.subr.bf16.mxu1 %v4639_v33  ;;  %1462 = vperm.xlu0 %4590, %v234_v46   ;;  %v5216_v46 = vld [vmem:[%s6163_s1 + $0xb8] sm:$0xff]  }
  0x38   : > { %1467 = vperm.xlu1 %4591, %v235_v50   ;;  %v5225_v50 = vld [vmem:[%s4743_s17 + $0x140] ss:$12 sps:$4 sm:$0xff]  }
  0x39   : > { %1145 = vmatpush1.bf16.msra.mxu0 %v4881_v34 }
  0x3a   : > { %1146 = vmatprep.subr.bf16.mxu0 %v4888_v35 }
  0x3b   : > { %1472 = vperm.xlu0 %4590, %v236_v58   ;;  %v5245_v58 = vld [vmem:[%s4743_s17 + $0x170] ss:$12 sps:$4 sm:$0x7f]  }
  0x3c   : > { %3673 = vmatmul.mubr.msk.bf16.gmra.mrb[12].mxu1 %vm419_vm1, %v4893_v36  ;;  %3706 = vmatmul.mubr.msk.bf16.gmra.mrb[4].mxu0 %vm419_vm1, %v4898_v37 }
  0x3d   : > { %546 = vmatprep.mubr.bf16.mxu1 %v6166_v0  ;;  %850 = vmatprep.mubr.bf16.mxu0 %v6166_v0 }
  0x3e   : > { %1147 = vmatpush1.bf16.msra.mxu0 %v4905_v39 }
  0x3f   : > { %3741 = vmatprep.subr.msk.bf16.mxu0 %vm444_vm0, %v4902_v38 }
  0x42   : > { %1149 = vmatpush1.bf16.msra.mxu0 %v4922_v42 }
  0x43   : > { %2468 = vmatprep.subr.bf16.mxu0 %v4917_v41 }
  0x44   : > { %3674 = vmatmul.mubr.msk.bf16.gmra.mrb[16].mxu1 %vm419_vm1, %v4927_v43  ;;  %3707 = vmatmul.mubr.msk.bf16.gmra.mrb[8].mxu0 %vm419_vm1, %v4932_v44 }
  0x45   : > { %556 = vmatprep.mubr.bf16.mxu1 %v6166_v0  ;;  %860 = vmatprep.mubr.bf16.mxu0 %v6166_v0 }
  0x4c   : > { %3675 = vmatmul.mubr.msk.bf16.gmra.mrb[20].mxu1 %vm419_vm1, %v4945_v45  ;;  %3708 = vmatmul.mubr.msk.bf16.gmra.mrb[12].mxu0 %vm419_vm1, %v4953_v47 }
  0x4d   : > { %4066 = vmatprep.mubr.msk.bf16.mxu1 %vm419_vm1, %v4793_v12  ;;  %870 = vmatprep.mubr.bf16.mxu0 %v6166_v0 }
  0x54   : > { %4067 = vmatmul.mubr.msk.bf16.vlgmr.msra.gmra.mrb[24].mxu1 %vm419_vm1, %v4823_v20  ;;  %3709 = vmatmul.mubr.msk.bf16.gmra.mrb[16].mxu0 %vm419_vm1, %v4974_v51 }
  0x55   : > { %4083 = vmatpush3.bf16.msra.mxu1 %v4639_v33  ;;  %4070 = vmatprep.mubr.msk.bf16.mxu1 %vm419_vm1, %v4798_v13  ;;  %v5082_v33 = vld [vmem:[%s4743_s17 + $0x154] ss:$12 sps:$4 sm:$0xff]  }
  0x56   : > { %880 = vmatprep.mubr.bf16.mxu0 %v6166_v0  ;;  %4084 = vmatprep.subr.bf16.mxu1 %v4644_v52 }
  0x59   : > { %4085 = vmatpush3.bf16.msra.mxu1 %v4644_v52  ;;  %v5108_v52 = vld [vmem:[%s4743_s17 + $0x16c] ss:$12 sps:$4 sm:$0x7f]  }
  0x5a   : > { %4086 = vmatprep.subr.bf16.mxu1 %v4646_v55 }
  0x5c   : > { %4071 = vmatmul.mubr.msk.bf16.gmra.mrb[28].mxu1 %vm419_vm1, %v4830_v22  ;;  %3710 = vmatmul.mubr.msk.bf16.gmra.mrb[20].mxu0 %vm419_vm1, %v4994_v56 }
  0x5d   : > { %4074 = vmatprep.mubr.msk.bf16.mxu1 %vm419_vm1, %v4853_v28  ;;  %890 = vmatprep.mubr.bf16.mxu0 %v6166_v0 }
  0x5e   : > { %4087 = vmatpush3.bf16.msra.mxu1 %v4646_v55  ;;  %v5129_v55 = vsel %vm444_vm0, %v4674_v53, 0  ;;  %v5236_v53 = vld [vmem:[%s4743_s17 + $0x158] ss:$12 sps:$4 sm:$0xff]  }
  0x5f   : > { %4571 = vmatprep.subr.msk.bf16.mxu1 %vm444_vm0, %v4651_v57  ;;  %v5132_v57 = vld [vmem:[%s4743_s17 + $0x128] ss:$12 sps:$4 sm:$0xff]  }
  0x62   : > { %4089 = vmatpush3.bf16.msra.mxu1 %v796_v60  ;;  %v237_v60 = vld [vmem:[%s6164_s2 + $0x78] sm:$0xff] }
  0x63   : > { %4106 = vmatprep.subr.bf16.mxu1 %v5013_v61  ;;  %1477 = vperm.xlu1 %4591, %v237_v60   ;;  %v5261_v60 = vsel %vm444_vm0, %v5245_v58, 0 }
  0x64   : > { %4075 = vmatmul.mubr.msk.bf16.gmra.mrb[32].mxu1 %vm419_vm1, %v4893_v36  ;;  %3711 = vmatmul.mubr.msk.bf16.gmra.mrb[24].mxu0 %vm419_vm1, %v5018_v62 }
  0x65   : > { %4078 = vmatprep.mubr.msk.bf16.mxu1 %vm419_vm1, %v4927_v43  ;;  %900 = vmatprep.mubr.bf16.mxu0 %v6166_v0 }
  0x6c   : > { %4079 = vmatmul.mubr.msk.bf16.gmra.mrb[36].mxu1 %vm419_vm1, %v4945_v45  ;;  %3712 = vmatmul.mubr.msk.bf16.gmra.mrb[28].mxu0 %vm419_vm1, %v5037_v11 }
  0x6d   : > { %4090 = vmatprep.mubr.msk.bf16.mxu1 %vm419_vm1, %v4859_v29  ;;  %1174 = vmatprep.mubr.bf16.mxu0 %v6166_v0 }
  0x74   : > { %4091 = vmatmul.mubr.msk.bf16.vlgmr.msra.gmra.mrb[24].mxu1 %vm419_vm1, %v4898_v37  ;;  %3742 = vmatmul.mubr.msk.bf16.vlgmr.msra.gmra.mrb[0].mxu0 %vm419_vm1, %v5055_v17 }
  0x75   : > { %4107 = vmatpush3.bf16.msra.mxu1 %v5013_v61  ;;  %2469 = vmatpush1.bf16.msra.mxu0 %v5058_v18 }
  0x76   : > { %4094 = vmatprep.mubr.msk.bf16.mxu1 %vm419_vm1, %v4932_v44  ;;  %1184 = vmatprep.mubr.bf16.mxu0 %v6166_v0 }
  0x77   : > { %4108 = vmatprep.subr.bf16.mxu1 %v5061_v21  ;;  %2470 = vmatprep.subr.bf16.mxu0 %v5064_v23 }
  0x79   : > { %4109 = vmatpush3.bf16.msra.mxu1 %v5061_v21  ;;  %2471 = vmatpush1.bf16.msra.mxu0 %v5073_v24 }
  0x7a   : > { %4110 = vmatprep.subr.bf16.mxu1 %v5079_v26  ;;  %2472 = vmatprep.subr.bf16.mxu0 %v5082_v33 }
  0x7c   : > { %4095 = vmatmul.mubr.msk.bf16.gmra.mrb[28].mxu1 %vm419_vm1, %v4953_v47  ;;  %3743 = vmatmul.mubr.msk.bf16.gmra.mrb[4].mxu0 %vm419_vm1, %v5089_v40 }
  0x7d   : > { %4098 = vmatprep.mubr.msk.bf16.mxu1 %vm419_vm1, %v4974_v51  ;;  %1194 = vmatprep.mubr.bf16.mxu0 %v6166_v0 }
  0x7e   : > { %4111 = vmatpush3.bf16.msra.mxu1 %v5079_v26  ;;  %2473 = vmatpush1.bf16.msra.mxu0 %v5101_v49 }
  0x7f   : > { %4572 = vmatprep.subr.msk.bf16.mxu1 %vm444_vm0, %v5098_v48  ;;  %3821 = vmatprep.subr.msk.bf16.mxu0 %vm444_vm0, %v5108_v52 }
  0x82   : > { %4113 = vmatpush3.bf16.msra.mxu1 %v5124_v54  ;;  %2475 = vmatpush1.bf16.msra.mxu0 %v5129_v55 }
  0x83   : > { %1576 = vmatprep.subr.bf16.mxu1 %v4848_v27  ;;  %4202 = vmatprep.subr.bf16.mxu0 %v5132_v57 }
  0x84   : > { %4099 = vmatmul.mubr.msk.bf16.gmra.mrb[32].mxu1 %vm419_vm1, %v4994_v56  ;;  %3744 = vmatmul.mubr.msk.bf16.gmra.mrb[8].mxu0 %vm419_vm1, %v5140_v59 }
  0x85   : > { %4102 = vmatprep.mubr.msk.bf16.mxu1 %vm419_vm1, %v5018_v62  ;;  %1204 = vmatprep.mubr.bf16.mxu0 %v6166_v0 }
  0x8c   : > { %4103 = vmatmul.mubr.msk.bf16.gmra.mrb[36].mxu1 %vm419_vm1, %v5037_v11  ;;  %3745 = vmatmul.mubr.msk.bf16.gmra.mrb[12].mxu0 %vm419_vm1, %v5159_v63 }
  0x8d   : > { %1214 = vmatprep.mubr.bf16.mxu0 %v6166_v0  ;;  %4114 = vmatprep.mubr.msk.bf16.mxu1 %vm419_vm1, %v5055_v17 }
  0x94   : > { %3746 = vmatmul.mubr.msk.bf16.gmra.mrb[16].mxu0 %vm419_vm1, %v5171_v8  ;;  %4115 = vmatmul.mubr.msk.bf16.vlgmr.msra.gmra.mrb[24].mxu1 %vm419_vm1, %v5089_v40 }
  0x95   : > { %1577 = vmatpush1.bf16.msra.mxu1 %v4868_v31  ;;  %1224 = vmatprep.mubr.bf16.mxu0 %v6166_v0 }
  0x96   : > { %4118 = vmatprep.mubr.msk.bf16.mxu1 %vm419_vm1, %v5140_v59  ;;  %1578 = vmatprep.subr.bf16.mxu1 %v4872_v32 }
  0x99   : > { %1579 = vmatpush1.bf16.msra.mxu1 %v4881_v34 }
  0x9a   : > { %1580 = vmatprep.subr.bf16.mxu1 %v4888_v35 }
  0x9c   : > { %3747 = vmatmul.mubr.msk.bf16.gmra.mrb[20].mxu0 %vm419_vm1, %v5185_v14  ;;  %4119 = vmatmul.mubr.msk.bf16.gmra.mrb[28].mxu1 %vm419_vm1, %v5159_v63 }
  0x9d   : > { %1234 = vmatprep.mubr.bf16.mxu0 %v6166_v0  ;;  %4122 = vmatprep.mubr.msk.bf16.mxu1 %vm419_vm1, %v5171_v8 }
  0x9e   : > { %1581 = vmatpush1.bf16.msra.mxu1 %v4905_v39 }
  0x9f   : > { %3758 = vmatprep.subr.msk.bf16.mxu1 %vm444_vm0, %v4902_v38 }
  0xa2   : > { %1583 = vmatpush1.bf16.msra.mxu1 %v4922_v42 }
  0xa3   : > { %4130 = vmatprep.subr.bf16.mxu1 %v5013_v61 }
  0xa4   : > { %3748 = vmatmul.mubr.msk.bf16.gmra.mrb[24].mxu0 %vm419_vm1, %v5202_v15  ;;  %4123 = vmatmul.mubr.msk.bf16.gmra.mrb[32].mxu1 %vm419_vm1, %v5185_v14 }
  0xa5   : > { %1244 = vmatprep.mubr.bf16.mxu0 %v6166_v0  ;;  %4126 = vmatprep.mubr.msk.bf16.mxu1 %vm419_vm1, %v5202_v15 }
  0xac   : > { %3749 = vmatmul.mubr.msk.bf16.gmra.mrb[28].mxu0 %vm419_vm1, %v5216_v46  ;;  %4127 = vmatmul.mubr.msk.bf16.gmra.mrb[36].mxu1 %vm419_vm1, %v5216_v46 }
  0xad   : > { %1608 = vmatprep.mubr.bf16.mxu1 %v6166_v0  ;;  %2500 = vmatprep.mubr.bf16.mxu0 %v6166_v0 }
  0xb4   : > { %3759 = vmatmul.mubr.msk.bf16.vlgmr.msra.gmra.mrb[40].mxu1 %vm419_vm1, %v4793_v12  ;;  %3822 = vmatmul.mubr.msk.bf16.vlgmr.msra.gmra.mrb[32].mxu0 %vm419_vm1, %v4793_v12 }
  0xb5   : > { %4131 = vmatpush3.bf16.msra.mxu1 %v5013_v61  ;;  %4203 = vmatpush3.bf16.msra.mxu0 %v5132_v57 }
  0xb6   : > { %1618 = vmatprep.mubr.bf16.mxu1 %v6166_v0  ;;  %2510 = vmatprep.mubr.bf16.mxu0 %v6166_v0 }
  0xb7   : > { %4132 = vmatprep.subr.bf16.mxu1 %v5061_v21  ;;  %4204 = vmatprep.subr.bf16.mxu0 %v5225_v50 }
  0xb9   : > { %4133 = vmatpush3.bf16.msra.mxu1 %v5061_v21  ;;  %4205 = vmatpush3.bf16.msra.mxu0 %v5225_v50 }
  0xba   : > { %4134 = vmatprep.subr.bf16.mxu1 %v5079_v26  ;;  %4206 = vmatprep.subr.bf16.mxu0 %v5236_v53 }
  0xbc   : > { %3760 = vmatmul.mubr.msk.bf16.gmra.mrb[44].mxu1 %vm419_vm1, %v4823_v20  ;;  %3823 = vmatmul.mubr.msk.bf16.gmra.mrb[36].mxu0 %vm419_vm1, %v4823_v20 }
  0xbd   : > { %1628 = vmatprep.mubr.bf16.mxu1 %v6166_v0  ;;  %2520 = vmatprep.mubr.bf16.mxu0 %v6166_v0 }
  0xbe   : > { %4135 = vmatpush3.bf16.msra.mxu1 %v5079_v26  ;;  %4207 = vmatpush3.bf16.msra.mxu0 %v5236_v53 }
  0xbf   : > { %4573 = vmatprep.subr.msk.bf16.mxu1 %vm444_vm0, %v5098_v48  ;;  %4576 = vmatprep.subr.msk.bf16.mxu0 %vm444_vm0, %v5245_v58 }
  0xc2   : > { %4137 = vmatpush3.bf16.msra.mxu1 %v5124_v54  ;;  %4209 = vmatpush3.bf16.msra.mxu0 %v5261_v60 }
  0xc3   : > { %1786 = vmatprep.subr.bf16.mxu1 %v4746_v1  ;;  %2678 = vmatprep.subr.bf16.mxu0 %v4848_v27 }
  0xc4   : > { %3761 = vmatmul.mubr.msk.bf16.gmra.mrb[48].mxu1 %vm419_vm1, %v4798_v13  ;;  %3824 = vmatmul.mubr.msk.bf16.gmra.mrb[40].mxu0 %vm419_vm1, %v4798_v13 }
  0xc5   : > { %1638 = vmatprep.mubr.bf16.mxu1 %v6166_v0  ;;  %2530 = vmatprep.mubr.bf16.mxu0 %v6166_v0 }
  0xcc   : > { %3762 = vmatmul.mubr.msk.bf16.gmra.mrb[52].mxu1 %vm419_vm1, %v4830_v22  ;;  %3825 = vmatmul.mubr.msk.bf16.gmra.mrb[44].mxu0 %vm419_vm1, %v4830_v22 }
  0xcd   : > { %1648 = vmatprep.mubr.bf16.mxu1 %v6166_v0  ;;  %2540 = vmatprep.mubr.bf16.mxu0 %v6166_v0 }
  0xd4   : > { %3763 = vmatmul.mubr.msk.bf16.gmra.mrb[56].mxu1 %vm419_vm1, %v4853_v28  ;;  %3826 = vmatmul.mubr.msk.bf16.gmra.mrb[48].mxu0 %vm419_vm1, %v4853_v28 }
  0xd5   : > { %1658 = vmatprep.mubr.bf16.mxu1 %v6166_v0  ;;  %2550 = vmatprep.mubr.bf16.mxu0 %v6166_v0 }
  0xdc   : > { %3764 = vmatmul.mubr.msk.bf16.gmra.mrb[60].mxu1 %vm419_vm1, %v4893_v36  ;;  %3827 = vmatmul.mubr.msk.bf16.gmra.mrb[52].mxu0 %vm419_vm1, %v4893_v36 }
  0xdd   : > { %1668 = vmatprep.mubr.bf16.mxu1 %v6166_v0  ;;  %2560 = vmatprep.mubr.bf16.mxu0 %v6166_v0 }
  0xe4   : > { %3765 = vmatmul.mubr.msk.bf16.gmra.mrb[64].mxu1 %vm419_vm1, %v4927_v43  ;;  %3828 = vmatmul.mubr.msk.bf16.gmra.mrb[56].mxu0 %vm419_vm1, %v4927_v43 }
  0xe5   : > { %1678 = vmatprep.mubr.bf16.mxu1 %v6166_v0  ;;  %2570 = vmatprep.mubr.bf16.mxu0 %v6166_v0 }
  0xec   : > { %3766 = vmatmul.mubr.msk.bf16.gmra.mrb[68].mxu1 %vm419_vm1, %v4945_v45  ;;  %3829 = vmatmul.mubr.msk.bf16.gmra.mrb[60].mxu0 %vm419_vm1, %v4945_v45 }
  0xed   : > { %4138 = vmatprep.mubr.msk.bf16.mxu1 %vm419_vm1, %v4793_v12  ;;  %4210 = vmatprep.mubr.msk.bf16.mxu0 %vm419_vm1, %v4793_v12 }
  0xf4   : > { %4139 = vmatmul.mubr.msk.bf16.vlgmr.msra.gmra.mrb[72].mxu1 %vm419_vm1, %v4823_v20  ;;  %4211 = vmatmul.mubr.msk.bf16.vlgmr.msra.gmra.mrb[64].mxu0 %vm419_vm1, %v4823_v20 }
  0xf5   : > { %1787 = vmatpush1.bf16.msra.mxu1 %v4749_v2  ;;  %2679 = vmatpush1.bf16.msra.mxu0 %v4868_v31 }
  0xf6   : > { %4142 = vmatprep.mubr.msk.bf16.mxu1 %vm419_vm1, %v4798_v13  ;;  %4214 = vmatprep.mubr.msk.bf16.mxu0 %vm419_vm1, %v4798_v13 }
  0xf7   : > { %v5315_v1 = vpop.f32.mrb[0].mxu1  ;;  %1788 = vmatprep.subr.bf16.mxu1 %v4754_v3  ;;  %2680 = vmatprep.subr.bf16.mxu0 %v4872_v32 }
  0xf8   : > { %v5319_v12 = vpop.f32.mrb[1].mxu1 }
  0xf9   : > { %v5321_v27 = vpop.f32.mrb[2].mxu1  ;;  %1789 = vmatpush1.bf16.msra.mxu1 %v4759_v4  ;;  %2681 = vmatpush1.bf16.msra.mxu0 %v4881_v34 }
  0xfa   : > { %v5325_v2 = vpop.f32.mrb[3].mxu1  ;;  %1790 = vmatprep.subr.bf16.mxu1 %v4764_v5  ;;  %2682 = vmatprep.subr.bf16.mxu0 %v4888_v35 }
  0xfc   : > { %4143 = vmatmul.mubr.msk.bf16.gmra.mrb[76].mxu1 %vm419_vm1, %v4830_v22  ;;  %4215 = vmatmul.mubr.msk.bf16.gmra.mrb[68].mxu0 %vm419_vm1, %v4830_v22 }
  0xfd   : > { %4146 = vmatprep.mubr.msk.bf16.mxu1 %vm419_vm1, %v4853_v28  ;;  %4218 = vmatprep.mubr.msk.bf16.mxu0 %vm419_vm1, %v4853_v28 }
  0xfe   : > { %1791 = vmatpush1.bf16.msra.mxu1 %v4769_v6  ;;  %2683 = vmatpush1.bf16.msra.mxu0 %v4905_v39 }
  0xff   : > { %v5339_v3 = vpop.f32.mrb[4].mxu1  ;;  %3775 = vmatprep.subr.msk.bf16.mxu1 %vm444_vm0, %v4772_v7  ;;  %3838 = vmatprep.subr.msk.bf16.mxu0 %vm444_vm0, %v4902_v38  ;;  %v4682_v38 = vld [vmem:[%s4743_s17 + $0x184] ss:$12 sps:$4 sm:$0xff]  }
 0x100   : > { %v5345_v4 = vpop.f32.mrb[5].mxu1 }
 0x101   : > { %v5347_v5 = vpop.f32.mrb[6].mxu1 }
 0x102   : > { %v5349_v13 = vpop.f32.mrb[7].mxu1  ;;  %1793 = vmatpush1.bf16.msra.mxu1 %v4784_v9  ;;  %2685 = vmatpush1.bf16.msra.mxu0 %v4922_v42 }
 0x103   : > { %4154 = vmatprep.subr.bf16.mxu1 %v4787_v10  ;;  %4226 = vmatprep.subr.bf16.mxu0 %v5013_v61 }
 0x104   : > { %4147 = vmatmul.mubr.msk.bf16.gmra.mrb[80].mxu1 %vm419_vm1, %v4893_v36  ;;  %4219 = vmatmul.mubr.msk.bf16.gmra.mrb[72].mxu0 %vm419_vm1, %v4893_v36 }
 0x105   : > { %4150 = vmatprep.mubr.msk.bf16.mxu1 %vm419_vm1, %v4927_v43  ;;  %4222 = vmatprep.mubr.msk.bf16.mxu0 %vm419_vm1, %v4927_v43 }
 0x107   : > { %v5363_v6 = vpop.f32.mrb[8].mxu1 }
 0x108   : > { %v5365_v7 = vpop.f32.mrb[9].mxu1 }
 0x109   : > { %v5367_v9 = vpop.f32.mrb[10].mxu1 }
 0x10a   : > { %v5369_v20 = vpop.f32.mrb[11].mxu1 }
 0x10c   : > { %4151 = vmatmul.mubr.msk.bf16.gmra.mrb[84].mxu1 %vm419_vm1, %v4945_v45  ;;  %4223 = vmatmul.mubr.msk.bf16.gmra.mrb[76].mxu0 %vm419_vm1, %v4945_v45 }
 0x10d   : > { %1818 = vmatprep.mubr.bf16.mxu1 %v6166_v0  ;;  %2710 = vmatprep.mubr.bf16.mxu0 %v6166_v0 }
 0x10f   : > { %v5377_v22 = vpop.f32.mrb[12].mxu1 }
 0x110   : > { %v5379_v28 = vpop.f32.mrb[13].mxu1 }
 0x111   : > { %v5381_v31 = vpop.f32.mrb[14].mxu1 }
 0x112   : > { %v5383_v32 = vpop.f32.mrb[15].mxu1 }
 0x114   : > { %3776 = vmatmul.mubr.msk.bf16.vlgmr.msra.gmra.mrb[40].mxu1 %vm419_vm1, %v4859_v29  ;;  %3839 = vmatmul.mubr.msk.bf16.vlgmr.msra.gmra.mrb[32].mxu0 %vm419_vm1, %v4859_v29 }
 0x115   : > { %4155 = vmatpush3.bf16.msra.mxu1 %v4787_v10  ;;  %4227 = vmatpush3.bf16.msra.mxu0 %v5013_v61 }
 0x116   : > { %1828 = vmatprep.mubr.bf16.mxu1 %v6166_v0  ;;  %2720 = vmatprep.mubr.bf16.mxu0 %v6166_v0 }
 0x117   : > { %v5393_v34 = vpop.f32.mrb[16].mxu1  ;;  %4156 = vmatprep.subr.bf16.mxu1 %v4806_v16  ;;  %4228 = vmatprep.subr.bf16.mxu0 %v5061_v21 }
 0x118   : > { %v5397_v35 = vpop.f32.mrb[17].mxu1 }
 0x119   : > { %v5399_v36 = vpop.f32.mrb[18].mxu1  ;;  %4157 = vmatpush3.bf16.msra.mxu1 %v4806_v16  ;;  %4229 = vmatpush3.bf16.msra.mxu0 %v5061_v21 }
 0x11a   : > { %v5403_v10 = vpop.f32.mrb[19].mxu1  ;;  %4158 = vmatprep.subr.bf16.mxu1 %v4816_v19  ;;  %4230 = vmatprep.subr.bf16.mxu0 %v5079_v26 }
 0x11c   : > { %3777 = vmatmul.mubr.msk.bf16.gmra.mrb[44].mxu1 %vm419_vm1, %v4898_v37  ;;  %3840 = vmatmul.mubr.msk.bf16.gmra.mrb[36].mxu0 %vm419_vm1, %v4898_v37 }
 0x11d   : > { %1838 = vmatprep.mubr.bf16.mxu1 %v6166_v0  ;;  %2730 = vmatprep.mubr.bf16.mxu0 %v6166_v0 }
 0x11e   : > { %4159 = vmatpush3.bf16.msra.mxu1 %v4816_v19  ;;  %4231 = vmatpush3.bf16.msra.mxu0 %v5079_v26  ;;  %v4680_v26 = vld [vmem:[%s4743_s17 + $0x180] ss:$12 sps:$4 sm:$0xff]  }
 0x11f   : > { %v5415_v16 = vpop.f32.mrb[20].mxu1  ;;  %4574 = vmatprep.subr.msk.bf16.mxu1 %vm444_vm0, %v4837_v25  ;;  %4577 = vmatprep.subr.msk.bf16.mxu0 %vm444_vm0, %v5098_v48 }
 0x120   : > { %v5422_v39 = vpop.f32.mrb[21].mxu1 }
 0x121   : > { %v5424_v42 = vpop.f32.mrb[22].mxu1 }
 0x122   : > { %v5426_v43 = vpop.f32.mrb[23].mxu1  ;;  %4161 = vmatpush3.bf16.msra.mxu1 %v4865_v30  ;;  %4233 = vmatpush3.bf16.msra.mxu0 %v5124_v54  ;;  %v4685_v54 = vld [vmem:[%s4743_s17 + $0x19c] ss:$12 sps:$4 sm:$0xff]  }
 0x123   : > { %2066 = vmatprep.subr.bf16.mxu1 %v4917_v41  ;;  %2958 = vmatprep.subr.bf16.mxu0 %v4682_v38  ;;  %v4688_v38 = vld [vmem:[%s4743_s17 + $0x1b4] ss:$12 sps:$4 sm:$0xff]  }
 0x124   : > { %3778 = vmatmul.mubr.msk.bf16.gmra.mrb[48].mxu1 %vm419_vm1, %v4932_v44  ;;  %3841 = vmatmul.mubr.msk.bf16.gmra.mrb[40].mxu0 %vm419_vm1, %v4932_v44 }
 0x125   : > { %1848 = vmatprep.mubr.bf16.mxu1 %v6166_v0  ;;  %2740 = vmatprep.mubr.bf16.mxu0 %v6166_v0 }
 0x12c   : > { %3779 = vmatmul.mubr.msk.bf16.gmra.mrb[52].mxu1 %vm419_vm1, %v4953_v47  ;;  %3842 = vmatmul.mubr.msk.bf16.gmra.mrb[44].mxu0 %vm419_vm1, %v4953_v47 }
 0x12d   : > { %1858 = vmatprep.mubr.bf16.mxu1 %v6166_v0  ;;  %2750 = vmatprep.mubr.bf16.mxu0 %v6166_v0 }
 0x134   : > { %3780 = vmatmul.mubr.msk.bf16.gmra.mrb[56].mxu1 %vm419_vm1, %v4974_v51  ;;  %3843 = vmatmul.mubr.msk.bf16.gmra.mrb[48].mxu0 %vm419_vm1, %v4974_v51 }
 0x135   : > { %1868 = vmatprep.mubr.bf16.mxu1 %v6166_v0  ;;  %2760 = vmatprep.mubr.bf16.mxu0 %v6166_v0 }
 0x13c   : > { %3781 = vmatmul.mubr.msk.bf16.gmra.mrb[60].mxu1 %vm419_vm1, %v4994_v56  ;;  %3844 = vmatmul.mubr.msk.bf16.gmra.mrb[52].mxu0 %vm419_vm1, %v4994_v56 }
 0x13d   : > { %1878 = vmatprep.mubr.bf16.mxu1 %v6166_v0  ;;  %2770 = vmatprep.mubr.bf16.mxu0 %v6166_v0 }
 0x144   : > { %3782 = vmatmul.mubr.msk.bf16.gmra.mrb[64].mxu1 %vm419_vm1, %v5018_v62  ;;  %3845 = vmatmul.mubr.msk.bf16.gmra.mrb[56].mxu0 %vm419_vm1, %v5018_v62 }
 0x145   : > { %1888 = vmatprep.mubr.bf16.mxu1 %v6166_v0  ;;  %2780 = vmatprep.mubr.bf16.mxu0 %v6166_v0 }
 0x147   : > { %v5461_v19 = vpop.f32.mrb[0].mxu0 }
 0x148   : > { %v5463_v25 = vpop.f32.mrb[1].mxu0 }
 0x149   : > { %v5465_v30 = vpop.f32.mrb[2].mxu0 }
 0x14a   : > { %v5467_v41 = vpop.f32.mrb[3].mxu0 }
 0x14c   : > { %3783 = vmatmul.mubr.msk.bf16.gmra.mrb[68].mxu1 %vm419_vm1, %v5037_v11  ;;  %3846 = vmatmul.mubr.msk.bf16.gmra.mrb[60].mxu0 %vm419_vm1, %v5037_v11 }
 0x14d   : > { %4162 = vmatprep.mubr.msk.bf16.mxu1 %vm419_vm1, %v4859_v29  ;;  %4234 = vmatprep.mubr.msk.bf16.mxu0 %vm419_vm1, %v4859_v29  ;;  %v4683_v29 = vld [vmem:[%s4743_s17 + $0x198] ss:$12 sps:$4 sm:$0xff]  }
 0x14f   : > { %v5477_v45 = vpop.f32.mrb[4].mxu0 }
 0x150   : > { %v5479_v61 = vpop.f32.mrb[5].mxu0 }
 0x151   : > { %v5481_v21 = vpop.f32.mrb[6].mxu0 }
 0x152   : > { %6170 = vst [vmem:[#allocation2_spill] sm:$0xff] %v5481_v21  ;;  %v5484_v48 = vpop.f32.mrb[7].mxu0 }
 0x153   : > { %6171 = vst [vmem:[#allocation3_spill] sm:$0xff] %v5484_v48 }
 0x154   : > { %4163 = vmatmul.mubr.msk.bf16.vlgmr.msra.gmra.mrb[72].mxu1 %vm419_vm1, %v4898_v37  ;;  %4235 = vmatmul.mubr.msk.bf16.vlgmr.msra.gmra.mrb[64].mxu0 %vm419_vm1, %v4898_v37 }
 0x155   : > { %2067 = vmatpush1.bf16.msra.mxu1 %v5058_v18  ;;  %2959 = vmatpush1.bf16.msra.mxu0 %v4680_v26 }
 0x156   : > { %4166 = vmatprep.mubr.msk.bf16.mxu1 %vm419_vm1, %v4932_v44  ;;  %4238 = vmatprep.mubr.msk.bf16.mxu0 %vm419_vm1, %v4932_v44 }
 0x157   : > { %v1196_v0 = vpop.f32.mrb[8].mxu0  ;;  %2068 = vmatprep.subr.bf16.mxu1 %v5064_v23  ;;  %2960 = vmatprep.subr.bf16.mxu0 %v4685_v54  ;;  %v4686_v23 = vld [vmem:[%s4743_s17 + $0x1b0] ss:$12 sps:$4 sm:$0xff]   ;;  %v4691_v54 = vld [vmem:[%s4743_s17 + $0x1c8] ss:$12 sps:$4 sm:$0x7f]  }
 0x158   : > { %v5500_v37 = vadd.f32 %v1196_v0, %v5315_v1  ;;  %v1198_v18 = vpop.f32.mrb[9].mxu0  ;;  %v4689_v1 = vld [vmem:[%s4743_s17 + $0x1cc] ss:$12 sps:$4 sm:$0x7f]  }
 0x159   : > { %v5503_v26 = vadd.f32 %v1198_v18, %v5319_v12  ;;  %v1200_v48 = vpop.f32.mrb[10].mxu0  ;;  %2069 = vmatpush1.bf16.msra.mxu1 %v5073_v24  ;;  %2961 = vmatpush1.bf16.msra.mxu0 %v4683_v29  ;;  %v4692_v12 = vld [vmem:[%s4743_s17 + $0x188] ss:$12 sps:$4 sm:$0xff]  }
 0x15a   : > { %v5507_v44 = vadd.f32 %v1200_v48, %v5321_v27  ;;  %v1202_v21 = vpop.f32.mrb[11].mxu0  ;;  %2070 = vmatprep.subr.bf16.mxu1 %v5082_v33  ;;  %2962 = vmatprep.subr.bf16.mxu0 %v4688_v38  ;;  %v2950_v33 = vsel %vm444_vm0, %v4691_v54, 0 }
 0x15b   : > { %v5512_v0 = vadd.f32 %v1202_v21, %v5325_v2 }
 0x15c   : > { %4167 = vmatmul.mubr.msk.bf16.gmra.mrb[76].mxu1 %vm419_vm1, %v4953_v47  ;;  %4239 = vmatmul.mubr.msk.bf16.gmra.mrb[68].mxu0 %vm419_vm1, %v4953_v47 }
 0x15d   : > { %4170 = vmatprep.mubr.msk.bf16.mxu1 %vm419_vm1, %v4974_v51  ;;  %4242 = vmatprep.mubr.msk.bf16.mxu0 %vm419_vm1, %v4974_v51 }
 0x15e   : > { %2071 = vmatpush1.bf16.msra.mxu1 %v5101_v49  ;;  %2963 = vmatpush1.bf16.msra.mxu0 %v4686_v23 }
 0x15f   : > { %v1206_v24 = vpop.f32.mrb[12].mxu0  ;;  %3804 = vmatprep.subr.msk.bf16.mxu1 %vm444_vm0, %v5108_v52  ;;  %3867 = vmatprep.subr.msk.bf16.mxu0 %vm444_vm0, %v4689_v1 }
 0x160   : > { %v5531_v47 = vadd.f32 %v1206_v24, %v5339_v3  ;;  %v1208_v27 = vpop.f32.mrb[13].mxu0 }
 0x161   : > { %v5534_v2 = vadd.f32 %v1208_v27, %v5345_v4  ;;  %v1210_v51 = vpop.f32.mrb[14].mxu0 }
 0x162   : > { %v5537_v49 = vadd.f32 %v1210_v51, %v5347_v5  ;;  %v1212_v21 = vpop.f32.mrb[15].mxu0  ;;  %2073 = vmatpush1.bf16.msra.mxu1 %v5129_v55  ;;  %2965 = vmatpush1.bf16.msra.mxu0 %v2950_v33 }
 0x163   : > { %v5541_v52 = vadd.f32 %v1212_v21, %v5349_v13  ;;  %4178 = vmatprep.subr.bf16.mxu1 %v5132_v57  ;;  %4250 = vmatprep.subr.bf16.mxu0 %v4692_v12 }
 0x164   : > { %4171 = vmatmul.mubr.msk.bf16.gmra.mrb[80].mxu1 %vm419_vm1, %v4994_v56  ;;  %4243 = vmatmul.mubr.msk.bf16.gmra.mrb[72].mxu0 %vm419_vm1, %v4994_v56 }
 0x165   : > { %4174 = vmatprep.mubr.msk.bf16.mxu1 %vm419_vm1, %v5018_v62  ;;  %4246 = vmatprep.mubr.msk.bf16.mxu0 %vm419_vm1, %v5018_v62 }
 0x167   : > { %v1216_v55 = vpop.f32.mrb[16].mxu0  ;;  %v5552_v3 = vpop.f32.mrb[24].mxu1 }
 0x168   : > { %v5555_v4 = vadd.f32 %v1216_v55, %v5363_v6  ;;  %v1218_v5 = vpop.f32.mrb[17].mxu0  ;;  %v5557_v13 = vpop.f32.mrb[25].mxu1  ;;  %v6172_v6 = vmov 0  }
 0x169   : > { %v5560_v48 = vadd.f32 %v1218_v5, %v5365_v7  ;;  %v1220_v29 = vpop.f32.mrb[18].mxu0  ;;  %v5562_v56 = vpop.f32.mrb[26].mxu1 }
 0x16a   : > { %v5565_v38 = vadd.f32 %v1220_v29, %v5367_v9  ;;  %v1222_v18 = vpop.f32.mrb[19].mxu0  ;;  %v5567_v62 = vpop.f32.mrb[27].mxu1 }
 0x16b   : > { %v5570_v23 = vadd.f32 %v1222_v18, %v5369_v20 }
 0x16c   : > { %4175 = vmatmul.mubr.msk.bf16.gmra.mrb[84].mxu1 %vm419_vm1, %v5037_v11  ;;  %4247 = vmatmul.mubr.msk.bf16.gmra.mrb[76].mxu0 %vm419_vm1, %v5037_v11 }
 0x16d   : > { %2098 = vmatprep.mubr.bf16.mxu1 %v6172_v6  ;;  %2990 = vmatprep.mubr.bf16.mxu0 %v6172_v6 }
 0x16f   : > { %v1226_v7 = vpop.f32.mrb[20].mxu0  ;;  %v5578_v9 = vpop.f32.mrb[28].mxu1 }
 0x170   : > { %v5581_v1 = vadd.f32 %v1226_v7, %v5377_v22  ;;  %v1228_v54 = vpop.f32.mrb[21].mxu0  ;;  %v5583_v20 = vpop.f32.mrb[29].mxu1  ;;  %v4693_v22 = vld [vmem:[%s4743_s17 + $0x1a0] ss:$12 sps:$4 sm:$0xff]  }
 0x171   : > { %v5586_v24 = vadd.f32 %v1228_v54, %v5379_v28  ;;  %v1230_v33 = vpop.f32.mrb[22].mxu0  ;;  %v5588_v27 = vpop.f32.mrb[30].mxu1  ;;  %v4694_v28 = vld [vmem:[%s4743_s17 + $0x1b8] ss:$12 sps:$4 sm:$0xff]  }
 0x172   : > { %v5591_v11 = vadd.f32 %v1230_v33, %v5381_v31  ;;  %v1232_v51 = vpop.f32.mrb[23].mxu0  ;;  %v5593_v21 = vpop.f32.mrb[31].mxu1 }
 0x173   : > { %v5596_v55 = vadd.f32 %v1232_v51, %v5383_v32 }
 0x174   : > { %3805 = vmatmul.mubr.msk.bf16.vlgmr.msra.gmra.mrb[40].mxu1 %vm419_vm1, %v5055_v17  ;;  %3868 = vmatmul.mubr.msk.bf16.vlgmr.msra.gmra.mrb[32].mxu0 %vm419_vm1, %v5055_v17 }
 0x175   : > { %4179 = vmatpush3.bf16.msra.mxu1 %v5132_v57  ;;  %4251 = vmatpush3.bf16.msra.mxu0 %v4692_v12 }
 0x176   : > { %2108 = vmatprep.mubr.bf16.mxu1 %v6172_v6  ;;  %3000 = vmatprep.mubr.bf16.mxu0 %v6172_v6 }
 0x177   : > { %v1236_v31 = vpop.f32.mrb[24].mxu0  ;;  %v5607_v5 = vpop.f32.mrb[32].mxu1  ;;  %4180 = vmatprep.subr.bf16.mxu1 %v5225_v50  ;;  %4252 = vmatprep.subr.bf16.mxu0 %v4693_v22 }
 0x178   : > { %6173 = vst [vmem:[#allocation4_spill] sm:$0xff] %v5607_v5  ;;  %v5611_v32 = vadd.f32 %v1236_v31, %v5393_v34  ;;  %v1238_v29 = vpop.f32.mrb[25].mxu0  ;;  %v5613_v18 = vpop.f32.mrb[33].mxu1 }
 0x179   : > { %6174 = vst [vmem:[#allocation5_spill] sm:$0xff] %v5613_v18  ;;  %v5616_v57 = vadd.f32 %v1238_v29, %v5397_v35  ;;  %v1240_v12 = vpop.f32.mrb[26].mxu0  ;;  %v5618_v7 = vpop.f32.mrb[34].mxu1  ;;  %4181 = vmatpush3.bf16.msra.mxu1 %v5225_v50  ;;  %4253 = vmatpush3.bf16.msra.mxu0 %v4693_v22  ;;  %v4695_v35 = vld [vmem:[%s4743_s17 + $0x1d0] ss:$12 sps:$4 sm:$0x7f]  }
 0x17a   : > { %6175 = vst [vmem:[#allocation6_spill] sm:$0xff] %v5618_v7  ;;  %v5622_v54 = vadd.f32 %v1240_v12, %v5399_v36  ;;  %v1242_v33 = vpop.f32.mrb[27].mxu0  ;;  %v5624_v51 = vpop.f32.mrb[35].mxu1  ;;  %4182 = vmatprep.subr.bf16.mxu1 %v5236_v53  ;;  %4254 = vmatprep.subr.bf16.mxu0 %v4694_v28  ;;  %s4580_s17 = smul.u32 192, %s6219_s13 }
 0x17b   : > { %6176 = vst [vmem:[#allocation7_spill] sm:$0xff] %v5624_v51  ;;  %v5628_v34 = vadd.f32 %v1242_v33, %v5403_v10  ;;  %v2956_v10 = vsel %vm444_vm0, %v4695_v35, 0 }
 0x17c   : > { %3806 = vmatmul.mubr.msk.bf16.gmra.mrb[44].mxu1 %vm419_vm1, %v5089_v40  ;;  %3869 = vmatmul.mubr.msk.bf16.gmra.mrb[36].mxu0 %vm419_vm1, %v5089_v40  ;;  %s5855_s27 = scalar_lea.vmem %s6165_s3, %s4580_s17 }
 0x17d   : > { %6177 = vst [vmem:[#allocation8_spill] sm:$0xff] %v5628_v34  ;;  %2118 = vmatprep.mubr.bf16.mxu1 %v6172_v6  ;;  %3010 = vmatprep.mubr.bf16.mxu0 %v6172_v6 }
 0x17e   : > { %4183 = vmatpush3.bf16.msra.mxu1 %v5236_v53  ;;  %4255 = vmatpush3.bf16.msra.mxu0 %v4694_v28 }
 0x17f   : > { %v1246_v50 = vpop.f32.mrb[28].mxu0  ;;  %v5638_v36 = vpop.f32.mrb[36].mxu1  ;;  %4575 = vmatprep.subr.msk.bf16.mxu1 %vm444_vm0, %v5245_v58  ;;  %4578 = vmatprep.subr.msk.bf16.mxu0 %vm444_vm0, %v4695_v35 }
 0x180   : > { %6178 = vst [vmem:[#allocation9_spill] sm:$0xff] %v5638_v36  ;;  %v5645_v22 = vadd.f32 %v1246_v50, %v5415_v16  ;;  %v1248_v31 = vpop.f32.mrb[29].mxu0  ;;  %v5647_v29 = vpop.f32.mrb[37].mxu1 }
 0x181   : > { %6180 = vst [vmem:[#allocation11_spill] sm:$0xff] %v5647_v29  ;;  %v5650_v12 = vadd.f32 %v1248_v31, %v5422_v39  ;;  %v1250_v53 = vpop.f32.mrb[30].mxu0  ;;  %v5652_v28 = vpop.f32.mrb[38].mxu1 }
 0x182   : > { %6179 = vst [vmem:[#allocation10_spill] sm:$0xff] %v5645_v22  ;;  %6182 = vst [vmem:[#allocation13_spill] sm:$0xff] %v5652_v28  ;;  %v5655_v33 = vadd.f32 %v1250_v53, %v5424_v42  ;;  %v1252_v58 = vpop.f32.mrb[31].mxu0  ;;  %v5657_v36 = vpop.f32.mrb[39].mxu1  ;;  %4185 = vmatpush3.bf16.msra.mxu1 %v5261_v60  ;;  %4257 = vmatpush3.bf16.msra.mxu0 %v2956_v10 }
 0x183   : > { %6181 = vst [vmem:[#allocation12_spill] sm:$0xff] %v5650_v12  ;;  %6184 = vst [vmem:[#allocation15_spill] sm:$0xff] %v5657_v36  ;;  %v5661_v16 = vadd.f32 %v1252_v58, %v5426_v43 }
 0x184   : > { %6183 = vst [vmem:[#allocation14_spill] sm:$0xff] %v5655_v33  ;;  %3807 = vmatmul.mubr.msk.bf16.gmra.mrb[48].mxu1 %vm419_vm1, %v5140_v59  ;;  %3870 = vmatmul.mubr.msk.bf16.gmra.mrb[40].mxu0 %vm419_vm1, %v5140_v59 }
 0x185   : > { %6185 = vst [vmem:[#allocation16_spill] sm:$0xff] %v5661_v16  ;;  %2128 = vmatprep.mubr.bf16.mxu1 %v6172_v6  ;;  %3020 = vmatprep.mubr.bf16.mxu0 %v6172_v6 }
 0x18c   : > { %3808 = vmatmul.mubr.msk.bf16.gmra.mrb[52].mxu1 %vm419_vm1, %v5159_v63  ;;  %3871 = vmatmul.mubr.msk.bf16.gmra.mrb[44].mxu0 %vm419_vm1, %v5159_v63 }
 0x18d   : > { %2138 = vmatprep.mubr.bf16.mxu1 %v6172_v6  ;;  %3030 = vmatprep.mubr.bf16.mxu0 %v6172_v6 }
 0x194   : > { %3809 = vmatmul.mubr.msk.bf16.gmra.mrb[56].mxu1 %vm419_vm1, %v5171_v8  ;;  %3872 = vmatmul.mubr.msk.bf16.gmra.mrb[48].mxu0 %vm419_vm1, %v5171_v8 }
 0x195   : > { %2148 = vmatprep.mubr.bf16.mxu1 %v6172_v6  ;;  %3040 = vmatprep.mubr.bf16.mxu0 %v6172_v6 }
 0x19c   : > { %3810 = vmatmul.mubr.msk.bf16.gmra.mrb[60].mxu1 %vm419_vm1, %v5185_v14  ;;  %3873 = vmatmul.mubr.msk.bf16.gmra.mrb[52].mxu0 %vm419_vm1, %v5185_v14 }
 0x19d   : > { %2158 = vmatprep.mubr.bf16.mxu1 %v6172_v6  ;;  %3050 = vmatprep.mubr.bf16.mxu0 %v6172_v6 }
 0x1a4   : > { %3811 = vmatmul.mubr.msk.bf16.gmra.mrb[64].mxu1 %vm419_vm1, %v5202_v15  ;;  %3874 = vmatmul.mubr.msk.bf16.gmra.mrb[56].mxu0 %vm419_vm1, %v5202_v15 }
 0x1a5   : > { %2168 = vmatprep.mubr.bf16.mxu1 %v6172_v6  ;;  %3060 = vmatprep.mubr.bf16.mxu0 %v6172_v6  ;;  %v6187_v6 = vld [vmem:[#allocation2_spill] sm:$0xff] }
 0x1ac   : > { %3812 = vmatmul.mubr.msk.bf16.gmra.mrb[68].mxu1 %vm419_vm1, %v5216_v46  ;;  %3875 = vmatmul.mubr.msk.bf16.gmra.mrb[60].mxu0 %vm419_vm1, %v5216_v46 }
 0x1ad   : > { %4186 = vmatprep.mubr.msk.bf16.mxu1 %vm419_vm1, %v5055_v17  ;;  %4258 = vmatprep.mubr.msk.bf16.mxu0 %vm419_vm1, %v5055_v17  ;;  %v5729_v17 = vpop.permute.xlu0 %1402 }
 0x1ae   : > { %6186 = vst [vmem:[#allocation17_spill] sm:$0xff] %v5729_v17  ;;  %v1481_v60 = vadd.f32 %v5729_v17, %v5463_v25 }
 0x1b0   : > { %v1529_v53 = vmax.f32 %v1481_v60, 0.0 }
 0x1b4   : > { %4187 = vmatmul.mubr.msk.bf16.vlgmr.msra.gmra.mrb[72].mxu1 %vm419_vm1, %v5089_v40  ;;  %4259 = vmatmul.mubr.msk.bf16.vlgmr.msra.gmra.mrb[64].mxu0 %vm419_vm1, %v5089_v40  ;;  %v5731_v40 = vpop.permute.xlu1 %1412 }
 0x1b5   : > { %4190 = vmatprep.mubr.msk.bf16.mxu1 %vm419_vm1, %v5140_v59  ;;  %4262 = vmatprep.mubr.msk.bf16.mxu0 %vm419_vm1, %v5140_v59  ;;  %v5733_v59 = vpop.permute.xlu0 %1407  ;;  %v5755_v42 = vadd.f32 %v5731_v40, %v5477_v45 }
 0x1b6   : > { %v5751_v39 = vadd.f32 %v5733_v59, %v5467_v41 }
 0x1bc   : > { %4191 = vmatmul.mubr.msk.bf16.gmra.mrb[76].mxu1 %vm419_vm1, %v5159_v63  ;;  %4263 = vmatmul.mubr.msk.bf16.gmra.mrb[68].mxu0 %vm419_vm1, %v5159_v63  ;;  %v5735_v63 = vpop.permute.xlu1 %1417 }
 0x1bd   : > { %4194 = vmatprep.mubr.msk.bf16.mxu1 %vm419_vm1, %v5171_v8  ;;  %4266 = vmatprep.mubr.msk.bf16.mxu0 %vm419_vm1, %v5171_v8  ;;  %v5737_v8 = vpop.permute.xlu0 %1422  ;;  %v5765_v25 = vadd.f32 %v5735_v63, %v6187_v6  ;;  %v1532_v6 = vmax.f32 %v5751_v39, 0.0  ;;  %v5841_v29 = vadd.f32 %v5562_v56, %v5735_v63  ;;  %v5850_v56 = vadd.f32 %v5733_v59, %v5567_v62 }
 0x1be   : > { %v5775_v45 = vadd.f32 %v5500_v37, %v5737_v8  ;;  %v5779_v50 = vadd.f32 %v5503_v26, %v5737_v8 }
 0x1c1   : > { %v5757_v43 = vpop.permute.xlu0 %1432 }
 0x1c2   : > { %v5792_v37 = vadd.f32 %v5531_v47, %v5757_v43 }
 0x1c4   : > { %4195 = vmatmul.mubr.msk.bf16.gmra.mrb[80].mxu1 %vm419_vm1, %v5185_v14  ;;  %4267 = vmatmul.mubr.msk.bf16.gmra.mrb[72].mxu0 %vm419_vm1, %v5185_v14  ;;  %v5739_v14 = vpop.permute.xlu1 %1427 }
 0x1c5   : > { %4198 = vmatprep.mubr.msk.bf16.mxu1 %vm419_vm1, %v5202_v15  ;;  %4270 = vmatprep.mubr.msk.bf16.mxu0 %vm419_vm1, %v5202_v15  ;;  %v1480_v15 = vadd.f32 %v5729_v17, %v5461_v19  ;;  %v5761_v19 = vadd.f32 %v5731_v40, %v5479_v61  ;;  %v5783_v61 = vadd.f32 %v5507_v44, %v5739_v14 }
 0x1c6   : > { %v5787_v10 = vadd.f32 %v5512_v0, %v5739_v14  ;;  %v5798_v44 = vadd.f32 %v5534_v2, %v5757_v43 }
 0x1c7   : > { %v1528_v31 = vmax.f32 %v1480_v15, 0.0  ;;  %v5817_v15 = vadd.f32 %v5552_v3, %v5731_v40 }
 0x1c8   : > { %v5771_v41 = vpop.permute.xlu1 %1437 }
 0x1c9   : > { %v5802_v0 = vadd.f32 %v5537_v49, %v5771_v41  ;;  %v5809_v47 = vadd.f32 %v5541_v52, %v5771_v41 }
 0x1cc   : > { %4199 = vmatmul.mubr.msk.bf16.gmra.mrb[84].mxu1 %vm419_vm1, %v5216_v46  ;;  %4271 = vmatmul.mubr.msk.bf16.gmra.mrb[76].mxu0 %vm419_vm1, %v5216_v46  ;;  %v5747_v46 = vadd.f32 %v5733_v59, %v5465_v30  ;;  %v6188_v30 = vld [vmem:[#allocation3_spill] sm:$0xff] }
 0x1cd   : > { %v5769_v35 = vadd.f32 %v5735_v63, %v6188_v30 }
 0x1ce   : > { %v1531_v58 = vmax.f32 %v5747_v46, 0.0 }
 0x247   : > { %v2100_v39 = vpop.f32.mrb[40].mxu1  ;;  %v2992_v30 = vpop.f32.mrb[32].mxu0 }
 0x248   : > { %v2324_v46 = vadd.f32 %v2100_v39, %v5729_v17  ;;  %v3216_v60 = vadd.f32 %v2992_v30, %v5729_v17  ;;  %v2102_v52 = vpop.f32.mrb[41].mxu1  ;;  %v2994_v28 = vpop.f32.mrb[33].mxu0 }
 0x249   : > { %v2325_v26 = vadd.f32 %v2102_v52, %v5729_v17  ;;  %v3217_v2 = vadd.f32 %v2994_v28, %v5729_v17  ;;  %v2104_v51 = vpop.f32.mrb[42].mxu1  ;;  %v2996_v36 = vpop.f32.mrb[34].mxu0  ;;  %v5831_v52 = vadd.f32 %v5729_v17, %v5557_v13 }
 0x24a   : > { %v2372_v7 = vmax.f32 %v2324_v46, 0.0  ;;  %v2327_v39 = vadd.f32 %v2104_v51, %v5733_v59  ;;  %v3219_v30 = vadd.f32 %v2996_v36, %v5733_v59  ;;  %v2106_v18 = vpop.f32.mrb[43].mxu1  ;;  %v2998_v5 = vpop.f32.mrb[35].mxu0  ;;  %v3264_v33 = vmax.f32 %v3216_v60, 0.0 }
 0x24b   : > { %v5833_v28 = vpop.permute.xlu0 %1442  ;;  %v2373_v16 = vmax.f32 %v2325_v26, 0.0  ;;  %v2328_v49 = vadd.f32 %v2106_v18, %v5733_v59  ;;  %v3220_v3 = vadd.f32 %v2998_v5, %v5733_v59  ;;  %v3265_v13 = vmax.f32 %v3217_v2, 0.0 }
 0x24c   : > { %v2420_v51 = vmax.f32 %v1528_v31, %v2372_v7  ;;  %v2375_v36 = vmax.f32 %v2327_v39, 0.0  ;;  %v3267_v26 = vmax.f32 %v3219_v30, 0.0  ;;  %v5845_v18 = vadd.f32 %v5555_v4, %v5833_v28 }
 0x24d   : > { %v2421_v12 = vmax.f32 %v1529_v53, %v2373_v16  ;;  %v2376_v17 = vmax.f32 %v2328_v49, 0.0  ;;  %v3268_v60 = vmax.f32 %v3220_v3, 0.0 }
 0x24e   : > { %v3312_v22 = vmax.f32 %v2420_v51, %v3264_v33  ;;  %v2423_v34 = vmax.f32 %v1531_v58, %v2375_v36  ;;  %v1552_v5 = vmax.f32 %v5845_v18, 0.0 }
 0x24f   : > { %v3313_v7 = vmax.f32 %v2421_v12, %v3265_v13  ;;  %v2424_v31 = vmax.f32 %v1532_v6, %v2376_v17  ;;  %v2110_v39 = vpop.f32.mrb[44].mxu1  ;;  %v3002_v46 = vpop.f32.mrb[36].mxu0 }
 0x250   : > { %v3315_v33 = vmax.f32 %v2423_v34, %v3267_v26  ;;  %v2330_v4 = vadd.f32 %v2110_v39, %v5731_v40  ;;  %v3222_v16 = vadd.f32 %v3002_v46, %v5731_v40  ;;  %v2112_v53 = vpop.f32.mrb[45].mxu1  ;;  %v3004_v12 = vpop.f32.mrb[37].mxu0  ;;  %v5865_v46 = vadd.f32 %v5560_v48, %v5833_v28 }
 0x251   : > { %v3918_v17 = vpack.c.bf16 %v3313_v7, %v3312_v22  ;;  %v3316_v58 = vmax.f32 %v2424_v31, %v3268_v60  ;;  %v2331_v6 = vadd.f32 %v2112_v53, %v5731_v40  ;;  %v3223_v62 = vadd.f32 %v3004_v12, %v5731_v40  ;;  %v2114_v2 = vpop.f32.mrb[46].mxu1  ;;  %v3006_v49 = vpop.f32.mrb[38].mxu0 }
 0x252   : > { %v2378_v3 = vmax.f32 %v2330_v4, 0.0  ;;  %v2333_v30 = vadd.f32 %v2114_v2, %v5735_v63  ;;  %v3225_v34 = vadd.f32 %v3006_v49, %v5735_v63  ;;  %v2116_v51 = vpop.f32.mrb[47].mxu1  ;;  %v3008_v36 = vpop.f32.mrb[39].mxu0  ;;  %v6189_v60 = vmax.f32 %v5755_v42, 0.0 }
 0x253   : > { %v5868_v13 = vpop.permute.xlu1 %1447  ;;  %3520 = vst [vmem:[%s5855_s27] sm:$0xff] %v3918_v17  ;;  %v3920_v26 = vpack.c.bf16 %v3316_v58, %v3315_v33  ;;  %v2379_v7 = vmax.f32 %v2331_v6, 0.0  ;;  %v2334_v31 = vadd.f32 %v2116_v51, %v5735_v63  ;;  %v3270_v4 = vmax.f32 %v3222_v16, 0.0 }
 0x254   : > { %v2426_v39 = vmax.f32 %v6189_v60, %v2378_v3  ;;  %v2381_v53 = vmax.f32 %v2333_v30, 0.0  ;;  %v3226_v12 = vadd.f32 %v3008_v36, %v5735_v63  ;;  %v6190_v48 = vmax.f32 %v5761_v19, 0.0 }
 0x255   : > { %3523 = vst [vmem:[%s5855_s27 + $0xc] sm:$0xff] %v3920_v26  ;;  %v3271_v49 = vmax.f32 %v3223_v62, 0.0  ;;  %v2382_v22 = vmax.f32 %v2334_v31, 0.0  ;;  %v6191_v33 = vmax.f32 %v5765_v25, 0.0  ;;  %v3273_v6 = vmax.f32 %v3225_v34, 0.0 }
 0x256   : > { %v2427_v2 = vmax.f32 %v6190_v48, %v2379_v7  ;;  %v3318_v17 = vmax.f32 %v2426_v39, %v3270_v4  ;;  %v5883_v42 = vadd.f32 %v5565_v38, %v5868_v13  ;;  %v1533_v16 = vmax.f32 %v5850_v56, 0.0 }
 0x257   : > { %v2429_v58 = vmax.f32 %v6191_v33, %v2381_v53  ;;  %v6192_v30 = vmax.f32 %v5769_v35, 0.0  ;;  %v3274_v51 = vmax.f32 %v3226_v12, 0.0  ;;  %v2120_v62 = vpop.f32.mrb[48].mxu1  ;;  %v3012_v36 = vpop.f32.mrb[40].mxu0  ;;  %v1553_v38 = vmax.f32 %v5865_v46, 0.0 }
 0x258   : > { %v3319_v3 = vmax.f32 %v2427_v2, %v3271_v49  ;;  %v2336_v7 = vadd.f32 %v2120_v62, %v5737_v8  ;;  %v3228_v25 = vadd.f32 %v3012_v36, %v5737_v8  ;;  %v2122_v31 = vpop.f32.mrb[49].mxu1  ;;  %v3014_v34 = vpop.f32.mrb[41].mxu0 }
 0x259   : > { %v2430_v19 = vmax.f32 %v6192_v30, %v2382_v22  ;;  %v3321_v26 = vmax.f32 %v2429_v58, %v3273_v6  ;;  %v2337_v4 = vadd.f32 %v2122_v31, %v5737_v8  ;;  %v3229_v35 = vadd.f32 %v3014_v34, %v5737_v8  ;;  %v2124_v22 = vpop.f32.mrb[50].mxu1  ;;  %v3016_v53 = vpop.f32.mrb[42].mxu0 }
 0x25a   : > { %v3922_v60 = vpack.c.bf16 %v3319_v3, %v3318_v17  ;;  %v2384_v12 = vmax.f32 %v2336_v7, 0.0  ;;  %v2339_v48 = vadd.f32 %v2124_v22, %v5739_v14  ;;  %v3231_v2 = vadd.f32 %v3016_v53, %v5739_v14  ;;  %v2126_v49 = vpop.f32.mrb[51].mxu1  ;;  %v3018_v33 = vpop.f32.mrb[43].mxu0 }
 0x25b   : > { %v3322_v39 = vmax.f32 %v2430_v19, %v3274_v51  ;;  %v5897_v58 = vadd.f32 %v5570_v23, %v5868_v13  ;;  %v5901_v17 = vadd.f32 %v5578_v9, %v5757_v43  ;;  %v2385_v3 = vmax.f32 %v2337_v4, 0.0 }
 0x25c   : > { %3525 = vst [vmem:[%s5855_s27 + $0x18] sm:$0xff] %v3922_v60  ;;  %v2340_v30 = vadd.f32 %v2126_v49, %v5739_v14  ;;  %v6193_v19 = vmax.f32 %v5775_v45, 0.0  ;;  %v3276_v62 = vmax.f32 %v3228_v25, 0.0  ;;  %v2387_v36 = vmax.f32 %v2339_v48, 0.0  ;;  %v5912_v60 = vpop.permute.xlu0 %1452 }
 0x25d   : > { %v3924_v6 = vpack.c.bf16 %v3322_v39, %v3321_v26  ;;  %v3232_v7 = vadd.f32 %v3018_v33, %v5739_v14  ;;  %v6194_v23 = vmax.f32 %v5779_v50, 0.0  ;;  %v3277_v34 = vmax.f32 %v3229_v35, 0.0 }
 0x25e   : > { %v2432_v51 = vmax.f32 %v6193_v19, %v2384_v12  ;;  %v2388_v22 = vmax.f32 %v2340_v30, 0.0  ;;  %v1555_v9 = vmax.f32 %v5883_v42, 0.0  ;;  %v6195_v39 = vmax.f32 %v5783_v61, 0.0 }
 0x25f   : > { %3527 = vst [vmem:[%s5855_s27 + $0x24] sm:$0xff] %v3924_v6  ;;  %v2433_v31 = vmax.f32 %v6194_v23, %v2385_v3  ;;  %v3279_v45 = vmax.f32 %v3231_v2, 0.0  ;;  %v1556_v25 = vmax.f32 %v5897_v58, 0.0  ;;  %v5919_v53 = vadd.f32 %v5737_v8, %v5583_v20  ;;  %v2130_v49 = vpop.f32.mrb[52].mxu1  ;;  %v3022_v33 = vpop.f32.mrb[44].mxu0 }
 0x260   : > { %v3324_v26 = vmax.f32 %v2432_v51, %v3276_v62  ;;  %v2435_v4 = vmax.f32 %v6195_v39, %v2387_v36  ;;  %v6196_v50 = vmax.f32 %v5787_v10, 0.0  ;;  %v3280_v48 = vmax.f32 %v3232_v7, 0.0  ;;  %v2132_v30 = vpop.f32.mrb[53].mxu1  ;;  %v3024_v19 = vpop.f32.mrb[45].mxu0 }
 0x261   : > { %v3325_v12 = vmax.f32 %v2433_v31, %v3277_v34  ;;  %v1548_v6 = vmax.f32 %v5901_v17, 0.0  ;;  %v2342_v61 = vadd.f32 %v2130_v49, %v5757_v43  ;;  %v3234_v2 = vadd.f32 %v3022_v33, %v5757_v43  ;;  %v2134_v36 = vpop.f32.mrb[54].mxu1  ;;  %v3026_v7 = vpop.f32.mrb[46].mxu0 }
 0x262   : > { %v2436_v35 = vmax.f32 %v6196_v50, %v2388_v22  ;;  %v3327_v3 = vmax.f32 %v2435_v4, %v3279_v45  ;;  %v2343_v62 = vadd.f32 %v2132_v30, %v5757_v43  ;;  %v3235_v10 = vadd.f32 %v3024_v19, %v5757_v43  ;;  %v2136_v39 = vpop.f32.mrb[55].mxu1  ;;  %v3028_v4 = vpop.f32.mrb[47].mxu0 }
 0x263   : > { %v3926_v51 = vpack.c.bf16 %v3325_v12, %v3324_v26  ;;  %v5930_v23 = vadd.f32 %v5588_v27, %v5771_v41  ;;  %v2390_v31 = vmax.f32 %v2342_v61, 0.0  ;;  %v2345_v34 = vadd.f32 %v2134_v36, %v5771_v41 }
 0x264   : > { %v3328_v20 = vmax.f32 %v2436_v35, %v3280_v48  ;;  %v3237_v22 = vadd.f32 %v3026_v7, %v5771_v41  ;;  %v2391_v45 = vmax.f32 %v2343_v62, 0.0  ;;  %v2346_v12 = vadd.f32 %v2136_v39, %v5771_v41 }
 0x265   : > { %3529 = vst [vmem:[%s5855_s27 + $0x30] sm:$0xff] %v3926_v51  ;;  %v5938_v50 = vadd.f32 %v5581_v1, %v5912_v60  ;;  %v6197_v27 = vmax.f32 %v5792_v37, 0.0  ;;  %v3282_v48 = vmax.f32 %v3234_v2, 0.0  ;;  %v2393_v49 = vmax.f32 %v2345_v34, 0.0  ;;  %v5951_v1 = vpop.permute.xlu1 %1457 }
 0x266   : > { %v3928_v26 = vpack.c.bf16 %v3328_v20, %v3327_v3  ;;  %v3238_v33 = vadd.f32 %v3028_v4, %v5771_v41  ;;  %v1542_v61 = vmax.f32 %v5919_v53, 0.0  ;;  %v6198_v30 = vmax.f32 %v5798_v44, 0.0 }
 0x267   : > { %v2438_v35 = vmax.f32 %v6197_v27, %v2390_v31  ;;  %v3283_v19 = vmax.f32 %v3235_v10, 0.0  ;;  %v2394_v51 = vmax.f32 %v2346_v12, 0.0  ;;  %v5949_v20 = vadd.f32 %v5739_v14, %v5593_v21  ;;  %v2140_v44 = vpop.f32.mrb[56].mxu1  ;;  %v3032_v4 = vpop.f32.mrb[48].mxu0 }
 0x268   : > { %3531 = vst [vmem:[%s5855_s27 + $0x3c] sm:$0xff] %v3928_v26  ;;  %v2439_v3 = vmax.f32 %v6198_v30, %v2391_v45  ;;  %v6199_v2 = vmax.f32 %v5802_v0, 0.0  ;;  %v3285_v36 = vmax.f32 %v3237_v22, 0.0  ;;  %v6200_v31 = vmax.f32 %v5809_v47, 0.0  ;;  %v2142_v0 = vpop.f32.mrb[57].mxu1  ;;  %v3034_v12 = vpop.f32.mrb[49].mxu0 }
 0x269   : > { %v3330_v37 = vmax.f32 %v2438_v35, %v3282_v48  ;;  %v3286_v39 = vmax.f32 %v3238_v33, 0.0  ;;  %v5959_v10 = vadd.f32 %v5586_v24, %v5912_v60  ;;  %v2348_v26 = vadd.f32 %v2140_v44, %v5833_v28  ;;  %v3036_v33 = vpop.f32.mrb[50].mxu0  ;;  %v5977_v44 = vpop.permute.xlu0 %1462 }
 0x26a   : > { %v2441_v62 = vmax.f32 %v6199_v2, %v2393_v49  ;;  %v3331_v7 = vmax.f32 %v2439_v3, %v3283_v19  ;;  %v2442_v34 = vmax.f32 %v6200_v31, %v2394_v51  ;;  %v3240_v45 = vadd.f32 %v3032_v4, %v5833_v28  ;;  %v2144_v49 = vpop.f32.mrb[58].mxu1  ;;  %v3038_v51 = vpop.f32.mrb[51].mxu0 }
 0x26b   : > { %v1558_v22 = vmax.f32 %v5938_v50, 0.0  ;;  %v2349_v35 = vadd.f32 %v2142_v0, %v5833_v28  ;;  %v3241_v48 = vadd.f32 %v3034_v12, %v5833_v28  ;;  %v2396_v24 = vmax.f32 %v2348_v26, 0.0  ;;  %v2146_v19 = vpop.f32.mrb[59].mxu1  ;;  %v5983_v0 = vpop.permute.xlu1 %1467 }
 0x26c   : > { %v3333_v21 = vmax.f32 %v2441_v62, %v3285_v36  ;;  %v3930_v27 = vpack.c.bf16 %v3331_v7, %v3330_v37  ;;  %v3334_v47 = vmax.f32 %v2442_v34, %v3286_v39  ;;  %v2351_v30 = vadd.f32 %v2144_v49, %v5868_v13 }
 0x26d   : > { %v3243_v3 = vadd.f32 %v3036_v33, %v5868_v13  ;;  %v1513_v2 = vadd.f32 %v5591_v11, %v5951_v1  ;;  %v2397_v37 = vmax.f32 %v2349_v35, 0.0  ;;  %v2352_v62 = vadd.f32 %v2146_v19, %v5868_v13 }
 0x26e   : > { %3533 = vst [vmem:[%s5855_s27 + $0x48] sm:$0xff] %v3930_v27  ;;  %v3932_v50 = vpack.c.bf16 %v3334_v47, %v3333_v21  ;;  %v1514_v36 = vadd.f32 %v5596_v55, %v5951_v1  ;;  %v2444_v7 = vmax.f32 %v1552_v5, %v2396_v24  ;;  %v3288_v31 = vmax.f32 %v3240_v45, 0.0 }
 0x26f   : > { %v2399_v34 = vmax.f32 %v2351_v30, 0.0  ;;  %v3244_v39 = vadd.f32 %v3038_v51, %v5868_v13  ;;  %v2445_v11 = vmax.f32 %v1553_v38, %v2397_v37  ;;  %v3289_v4 = vmax.f32 %v3241_v48, 0.0  ;;  %v2150_v35 = vpop.f32.mrb[60].mxu1  ;;  %v3042_v46 = vpop.f32.mrb[52].mxu0 }
 0x270   : > { %3535 = vst [vmem:[%s5855_s27 + $0x54] sm:$0xff] %v3932_v50  ;;  %v2400_v21 = vmax.f32 %v2352_v62, 0.0  ;;  %v1559_v26 = vmax.f32 %v5959_v10, 0.0  ;;  %v3336_v55 = vmax.f32 %v2444_v7, %v3288_v31  ;;  %v3291_v5 = vmax.f32 %v3243_v3, 0.0  ;;  %v2152_v33 = vpop.f32.mrb[61].mxu1  ;;  %v3044_v24 = vpop.f32.mrb[53].mxu0 }
 0x271   : > { %v2447_v18 = vmax.f32 %v1555_v9, %v2399_v34  ;;  %v1561_v45 = vmax.f32 %v1513_v2, 0.0  ;;  %v3337_v12 = vmax.f32 %v2445_v11, %v3289_v4  ;;  %v3292_v47 = vmax.f32 %v3244_v39, 0.0  ;;  %v2154_v3 = vpop.f32.mrb[62].mxu1  ;;  %v3046_v19 = vpop.f32.mrb[54].mxu0 }
 0x272   : > { %v2448_v27 = vmax.f32 %v1556_v25, %v2400_v21  ;;  %v1562_v38 = vmax.f32 %v1514_v36, 0.0  ;;  %v2354_v49 = vadd.f32 %v2150_v35, %v5912_v60  ;;  %v3246_v10 = vadd.f32 %v3042_v46, %v5912_v60  ;;  %v2156_v37 = vpop.f32.mrb[63].mxu1  ;;  %v3048_v62 = vpop.f32.mrb[55].mxu0 }
 0x273   : > { %v3339_v48 = vmax.f32 %v2447_v18, %v3291_v5  ;;  %v1516_v42 = vadd.f32 %v5611_v32, %v5977_v44  ;;  %v3934_v9 = vpack.c.bf16 %v3337_v12, %v3336_v55  ;;  %v2355_v58 = vadd.f32 %v2152_v33, %v5912_v60 }
 0x274   : > { %v3340_v30 = vmax.f32 %v2448_v27, %v3292_v47  ;;  %v3247_v25 = vadd.f32 %v3044_v24, %v5912_v60  ;;  %v2402_v51 = vmax.f32 %v2354_v49, 0.0  ;;  %v2357_v2 = vadd.f32 %v2154_v3, %v5951_v1  ;;  %v6005_v27 = vpop.permute.xlu0 %1472 }
 0x275   : > { %v3249_v50 = vadd.f32 %v3046_v19, %v5951_v1  ;;  %v1517_v36 = vadd.f32 %v5616_v57, %v5977_v44  ;;  %3537 = vst [vmem:[%s5855_s27 + $0x60] sm:$0xff] %v3934_v9  ;;  %v2403_v7 = vmax.f32 %v2355_v58, 0.0  ;;  %v2358_v31 = vadd.f32 %v2156_v37, %v5951_v1 }
 0x276   : > { %v3936_v32 = vpack.c.bf16 %v3340_v30, %v3339_v48  ;;  %v1519_v34 = vadd.f32 %v5622_v54, %v5983_v0  ;;  %v2450_v39 = vmax.f32 %v1558_v22, %v2402_v51  ;;  %v3294_v11 = vmax.f32 %v3246_v10, 0.0  ;;  %v6201_v10 = vld [vmem:[#allocation8_spill] sm:$0xff] }
 0x277   : > { %v2405_v4 = vmax.f32 %v2357_v2, 0.0  ;;  %v3250_v21 = vadd.f32 %v3048_v62, %v5951_v1  ;;  %v2451_v55 = vmax.f32 %v1559_v26, %v2403_v7  ;;  %v3295_v18 = vmax.f32 %v3247_v25, 0.0  ;;  %v2160_v54 = vpop.f32.mrb[64].mxu1  ;;  %v3052_v22 = vpop.f32.mrb[56].mxu0 }
 0x278   : > { %3539 = vst [vmem:[%s5855_s27 + $0x6c] sm:$0xff] %v3936_v32  ;;  %v2406_v5 = vmax.f32 %v2358_v31, 0.0  ;;  %v1564_v12 = vmax.f32 %v1516_v42, 0.0  ;;  %v3342_v57 = vmax.f32 %v2450_v39, %v3294_v11  ;;  %v3297_v35 = vmax.f32 %v3249_v50, 0.0  ;;  %v2162_v42 = vpop.f32.mrb[65].mxu1  ;;  %v3054_v58 = vpop.f32.mrb[57].mxu0 }
 0x279   : > { %v2453_v47 = vmax.f32 %v1561_v45, %v2405_v4  ;;  %v1565_v46 = vmax.f32 %v1517_v36, 0.0  ;;  %v3343_v48 = vmax.f32 %v2451_v55, %v3295_v18  ;;  %v3298_v33 = vmax.f32 %v3250_v21, 0.0  ;;  %v2164_v51 = vpop.f32.mrb[66].mxu1  ;;  %v3056_v2 = vpop.f32.mrb[58].mxu0  ;;  %v6202_v50 = vld [vmem:[#allocation10_spill] sm:$0xff] }
 0x27a   : > { %v2454_v49 = vmax.f32 %v1562_v38, %v2406_v5  ;;  %v1520_v24 = vadd.f32 %v6201_v10, %v5983_v0  ;;  %v2360_v26 = vadd.f32 %v2160_v54, %v5977_v44  ;;  %v3252_v30 = vadd.f32 %v3052_v22, %v5977_v44  ;;  %v2166_v7 = vpop.f32.mrb[67].mxu1  ;;  %v3058_v31 = vpop.f32.mrb[59].mxu0 }
 0x27b   : > { %v3345_v9 = vmax.f32 %v2453_v47, %v3297_v35  ;;  %v1567_v25 = vmax.f32 %v1519_v34, 0.0  ;;  %v3938_v45 = vpack.c.bf16 %v3343_v48, %v3342_v57  ;;  %v2361_v19 = vadd.f32 %v2162_v42, %v5977_v44  ;;  %v6203_v57 = vld [vmem:[#allocation12_spill] sm:$0xff]  ;;  %v6023_v54 = vpop.permute.xlu1 %1477 }
 0x27c   : > { %v3346_v3 = vmax.f32 %v2454_v49, %v3298_v33  ;;  %v3253_v38 = vadd.f32 %v3054_v58, %v5977_v44  ;;  %v1522_v37 = vadd.f32 %v6202_v50, %v6005_v27  ;;  %v2408_v62 = vmax.f32 %v2360_v26, 0.0 }
 0x27d   : > { %v2363_v36 = vadd.f32 %v2164_v51, %v5983_v0  ;;  %v3255_v32 = vadd.f32 %v3056_v2, %v5983_v0  ;;  %3541 = vst [vmem:[%s5855_s27 + $0x78] sm:$0xff] %v3938_v45  ;;  %v2409_v39 = vmax.f32 %v2361_v19, 0.0  ;;  %v1568_v11 = vmax.f32 %v1520_v24, 0.0 }
 0x27e   : > { %v3940_v34 = vpack.c.bf16 %v3346_v3, %v3345_v9  ;;  %v2364_v4 = vadd.f32 %v2166_v7, %v5983_v0  ;;  %v2456_v21 = vmax.f32 %v1564_v12, %v2408_v62  ;;  %v3300_v55 = vmax.f32 %v3252_v30, 0.0  ;;  %v6204_v9 = vld [vmem:[#allocation14_spill] sm:$0xff]  ;;  %v6205_v3 = vld [vmem:[#allocation16_spill] sm:$0xff] }
 0x27f   : > { %v2411_v18 = vmax.f32 %v2363_v36, 0.0  ;;  %v3256_v5 = vadd.f32 %v3058_v31, %v5983_v0  ;;  %v1523_v47 = vadd.f32 %v6203_v57, %v6005_v27  ;;  %v2457_v35 = vmax.f32 %v1565_v46, %v2409_v39  ;;  %v2170_v58 = vpop.f32.mrb[68].mxu1  ;;  %v3062_v45 = vpop.f32.mrb[60].mxu0 }
 0x280   : > { %3543 = vst [vmem:[%s5855_s27 + $0x84] sm:$0xff] %v3940_v34  ;;  %v3301_v48 = vmax.f32 %v3253_v38, 0.0  ;;  %v2412_v49 = vmax.f32 %v2364_v4, 0.0  ;;  %v1570_v33 = vmax.f32 %v1522_v37, 0.0  ;;  %v3348_v22 = vmax.f32 %v2456_v21, %v3300_v55  ;;  %v2172_v2 = vpop.f32.mrb[69].mxu1 }
 0x281   : > { %v2459_v10 = vmax.f32 %v1567_v25, %v2411_v18  ;;  %v3303_v24 = vmax.f32 %v3255_v32, 0.0  ;;  %v1525_v12 = vadd.f32 %v6204_v9, %v6023_v54  ;;  %v3304_v42 = vmax.f32 %v3256_v5, 0.0  ;;  %v3064_v25 = vpop.f32.mrb[61].mxu0  ;;  %v2174_v32 = vpop.f32.mrb[70].mxu1 }
 0x282   : > { %v3349_v26 = vmax.f32 %v2457_v35, %v3301_v48  ;;  %v2460_v30 = vmax.f32 %v1568_v11, %v2412_v49  ;;  %v1526_v19 = vadd.f32 %v6205_v3, %v6023_v54  ;;  %v2366_v38 = vadd.f32 %v2170_v58, %v6005_v27  ;;  %v3066_v7 = vpop.f32.mrb[62].mxu0  ;;  %v2176_v4 = vpop.f32.mrb[71].mxu1  ;;  %v6206_v58 = vld [vmem:[#allocation4_spill] sm:$0xff] }
 0x283   : > { %v3351_v46 = vmax.f32 %v2459_v10, %v3303_v24  ;;  %v3258_v51 = vadd.f32 %v3062_v45, %v6005_v27  ;;  %v2367_v62 = vadd.f32 %v2172_v2, %v6005_v27  ;;  %v3259_v36 = vadd.f32 %v3064_v25, %v6005_v27  ;;  %v3068_v21 = vpop.f32.mrb[63].mxu0 }
 0x284   : > { %v3942_v50 = vpack.c.bf16 %v3349_v26, %v3348_v22  ;;  %v3352_v37 = vmax.f32 %v2460_v30, %v3304_v42  ;;  %v1571_v31 = vmax.f32 %v1523_v47, 0.0  ;;  %v2414_v34 = vmax.f32 %v2366_v38, 0.0 }
 0x285   : > { %v2369_v39 = vadd.f32 %v2174_v32, %v6023_v54  ;;  %v3261_v11 = vadd.f32 %v3066_v7, %v6023_v54  ;;  %v1573_v55 = vmax.f32 %v1525_v12, 0.0  ;;  %v2415_v5 = vmax.f32 %v2367_v62, 0.0  ;;  %v6207_v7 = vld [vmem:[#allocation17_spill] sm:$0xff] }
 0x286   : > { %3545 = vst [vmem:[%s5855_s27 + $0x90] sm:$0xff] %v3942_v50  ;;  %v3944_v18 = vpack.c.bf16 %v3352_v37, %v3351_v46  ;;  %v2370_v57 = vadd.f32 %v2176_v4, %v6023_v54  ;;  %v2462_v35 = vmax.f32 %v1570_v33, %v2414_v34  ;;  %v3306_v48 = vmax.f32 %v3258_v51, 0.0  ;;  %v6208_v4 = vld [vmem:[#allocation5_spill] sm:$0xff] }
 0x287   : > { %v2417_v49 = vmax.f32 %v2369_v39, 0.0  ;;  %v3262_v22 = vadd.f32 %v3068_v21, %v6023_v54  ;;  %v1574_v47 = vmax.f32 %v1526_v19, 0.0  ;;  %v2463_v10 = vmax.f32 %v1571_v31, %v2415_v5  ;;  %v4188_v38 = vpop.f32.mrb[72].mxu1  ;;  %v4260_v51 = vpop.f32.mrb[64].mxu0 }
 0x288   : > { %3547 = vst [vmem:[%s5855_s27 + $0x9c] sm:$0xff] %v3944_v18  ;;  %v3307_v24 = vmax.f32 %v3259_v36, 0.0  ;;  %v2418_v9 = vmax.f32 %v2370_v57, 0.0  ;;  %v1551_v26 = vmax.f32 %v5930_v23, 0.0  ;;  %v3354_v30 = vmax.f32 %v2462_v35, %v3306_v48  ;;  %v2213_v37 = vpop.f32.mrb[73].mxu1  ;;  %v3105_v62 = vpop.f32.mrb[65].mxu0 }
 0x289   : > { %v2465_v42 = vmax.f32 %v1573_v55, %v2417_v49  ;;  %v3309_v12 = vmax.f32 %v3261_v11, 0.0  ;;  %v6042_v45 = vadd.f32 %v6206_v58, %v5912_v60  ;;  %v3310_v46 = vmax.f32 %v3262_v22, 0.0  ;;  %v4189_v39 = vpop.f32.mrb[74].mxu1  ;;  %v4261_v11 = vpop.f32.mrb[66].mxu0 }
 0x28a   : > { %v3355_v3 = vmax.f32 %v2463_v10, %v3307_v24  ;;  %v2466_v33 = vmax.f32 %v1574_v47, %v2418_v9  ;;  %v1545_v19 = vmax.f32 %v5949_v20, 0.0  ;;  %v2332_v25 = vadd.f32 %v4188_v38, %v5731_v40  ;;  %v2216_v5 = vpop.f32.mrb[75].mxu1  ;;  %v3108_v57 = vpop.f32.mrb[67].mxu0 }
 0x28b   : > { %v3357_v2 = vmax.f32 %v2465_v42, %v3309_v12  ;;  %v3224_v50 = vadd.f32 %v4260_v51, %v5731_v40  ;;  %v2326_v31 = vadd.f32 %v2213_v37, %v6207_v7  ;;  %v3218_v34 = vadd.f32 %v3105_v62, %v6207_v7  ;;  %v6210_v42 = vld [vmem:[#allocation6_spill] sm:$0xff] }
 0x28c   : > { %v3946_v36 = vpack.c.bf16 %v3355_v3, %v3354_v30  ;;  %v3358_v32 = vmax.f32 %v2466_v33, %v3310_v46  ;;  %v6051_v21 = vadd.f32 %v5833_v28, %v6208_v4  ;;  %v2380_v55 = vmax.f32 %v2332_v25, 0.0  ;;  %v6212_v46 = vld [vmem:[#allocation7_spill] sm:$0xff] }
 0x28d   : > { %v2335_v18 = vadd.f32 %v4189_v39, %v5735_v63  ;;  %v3227_v40 = vadd.f32 %v4261_v11, %v5735_v63  ;;  %v1560_v35 = vmax.f32 %v6042_v45, 0.0  ;;  %v2374_v49 = vmax.f32 %v2326_v31, 0.0  ;;  %v6217_v45 = vld [vmem:[#allocation15_spill] sm:$0xff] }
 0x28e   : > { %3549 = vst [vmem:[%s5855_s27 + $0xa8] sm:$0xff] %v3946_v36  ;;  %v3948_v48 = vpack.c.bf16 %v3358_v32, %v3357_v2  ;;  %v2329_v22 = vadd.f32 %v2216_v5, %v5733_v59  ;;  %v6209_v47 = vmax.f32 %v5817_v15, 0.0  ;;  %v3272_v24 = vmax.f32 %v3224_v50, 0.0 }
 0x28f   : > { %v2383_v9 = vmax.f32 %v2335_v18, 0.0  ;;  %v3221_v30 = vadd.f32 %v3108_v57, %v5733_v59  ;;  %v6063_v12 = vadd.f32 %v6210_v42, %v5951_v1  ;;  %v6211_v63 = vmax.f32 %v5831_v52, 0.0  ;;  %v4192_v52 = vpop.f32.mrb[76].mxu1  ;;  %v4264_v62 = vpop.f32.mrb[68].mxu0 }
 0x290   : > { %v2428_v10 = vmax.f32 %v6209_v47, %v2380_v55  ;;  %3551 = vst [vmem:[%s5855_s27 + $0xb4] sm:$0xff] %v3948_v48  ;;  %v3266_v3 = vmax.f32 %v3218_v34, 0.0  ;;  %v2377_v33 = vmax.f32 %v2329_v22, 0.0  ;;  %v6070_v38 = vadd.f32 %v5868_v13, %v6212_v46  ;;  %v2229_v34 = vpop.f32.mrb[77].mxu1 }
 0x291   : > { %v2422_v58 = vmax.f32 %v6211_v63, %v2374_v49  ;;  %v6213_v51 = vmax.f32 %v5841_v29, 0.0  ;;  %v3275_v25 = vmax.f32 %v3227_v40, 0.0  ;;  %v3269_v37 = vmax.f32 %v3221_v30, 0.0  ;;  %v3121_v29 = vpop.f32.mrb[69].mxu0 }
 0x292   : > { %v3320_v15 = vmax.f32 %v2428_v10, %v3272_v24  ;;  %v2425_v50 = vmax.f32 %v1533_v16, %v2377_v33  ;;  %v2344_v7 = vadd.f32 %v4192_v52, %v5757_v43  ;;  %v3236_v31 = vadd.f32 %v4264_v62, %v5757_v43  ;;  %v4193_v16 = vpop.f32.mrb[78].mxu1  ;;  %v4265_v55 = vpop.f32.mrb[70].mxu0  ;;  %v6214_v33 = vld [vmem:[#allocation9_spill] sm:$0xff] }
 0x293   : > { %v2431_v2 = vmax.f32 %v6213_v51, %v2383_v9  ;;  %v3314_v59 = vmax.f32 %v2422_v58, %v3266_v3  ;;  %v2338_v4 = vadd.f32 %v2229_v34, %v5737_v8  ;;  %v3230_v56 = vadd.f32 %v3121_v29, %v5737_v8  ;;  %v2232_v57 = vpop.f32.mrb[79].mxu1  ;;  %v3124_v48 = vpop.f32.mrb[71].mxu0 }
 0x294   : > { %v3923_v36 = vpack.c.bf16 %v3320_v15, %v3320_v15  ;;  %v3317_v11 = vmax.f32 %v2425_v50, %v3269_v37  ;;  %v1554_v18 = vmax.f32 %v6051_v21, 0.0  ;;  %v2392_v5 = vmax.f32 %v2344_v7, 0.0 }
 0x295   : > { %v3323_v32 = vmax.f32 %v2431_v2, %v3275_v25  ;;  %v3919_v39 = vpack.c.bf16 %v3314_v59, %v3314_v59  ;;  %v2347_v43 = vadd.f32 %v4193_v16, %v5771_v41  ;;  %v3284_v22 = vmax.f32 %v3236_v31, 0.0 }
 0x296   : > { %3526 = vst.msk [vmem:[%s5855_s27 + $0x20] sm:$0xf] %vm3521_vm2, %v3923_v36  ;;  %v3921_v49 = vpack.c.bf16 %v3317_v11, %v3317_v11  ;;  %v2386_v47 = vmax.f32 %v2338_v4, 0.0  ;;  %v3239_v8 = vadd.f32 %v4265_v55, %v5771_v41  ;;  %v2440_v21 = vmax.f32 %v1548_v6, %v2392_v5 }
 0x297   : > { %v3925_v40 = vpack.c.bf16 %v3323_v32, %v3323_v32  ;;  %3522 = vst.msk [vmem:[%s5855_s27 + $0x8] sm:$0xf] %vm3521_vm2, %v3919_v39  ;;  %v2395_v10 = vmax.f32 %v2347_v43, 0.0  ;;  %v2341_v24 = vadd.f32 %v2232_v57, %v5739_v14  ;;  %v3233_v9 = vadd.f32 %v3124_v48, %v5739_v14  ;;  %v6215_v14 = vld [vmem:[#allocation11_spill] sm:$0xff]  ;;  %v4196_v53 = vpop.f32.mrb[80].mxu1 }
 0x298   : > { %v1563_v30 = vmax.f32 %v6063_v12, 0.0  ;;  %v1557_v42 = vmax.f32 %v6070_v38, 0.0  ;;  %3524 = vst.msk [vmem:[%s5855_s27 + $0x14] sm:$0xf] %vm3521_vm2, %v3921_v49  ;;  %v2434_v63 = vmax.f32 %v1542_v61, %v2386_v47  ;;  %v3278_v41 = vmax.f32 %v3230_v56, 0.0  ;;  %v4268_v61 = vpop.f32.mrb[72].mxu0 }
 0x299   : > { %3528 = vst.msk [vmem:[%s5855_s27 + $0x2c] sm:$0xf] %vm3521_vm2, %v3925_v40  ;;  %v3332_v58 = vmax.f32 %v2440_v21, %v3284_v22  ;;  %v2443_v17 = vmax.f32 %v1551_v26, %v2395_v10  ;;  %v3287_v6 = vmax.f32 %v3239_v8, 0.0  ;;  %v2389_v3 = vmax.f32 %v2341_v24, 0.0  ;;  %v2245_v25 = vpop.f32.mrb[81].mxu1  ;;  %v3137_v59 = vpop.f32.mrb[73].mxu0 }
 0x29a   : > { %v6103_v46 = vadd.f32 %v6214_v33, %v6005_v27  ;;  %v6107_v12 = vadd.f32 %v5977_v44, %v6215_v14  ;;  %v3326_v38 = vmax.f32 %v2434_v63, %v3278_v41  ;;  %v3281_v15 = vmax.f32 %v3233_v9, 0.0  ;;  %v4197_v36 = vpop.f32.mrb[82].mxu1  ;;  %v4269_v32 = vpop.f32.mrb[74].mxu0  ;;  %v6216_v40 = vld [vmem:[#allocation13_spill] sm:$0xff] }
 0x29b   : > { %v3931_v51 = vpack.c.bf16 %v3332_v58, %v3332_v58  ;;  %v3335_v2 = vmax.f32 %v2443_v17, %v3287_v6  ;;  %v2437_v23 = vmax.f32 %v1545_v19, %v2389_v3  ;;  %v2356_v26 = vadd.f32 %v4196_v53, %v5912_v60  ;;  %v2248_v34 = vpop.f32.mrb[83].mxu1  ;;  %v3140_v29 = vpop.f32.mrb[75].mxu0 }
 0x29c   : > { %v3927_v50 = vpack.c.bf16 %v3326_v38, %v3326_v38  ;;  %v3248_v37 = vadd.f32 %v4268_v61, %v5912_v60  ;;  %v2350_v52 = vadd.f32 %v2245_v25, %v5833_v28  ;;  %v3242_v62 = vadd.f32 %v3137_v59, %v5833_v28 }
 0x29d   : > { %3534 = vst.msk [vmem:[%s5855_s27 + $0x50] sm:$0xf] %vm3521_vm2, %v3931_v51  ;;  %v3933_v7 = vpack.c.bf16 %v3335_v2, %v3335_v2  ;;  %v3329_v20 = vmax.f32 %v2437_v23, %v3281_v15  ;;  %v2404_v19 = vmax.f32 %v2356_v26, 0.0  ;;  %v2359_v31 = vadd.f32 %v4197_v36, %v5951_v1 }
 0x29e   : > { %v1572_v39 = vmax.f32 %v6103_v46, 0.0  ;;  %3530 = vst.msk [vmem:[%s5855_s27 + $0x38] sm:$0xf] %vm3521_vm2, %v3927_v50  ;;  %v3296_v60 = vmax.f32 %v3248_v37, 0.0  ;;  %v2398_v11 = vmax.f32 %v2350_v52, 0.0  ;;  %v3251_v28 = vadd.f32 %v4269_v32, %v5951_v1 }
 0x29f   : > { %3536 = vst.msk [vmem:[%s5855_s27 + $0x5c] sm:$0xf] %vm3521_vm2, %v3933_v7  ;;  %v3929_v4 = vpack.c.bf16 %v3329_v20, %v3329_v20  ;;  %v2452_v56 = vmax.f32 %v1560_v35, %v2404_v19  ;;  %v2407_v16 = vmax.f32 %v2359_v31, 0.0  ;;  %v2353_v55 = vadd.f32 %v2248_v34, %v5868_v13  ;;  %v4200_v24 = vpop.f32.mrb[84].mxu1  ;;  %v4272_v9 = vpop.f32.mrb[76].mxu0 }
 0x2a0   : > { %v1527_v5 = vadd.f32 %v6216_v40, %v6023_v54  ;;  %v2446_v43 = vmax.f32 %v1554_v18, %v2398_v11  ;;  %v3290_v57 = vmax.f32 %v3242_v62, 0.0  ;;  %v3245_v48 = vadd.f32 %v3140_v29, %v5868_v13  ;;  %v2261_v58 = vpop.f32.mrb[85].mxu1 }
 0x2a1   : > { %3532 = vst.msk [vmem:[%s5855_s27 + $0x44] sm:$0xf] %vm3521_vm2, %v3929_v4  ;;  %v3344_v49 = vmax.f32 %v2452_v56, %v3296_v60  ;;  %v2455_v1 = vmax.f32 %v1563_v30, %v2407_v16  ;;  %v3299_v22 = vmax.f32 %v3251_v28, 0.0  ;;  %v2401_v47 = vmax.f32 %v2353_v55, 0.0  ;;  %v3153_v30 = vpop.f32.mrb[77].mxu0  ;;  %v4201_v46 = vpop.f32.mrb[86].mxu1 }
 0x2a2   : > { %v1566_v8 = vmax.f32 %v6107_v12, 0.0  ;;  %v1521_v35 = vadd.f32 %v5983_v0, %v6217_v45  ;;  %v3338_v21 = vmax.f32 %v2446_v43, %v3290_v57  ;;  %v3293_v10 = vmax.f32 %v3245_v48, 0.0  ;;  %v4273_v14 = vpop.f32.mrb[78].mxu0  ;;  %v2264_v53 = vpop.f32.mrb[87].mxu1 }
 0x2a3   : > { %v3939_v18 = vpack.c.bf16 %v3344_v49, %v3344_v49  ;;  %v3347_v63 = vmax.f32 %v2455_v1, %v3299_v22  ;;  %v2449_v41 = vmax.f32 %v1557_v42, %v2401_v47  ;;  %v2368_v13 = vadd.f32 %v4200_v24, %v6005_v27  ;;  %v3156_v61 = vpop.f32.mrb[79].mxu0 }
 0x2a4   : > { %v3935_v17 = vpack.c.bf16 %v3338_v21, %v3338_v21  ;;  %v3260_v6 = vadd.f32 %v4272_v9, %v6005_v27  ;;  %v2362_v3 = vadd.f32 %v2261_v58, %v5977_v44  ;;  %v3254_v33 = vadd.f32 %v3153_v30, %v5977_v44 }
 0x2a5   : > { %3542 = vst.msk [vmem:[%s5855_s27 + $0x80] sm:$0xf] %vm3521_vm2, %v3939_v18  ;;  %v3941_v12 = vpack.c.bf16 %v3347_v63, %v3347_v63  ;;  %v3341_v38 = vmax.f32 %v2449_v41, %v3293_v10  ;;  %v2416_v42 = vmax.f32 %v2368_v13, 0.0  ;;  %v2371_v15 = vadd.f32 %v4201_v46, %v6023_v54 }
 0x2a6   : > { %v1575_v51 = vmax.f32 %v1527_v5, 0.0  ;;  %3538 = vst.msk [vmem:[%s5855_s27 + $0x68] sm:$0xf] %vm3521_vm2, %v3935_v17  ;;  %v3308_v27 = vmax.f32 %v3260_v6, 0.0  ;;  %v2410_v2 = vmax.f32 %v2362_v3, 0.0  ;;  %v3263_v23 = vadd.f32 %v4273_v14, %v6023_v54 }
 0x2a7   : > { %3544 = vst.msk [vmem:[%s5855_s27 + $0x8c] sm:$0xf] %vm3521_vm2, %v3941_v12  ;;  %v3937_v44 = vpack.c.bf16 %v3341_v38, %v3341_v38  ;;  %v2464_v26 = vmax.f32 %v1572_v39, %v2416_v42  ;;  %v2419_v25 = vmax.f32 %v2371_v15, 0.0  ;;  %v2365_v59 = vadd.f32 %v2264_v53, %v5983_v0 }
 0x2a8   : > { %v1569_v50 = vmax.f32 %v1521_v35, 0.0  ;;  %v2458_v37 = vmax.f32 %v1566_v8, %v2410_v2  ;;  %v3302_v52 = vmax.f32 %v3254_v33, 0.0  ;;  %v3257_v62 = vadd.f32 %v3156_v61, %v5983_v0 }
 0x2a9   : > { %3540 = vst.msk [vmem:[%s5855_s27 + $0x74] sm:$0xf] %vm3521_vm2, %v3937_v44  ;;  %v3356_v36 = vmax.f32 %v2464_v26, %v3308_v27  ;;  %v2467_v54 = vmax.f32 %v1575_v51, %v2419_v25  ;;  %v3311_v32 = vmax.f32 %v3263_v23, 0.0  ;;  %v2413_v7 = vmax.f32 %v2365_v59, 0.0 }
 0x2aa   : > { %v3350_v20 = vmax.f32 %v2458_v37, %v3302_v52  ;;  %v3305_v29 = vmax.f32 %v3257_v62, 0.0 }
 0x2ab   : > { %v3947_v19 = vpack.c.bf16 %v3356_v36, %v3356_v36  ;;  %v3359_v31 = vmax.f32 %v2467_v54, %v3311_v32  ;;  %v2461_v34 = vmax.f32 %v1569_v50, %v2413_v7 }
 0x2ac   : > { %v3943_v39 = vpack.c.bf16 %v3350_v20, %v3350_v20 }
 0x2ad   : > { %3550 = vst.msk [vmem:[%s5855_s27 + $0xb0] sm:$0xf] %vm3521_vm2, %v3947_v19  ;;  %v3949_v60 = vpack.c.bf16 %v3359_v31, %v3359_v31  ;;  %v3353_v11 = vmax.f32 %v2461_v34, %v3305_v29 }
 0x2ae   : > { %3546 = vst.msk [vmem:[%s5855_s27 + $0x98] sm:$0xf] %vm3521_vm2, %v3943_v39 }
 0x2af   : > { %3552 = vst.msk [vmem:[%s5855_s27 + $0xbc] sm:$0xf] %vm3521_vm2, %v3949_v60  ;;  %v3945_v0 = vpack.c.bf16 %v3353_v11, %v3353_v11 }
 0x2b1   : > { %3548 = vst.msk [vmem:[%s5855_s27 + $0xa4] sm:$0xf] %vm3521_vm2, %v3945_v0 }
 0x2b2 PF: > { %s13_s12 = sadd.s32 1, %s4702_s12  }
 0x2b3   : > { %p10_p4 = scmp.ge.s32.totalorder %s13_s12, 4  }
 0x2b5   :  { %12 = sbr.rel (!%p10_p4) target bundleno = 1 (0x1), region = 64 }

// kernel: char_cnn_forward.4
= control target key start
LH: loop header
LB: loop body
LE: loop exit
PB: predicated region body
PF: predicated region fallthrough
CT: control target
= control target key end

     0   :  { %s13369_s0 = inlined_call_operand.vmem [shape: bf16[2,43520], index: 0, kind: input, shape index: {}]   ;;  %s13370_s1 = inlined_call_operand.hbm [shape: bf16[43520,1024], index: 1, kind: input, shape index: {}]   ;;  %s13371_s2 = inlined_call_operand.hbm [shape: f32[1,1024], index: 2, kind: input, shape index: {}]   ;;  %s13372_s3 = inlined_call_operand.vmem [shape: f32[2,1024], index: 3, kind: output, shape index: {}]  }
   0x1   :  { %13378 = sst [smem:[#allocation9_spill]] %s13370_s1 }
   0x2   :  { %8 = vsyncpa [#allocation3], 0 }
   0x3   :  { %10 = vsyncpa [#allocation3 + $0x1], 0 }
   0x4   :  { %11 = vsyncpa [#allocation5], 0 }
   0x5   :  { %13 = vsyncpa [#allocation5 + $0x1], 0  ;;  %s11808_s12 = smov 0   ;;  %s11810_s13 = smov 0  }
   0x6   :  { %s11812_s14 = smov 0   ;;  %s11814_s15 = smov 0  }
   0x7   :  { %s11816_s16 = smov 0   ;;  %s11818_s17 = smov 0  }
   0x8   :  { %s11820_s18 = smov 0   ;;  %s11822_s19 = smov 0  }
   0x9   :  { %s11824_s20 = smov 0   ;;  %s11826_s21 = smov 0  }
   0xa   :  { %s11828_s22 = smov 0  }
   0xb LB: > { %s28_s23 = sadd.s32 1, %s11770_s20  ;;  %p73_p1 = scmp.ne.s32.totalorder %s11758_s17, %s11754_s16  ;;  %s11778_s22 = sphi %s11828_s22, %s19_s22   ;;  %s11774_s21 = sphi %s11826_s21, %s13406_s21   ;;  %s11770_s20 = sphi %s11824_s20, %s13405_s20   ;;  %s11766_s19 = sphi %s11822_s19, %s13404_s19   ;;  %s11762_s18 = sphi %s11820_s18, %s13403_s18   ;;  %s11758_s17 = sphi %s11818_s17, %s13402_s17   ;;  %s11754_s16 = sphi %s11816_s16, %s13401_s16   ;;  %s11750_s15 = sphi %s11814_s15, %s13400_s15   ;;  %s11746_s14 = sphi %s11812_s14, %s13399_s14   ;;  %s11742_s13 = sphi %s11810_s13, %s13398_s13   ;;  %s11738_s12 = sphi %s11808_s12, %s13397_s12  }
   0xc   : > { %p11865_p0 = scmp.ge.s32.totalorder %s28_s23, 10  ;;  %p13374_p2 = scmp.eq.s32.totalorder %s11778_s22, 0 }
   0xd   : > { %p13373_p4 = scmp.lt.s32.totalorder %s11778_s22, 20  ;;  %s163_s27 = sand.u32 1, %s11758_s17  }
   0xe   : > { %s13408_s23 = smov (%p11865_p0, %s28_s23), 0  ;;  %p75_p3 = por %p13374_p2, %p73_p1 }
   0xf   : > { %s9878_s28 = smul.u32 8704, %s163_s27  ;;  %s8645_s29 = sshll.u32 %s11774_s21, 2 }
  0x10   : > { %s9748_s30 = smul.u32 4352, %s11770_s20  ;;  %p11886_p5 = pnand %p13373_p4, %p75_p3 }
  0x11   : > { %s167_s6 = scalar_lea.vmem [#allocation2], %s9878_s28  ;;  %s13381_s1 = sld [smem:[#allocation9_spill]] }
  0x12   : > { %s174_s5 = sadd.s32 %s9748_s30, %s8645_s29  ;;  %s177_s7 = sshll.u32 %s167_s6, 4  ;;  %s11890_s7 = int_to_ptr.vmem [resolvable:$true] %s177_s7 }
  0x13   : > { %s8647_s8 = sshll.u32 %s174_s5, 6  ;;  %s11898_s24 = scalar_lea.sflag [#allocation3], %s163_s27 }
  0x14   : > { %p11626_p8 = pneg %p11886_p5 }
  0x17   : > { %s11895_s11 = scalar_lea.hbm %s13381_s1, %s8647_s8  ;;  %s11629_s30 = scalar_lea.hbm %s13381_s1, 2785280 }
  0x18   : > { %s11624_s26 = scalar_lea.hbm %s11895_s11, 139264  ;;  %p11630_p11 = scmp.lt.u32.totalorder %s11895_s11, %s13381_s1 }
  0x19   : > { %p11625_p7 = scmp.ne.s32.totalorder %s11895_s11, %s11624_s26  ;;  %p11631_p12 = scmp.lt.u32.totalorder %s11629_s30, %s11624_s26 }
  0x1a   : > { %p11633_p1 = scmp.lt.u32.totalorder %s11624_s26, %s11895_s11 }
  0x1b   : > { %p11627_p9 = pnand %p11626_p8, %p11625_p7  ;;  %p11632_p13 = por %p11631_p12, %p11630_p11 }
  0x1d   : > { %p11628_p10 = pneg %p11627_p9  ;;  %p11634_p3 = por %p11633_p1, %p11632_p13 }
  0x1f   : > { %p11635_p4 = pnand %p11634_p3, %p11628_p10 }
  0x21   : > { %11638 = shalt.err (!%p11635_p4)
}
  0x22   : > { %s11639_s27 = scalar_lea.vmem %s11890_s7, 139264  ;;  %s11780_s8 = smov [#allocation2]  }
  0x23   : > { %p11640_p7 = scmp.ne.s32.totalorder %s11890_s7, %s11639_s27  ;;  %s11644_s9 = sshll.u32 %s11780_s8, 4  ;;  %s11645_s9 = int_to_ptr.vmem [resolvable:$false] %s11644_s9 }
  0x24   : > { %s11646_s10 = scalar_lea.vmem %s11645_s9, 278528  ;;  %p11647_p6 = scmp.lt.s32.totalorder %s11890_s7, %s11645_s9 }
  0x25   : > { %p11642_p9 = pnand %p11640_p7, %p11626_p8  ;;  %p11648_p11 = scmp.lt.s32.totalorder %s11646_s10, %s11639_s27 }
  0x27   : > { %p11643_p2 = pneg %p11642_p9  ;;  %p11649_p12 = por %p11648_p11, %p11647_p6 }
  0x29   : > { %p11650_p13 = pnand %p11649_p12, %p11643_p2 }
  0x2b   : > { %11653 = shalt.err (!%p11650_p13)
}
  0x2c   : > { %s11781_s26 = smov 512   ;;  %s11782_s28 = smov 256  }
  0x2d   : > { %s11783_s29 = smov 16   ;;  %p204_p2 = scmp.lt.s32.totalorder %s11778_s22, 21 }
  0x2e   : > { %9887 = dma.hbm_to_vmem [thread:$0]  (!%p11886_p5), %s11895_s11, 139264, %s11890_s7, %s11898_s24, %s11781_s26, %s11782_s28, %s11783_s29  }
  0x2f   : > { %p13382_p4 = scmp.ge.s32.totalorder %s11778_s22, 1  ;;  %s8641_s5 = sadd.s32 4294967295, %s11778_s22  }
  0x30   : > { %s31_s6 = sadd.s32 1, %s11774_s21  ;;  %p79_p8 = scmp.ne.s32.totalorder %s11754_s16, %s11750_s15 }
  0x31   : > { %p11929_p6 = pnand %p13382_p4, %p204_p2  ;;  %s13410_s6 = smov (!%p11865_p0, %s31_s6), %s11774_s21 }
  0x32   : > { %p11940_p10 = scmp.eq.s32.totalorder %s8641_s5, 0  ;;  %p33_p5 = scmp.ge.s32.totalorder %s13410_s6, 2 }
  0x33   : > { %s92_s24 = sadd.s32 1, %s11746_s14  ;;  %p99_p3 = scmp.ne.s32.totalorder %s11746_s14, %s11742_s13 }
  0x34   : > { %p11947_p1 = por %p11940_p10, %p79_p8  ;;  %s13412_s6 = smov (%p33_p5, %s13410_s6), 0 }
  0x35   : > { %13386 = sst [smem:[#allocation8_spill]] %s13412_s6  ;;  %p13387_p0 = scmp.eq.s32.totalorder %s11778_s22, 0 }
  0x36   : > { %s13385_s7 = scalar_select %p11947_p1, 1, 0 }
  0x37   : > { %p11957_p7 = por %p99_p3, %p13387_p0  ;;  %p105_p9 = scmp.ne.s32.totalorder %s11742_s13, %s11738_s12 }
  0x38   : > { %s62_s25 = ssub.s32 %s11774_s21, %s13412_s6  ;;  %s187_s11 = sand.u32 1, %s11746_s14  }
  0x39   : > { %s13389_s27 = ssub.s32 %s11770_s20, %s13408_s23  ;;  %p90_p11 = scmp.eq.s32.totalorder %s62_s25, 0 }
  0x3a   : > { %s63_s8 = sor.u32 %s62_s25, %s13389_s27  ;;  %p11971_p13 = por %p105_p9, %p11940_p10 }
  0x3b   : > { %p64_p12 = scmp.eq.s32.totalorder %s63_s8, 0  ;;  %s13391_s26 = sadd.s32 1, %s11758_s17 }
  0x3c   : > { %s13390_s9 = scalar_select %p11971_p13, 1, 0 }
  0x3d   : > { %s11976_s10 = scalar_select %p90_p11, %s11746_s14, %s92_s24  }
  0x3e   : > { %s11981_s28 = scalar_select %p64_p12, %s11758_s17, %s13391_s26  }
  0x3f   : > { %s8648_s29 = sshll.u32 %s187_s11, 2  ;;  %s9749_s5 = sshll.u32 %s11774_s21, 6 }
  0x40   : > { %s11987_s6 = scalar_lea.hbm %s13371_s2, %s9749_s5  ;;  %s191_s4 = scalar_lea.vmem [#allocation4], %s8648_s29 }
  0x41   : > { %s199_s25 = sshll.u32 %s191_s4, 4  ;;  %p13392_p2 = scmp.lt.s32.totalorder %s11778_s22, 20  ;;  %s11989_s25 = int_to_ptr.vmem [resolvable:$true] %s199_s25 }
  0x42   : > { %s188_s27 = scalar_lea.sflag [#allocation5], %s187_s11  ;;  %s11654_s1 = scalar_lea.hbm %s11987_s6, 64 }
  0x43   : > { %p11995_p4 = pnand %p13392_p2, %p11957_p7  ;;  %p11655_p8 = scmp.ne.s32.totalorder %s11987_s6, %s11654_s1 }
  0x44   : > { %s11659_s15 = scalar_lea.hbm %s13371_s2, 128  ;;  %p11660_p0 = scmp.lt.u32.totalorder %s11987_s6, %s13371_s2 }
  0x45   : > { %p11656_p10 = pneg %p11995_p4  ;;  %p11661_p7 = scmp.lt.u32.totalorder %s11659_s15, %s11654_s1 }
  0x46   : > { %p11663_p11 = scmp.lt.u32.totalorder %s11654_s1, %s11987_s6 }
  0x47   : > { %p11657_p5 = pnand %p11656_p10, %p11655_p8  ;;  %p11662_p9 = por %p11661_p7, %p11660_p0 }
  0x49   : > { %p11658_p3 = pneg %p11657_p5  ;;  %p11664_p12 = por %p11663_p11, %p11662_p9 }
  0x4b   : > { %p11665_p2 = pnand %p11664_p12, %p11658_p3 }
  0x4d   : > { %11668 = shalt.err (!%p11665_p2)
}
  0x4e   : > { %s11669_s11 = scalar_lea.vmem %s11989_s25, 64  ;;  %s11784_s12 = smov [#allocation4]  }
  0x4f   : > { %p11670_p8 = scmp.ne.s32.totalorder %s11989_s25, %s11669_s11  ;;  %s11674_s4 = sshll.u32 %s11784_s12, 4  ;;  %s11675_s4 = int_to_ptr.vmem [resolvable:$false] %s11674_s4 }
  0x50   : > { %s11676_s8 = scalar_lea.vmem %s11675_s4, 128  ;;  %p11677_p1 = scmp.lt.s32.totalorder %s11989_s25, %s11675_s4 }
  0x51   : > { %p11672_p5 = pnand %p11670_p8, %p11656_p10  ;;  %p11678_p0 = scmp.lt.s32.totalorder %s11676_s8, %s11669_s11 }
  0x53   : > { %p11673_p13 = pneg %p11672_p5  ;;  %p11679_p7 = por %p11678_p0, %p11677_p1 }
  0x55   : > { %p11680_p9 = pnand %p11679_p7, %p11673_p13 }
  0x57   : > { %11683 = shalt.err (!%p11680_p9)
}
  0x58   : > { %9890 = dma.hbm_to_vmem [thread:$0]  (!%p11995_p4), %s11987_s6, 64, %s11989_s25, %s188_s27  }
  0x59   : > { %208 = sbr.rel (%p11929_p6) target bundleno = 1434 (0x59a), region = 32  ;;  %s210_s1 = sand.u32 (!%p11929_p6), 1, %s11754_s16  }
  0x5a   : > { %s9879_s26 = smul.u32 (!%p11929_p6), 8704, %s210_s1  ;;  %s211_s15 = scalar_lea.sflag (!%p11929_p6), [#allocation3], %s210_s1 }
  0x5b   : > { %p13394_p10 = scmp.ne.s32.totalorder (!%p11929_p6), %s13385_s7, 0 }
  0x5c   : > { %s12027_s29 = scalar_lea.vmem (!%p11929_p6), [#allocation2], %s9879_s26 }
  0x60   : > { %11729 = dma.done.wait (%p13394_p10), %s211_s15, 139264  }
  0x61   : > { %11731 = vsyncadd (%p13394_p10), %s211_s15, 4294828032  ;;  %s219_s24 = sand.u32 1, %s11742_s13   ;;  %p13395_p6 = scmp.ne.s32.totalorder %s13390_s9, 0 }
  0x62   : > { %s12034_s5 = sshll.u32 %s219_s24, 2  ;;  %s220_s30 = scalar_lea.sflag [#allocation5], %s219_s24 }
  0x63   : > { %s223_s6 = scalar_lea.vmem [#allocation4], %s12034_s5 }
  0x64   : > { %11733 = dma.done.wait (%p13395_p6), %s220_s30, 64  }
  0x65   : > { %11735 = vsyncadd (%p13395_p6), %s220_s30, 4294967232  ;;  %s255_s25 = smul.u32 34, %s11762_s18  ;;  %s8653_s27 = sshll.u32 %s11766_s19, 2 }
  0x66   : > { %p264_p1 = scmp.lt.s32.totalorder %s8653_s27, 7  ;;  %p8655_p4 = scmp.ne.s32.totalorder %s11762_s18, 0 }
  0x67   : > { %p256_p13 = scmp.lt.s32.totalorder %s255_s25, 339  ;;  %v11785_v0 = vmov (!%p8655_p4), 0.0  }
  0x68   : > { %s13414_s27 = smov (!%p264_p1, %s8653_s27), 7  ;;  %272 = sbr.rel (%p8655_p4) target bundleno = 111 (0x6f), region = 44 }
  0x69   : > { %s13416_s25 = smov (!%p256_p13, %s255_s25), 339  ;;  %s8654_s7 = sshll.u32 %s13414_s27, 1 }
  0x6a   : > { %s12046_s4 = scalar_lea.vmem %s13369_s0, %s13416_s25  ;;  %s12051_s26 = scalar_lea.vmem %s13372_s3, %s8654_s7 }
  0x6b   : > { %273 = vst [vmem:[%s12051_s26] sm:$0xff] (!%p8655_p4), %v11785_v0 }
  0x6f PF: > { %v9986_v1 = vld [vmem:[%s12027_s29 + $0x4] ss:$16 sps:$4 sm:$0xff]   ;;  %v9988_v2 = vld [vmem:[%s12027_s29 + $0xc] ss:$16 sps:$4 sm:$0xff]   ;;  %v9990_v3 = vld [vmem:[%s12027_s29] ss:$16 sps:$4 sm:$0xff]   ;;  %v1377_v39 = vlaneseq }
  0x70   : > { %7065 = vmatprep.subr.bf16.mxu0 %v9986_v1  ;;  %v9991_v4 = vld [vmem:[%s12027_s29 + $0x8] ss:$16 sps:$4 sm:$0xff]   ;;  %7762 = vmatprep.subr.bf16.mxu1 %v9988_v2  ;;  %v9992_v5 = vld [vmem:[%s12027_s29 + $0x24] ss:$16 sps:$4 sm:$0xff]   ;;  %v9994_v6 = vld [vmem:[%s12027_s29 + $0x2c] ss:$16 sps:$4 sm:$0xff]  }
  0x71   : > { %7066 = vmatpush1.bf16.msra.mxu0 %v9990_v3  ;;  %7763 = vmatpush1.bf16.msra.mxu1 %v9991_v4  ;;  %v9996_v7 = vld [vmem:[%s12027_s29 + $0x20] ss:$16 sps:$4 sm:$0xff]   ;;  %v9997_v8 = vld [vmem:[%s12027_s29 + $0x28] ss:$16 sps:$4 sm:$0xff]   ;;  %v9998_v9 = vld [vmem:[%s12027_s29 + $0x44] ss:$16 sps:$4 sm:$0xff]  }
  0x72   : > { %7067 = vmatprep.subr.bf16.mxu0 %v9992_v5  ;;  %7764 = vmatprep.subr.bf16.mxu1 %v9994_v6  ;;  %v10000_v10 = vld [vmem:[%s12027_s29 + $0x4c] ss:$16 sps:$4 sm:$0xff]   ;;  %v10002_v11 = vld [vmem:[%s12027_s29 + $0x40] ss:$16 sps:$4 sm:$0xff]   ;;  %v10003_v12 = vld [vmem:[%s12027_s29 + $0x48] ss:$16 sps:$4 sm:$0xff]  }
  0x73   : > { %v10004_v13 = vld [vmem:[%s12027_s29 + $0x64] ss:$16 sps:$4 sm:$0xff]   ;;  %v10006_v14 = vld [vmem:[%s12027_s29 + $0x6c] ss:$16 sps:$4 sm:$0xff]   ;;  %v10008_v15 = vld [vmem:[%s12027_s29 + $0x60] ss:$16 sps:$4 sm:$0xff]  }
  0x74   : > { %v10009_v16 = vld [vmem:[%s12027_s29 + $0x68] ss:$16 sps:$4 sm:$0xff]   ;;  %v10010_v17 = vld [vmem:[%s12027_s29 + $0x84] ss:$16 sps:$4 sm:$0xff]   ;;  %v10012_v18 = vld [vmem:[%s12027_s29 + $0x8c] ss:$16 sps:$4 sm:$0xff]  }
  0x75   : > { %7068 = vmatpush1.bf16.msra.mxu0 %v9996_v7  ;;  %7765 = vmatpush1.bf16.msra.mxu1 %v9997_v8  ;;  %v10014_v19 = vld [vmem:[%s12027_s29 + $0x80] ss:$16 sps:$4 sm:$0xff]   ;;  %v10015_v20 = vld [vmem:[%s12027_s29 + $0x88] ss:$16 sps:$4 sm:$0xff]   ;;  %v10016_v21 = vld [vmem:[%s12027_s29 + $0xa4] ss:$16 sps:$4 sm:$0xff]  }
  0x76   : > { %7069 = vmatprep.subr.bf16.mxu0 %v9998_v9  ;;  %7766 = vmatprep.subr.bf16.mxu1 %v10000_v10  ;;  %v10018_v22 = vld [vmem:[%s12027_s29 + $0xac] ss:$16 sps:$4 sm:$0xff]   ;;  %v10020_v23 = vld [vmem:[%s12027_s29 + $0xa0] ss:$16 sps:$4 sm:$0xff]   ;;  %v10021_v24 = vld [vmem:[%s12027_s29 + $0xa8] ss:$16 sps:$4 sm:$0xff]  }
  0x77   : > { %v10022_v25 = vld [vmem:[%s12027_s29 + $0xc4] ss:$16 sps:$4 sm:$0xff]   ;;  %v10024_v26 = vld [vmem:[%s12027_s29 + $0xcc] ss:$16 sps:$4 sm:$0xff]   ;;  %v10026_v27 = vld [vmem:[%s12027_s29 + $0xc0] ss:$16 sps:$4 sm:$0xff]  }
  0x78   : > { %v10027_v28 = vld [vmem:[%s12027_s29 + $0xc8] ss:$16 sps:$4 sm:$0xff]   ;;  %v10028_v29 = vld [vmem:[%s12027_s29 + $0xe4] ss:$16 sps:$4 sm:$0xff]   ;;  %v10030_v30 = vld [vmem:[%s12027_s29 + $0xec] ss:$16 sps:$4 sm:$0xff]  }
  0x79   : > { %7070 = vmatpush1.bf16.msra.mxu0 %v10002_v11  ;;  %7767 = vmatpush1.bf16.msra.mxu1 %v10003_v12  ;;  %v10032_v31 = vld [vmem:[%s12027_s29 + $0xe0] ss:$16 sps:$4 sm:$0xff]   ;;  %v10033_v32 = vld [vmem:[%s12027_s29 + $0xe8] ss:$16 sps:$4 sm:$0xff]   ;;  %v10034_v33 = vld [vmem:[%s12027_s29 + $0x104] ss:$16 sps:$4 sm:$0xff]  }
  0x7a   : > { %7071 = vmatprep.subr.bf16.mxu0 %v10004_v13  ;;  %7768 = vmatprep.subr.bf16.mxu1 %v10006_v14  ;;  %v10036_v34 = vld [vmem:[%s12027_s29 + $0x10c] ss:$16 sps:$4 sm:$0xff]   ;;  %v10038_v35 = vld [vmem:[%s12027_s29 + $0x100] ss:$16 sps:$4 sm:$0xff]   ;;  %v10039_v36 = vld [vmem:[%s12027_s29 + $0x108] ss:$16 sps:$4 sm:$0xff]  }
  0x7b   : > { %v11786_v37 = vmov 1966171168   ;;  %v10040_v40 = vld [vmem:[%s12027_s29 + $0x124] ss:$16 sps:$4 sm:$0xff]   ;;  %v10042_v41 = vld [vmem:[%s12027_s29 + $0x12c] ss:$16 sps:$4 sm:$0xff]  }
  0x7c   : > { %v1375_v38 = vunpack.c.l.s4 %v11786_v37  ;;  %v10044_v42 = vld [vmem:[%s12027_s29 + $0x120] ss:$16 sps:$4 sm:$0xff]   ;;  %v12094_v44 = vshrl.u32 %v1377_v39, 7  ;;  %v10045_v45 = vld [vmem:[%s12027_s29 + $0x128] ss:$16 sps:$4 sm:$0xff]   ;;  %p9745_p3 = scmp.ne.s32.totalorder %s11762_s18, 9 }
  0x7d   : > { %7072 = vmatpush1.bf16.msra.mxu0 %v10008_v15  ;;  %7769 = vmatpush1.bf16.msra.mxu1 %v10009_v16  ;;  %v10046_v46 = vld [vmem:[%s12027_s29 + $0x144] ss:$16 sps:$4 sm:$0xff]   ;;  %v10048_v47 = vld [vmem:[%s12027_s29 + $0x14c] ss:$16 sps:$4 sm:$0xff]   ;;  %v10050_v48 = vld [vmem:[%s12027_s29 + $0x140] ss:$16 sps:$4 sm:$0xff]  }
  0x7e   : > { %7073 = vmatprep.subr.bf16.mxu0 %v10010_v17  ;;  %7770 = vmatprep.subr.bf16.mxu1 %v10012_v18  ;;  %v1376_v43 = vunpack.c.0.s8 %v1375_v38  ;;  %v10051_v49 = vld [vmem:[%s12027_s29 + $0x148] ss:$16 sps:$4 sm:$0xff]   ;;  %v10052_v51 = vld [vmem:[%s12027_s29 + $0x164] ss:$16 sps:$4 sm:$0xff]   ;;  %v10054_v52 = vld [vmem:[%s12027_s29 + $0x16c] ss:$16 sps:$4 sm:$0xff]  }
  0x7f   : > { %v12107_v53 = vld [vmem:[%s12046_s4] sm:$0xff]  ;;  %v10057_v56 = vld [vmem:[%s12027_s29 + $0x168] ss:$16 sps:$4 sm:$0xff]   ;;  %v10060_v58 = vld [vmem:[%s12027_s29 + $0x18c] ss:$16 sps:$4 sm:$0xff]  }
  0x80   : > { %v12102_v50 = vsub.s32 %v1376_v43, %v12094_v44  ;;  %v10056_v54 = vld [vmem:[%s12027_s29 + $0x160] ss:$16 sps:$4 sm:$0xff]   ;;  %v10058_v57 = vld [vmem:[%s12027_s29 + $0x184] ss:$16 sps:$4 sm:$0xff]   ;;  %v10063_v62 = vld [vmem:[%s12027_s29 + $0x188] ss:$16 sps:$4 sm:$0xff]  }
  0x81   : > { %7074 = vmatpush1.bf16.msra.mxu0 %v10014_v19  ;;  %7771 = vmatpush1.bf16.msra.mxu1 %v10015_v20  ;;  %v10062_v60 = vld [vmem:[%s12027_s29 + $0x180] ss:$16 sps:$4 sm:$0xff]   ;;  %v10064_v63 = vld [vmem:[%s12027_s29 + $0x1a4] ss:$16 sps:$4 sm:$0xff]   ;;  %v10066_v0 = vld [vmem:[%s12027_s29 + $0x1ac] ss:$16 sps:$4 sm:$0xff]  }
  0x82   : > { %7075 = vmatprep.subr.bf16.mxu0 %v10016_v21  ;;  %7772 = vmatprep.subr.bf16.mxu1 %v10018_v22  ;;  %v1380_v55 = vrot.slane %v12107_v53, %v12102_v50  ;;  %v10068_v1 = vld [vmem:[%s12027_s29 + $0x1a0] ss:$16 sps:$4 sm:$0xff]   ;;  %v10069_v2 = vld [vmem:[%s12027_s29 + $0x1a8] ss:$16 sps:$4 sm:$0xff]   ;;  %v10070_v3 = vld [vmem:[%s12027_s29 + $0x1c4] ss:$16 sps:$4 sm:$0xff]  }
  0x83   : > { %v10072_v4 = vld [vmem:[%s12027_s29 + $0x1cc] ss:$16 sps:$4 sm:$0xff]   ;;  %v10074_v5 = vld [vmem:[%s12027_s29 + $0x1c0] ss:$16 sps:$4 sm:$0xff]   ;;  %v10075_v6 = vld [vmem:[%s12027_s29 + $0x1c8] ss:$16 sps:$4 sm:$0xff]  }
  0x84   : > { %v1388_v59 = vcombine.high %v1380_v55, %v1380_v55  ;;  %v10076_v7 = vld [vmem:[%s12027_s29 + $0x1e4] ss:$16 sps:$4 sm:$0xff]   ;;  %v10078_v8 = vld [vmem:[%s12027_s29 + $0x1ec] ss:$16 sps:$4 sm:$0xff]   ;;  %v10080_v9 = vld [vmem:[%s12027_s29 + $0x1e0] ss:$16 sps:$4 sm:$0xff]   ;;  %v12134_v14 = vrot.slane %v1380_v55, %v12102_v50 }
  0x85   : > { %7076 = vmatpush1.bf16.msra.mxu0 %v10020_v23  ;;  %7773 = vmatpush1.bf16.msra.mxu1 %v10021_v24  ;;  %v10081_v10 = vld [vmem:[%s12027_s29 + $0x1e8] ss:$16 sps:$4 sm:$0xff]   ;;  %v10084_v11 = vld [vmem:[%s12027_s29 + $0x204] ss:$16 sps:$4 sm:$0xff]   ;;  %v10087_v12 = vld [vmem:[%s12027_s29 + $0x20c] ss:$16 sps:$4 sm:$0xff]  }
  0x86   : > { %7077 = vmatprep.subr.bf16.mxu0 %v10022_v25  ;;  %7774 = vmatprep.subr.bf16.mxu1 %v10024_v26  ;;  %v1410_v61 = vrot.slane %v1388_v59, %v12102_v50  ;;  %v10082_v13 = vld [vmem:[%s12027_s29 + $0x200] ss:$16 sps:$4 sm:$0xff]   ;;  %v10085_v15 = vld [vmem:[%s12027_s29 + $0x208] ss:$16 sps:$4 sm:$0xff]   ;;  %v10090_v16 = vld [vmem:[%s12027_s29 + $0x224] ss:$16 sps:$4 sm:$0xff]  }
  0x87   : > { %v10093_v17 = vld [vmem:[%s12027_s29 + $0x22c] ss:$16 sps:$4 sm:$0xff]   ;;  %v10088_v19 = vld [vmem:[%s12027_s29 + $0x220] ss:$16 sps:$4 sm:$0xff]   ;;  %v10091_v20 = vld [vmem:[%s12027_s29 + $0x228] ss:$16 sps:$4 sm:$0xff]  }
  0x88   : > { %7097 = vmatprep.mubr.bf16.mxu0 %v1410_v61  ;;  %7794 = vmatprep.mubr.bf16.mxu1 %v1410_v61  ;;  %v1420_v18 = vcombine.high %v1410_v61, %v1410_v61  ;;  %v10096_v21 = vld [vmem:[%s12027_s29 + $0x244] ss:$16 sps:$4 sm:$0xff]   ;;  %v10099_v22 = vld [vmem:[%s12027_s29 + $0x24c] ss:$16 sps:$4 sm:$0xff]   ;;  %v10094_v23 = vld [vmem:[%s12027_s29 + $0x240] ss:$16 sps:$4 sm:$0xff]  }
  0x89   : > { %7078 = vmatpush1.bf16.msra.mxu0 %v10026_v27  ;;  %7775 = vmatpush1.bf16.msra.mxu1 %v10027_v28  ;;  %v10097_v24 = vld [vmem:[%s12027_s29 + $0x248] ss:$16 sps:$4 sm:$0xff]   ;;  %v10102_v25 = vld [vmem:[%s12027_s29 + $0x264] ss:$16 sps:$4 sm:$0xff]   ;;  %v10105_v26 = vld [vmem:[%s12027_s29 + $0x26c] ss:$16 sps:$4 sm:$0xff]  }
  0x8a   : > { %7079 = vmatprep.subr.bf16.mxu0 %v10028_v29  ;;  %7776 = vmatprep.subr.bf16.mxu1 %v10030_v30  ;;  %v10100_v27 = vld [vmem:[%s12027_s29 + $0x260] ss:$16 sps:$4 sm:$0xff]   ;;  %v10103_v28 = vld [vmem:[%s12027_s29 + $0x268] ss:$16 sps:$4 sm:$0xff]   ;;  %v10108_v29 = vld [vmem:[%s12027_s29 + $0x284] ss:$16 sps:$4 sm:$0xff]  }
  0x8b   : > { %v10111_v30 = vld [vmem:[%s12027_s29 + $0x28c] ss:$16 sps:$4 sm:$0xff]   ;;  %v10120_v37 = vld [vmem:[%s12027_s29 + $0x2c4] ss:$16 sps:$4 sm:$0xff]   ;;  %v10118_v39 = vld [vmem:[%s12027_s29 + $0x2c0] ss:$16 sps:$4 sm:$0xff]  }
  0x8c   : > { %v10123_v38 = vld [vmem:[%s12027_s29 + $0x2cc] ss:$16 sps:$4 sm:$0xff]   ;;  %v10124_v43 = vld [vmem:[%s12027_s29 + $0x2e0] ss:$16 sps:$4 sm:$0xff]   ;;  %v10139_v55 = vld [vmem:[%s12027_s29 + $0x328] ss:$16 sps:$4 sm:$0xff]  }
  0x8d   : > { %7080 = vmatpush1.bf16.msra.mxu0 %v10032_v31  ;;  %7777 = vmatpush1.bf16.msra.mxu1 %v10033_v32  ;;  %v10106_v31 = vld [vmem:[%s12027_s29 + $0x280] ss:$16 sps:$4 sm:$0xff]   ;;  %v10109_v32 = vld [vmem:[%s12027_s29 + $0x288] ss:$16 sps:$4 sm:$0xff]   ;;  %v10153_v61 = vld [vmem:[%s12027_s29 + $0x36c] ss:$16 sps:$4 sm:$0xff]  }
  0x8e   : > { %7081 = vmatprep.subr.bf16.mxu0 %v10034_v33  ;;  %7778 = vmatprep.subr.bf16.mxu1 %v10036_v34  ;;  %v10114_v33 = vld [vmem:[%s12027_s29 + $0x2a4] ss:$16 sps:$4 sm:$0xff]   ;;  %v10117_v34 = vld [vmem:[%s12027_s29 + $0x2ac] ss:$16 sps:$4 sm:$0xff]   ;;  %v10145_v59 = vld [vmem:[%s12027_s29 + $0x348] ss:$16 sps:$4 sm:$0xff]  }
  0x91   : > { %7082 = vmatpush1.bf16.msra.mxu0 %v10038_v35  ;;  %7779 = vmatpush1.bf16.msra.mxu1 %v10039_v36  ;;  %v10112_v35 = vld [vmem:[%s12027_s29 + $0x2a0] ss:$16 sps:$4 sm:$0xff]   ;;  %v10115_v36 = vld [vmem:[%s12027_s29 + $0x2a8] ss:$16 sps:$4 sm:$0xff]  }
  0x92   : > { %7083 = vmatprep.subr.bf16.mxu0 %v10040_v40  ;;  %7780 = vmatprep.subr.bf16.mxu1 %v10042_v41  ;;  %v10121_v40 = vld [vmem:[%s12027_s29 + $0x2c8] ss:$16 sps:$4 sm:$0xff]   ;;  %v10126_v41 = vld [vmem:[%s12027_s29 + $0x2e4] ss:$16 sps:$4 sm:$0xff]  }
  0x95   : > { %7084 = vmatpush1.bf16.msra.mxu0 %v10044_v42  ;;  %7781 = vmatpush1.bf16.msra.mxu1 %v10045_v45  ;;  %v10129_v42 = vld [vmem:[%s12027_s29 + $0x2ec] ss:$16 sps:$4 sm:$0xff]   ;;  %v10127_v45 = vld [vmem:[%s12027_s29 + $0x2e8] ss:$16 sps:$4 sm:$0xff]  }
  0x96   : > { %7085 = vmatprep.subr.bf16.mxu0 %v10046_v46  ;;  %7782 = vmatprep.subr.bf16.mxu1 %v10048_v47  ;;  %v10132_v46 = vld [vmem:[%s12027_s29 + $0x304] ss:$16 sps:$4 sm:$0xff]   ;;  %v10135_v47 = vld [vmem:[%s12027_s29 + $0x30c] ss:$16 sps:$4 sm:$0xff]  }
  0x99   : > { %7086 = vmatpush1.bf16.msra.mxu0 %v10050_v48  ;;  %7783 = vmatpush1.bf16.msra.mxu1 %v10051_v49  ;;  %v10130_v48 = vld [vmem:[%s12027_s29 + $0x300] ss:$16 sps:$4 sm:$0xff]   ;;  %v10133_v49 = vld [vmem:[%s12027_s29 + $0x308] ss:$16 sps:$4 sm:$0xff]  }
  0x9a   : > { %7087 = vmatprep.subr.bf16.mxu0 %v10052_v51  ;;  %7784 = vmatprep.subr.bf16.mxu1 %v10054_v52  ;;  %v10138_v51 = vld [vmem:[%s12027_s29 + $0x324] ss:$16 sps:$4 sm:$0xff]   ;;  %v10141_v52 = vld [vmem:[%s12027_s29 + $0x32c] ss:$16 sps:$4 sm:$0xff]  }
  0x9d   : > { %7088 = vmatpush1.bf16.msra.mxu0 %v10056_v54  ;;  %7785 = vmatpush1.bf16.msra.mxu1 %v10057_v56  ;;  %v10136_v54 = vld [vmem:[%s12027_s29 + $0x320] ss:$16 sps:$4 sm:$0xff]   ;;  %v10144_v56 = vld [vmem:[%s12027_s29 + $0x344] ss:$16 sps:$4 sm:$0xff]  }
  0x9e   : > { %7089 = vmatprep.subr.bf16.mxu0 %v10058_v57  ;;  %7786 = vmatprep.subr.bf16.mxu1 %v10060_v58  ;;  %v10147_v57 = vld [vmem:[%s12027_s29 + $0x34c] ss:$16 sps:$4 sm:$0xff]   ;;  %v10142_v58 = vld [vmem:[%s12027_s29 + $0x340] ss:$16 sps:$4 sm:$0xff]  }
  0xa1   : > { %7090 = vmatpush1.bf16.msra.mxu0 %v10062_v60  ;;  %7787 = vmatpush1.bf16.msra.mxu1 %v10063_v62  ;;  %v10150_v60 = vld [vmem:[%s12027_s29 + $0x364] ss:$16 sps:$4 sm:$0xff]   ;;  %v10148_v62 = vld [vmem:[%s12027_s29 + $0x360] ss:$16 sps:$4 sm:$0xff]  }
  0xa2   : > { %7091 = vmatprep.subr.bf16.mxu0 %v10064_v63  ;;  %7788 = vmatprep.subr.bf16.mxu1 %v10066_v0  ;;  %v10151_v63 = vld [vmem:[%s12027_s29 + $0x368] ss:$16 sps:$4 sm:$0xff]   ;;  %v10156_v0 = vld [vmem:[%s12027_s29 + $0x384] ss:$16 sps:$4 sm:$0xff]  }
  0xa5   : > { %7092 = vmatpush1.bf16.msra.mxu0 %v10068_v1  ;;  %7789 = vmatpush1.bf16.msra.mxu1 %v10069_v2  ;;  %v10159_v1 = vld [vmem:[%s12027_s29 + $0x38c] ss:$16 sps:$4 sm:$0xff]   ;;  %v10154_v2 = vld [vmem:[%s12027_s29 + $0x380] ss:$16 sps:$4 sm:$0xff]  }
  0xa6   : > { %7093 = vmatprep.subr.bf16.mxu0 %v10070_v3  ;;  %7790 = vmatprep.subr.bf16.mxu1 %v10072_v4  ;;  %v10157_v3 = vld [vmem:[%s12027_s29 + $0x388] ss:$16 sps:$4 sm:$0xff]   ;;  %v10162_v4 = vld [vmem:[%s12027_s29 + $0x3a4] ss:$16 sps:$4 sm:$0xff]  }
  0xa9   : > { %7094 = vmatpush1.bf16.msra.mxu0 %v10074_v5  ;;  %7791 = vmatpush1.bf16.msra.mxu1 %v10075_v6  ;;  %v10165_v5 = vld [vmem:[%s12027_s29 + $0x3ac] ss:$16 sps:$4 sm:$0xff]   ;;  %v10160_v6 = vld [vmem:[%s12027_s29 + $0x3a0] ss:$16 sps:$4 sm:$0xff]  }
  0xaa   : > { %7095 = vmatprep.subr.bf16.mxu0 %v10076_v7  ;;  %7792 = vmatprep.subr.bf16.mxu1 %v10078_v8  ;;  %v10163_v7 = vld [vmem:[%s12027_s29 + $0x3a8] ss:$16 sps:$4 sm:$0xff]   ;;  %v10168_v8 = vld [vmem:[%s12027_s29 + $0x3c4] ss:$16 sps:$4 sm:$0xff]  }
  0xad   : > { %7096 = vmatpush1.bf16.msra.mxu0 %v10080_v9  ;;  %7793 = vmatpush1.bf16.msra.mxu1 %v10081_v10  ;;  %v10171_v9 = vld [vmem:[%s12027_s29 + $0x3cc] ss:$16 sps:$4 sm:$0xff]   ;;  %v1373_v10 = vcombine.high %v12107_v53, %v12107_v53  ;;  %v10175_v53 = vld [vmem:[%s12027_s29 + $0x3e8] ss:$16 sps:$4 sm:$0xff]  }
  0xae   : > { %7106 = vmatprep.subr.bf16.mxu0 %v10084_v11  ;;  %7803 = vmatprep.subr.bf16.mxu1 %v10087_v12  ;;  %v10166_v11 = vld [vmem:[%s12027_s29 + $0x3c0] ss:$16 sps:$4 sm:$0xff]   ;;  %v10169_v12 = vld [vmem:[%s12027_s29 + $0x3c8] ss:$16 sps:$4 sm:$0xff]  }
  0xb0   : > { %7098 = vmatmul.mubr.bf16.vlgmr.msra.gmra.mrb[0].mxu0 %v12134_v14  ;;  %7795 = vmatmul.mubr.bf16.vlgmr.msra.gmra.mrb[0].mxu1 %v12134_v14 }
  0xb1   : > { %7107 = vmatpush1.bf16.msra.mxu0 %v10082_v13  ;;  %7804 = vmatpush1.bf16.msra.mxu1 %v10085_v15  ;;  %v10174_v13 = vld [vmem:[%s12027_s29 + $0x3e4] ss:$16 sps:$4 sm:$0xff]   ;;  %v10177_v15 = vld [vmem:[%s12027_s29 + $0x3ec] ss:$16 sps:$4 sm:$0xff]  }
  0xb2   : > { %7108 = vmatprep.subr.bf16.mxu0 %v10090_v16  ;;  %7805 = vmatprep.subr.bf16.mxu1 %v10093_v17  ;;  %v12200_v16 = vrot.slane %v1373_v10, %v12102_v50  ;;  %v10172_v17 = vld [vmem:[%s12027_s29 + $0x3e0] ss:$16 sps:$4 sm:$0xff]   ;;  %v10253_v10 = vld [vmem:[%s12027_s29 + $0x588] ss:$16 sps:$4 sm:$0xff]  }
  0xb3   : > { %7138 = vmatprep.mubr.bf16.mxu0 %v1420_v18  ;;  %7835 = vmatprep.mubr.bf16.mxu1 %v1420_v18  ;;  %v10180_v18 = vld [vmem:[%s12027_s29 + $0x404] ss:$16 sps:$4 sm:$0xff]  }
  0xb5   : > { %7109 = vmatpush1.bf16.msra.mxu0 %v10088_v19  ;;  %7806 = vmatpush1.bf16.msra.mxu1 %v10091_v20  ;;  %v10183_v19 = vld [vmem:[%s12027_s29 + $0x40c] ss:$16 sps:$4 sm:$0xff]   ;;  %v1389_v20 = vcombine.high %v12200_v16, %v12200_v16 }
  0xb6   : > { %7110 = vmatprep.subr.bf16.mxu0 %v10096_v21  ;;  %7807 = vmatprep.subr.bf16.mxu1 %v10099_v22  ;;  %v10178_v21 = vld [vmem:[%s12027_s29 + $0x400] ss:$16 sps:$4 sm:$0xff]   ;;  %v1418_v22 = vcombine.high %v12134_v14, %v12134_v14  ;;  %v10187_v14 = vld [vmem:[%s12027_s29 + $0x428] ss:$16 sps:$4 sm:$0xff]  }
  0xb9   : > { %7111 = vmatpush1.bf16.msra.mxu0 %v10094_v23  ;;  %7808 = vmatpush1.bf16.msra.mxu1 %v10097_v24  ;;  %v10181_v23 = vld [vmem:[%s12027_s29 + $0x408] ss:$16 sps:$4 sm:$0xff]   ;;  %v10186_v24 = vld [vmem:[%s12027_s29 + $0x424] ss:$16 sps:$4 sm:$0xff]  }
  0xba   : > { %7112 = vmatprep.subr.bf16.mxu0 %v10102_v25  ;;  %7809 = vmatprep.subr.bf16.mxu1 %v10105_v26  ;;  %v10189_v25 = vld [vmem:[%s12027_s29 + $0x42c] ss:$16 sps:$4 sm:$0xff]   ;;  %v12215_v26 = vrot.slane %v1389_v20, %v12102_v50  ;;  %v10270_v20 = vld [vmem:[%s12027_s29 + $0x5e4] ss:$16 sps:$4 sm:$0xff]  }
  0xbd   : > { %7113 = vmatpush1.bf16.msra.mxu0 %v10100_v27  ;;  %7810 = vmatpush1.bf16.msra.mxu1 %v10103_v28  ;;  %v10184_v27 = vld [vmem:[%s12027_s29 + $0x420] ss:$16 sps:$4 sm:$0xff]   ;;  %v10192_v28 = vld [vmem:[%s12027_s29 + $0x444] ss:$16 sps:$4 sm:$0xff]  }
  0xbe   : > { %7114 = vmatprep.subr.bf16.mxu0 %v10108_v29  ;;  %7811 = vmatprep.subr.bf16.mxu1 %v10111_v30  ;;  %v10195_v29 = vld [vmem:[%s12027_s29 + $0x44c] ss:$16 sps:$4 sm:$0xff]   ;;  %v10190_v30 = vld [vmem:[%s12027_s29 + $0x440] ss:$16 sps:$4 sm:$0xff]  }
  0xc1   : > { %7115 = vmatpush1.bf16.msra.mxu0 %v10106_v31  ;;  %7812 = vmatpush1.bf16.msra.mxu1 %v10109_v32  ;;  %v10193_v31 = vld [vmem:[%s12027_s29 + $0x448] ss:$16 sps:$4 sm:$0xff]   ;;  %v10198_v32 = vld [vmem:[%s12027_s29 + $0x464] ss:$16 sps:$4 sm:$0xff]  }
  0xc2   : > { %7116 = vmatprep.subr.bf16.mxu0 %v10114_v33  ;;  %7813 = vmatprep.subr.bf16.mxu1 %v10117_v34  ;;  %v10201_v33 = vld [vmem:[%s12027_s29 + $0x46c] ss:$16 sps:$4 sm:$0xff]   ;;  %v10196_v34 = vld [vmem:[%s12027_s29 + $0x460] ss:$16 sps:$4 sm:$0xff]  }
  0xc5   : > { %7117 = vmatpush1.bf16.msra.mxu0 %v10112_v35  ;;  %7814 = vmatpush1.bf16.msra.mxu1 %v10115_v36  ;;  %v10199_v35 = vld [vmem:[%s12027_s29 + $0x468] ss:$16 sps:$4 sm:$0xff]   ;;  %v10204_v36 = vld [vmem:[%s12027_s29 + $0x484] ss:$16 sps:$4 sm:$0xff]  }
  0xc6   : > { %7118 = vmatprep.subr.bf16.mxu0 %v10120_v37  ;;  %7815 = vmatprep.subr.bf16.mxu1 %v10123_v38  ;;  %v10207_v37 = vld [vmem:[%s12027_s29 + $0x48c] ss:$16 sps:$4 sm:$0xff]   ;;  %v10202_v38 = vld [vmem:[%s12027_s29 + $0x480] ss:$16 sps:$4 sm:$0xff]  }
  0xc9   : > { %7119 = vmatpush1.bf16.msra.mxu0 %v10118_v39  ;;  %7816 = vmatpush1.bf16.msra.mxu1 %v10121_v40  ;;  %v10205_v39 = vld [vmem:[%s12027_s29 + $0x488] ss:$16 sps:$4 sm:$0xff]   ;;  %v10210_v40 = vld [vmem:[%s12027_s29 + $0x4a4] ss:$16 sps:$4 sm:$0xff]  }
  0xca   : > { %7120 = vmatprep.subr.bf16.mxu0 %v10126_v41  ;;  %7817 = vmatprep.subr.bf16.mxu1 %v10129_v42  ;;  %v10213_v41 = vld [vmem:[%s12027_s29 + $0x4ac] ss:$16 sps:$4 sm:$0xff]   ;;  %v10208_v42 = vld [vmem:[%s12027_s29 + $0x4a0] ss:$16 sps:$4 sm:$0xff]  }
  0xcd   : > { %7121 = vmatpush1.bf16.msra.mxu0 %v10124_v43  ;;  %7818 = vmatpush1.bf16.msra.mxu1 %v10127_v45  ;;  %v10211_v43 = vld [vmem:[%s12027_s29 + $0x4a8] ss:$16 sps:$4 sm:$0xff]   ;;  %v10216_v45 = vld [vmem:[%s12027_s29 + $0x4c4] ss:$16 sps:$4 sm:$0xff]  }
  0xce   : > { %7122 = vmatprep.subr.bf16.mxu0 %v10132_v46  ;;  %7819 = vmatprep.subr.bf16.mxu1 %v10135_v47  ;;  %v10219_v46 = vld [vmem:[%s12027_s29 + $0x4cc] ss:$16 sps:$4 sm:$0xff]   ;;  %v10214_v47 = vld [vmem:[%s12027_s29 + $0x4c0] ss:$16 sps:$4 sm:$0xff]  }
  0xd1   : > { %7123 = vmatpush1.bf16.msra.mxu0 %v10130_v48  ;;  %7820 = vmatpush1.bf16.msra.mxu1 %v10133_v49  ;;  %v10217_v48 = vld [vmem:[%s12027_s29 + $0x4c8] ss:$16 sps:$4 sm:$0xff]   ;;  %v10222_v49 = vld [vmem:[%s12027_s29 + $0x4e4] ss:$16 sps:$4 sm:$0xff]  }
  0xd2   : > { %7124 = vmatprep.subr.bf16.mxu0 %v10138_v51  ;;  %7821 = vmatprep.subr.bf16.mxu1 %v10141_v52  ;;  %v10225_v51 = vld [vmem:[%s12027_s29 + $0x4ec] ss:$16 sps:$4 sm:$0xff]   ;;  %v10220_v52 = vld [vmem:[%s12027_s29 + $0x4e0] ss:$16 sps:$4 sm:$0xff]  }
  0xd5   : > { %7125 = vmatpush1.bf16.msra.mxu0 %v10136_v54  ;;  %7822 = vmatpush1.bf16.msra.mxu1 %v10139_v55  ;;  %v10223_v54 = vld [vmem:[%s12027_s29 + $0x4e8] ss:$16 sps:$4 sm:$0xff]   ;;  %v10228_v55 = vld [vmem:[%s12027_s29 + $0x504] ss:$16 sps:$4 sm:$0xff]  }
  0xd6   : > { %7126 = vmatprep.subr.bf16.mxu0 %v10144_v56  ;;  %7823 = vmatprep.subr.bf16.mxu1 %v10147_v57  ;;  %v10231_v56 = vld [vmem:[%s12027_s29 + $0x50c] ss:$16 sps:$4 sm:$0xff]   ;;  %v10226_v57 = vld [vmem:[%s12027_s29 + $0x500] ss:$16 sps:$4 sm:$0xff]  }
  0xd9   : > { %7127 = vmatpush1.bf16.msra.mxu0 %v10142_v58  ;;  %7824 = vmatpush1.bf16.msra.mxu1 %v10145_v59  ;;  %v10229_v58 = vld [vmem:[%s12027_s29 + $0x508] ss:$16 sps:$4 sm:$0xff]   ;;  %v10234_v59 = vld [vmem:[%s12027_s29 + $0x524] ss:$16 sps:$4 sm:$0xff]  }
  0xda   : > { %7128 = vmatprep.subr.bf16.mxu0 %v10150_v60  ;;  %7825 = vmatprep.subr.bf16.mxu1 %v10153_v61  ;;  %v10237_v60 = vld [vmem:[%s12027_s29 + $0x52c] ss:$16 sps:$4 sm:$0xff]   ;;  %v10232_v61 = vld [vmem:[%s12027_s29 + $0x520] ss:$16 sps:$4 sm:$0xff]  }
  0xdd   : > { %7129 = vmatpush1.bf16.msra.mxu0 %v10148_v62  ;;  %7826 = vmatpush1.bf16.msra.mxu1 %v10151_v63  ;;  %v10235_v62 = vld [vmem:[%s12027_s29 + $0x528] ss:$16 sps:$4 sm:$0xff]   ;;  %v10240_v63 = vld [vmem:[%s12027_s29 + $0x544] ss:$16 sps:$4 sm:$0xff]  }
  0xde   : > { %7130 = vmatprep.subr.bf16.mxu0 %v10156_v0  ;;  %7827 = vmatprep.subr.bf16.mxu1 %v10159_v1  ;;  %v10243_v0 = vld [vmem:[%s12027_s29 + $0x54c] ss:$16 sps:$4 sm:$0xff]   ;;  %v10238_v1 = vld [vmem:[%s12027_s29 + $0x540] ss:$16 sps:$4 sm:$0xff]  }
  0xe1   : > { %7131 = vmatpush1.bf16.msra.mxu0 %v10154_v2  ;;  %7828 = vmatpush1.bf16.msra.mxu1 %v10157_v3  ;;  %v10241_v2 = vld [vmem:[%s12027_s29 + $0x548] ss:$16 sps:$4 sm:$0xff]   ;;  %v10246_v3 = vld [vmem:[%s12027_s29 + $0x564] ss:$16 sps:$4 sm:$0xff]  }
  0xe2   : > { %7132 = vmatprep.subr.bf16.mxu0 %v10162_v4  ;;  %7829 = vmatprep.subr.bf16.mxu1 %v10165_v5  ;;  %v10249_v4 = vld [vmem:[%s12027_s29 + $0x56c] ss:$16 sps:$4 sm:$0xff]   ;;  %v10244_v5 = vld [vmem:[%s12027_s29 + $0x560] ss:$16 sps:$4 sm:$0xff]  }
  0xe5   : > { %7133 = vmatpush1.bf16.msra.mxu0 %v10160_v6  ;;  %7830 = vmatpush1.bf16.msra.mxu1 %v10163_v7  ;;  %v10247_v6 = vld [vmem:[%s12027_s29 + $0x568] ss:$16 sps:$4 sm:$0xff]   ;;  %v10252_v7 = vld [vmem:[%s12027_s29 + $0x584] ss:$16 sps:$4 sm:$0xff]  }
  0xe6   : > { %7134 = vmatprep.subr.bf16.mxu0 %v10168_v8  ;;  %7831 = vmatprep.subr.bf16.mxu1 %v10171_v9  ;;  %v10255_v8 = vld [vmem:[%s12027_s29 + $0x58c] ss:$16 sps:$4 sm:$0xff]   ;;  %v10250_v9 = vld [vmem:[%s12027_s29 + $0x580] ss:$16 sps:$4 sm:$0xff]  }
  0xe9   : > { %7135 = vmatpush1.bf16.msra.mxu0 %v10166_v11  ;;  %7832 = vmatpush1.bf16.msra.mxu1 %v10169_v12  ;;  %v10258_v11 = vld [vmem:[%s12027_s29 + $0x5a4] ss:$16 sps:$4 sm:$0xff]   ;;  %v10261_v12 = vld [vmem:[%s12027_s29 + $0x5ac] ss:$16 sps:$4 sm:$0xff]  }
  0xea   : > { %7136 = vmatprep.subr.bf16.mxu0 %v10174_v13  ;;  %7833 = vmatprep.subr.bf16.mxu1 %v10177_v15  ;;  %v10256_v13 = vld [vmem:[%s12027_s29 + $0x5a0] ss:$16 sps:$4 sm:$0xff]   ;;  %v10259_v15 = vld [vmem:[%s12027_s29 + $0x5a8] ss:$16 sps:$4 sm:$0xff]  }
  0xed   : > { %7137 = vmatpush1.bf16.msra.mxu0 %v10172_v17  ;;  %7834 = vmatpush1.bf16.msra.mxu1 %v10175_v53  ;;  %v10264_v17 = vld [vmem:[%s12027_s29 + $0x5c4] ss:$16 sps:$4 sm:$0xff]   ;;  %v10267_v53 = vld [vmem:[%s12027_s29 + $0x5cc] ss:$16 sps:$4 sm:$0xff]  }
  0xee   : > { %7147 = vmatprep.subr.bf16.mxu0 %v10180_v18  ;;  %7844 = vmatprep.subr.bf16.mxu1 %v10183_v19  ;;  %v10262_v18 = vld [vmem:[%s12027_s29 + $0x5c0] ss:$16 sps:$4 sm:$0xff]   ;;  %v10265_v19 = vld [vmem:[%s12027_s29 + $0x5c8] ss:$16 sps:$4 sm:$0xff]  }
  0xf0   : > { %7139 = vmatmul.mubr.bf16.vlgmr.msra.gmra.mrb[0].mxu0 %v1418_v22  ;;  %7836 = vmatmul.mubr.bf16.vlgmr.msra.gmra.mrb[0].mxu1 %v1418_v22  ;;  %v10268_v22 = vld [vmem:[%s12027_s29 + $0x5e0] ss:$16 sps:$4 sm:$0xff]  }
  0xf1   : > { %7148 = vmatpush1.bf16.msra.mxu0 %v10178_v21  ;;  %7845 = vmatpush1.bf16.msra.mxu1 %v10181_v23  ;;  %v10273_v21 = vld [vmem:[%s12027_s29 + $0x5ec] ss:$16 sps:$4 sm:$0xff]   ;;  %v10271_v23 = vld [vmem:[%s12027_s29 + $0x5e8] ss:$16 sps:$4 sm:$0xff]  }
  0xf2   : > { %7149 = vmatprep.subr.bf16.mxu0 %v10186_v24  ;;  %7846 = vmatprep.subr.bf16.mxu1 %v10189_v25  ;;  %v10277_v24 = vld [vmem:[%s12027_s29 + $0x604] ss:$16 sps:$4 sm:$0xff]   ;;  %v10280_v25 = vld [vmem:[%s12027_s29 + $0x60c] ss:$16 sps:$4 sm:$0xff]  }
  0xf3   : > { %7179 = vmatprep.mubr.bf16.mxu0 %v12215_v26  ;;  %7876 = vmatprep.mubr.bf16.mxu1 %v12215_v26 }
  0xf5   : > { %7150 = vmatpush1.bf16.msra.mxu0 %v10184_v27  ;;  %7847 = vmatpush1.bf16.msra.mxu1 %v10187_v14  ;;  %v10275_v27 = vld [vmem:[%s12027_s29 + $0x600] ss:$16 sps:$4 sm:$0xff]   ;;  %v12282_v14 = vrot.slane %v12200_v16, %v12102_v50 }
  0xf6   : > { %7151 = vmatprep.subr.bf16.mxu0 %v10192_v28  ;;  %7848 = vmatprep.subr.bf16.mxu1 %v10195_v29  ;;  %v10278_v28 = vld [vmem:[%s12027_s29 + $0x608] ss:$16 sps:$4 sm:$0xff]   ;;  %v10283_v29 = vld [vmem:[%s12027_s29 + $0x624] ss:$16 sps:$4 sm:$0xff]   ;;  %v10281_v16 = vld [vmem:[%s12027_s29 + $0x620] ss:$16 sps:$4 sm:$0xff]  }
  0xf9   : > { %7152 = vmatpush1.bf16.msra.mxu0 %v10190_v30  ;;  %7849 = vmatpush1.bf16.msra.mxu1 %v10193_v31  ;;  %v10286_v30 = vld [vmem:[%s12027_s29 + $0x62c] ss:$16 sps:$4 sm:$0xff]   ;;  %v1421_v31 = vcombine.high %v12215_v26, %v12215_v26  ;;  %v10287_v26 = vld [vmem:[%s12027_s29 + $0x640] ss:$16 sps:$4 sm:$0xff]  }
  0xfa   : > { %7153 = vmatprep.subr.bf16.mxu0 %v10198_v32  ;;  %7850 = vmatprep.subr.bf16.mxu1 %v10201_v33  ;;  %v10284_v32 = vld [vmem:[%s12027_s29 + $0x628] ss:$16 sps:$4 sm:$0xff]   ;;  %v10289_v33 = vld [vmem:[%s12027_s29 + $0x644] ss:$16 sps:$4 sm:$0xff]  }
  0xfd   : > { %7154 = vmatpush1.bf16.msra.mxu0 %v10196_v34  ;;  %7851 = vmatpush1.bf16.msra.mxu1 %v10199_v35  ;;  %v10292_v34 = vld [vmem:[%s12027_s29 + $0x64c] ss:$16 sps:$4 sm:$0xff]   ;;  %v10290_v35 = vld [vmem:[%s12027_s29 + $0x648] ss:$16 sps:$4 sm:$0xff]  }
  0xfe   : > { %7155 = vmatprep.subr.bf16.mxu0 %v10204_v36  ;;  %7852 = vmatprep.subr.bf16.mxu1 %v10207_v37  ;;  %v10295_v36 = vld [vmem:[%s12027_s29 + $0x664] ss:$16 sps:$4 sm:$0xff]   ;;  %v10298_v37 = vld [vmem:[%s12027_s29 + $0x66c] ss:$16 sps:$4 sm:$0xff]  }
 0x101   : > { %7156 = vmatpush1.bf16.msra.mxu0 %v10202_v38  ;;  %7853 = vmatpush1.bf16.msra.mxu1 %v10205_v39  ;;  %v10293_v38 = vld [vmem:[%s12027_s29 + $0x660] ss:$16 sps:$4 sm:$0xff]   ;;  %v10296_v39 = vld [vmem:[%s12027_s29 + $0x668] ss:$16 sps:$4 sm:$0xff]  }
 0x102   : > { %7157 = vmatprep.subr.bf16.mxu0 %v10210_v40  ;;  %7854 = vmatprep.subr.bf16.mxu1 %v10213_v41  ;;  %v10301_v40 = vld [vmem:[%s12027_s29 + $0x684] ss:$16 sps:$4 sm:$0xff]   ;;  %v10304_v41 = vld [vmem:[%s12027_s29 + $0x68c] ss:$16 sps:$4 sm:$0xff]  }
 0x105   : > { %7158 = vmatpush1.bf16.msra.mxu0 %v10208_v42  ;;  %7855 = vmatpush1.bf16.msra.mxu1 %v10211_v43  ;;  %v10299_v42 = vld [vmem:[%s12027_s29 + $0x680] ss:$16 sps:$4 sm:$0xff]   ;;  %v10302_v43 = vld [vmem:[%s12027_s29 + $0x688] ss:$16 sps:$4 sm:$0xff]  }
 0x106   : > { %7159 = vmatprep.subr.bf16.mxu0 %v10216_v45  ;;  %7856 = vmatprep.subr.bf16.mxu1 %v10219_v46  ;;  %v10307_v45 = vld [vmem:[%s12027_s29 + $0x6a4] ss:$16 sps:$4 sm:$0xff]   ;;  %v10310_v46 = vld [vmem:[%s12027_s29 + $0x6ac] ss:$16 sps:$4 sm:$0xff]  }
 0x109   : > { %7160 = vmatpush1.bf16.msra.mxu0 %v10214_v47  ;;  %7857 = vmatpush1.bf16.msra.mxu1 %v10217_v48  ;;  %v10305_v47 = vld [vmem:[%s12027_s29 + $0x6a0] ss:$16 sps:$4 sm:$0xff]   ;;  %v10308_v48 = vld [vmem:[%s12027_s29 + $0x6a8] ss:$16 sps:$4 sm:$0xff]  }
 0x10a   : > { %7161 = vmatprep.subr.bf16.mxu0 %v10222_v49  ;;  %7858 = vmatprep.subr.bf16.mxu1 %v10225_v51  ;;  %v10313_v49 = vld [vmem:[%s12027_s29 + $0x6c4] ss:$16 sps:$4 sm:$0xff]   ;;  %v10316_v51 = vld [vmem:[%s12027_s29 + $0x6cc] ss:$16 sps:$4 sm:$0xff]  }
 0x10d   : > { %7162 = vmatpush1.bf16.msra.mxu0 %v10220_v52  ;;  %7859 = vmatpush1.bf16.msra.mxu1 %v10223_v54  ;;  %v10311_v52 = vld [vmem:[%s12027_s29 + $0x6c0] ss:$16 sps:$4 sm:$0xff]   ;;  %v10314_v54 = vld [vmem:[%s12027_s29 + $0x6c8] ss:$16 sps:$4 sm:$0xff]  }
 0x10e   : > { %7163 = vmatprep.subr.bf16.mxu0 %v10228_v55  ;;  %7860 = vmatprep.subr.bf16.mxu1 %v10231_v56  ;;  %v10319_v55 = vld [vmem:[%s12027_s29 + $0x6e4] ss:$16 sps:$4 sm:$0xff]   ;;  %v10322_v56 = vld [vmem:[%s12027_s29 + $0x6ec] ss:$16 sps:$4 sm:$0xff]  }
 0x111   : > { %7164 = vmatpush1.bf16.msra.mxu0 %v10226_v57  ;;  %7861 = vmatpush1.bf16.msra.mxu1 %v10229_v58  ;;  %v10317_v57 = vld [vmem:[%s12027_s29 + $0x6e0] ss:$16 sps:$4 sm:$0xff]   ;;  %v10320_v58 = vld [vmem:[%s12027_s29 + $0x6e8] ss:$16 sps:$4 sm:$0xff]  }
 0x112   : > { %7165 = vmatprep.subr.bf16.mxu0 %v10234_v59  ;;  %7862 = vmatprep.subr.bf16.mxu1 %v10237_v60  ;;  %v10325_v59 = vld [vmem:[%s12027_s29 + $0x704] ss:$16 sps:$4 sm:$0xff]   ;;  %v10328_v60 = vld [vmem:[%s12027_s29 + $0x70c] ss:$16 sps:$4 sm:$0xff]  }
 0x115   : > { %7166 = vmatpush1.bf16.msra.mxu0 %v10232_v61  ;;  %7863 = vmatpush1.bf16.msra.mxu1 %v10235_v62  ;;  %v10323_v61 = vld [vmem:[%s12027_s29 + $0x700] ss:$16 sps:$4 sm:$0xff]   ;;  %v10326_v62 = vld [vmem:[%s12027_s29 + $0x708] ss:$16 sps:$4 sm:$0xff]  }
 0x116   : > { %7167 = vmatprep.subr.bf16.mxu0 %v10240_v63  ;;  %7864 = vmatprep.subr.bf16.mxu1 %v10243_v0  ;;  %v10331_v63 = vld [vmem:[%s12027_s29 + $0x724] ss:$16 sps:$4 sm:$0xff]   ;;  %v10334_v0 = vld [vmem:[%s12027_s29 + $0x72c] ss:$16 sps:$4 sm:$0xff]  }
 0x119   : > { %7168 = vmatpush1.bf16.msra.mxu0 %v10238_v1  ;;  %7865 = vmatpush1.bf16.msra.mxu1 %v10241_v2  ;;  %v10329_v1 = vld [vmem:[%s12027_s29 + $0x720] ss:$16 sps:$4 sm:$0xff]   ;;  %v10332_v2 = vld [vmem:[%s12027_s29 + $0x728] ss:$16 sps:$4 sm:$0xff]  }
 0x11a   : > { %7169 = vmatprep.subr.bf16.mxu0 %v10246_v3  ;;  %7866 = vmatprep.subr.bf16.mxu1 %v10249_v4  ;;  %v10337_v3 = vld [vmem:[%s12027_s29 + $0x744] ss:$16 sps:$4 sm:$0xff]   ;;  %v10340_v4 = vld [vmem:[%s12027_s29 + $0x74c] ss:$16 sps:$4 sm:$0xff]  }
 0x11d   : > { %7170 = vmatpush1.bf16.msra.mxu0 %v10244_v5  ;;  %7867 = vmatpush1.bf16.msra.mxu1 %v10247_v6  ;;  %v10335_v5 = vld [vmem:[%s12027_s29 + $0x740] ss:$16 sps:$4 sm:$0xff]   ;;  %v10338_v6 = vld [vmem:[%s12027_s29 + $0x748] ss:$16 sps:$4 sm:$0xff]  }
 0x11e   : > { %7171 = vmatprep.subr.bf16.mxu0 %v10252_v7  ;;  %7868 = vmatprep.subr.bf16.mxu1 %v10255_v8  ;;  %v10343_v7 = vld [vmem:[%s12027_s29 + $0x764] ss:$16 sps:$4 sm:$0xff]   ;;  %v10346_v8 = vld [vmem:[%s12027_s29 + $0x76c] ss:$16 sps:$4 sm:$0xff]  }
 0x121   : > { %7172 = vmatpush1.bf16.msra.mxu0 %v10250_v9  ;;  %7869 = vmatpush1.bf16.msra.mxu1 %v10253_v10  ;;  %v10341_v9 = vld [vmem:[%s12027_s29 + $0x760] ss:$16 sps:$4 sm:$0xff]   ;;  %v10344_v10 = vld [vmem:[%s12027_s29 + $0x768] ss:$16 sps:$4 sm:$0xff]  }
 0x122   : > { %7173 = vmatprep.subr.bf16.mxu0 %v10258_v11  ;;  %7870 = vmatprep.subr.bf16.mxu1 %v10261_v12  ;;  %v10349_v11 = vld [vmem:[%s12027_s29 + $0x784] ss:$16 sps:$4 sm:$0xff]   ;;  %v10352_v12 = vld [vmem:[%s12027_s29 + $0x78c] ss:$16 sps:$4 sm:$0xff]  }
 0x125   : > { %7174 = vmatpush1.bf16.msra.mxu0 %v10256_v13  ;;  %7871 = vmatpush1.bf16.msra.mxu1 %v10259_v15  ;;  %v10347_v13 = vld [vmem:[%s12027_s29 + $0x780] ss:$16 sps:$4 sm:$0xff]   ;;  %v10350_v15 = vld [vmem:[%s12027_s29 + $0x788] ss:$16 sps:$4 sm:$0xff]  }
 0x126   : > { %7175 = vmatprep.subr.bf16.mxu0 %v10264_v17  ;;  %7872 = vmatprep.subr.bf16.mxu1 %v10267_v53  ;;  %v10355_v17 = vld [vmem:[%s12027_s29 + $0x7a4] ss:$16 sps:$4 sm:$0xff]   ;;  %v10358_v53 = vld [vmem:[%s12027_s29 + $0x7ac] ss:$16 sps:$4 sm:$0xff]  }
 0x129   : > { %7176 = vmatpush1.bf16.msra.mxu0 %v10262_v18  ;;  %7873 = vmatpush1.bf16.msra.mxu1 %v10265_v19  ;;  %v10353_v18 = vld [vmem:[%s12027_s29 + $0x7a0] ss:$16 sps:$4 sm:$0xff]   ;;  %v10356_v19 = vld [vmem:[%s12027_s29 + $0x7a8] ss:$16 sps:$4 sm:$0xff]  }
 0x12a   : > { %7177 = vmatprep.subr.bf16.mxu0 %v10270_v20  ;;  %7874 = vmatprep.subr.bf16.mxu1 %v10273_v21  ;;  %v10361_v20 = vld [vmem:[%s12027_s29 + $0x7c4] ss:$16 sps:$4 sm:$0xff]   ;;  %v10364_v21 = vld [vmem:[%s12027_s29 + $0x7cc] ss:$16 sps:$4 sm:$0xff]  }
 0x12d   : > { %7178 = vmatpush1.bf16.msra.mxu0 %v10268_v22  ;;  %7875 = vmatpush1.bf16.msra.mxu1 %v10271_v23  ;;  %v12344_v22 = vld.sshfl [vmem:[%s12046_s4 + $0x8] sm:$0xff pattern:$0x75316420]  ;;  %v10359_v23 = vld [vmem:[%s12027_s29 + $0x7c0] ss:$16 sps:$4 sm:$0xff]  }
 0x12e   : > { %7188 = vmatprep.subr.bf16.mxu0 %v10277_v24  ;;  %7885 = vmatprep.subr.bf16.mxu1 %v10280_v25  ;;  %v10362_v24 = vld [vmem:[%s12027_s29 + $0x7c8] ss:$16 sps:$4 sm:$0xff]   ;;  %v10367_v25 = vld [vmem:[%s12027_s29 + $0x7e4] ss:$16 sps:$4 sm:$0xff]  }
 0x130   : > { %7180 = vmatmul.mubr.bf16.vlgmr.msra.gmra.mrb[0].mxu0 %v12282_v14  ;;  %7877 = vmatmul.mubr.bf16.vlgmr.msra.gmra.mrb[0].mxu1 %v12282_v14 }
 0x131   : > { %7189 = vmatpush1.bf16.msra.mxu0 %v10275_v27  ;;  %7886 = vmatpush1.bf16.msra.mxu1 %v10278_v28  ;;  %v10370_v27 = vld [vmem:[%s12027_s29 + $0x7ec] ss:$16 sps:$4 sm:$0xff]   ;;  %v10365_v28 = vld [vmem:[%s12027_s29 + $0x7e0] ss:$16 sps:$4 sm:$0xff]  }
 0x132   : > { %7190 = vmatprep.subr.bf16.mxu0 %v10283_v29  ;;  %7887 = vmatprep.subr.bf16.mxu1 %v10286_v30  ;;  %v10368_v29 = vld [vmem:[%s12027_s29 + $0x7e8] ss:$16 sps:$4 sm:$0xff]   ;;  %v10373_v30 = vld [vmem:[%s12027_s29 + $0x804] ss:$16 sps:$4 sm:$0xff]  }
 0x133   : > { %7220 = vmatprep.mubr.bf16.mxu0 %v1421_v31  ;;  %7917 = vmatprep.mubr.bf16.mxu1 %v1421_v31  ;;  %v10376_v31 = vld [vmem:[%s12027_s29 + $0x80c] ss:$16 sps:$4 sm:$0xff]  }
 0x135   : > { %7191 = vmatpush1.bf16.msra.mxu0 %v10281_v16  ;;  %7888 = vmatpush1.bf16.msra.mxu1 %v10284_v32  ;;  %v1437_v16 = vcombine.high %v12344_v22, %v12344_v22  ;;  %v1419_v32 = vcombine.high %v12282_v14, %v12282_v14  ;;  %v10377_v14 = vld [vmem:[%s12027_s29 + $0x820] ss:$16 sps:$4 sm:$0xff]  }
 0x136   : > { %7192 = vmatprep.subr.bf16.mxu0 %v10289_v33  ;;  %7889 = vmatprep.subr.bf16.mxu1 %v10292_v34  ;;  %v10371_v33 = vld [vmem:[%s12027_s29 + $0x800] ss:$16 sps:$4 sm:$0xff]   ;;  %v10374_v34 = vld [vmem:[%s12027_s29 + $0x808] ss:$16 sps:$4 sm:$0xff]  }
 0x139   : > { %7193 = vmatpush1.bf16.msra.mxu0 %v10287_v26  ;;  %7890 = vmatpush1.bf16.msra.mxu1 %v10290_v35  ;;  %v10379_v26 = vld [vmem:[%s12027_s29 + $0x824] ss:$16 sps:$4 sm:$0xff]   ;;  %v10382_v35 = vld [vmem:[%s12027_s29 + $0x82c] ss:$16 sps:$4 sm:$0xff]  }
 0x13a   : > { %7194 = vmatprep.subr.bf16.mxu0 %v10295_v36  ;;  %7891 = vmatprep.subr.bf16.mxu1 %v10298_v37  ;;  %v12363_v36 = vrot.slane %v1437_v16, %v12102_v50  ;;  %v10380_v37 = vld [vmem:[%s12027_s29 + $0x828] ss:$16 sps:$4 sm:$0xff]   ;;  %v10463_v16 = vld [vmem:[%s12027_s29 + $0x9e4] ss:$16 sps:$4 sm:$0xff]  }
 0x13d   : > { %7195 = vmatpush1.bf16.msra.mxu0 %v10293_v38  ;;  %7892 = vmatpush1.bf16.msra.mxu1 %v10296_v39  ;;  %v10385_v38 = vld [vmem:[%s12027_s29 + $0x844] ss:$16 sps:$4 sm:$0xff]   ;;  %v10388_v39 = vld [vmem:[%s12027_s29 + $0x84c] ss:$16 sps:$4 sm:$0xff]  }
 0x13e   : > { %7196 = vmatprep.subr.bf16.mxu0 %v10301_v40  ;;  %7893 = vmatprep.subr.bf16.mxu1 %v10304_v41  ;;  %v10383_v40 = vld [vmem:[%s12027_s29 + $0x840] ss:$16 sps:$4 sm:$0xff]   ;;  %v10386_v41 = vld [vmem:[%s12027_s29 + $0x848] ss:$16 sps:$4 sm:$0xff]  }
 0x141   : > { %7197 = vmatpush1.bf16.msra.mxu0 %v10299_v42  ;;  %7894 = vmatpush1.bf16.msra.mxu1 %v10302_v43  ;;  %v10391_v42 = vld [vmem:[%s12027_s29 + $0x864] ss:$16 sps:$4 sm:$0xff]   ;;  %v10394_v43 = vld [vmem:[%s12027_s29 + $0x86c] ss:$16 sps:$4 sm:$0xff]  }
 0x142   : > { %7198 = vmatprep.subr.bf16.mxu0 %v10307_v45  ;;  %7895 = vmatprep.subr.bf16.mxu1 %v10310_v46  ;;  %v10389_v45 = vld [vmem:[%s12027_s29 + $0x860] ss:$16 sps:$4 sm:$0xff]   ;;  %v10392_v46 = vld [vmem:[%s12027_s29 + $0x868] ss:$16 sps:$4 sm:$0xff]  }
 0x145   : > { %7199 = vmatpush1.bf16.msra.mxu0 %v10305_v47  ;;  %7896 = vmatpush1.bf16.msra.mxu1 %v10308_v48  ;;  %v10397_v47 = vld [vmem:[%s12027_s29 + $0x884] ss:$16 sps:$4 sm:$0xff]   ;;  %v10400_v48 = vld [vmem:[%s12027_s29 + $0x88c] ss:$16 sps:$4 sm:$0xff]  }
 0x146   : > { %7200 = vmatprep.subr.bf16.mxu0 %v10313_v49  ;;  %7897 = vmatprep.subr.bf16.mxu1 %v10316_v51  ;;  %v10395_v49 = vld [vmem:[%s12027_s29 + $0x880] ss:$16 sps:$4 sm:$0xff]   ;;  %v10398_v51 = vld [vmem:[%s12027_s29 + $0x888] ss:$16 sps:$4 sm:$0xff]  }
 0x149   : > { %7201 = vmatpush1.bf16.msra.mxu0 %v10311_v52  ;;  %7898 = vmatpush1.bf16.msra.mxu1 %v10314_v54  ;;  %v10403_v52 = vld [vmem:[%s12027_s29 + $0x8a4] ss:$16 sps:$4 sm:$0xff]   ;;  %v10406_v54 = vld [vmem:[%s12027_s29 + $0x8ac] ss:$16 sps:$4 sm:$0xff]  }
 0x14a   : > { %7202 = vmatprep.subr.bf16.mxu0 %v10319_v55  ;;  %7899 = vmatprep.subr.bf16.mxu1 %v10322_v56  ;;  %v10401_v55 = vld [vmem:[%s12027_s29 + $0x8a0] ss:$16 sps:$4 sm:$0xff]   ;;  %v10404_v56 = vld [vmem:[%s12027_s29 + $0x8a8] ss:$16 sps:$4 sm:$0xff]  }
 0x14d   : > { %7203 = vmatpush1.bf16.msra.mxu0 %v10317_v57  ;;  %7900 = vmatpush1.bf16.msra.mxu1 %v10320_v58  ;;  %v10409_v57 = vld [vmem:[%s12027_s29 + $0x8c4] ss:$16 sps:$4 sm:$0xff]   ;;  %v10412_v58 = vld [vmem:[%s12027_s29 + $0x8cc] ss:$16 sps:$4 sm:$0xff]  }
 0x14e   : > { %7204 = vmatprep.subr.bf16.mxu0 %v10325_v59  ;;  %7901 = vmatprep.subr.bf16.mxu1 %v10328_v60  ;;  %v10407_v59 = vld [vmem:[%s12027_s29 + $0x8c0] ss:$16 sps:$4 sm:$0xff]   ;;  %v10410_v60 = vld [vmem:[%s12027_s29 + $0x8c8] ss:$16 sps:$4 sm:$0xff]  }
 0x151   : > { %7205 = vmatpush1.bf16.msra.mxu0 %v10323_v61  ;;  %7902 = vmatpush1.bf16.msra.mxu1 %v10326_v62  ;;  %v10415_v61 = vld [vmem:[%s12027_s29 + $0x8e4] ss:$16 sps:$4 sm:$0xff]   ;;  %v10418_v62 = vld [vmem:[%s12027_s29 + $0x8ec] ss:$16 sps:$4 sm:$0xff]  }
 0x152   : > { %7206 = vmatprep.subr.bf16.mxu0 %v10331_v63  ;;  %7903 = vmatprep.subr.bf16.mxu1 %v10334_v0  ;;  %v10413_v63 = vld [vmem:[%s12027_s29 + $0x8e0] ss:$16 sps:$4 sm:$0xff]   ;;  %v10416_v0 = vld [vmem:[%s12027_s29 + $0x8e8] ss:$16 sps:$4 sm:$0xff]  }
 0x155   : > { %7207 = vmatpush1.bf16.msra.mxu0 %v10329_v1  ;;  %7904 = vmatpush1.bf16.msra.mxu1 %v10332_v2  ;;  %v10421_v1 = vld [vmem:[%s12027_s29 + $0x904] ss:$16 sps:$4 sm:$0xff]   ;;  %v10424_v2 = vld [vmem:[%s12027_s29 + $0x90c] ss:$16 sps:$4 sm:$0xff]  }
 0x156   : > { %7208 = vmatprep.subr.bf16.mxu0 %v10337_v3  ;;  %7905 = vmatprep.subr.bf16.mxu1 %v10340_v4  ;;  %v10419_v3 = vld [vmem:[%s12027_s29 + $0x900] ss:$16 sps:$4 sm:$0xff]   ;;  %v10422_v4 = vld [vmem:[%s12027_s29 + $0x908] ss:$16 sps:$4 sm:$0xff]  }
 0x159   : > { %7209 = vmatpush1.bf16.msra.mxu0 %v10335_v5  ;;  %7906 = vmatpush1.bf16.msra.mxu1 %v10338_v6  ;;  %v10427_v5 = vld [vmem:[%s12027_s29 + $0x924] ss:$16 sps:$4 sm:$0xff]   ;;  %v10430_v6 = vld [vmem:[%s12027_s29 + $0x92c] ss:$16 sps:$4 sm:$0xff]  }
 0x15a   : > { %7210 = vmatprep.subr.bf16.mxu0 %v10343_v7  ;;  %7907 = vmatprep.subr.bf16.mxu1 %v10346_v8  ;;  %v10425_v7 = vld [vmem:[%s12027_s29 + $0x920] ss:$16 sps:$4 sm:$0xff]   ;;  %v10428_v8 = vld [vmem:[%s12027_s29 + $0x928] ss:$16 sps:$4 sm:$0xff]  }
 0x15d   : > { %7211 = vmatpush1.bf16.msra.mxu0 %v10341_v9  ;;  %7908 = vmatpush1.bf16.msra.mxu1 %v10344_v10  ;;  %v10433_v9 = vld [vmem:[%s12027_s29 + $0x944] ss:$16 sps:$4 sm:$0xff]   ;;  %v10436_v10 = vld [vmem:[%s12027_s29 + $0x94c] ss:$16 sps:$4 sm:$0xff]  }
 0x15e   : > { %7212 = vmatprep.subr.bf16.mxu0 %v10349_v11  ;;  %7909 = vmatprep.subr.bf16.mxu1 %v10352_v12  ;;  %v10431_v11 = vld [vmem:[%s12027_s29 + $0x940] ss:$16 sps:$4 sm:$0xff]   ;;  %v10434_v12 = vld [vmem:[%s12027_s29 + $0x948] ss:$16 sps:$4 sm:$0xff]  }
 0x161   : > { %7213 = vmatpush1.bf16.msra.mxu0 %v10347_v13  ;;  %7910 = vmatpush1.bf16.msra.mxu1 %v10350_v15  ;;  %v10439_v13 = vld [vmem:[%s12027_s29 + $0x964] ss:$16 sps:$4 sm:$0xff]   ;;  %v10442_v15 = vld [vmem:[%s12027_s29 + $0x96c] ss:$16 sps:$4 sm:$0xff]  }
 0x162   : > { %7214 = vmatprep.subr.bf16.mxu0 %v10355_v17  ;;  %7911 = vmatprep.subr.bf16.mxu1 %v10358_v53  ;;  %v10437_v17 = vld [vmem:[%s12027_s29 + $0x960] ss:$16 sps:$4 sm:$0xff]   ;;  %v10440_v53 = vld [vmem:[%s12027_s29 + $0x968] ss:$16 sps:$4 sm:$0xff]  }
 0x165   : > { %7215 = vmatpush1.bf16.msra.mxu0 %v10353_v18  ;;  %7912 = vmatpush1.bf16.msra.mxu1 %v10356_v19  ;;  %v10445_v18 = vld [vmem:[%s12027_s29 + $0x984] ss:$16 sps:$4 sm:$0xff]   ;;  %v10448_v19 = vld [vmem:[%s12027_s29 + $0x98c] ss:$16 sps:$4 sm:$0xff]  }
 0x166   : > { %7216 = vmatprep.subr.bf16.mxu0 %v10361_v20  ;;  %7913 = vmatprep.subr.bf16.mxu1 %v10364_v21  ;;  %v10443_v20 = vld [vmem:[%s12027_s29 + $0x980] ss:$16 sps:$4 sm:$0xff]   ;;  %v10446_v21 = vld [vmem:[%s12027_s29 + $0x988] ss:$16 sps:$4 sm:$0xff]  }
 0x169   : > { %7217 = vmatpush1.bf16.msra.mxu0 %v10359_v23  ;;  %7914 = vmatpush1.bf16.msra.mxu1 %v10362_v24  ;;  %v10451_v23 = vld [vmem:[%s12027_s29 + $0x9a4] ss:$16 sps:$4 sm:$0xff]   ;;  %v10454_v24 = vld [vmem:[%s12027_s29 + $0x9ac] ss:$16 sps:$4 sm:$0xff]  }
 0x16a   : > { %7218 = vmatprep.subr.bf16.mxu0 %v10367_v25  ;;  %7915 = vmatprep.subr.bf16.mxu1 %v10370_v27  ;;  %v10449_v25 = vld [vmem:[%s12027_s29 + $0x9a0] ss:$16 sps:$4 sm:$0xff]   ;;  %v10452_v27 = vld [vmem:[%s12027_s29 + $0x9a8] ss:$16 sps:$4 sm:$0xff]  }
 0x16d   : > { %7219 = vmatpush1.bf16.msra.mxu0 %v10365_v28  ;;  %7916 = vmatpush1.bf16.msra.mxu1 %v10368_v29  ;;  %v10457_v28 = vld [vmem:[%s12027_s29 + $0x9c4] ss:$16 sps:$4 sm:$0xff]   ;;  %v10460_v29 = vld [vmem:[%s12027_s29 + $0x9cc] ss:$16 sps:$4 sm:$0xff]  }
 0x16e   : > { %7229 = vmatprep.subr.bf16.mxu0 %v10373_v30  ;;  %7926 = vmatprep.subr.bf16.mxu1 %v10376_v31  ;;  %v10455_v30 = vld [vmem:[%s12027_s29 + $0x9c0] ss:$16 sps:$4 sm:$0xff]   ;;  %v10458_v31 = vld [vmem:[%s12027_s29 + $0x9c8] ss:$16 sps:$4 sm:$0xff]  }
 0x170   : > { %7221 = vmatmul.mubr.bf16.vlgmr.msra.gmra.mrb[0].mxu0 %v1419_v32  ;;  %7918 = vmatmul.mubr.bf16.vlgmr.msra.gmra.mrb[0].mxu1 %v1419_v32  ;;  %v10466_v32 = vld [vmem:[%s12027_s29 + $0x9ec] ss:$16 sps:$4 sm:$0xff]  }
 0x171   : > { %7230 = vmatpush1.bf16.msra.mxu0 %v10371_v33  ;;  %7927 = vmatpush1.bf16.msra.mxu1 %v10374_v34  ;;  %v10461_v33 = vld [vmem:[%s12027_s29 + $0x9e0] ss:$16 sps:$4 sm:$0xff]   ;;  %v10464_v34 = vld [vmem:[%s12027_s29 + $0x9e8] ss:$16 sps:$4 sm:$0xff]  }
 0x172   : > { %7231 = vmatprep.subr.bf16.mxu0 %v10379_v26  ;;  %7928 = vmatprep.subr.bf16.mxu1 %v10382_v35  ;;  %v10469_v26 = vld [vmem:[%s12027_s29 + $0xa04] ss:$16 sps:$4 sm:$0xff]   ;;  %v10472_v35 = vld [vmem:[%s12027_s29 + $0xa0c] ss:$16 sps:$4 sm:$0xff]  }
 0x173   : > { %7261 = vmatprep.mubr.bf16.mxu0 %v12363_v36  ;;  %7958 = vmatprep.mubr.bf16.mxu1 %v12363_v36 }
 0x175   : > { %7232 = vmatpush1.bf16.msra.mxu0 %v10377_v14  ;;  %7929 = vmatpush1.bf16.msra.mxu1 %v10380_v37  ;;  %v12429_v14 = vrot.slane %v12344_v22, %v12102_v50  ;;  %v10467_v37 = vld [vmem:[%s12027_s29 + $0xa00] ss:$16 sps:$4 sm:$0xff]  }
 0x176   : > { %7233 = vmatprep.subr.bf16.mxu0 %v10385_v38  ;;  %7930 = vmatprep.subr.bf16.mxu1 %v10388_v39  ;;  %v10470_v38 = vld [vmem:[%s12027_s29 + $0xa08] ss:$16 sps:$4 sm:$0xff]   ;;  %v10475_v39 = vld [vmem:[%s12027_s29 + $0xa24] ss:$16 sps:$4 sm:$0xff]   ;;  %v10473_v22 = vld [vmem:[%s12027_s29 + $0xa20] ss:$16 sps:$4 sm:$0xff]  }
 0x179   : > { %7234 = vmatpush1.bf16.msra.mxu0 %v10383_v40  ;;  %7931 = vmatpush1.bf16.msra.mxu1 %v10386_v41  ;;  %v10478_v40 = vld [vmem:[%s12027_s29 + $0xa2c] ss:$16 sps:$4 sm:$0xff]   ;;  %v1469_v41 = vcombine.high %v12363_v36, %v12363_v36  ;;  %v10479_v36 = vld [vmem:[%s12027_s29 + $0xa40] ss:$16 sps:$4 sm:$0xff]  }
 0x17a   : > { %7235 = vmatprep.subr.bf16.mxu0 %v10391_v42  ;;  %7932 = vmatprep.subr.bf16.mxu1 %v10394_v43  ;;  %v10476_v42 = vld [vmem:[%s12027_s29 + $0xa28] ss:$16 sps:$4 sm:$0xff]   ;;  %v10481_v43 = vld [vmem:[%s12027_s29 + $0xa44] ss:$16 sps:$4 sm:$0xff]  }
 0x17d   : > { %7236 = vmatpush1.bf16.msra.mxu0 %v10389_v45  ;;  %7933 = vmatpush1.bf16.msra.mxu1 %v10392_v46  ;;  %v10484_v45 = vld [vmem:[%s12027_s29 + $0xa4c] ss:$16 sps:$4 sm:$0xff]   ;;  %v10482_v46 = vld [vmem:[%s12027_s29 + $0xa48] ss:$16 sps:$4 sm:$0xff]  }
 0x17e   : > { %7237 = vmatprep.subr.bf16.mxu0 %v10397_v47  ;;  %7934 = vmatprep.subr.bf16.mxu1 %v10400_v48  ;;  %v10487_v47 = vld [vmem:[%s12027_s29 + $0xa64] ss:$16 sps:$4 sm:$0xff]   ;;  %v10490_v48 = vld [vmem:[%s12027_s29 + $0xa6c] ss:$16 sps:$4 sm:$0xff]  }
 0x181   : > { %7238 = vmatpush1.bf16.msra.mxu0 %v10395_v49  ;;  %7935 = vmatpush1.bf16.msra.mxu1 %v10398_v51  ;;  %v10485_v49 = vld [vmem:[%s12027_s29 + $0xa60] ss:$16 sps:$4 sm:$0xff]   ;;  %v10488_v51 = vld [vmem:[%s12027_s29 + $0xa68] ss:$16 sps:$4 sm:$0xff]  }
 0x182   : > { %7239 = vmatprep.subr.bf16.mxu0 %v10403_v52  ;;  %7936 = vmatprep.subr.bf16.mxu1 %v10406_v54  ;;  %v10493_v52 = vld [vmem:[%s12027_s29 + $0xa84] ss:$16 sps:$4 sm:$0xff]   ;;  %v10496_v54 = vld [vmem:[%s12027_s29 + $0xa8c] ss:$16 sps:$4 sm:$0xff]  }
 0x185   : > { %7240 = vmatpush1.bf16.msra.mxu0 %v10401_v55  ;;  %7937 = vmatpush1.bf16.msra.mxu1 %v10404_v56  ;;  %v10491_v55 = vld [vmem:[%s12027_s29 + $0xa80] ss:$16 sps:$4 sm:$0xff]   ;;  %v10494_v56 = vld [vmem:[%s12027_s29 + $0xa88] ss:$16 sps:$4 sm:$0xff]  }
 0x186   : > { %7241 = vmatprep.subr.bf16.mxu0 %v10409_v57  ;;  %7938 = vmatprep.subr.bf16.mxu1 %v10412_v58  ;;  %v10499_v57 = vld [vmem:[%s12027_s29 + $0xaa4] ss:$16 sps:$4 sm:$0xff]   ;;  %v10502_v58 = vld [vmem:[%s12027_s29 + $0xaac] ss:$16 sps:$4 sm:$0xff]  }
 0x189   : > { %7242 = vmatpush1.bf16.msra.mxu0 %v10407_v59  ;;  %7939 = vmatpush1.bf16.msra.mxu1 %v10410_v60  ;;  %v10497_v59 = vld [vmem:[%s12027_s29 + $0xaa0] ss:$16 sps:$4 sm:$0xff]   ;;  %v10500_v60 = vld [vmem:[%s12027_s29 + $0xaa8] ss:$16 sps:$4 sm:$0xff]  }
 0x18a   : > { %7243 = vmatprep.subr.bf16.mxu0 %v10415_v61  ;;  %7940 = vmatprep.subr.bf16.mxu1 %v10418_v62  ;;  %v10505_v61 = vld [vmem:[%s12027_s29 + $0xac4] ss:$16 sps:$4 sm:$0xff]   ;;  %v10508_v62 = vld [vmem:[%s12027_s29 + $0xacc] ss:$16 sps:$4 sm:$0xff]  }
 0x18d   : > { %7244 = vmatpush1.bf16.msra.mxu0 %v10413_v63  ;;  %7941 = vmatpush1.bf16.msra.mxu1 %v10416_v0  ;;  %v10503_v63 = vld [vmem:[%s12027_s29 + $0xac0] ss:$16 sps:$4 sm:$0xff]   ;;  %v10506_v0 = vld [vmem:[%s12027_s29 + $0xac8] ss:$16 sps:$4 sm:$0xff]  }
 0x18e   : > { %7245 = vmatprep.subr.bf16.mxu0 %v10421_v1  ;;  %7942 = vmatprep.subr.bf16.mxu1 %v10424_v2  ;;  %v10511_v1 = vld [vmem:[%s12027_s29 + $0xae4] ss:$16 sps:$4 sm:$0xff]   ;;  %v10514_v2 = vld [vmem:[%s12027_s29 + $0xaec] ss:$16 sps:$4 sm:$0xff]  }
 0x191   : > { %7246 = vmatpush1.bf16.msra.mxu0 %v10419_v3  ;;  %7943 = vmatpush1.bf16.msra.mxu1 %v10422_v4  ;;  %v10509_v3 = vld [vmem:[%s12027_s29 + $0xae0] ss:$16 sps:$4 sm:$0xff]   ;;  %v10512_v4 = vld [vmem:[%s12027_s29 + $0xae8] ss:$16 sps:$4 sm:$0xff]  }
 0x192   : > { %7247 = vmatprep.subr.bf16.mxu0 %v10427_v5  ;;  %7944 = vmatprep.subr.bf16.mxu1 %v10430_v6  ;;  %v10517_v5 = vld [vmem:[%s12027_s29 + $0xb04] ss:$16 sps:$4 sm:$0xff]   ;;  %v10520_v6 = vld [vmem:[%s12027_s29 + $0xb0c] ss:$16 sps:$4 sm:$0xff]  }
 0x195   : > { %7248 = vmatpush1.bf16.msra.mxu0 %v10425_v7  ;;  %7945 = vmatpush1.bf16.msra.mxu1 %v10428_v8  ;;  %v10515_v7 = vld [vmem:[%s12027_s29 + $0xb00] ss:$16 sps:$4 sm:$0xff]   ;;  %v10518_v8 = vld [vmem:[%s12027_s29 + $0xb08] ss:$16 sps:$4 sm:$0xff]  }
 0x196   : > { %7249 = vmatprep.subr.bf16.mxu0 %v10433_v9  ;;  %7946 = vmatprep.subr.bf16.mxu1 %v10436_v10  ;;  %v10523_v9 = vld [vmem:[%s12027_s29 + $0xb24] ss:$16 sps:$4 sm:$0xff]   ;;  %v10526_v10 = vld [vmem:[%s12027_s29 + $0xb2c] ss:$16 sps:$4 sm:$0xff]  }
 0x199   : > { %7250 = vmatpush1.bf16.msra.mxu0 %v10431_v11  ;;  %7947 = vmatpush1.bf16.msra.mxu1 %v10434_v12  ;;  %v10521_v11 = vld [vmem:[%s12027_s29 + $0xb20] ss:$16 sps:$4 sm:$0xff]   ;;  %v10524_v12 = vld [vmem:[%s12027_s29 + $0xb28] ss:$16 sps:$4 sm:$0xff]  }
 0x19a   : > { %7251 = vmatprep.subr.bf16.mxu0 %v10439_v13  ;;  %7948 = vmatprep.subr.bf16.mxu1 %v10442_v15  ;;  %v10529_v13 = vld [vmem:[%s12027_s29 + $0xb44] ss:$16 sps:$4 sm:$0xff]   ;;  %v10532_v15 = vld [vmem:[%s12027_s29 + $0xb4c] ss:$16 sps:$4 sm:$0xff]  }
 0x19d   : > { %7252 = vmatpush1.bf16.msra.mxu0 %v10437_v17  ;;  %7949 = vmatpush1.bf16.msra.mxu1 %v10440_v53  ;;  %v10527_v17 = vld [vmem:[%s12027_s29 + $0xb40] ss:$16 sps:$4 sm:$0xff]   ;;  %v10530_v53 = vld [vmem:[%s12027_s29 + $0xb48] ss:$16 sps:$4 sm:$0xff]  }
 0x19e   : > { %7253 = vmatprep.subr.bf16.mxu0 %v10445_v18  ;;  %7950 = vmatprep.subr.bf16.mxu1 %v10448_v19  ;;  %v10535_v18 = vld [vmem:[%s12027_s29 + $0xb64] ss:$16 sps:$4 sm:$0xff]   ;;  %v10538_v19 = vld [vmem:[%s12027_s29 + $0xb6c] ss:$16 sps:$4 sm:$0xff]  }
 0x1a1   : > { %7254 = vmatpush1.bf16.msra.mxu0 %v10443_v20  ;;  %7951 = vmatpush1.bf16.msra.mxu1 %v10446_v21  ;;  %v10533_v20 = vld [vmem:[%s12027_s29 + $0xb60] ss:$16 sps:$4 sm:$0xff]   ;;  %v10536_v21 = vld [vmem:[%s12027_s29 + $0xb68] ss:$16 sps:$4 sm:$0xff]  }
 0x1a2   : > { %7255 = vmatprep.subr.bf16.mxu0 %v10451_v23  ;;  %7952 = vmatprep.subr.bf16.mxu1 %v10454_v24  ;;  %v10541_v23 = vld [vmem:[%s12027_s29 + $0xb84] ss:$16 sps:$4 sm:$0xff]   ;;  %v10544_v24 = vld [vmem:[%s12027_s29 + $0xb8c] ss:$16 sps:$4 sm:$0xff]  }
 0x1a5   : > { %7256 = vmatpush1.bf16.msra.mxu0 %v10449_v25  ;;  %7953 = vmatpush1.bf16.msra.mxu1 %v10452_v27  ;;  %v10539_v25 = vld [vmem:[%s12027_s29 + $0xb80] ss:$16 sps:$4 sm:$0xff]   ;;  %v10542_v27 = vld [vmem:[%s12027_s29 + $0xb88] ss:$16 sps:$4 sm:$0xff]  }
 0x1a6   : > { %7257 = vmatprep.subr.bf16.mxu0 %v10457_v28  ;;  %7954 = vmatprep.subr.bf16.mxu1 %v10460_v29  ;;  %v10547_v28 = vld [vmem:[%s12027_s29 + $0xba4] ss:$16 sps:$4 sm:$0xff]   ;;  %v10550_v29 = vld [vmem:[%s12027_s29 + $0xbac] ss:$16 sps:$4 sm:$0xff]  }
 0x1a9   : > { %7258 = vmatpush1.bf16.msra.mxu0 %v10455_v30  ;;  %7955 = vmatpush1.bf16.msra.mxu1 %v10458_v31  ;;  %v10545_v30 = vld [vmem:[%s12027_s29 + $0xba0] ss:$16 sps:$4 sm:$0xff]   ;;  %v10548_v31 = vld [vmem:[%s12027_s29 + $0xba8] ss:$16 sps:$4 sm:$0xff]  }
 0x1aa   : > { %7259 = vmatprep.subr.bf16.mxu0 %v10463_v16  ;;  %7956 = vmatprep.subr.bf16.mxu1 %v10466_v32  ;;  %v10553_v16 = vld [vmem:[%s12027_s29 + $0xbc4] ss:$16 sps:$4 sm:$0xff]   ;;  %v10556_v32 = vld [vmem:[%s12027_s29 + $0xbcc] ss:$16 sps:$4 sm:$0xff]  }
 0x1ad   : > { %7260 = vmatpush1.bf16.msra.mxu0 %v10461_v33  ;;  %7957 = vmatpush1.bf16.msra.mxu1 %v10464_v34  ;;  %v11622_v33 = vld [vmem:[%s12046_s4 + $0x8] sm:$0xff] }
 0x1ae   : > { %7270 = vmatprep.subr.bf16.mxu0 %v10469_v26  ;;  %7967 = vmatprep.subr.bf16.mxu1 %v10472_v35  ;;  %v1422_v34 = vcombine.high %v11622_v33, %v11622_v33  ;;  %v10551_v26 = vld [vmem:[%s12027_s29 + $0xbc0] ss:$16 sps:$4 sm:$0xff]   ;;  %v10554_v35 = vld [vmem:[%s12027_s29 + $0xbc8] ss:$16 sps:$4 sm:$0xff]  }
 0x1af   : > { %v10635_v33 = vld [vmem:[%s12027_s29 + $0xd80] ss:$16 sps:$4 sm:$0xff]  }
 0x1b0   : > { %7262 = vmatmul.mubr.bf16.vlgmr.msra.gmra.mrb[0].mxu0 %v12429_v14  ;;  %7959 = vmatmul.mubr.bf16.vlgmr.msra.gmra.mrb[0].mxu1 %v12429_v14 }
 0x1b1   : > { %7271 = vmatpush1.bf16.msra.mxu0 %v10467_v37  ;;  %7968 = vmatpush1.bf16.msra.mxu1 %v10470_v38  ;;  %v10559_v37 = vld [vmem:[%s12027_s29 + $0xbe4] ss:$16 sps:$4 sm:$0xff]   ;;  %v10562_v38 = vld [vmem:[%s12027_s29 + $0xbec] ss:$16 sps:$4 sm:$0xff]  }
 0x1b2   : > { %7272 = vmatprep.subr.bf16.mxu0 %v10475_v39  ;;  %7969 = vmatprep.subr.bf16.mxu1 %v10478_v40  ;;  %v12497_v39 = vrot.slane %v1422_v34, %v12102_v50  ;;  %v10557_v40 = vld [vmem:[%s12027_s29 + $0xbe0] ss:$16 sps:$4 sm:$0xff]   ;;  %v10638_v34 = vld [vmem:[%s12027_s29 + $0xd88] ss:$16 sps:$4 sm:$0xff]  }
 0x1b3   : > { %7302 = vmatprep.mubr.bf16.mxu0 %v1469_v41  ;;  %7999 = vmatprep.mubr.bf16.mxu1 %v1469_v41  ;;  %v10560_v41 = vld [vmem:[%s12027_s29 + $0xbe8] ss:$16 sps:$4 sm:$0xff]  }
 0x1b5   : > { %7273 = vmatpush1.bf16.msra.mxu0 %v10473_v22  ;;  %7970 = vmatpush1.bf16.msra.mxu1 %v10476_v42  ;;  %v10565_v22 = vld [vmem:[%s12027_s29 + $0xc04] ss:$16 sps:$4 sm:$0xff]   ;;  %v10568_v42 = vld [vmem:[%s12027_s29 + $0xc0c] ss:$16 sps:$4 sm:$0xff]  }
 0x1b6   : > { %7274 = vmatprep.subr.bf16.mxu0 %v10481_v43  ;;  %7971 = vmatprep.subr.bf16.mxu1 %v10484_v45  ;;  %v1438_v43 = vcombine.high %v12497_v39, %v12497_v39  ;;  %v1467_v45 = vcombine.high %v12429_v14, %v12429_v14  ;;  %v10569_v14 = vld [vmem:[%s12027_s29 + $0xc20] ss:$16 sps:$4 sm:$0xff]  }
 0x1b9   : > { %7275 = vmatpush1.bf16.msra.mxu0 %v10479_v36  ;;  %7972 = vmatpush1.bf16.msra.mxu1 %v10482_v46  ;;  %v10563_v36 = vld [vmem:[%s12027_s29 + $0xc00] ss:$16 sps:$4 sm:$0xff]   ;;  %v10566_v46 = vld [vmem:[%s12027_s29 + $0xc08] ss:$16 sps:$4 sm:$0xff]  }
 0x1ba   : > { %7276 = vmatprep.subr.bf16.mxu0 %v10487_v47  ;;  %7973 = vmatprep.subr.bf16.mxu1 %v10490_v48  ;;  %v10571_v47 = vld [vmem:[%s12027_s29 + $0xc24] ss:$16 sps:$4 sm:$0xff]   ;;  %v10574_v48 = vld [vmem:[%s12027_s29 + $0xc2c] ss:$16 sps:$4 sm:$0xff]  }
 0x1bd   : > { %7277 = vmatpush1.bf16.msra.mxu0 %v10485_v49  ;;  %7974 = vmatpush1.bf16.msra.mxu1 %v10488_v51  ;;  %v12512_v49 = vrot.slane %v1438_v43, %v12102_v50  ;;  %v10572_v51 = vld [vmem:[%s12027_s29 + $0xc28] ss:$16 sps:$4 sm:$0xff]   ;;  %v10655_v43 = vld [vmem:[%s12027_s29 + $0xde4] ss:$16 sps:$4 sm:$0xff]  }
 0x1be   : > { %7278 = vmatprep.subr.bf16.mxu0 %v10493_v52  ;;  %7975 = vmatprep.subr.bf16.mxu1 %v10496_v54  ;;  %v10577_v52 = vld [vmem:[%s12027_s29 + $0xc44] ss:$16 sps:$4 sm:$0xff]   ;;  %v10580_v54 = vld [vmem:[%s12027_s29 + $0xc4c] ss:$16 sps:$4 sm:$0xff]  }
 0x1c1   : > { %7279 = vmatpush1.bf16.msra.mxu0 %v10491_v55  ;;  %7976 = vmatpush1.bf16.msra.mxu1 %v10494_v56  ;;  %v10575_v55 = vld [vmem:[%s12027_s29 + $0xc40] ss:$16 sps:$4 sm:$0xff]   ;;  %v10578_v56 = vld [vmem:[%s12027_s29 + $0xc48] ss:$16 sps:$4 sm:$0xff]  }
 0x1c2   : > { %7280 = vmatprep.subr.bf16.mxu0 %v10499_v57  ;;  %7977 = vmatprep.subr.bf16.mxu1 %v10502_v58  ;;  %v10583_v57 = vld [vmem:[%s12027_s29 + $0xc64] ss:$16 sps:$4 sm:$0xff]   ;;  %v10586_v58 = vld [vmem:[%s12027_s29 + $0xc6c] ss:$16 sps:$4 sm:$0xff]  }
 0x1c5   : > { %7281 = vmatpush1.bf16.msra.mxu0 %v10497_v59  ;;  %7978 = vmatpush1.bf16.msra.mxu1 %v10500_v60  ;;  %v10581_v59 = vld [vmem:[%s12027_s29 + $0xc60] ss:$16 sps:$4 sm:$0xff]   ;;  %v10584_v60 = vld [vmem:[%s12027_s29 + $0xc68] ss:$16 sps:$4 sm:$0xff]  }
 0x1c6   : > { %7282 = vmatprep.subr.bf16.mxu0 %v10505_v61  ;;  %7979 = vmatprep.subr.bf16.mxu1 %v10508_v62  ;;  %v10589_v61 = vld [vmem:[%s12027_s29 + $0xc84] ss:$16 sps:$4 sm:$0xff]   ;;  %v10592_v62 = vld [vmem:[%s12027_s29 + $0xc8c] ss:$16 sps:$4 sm:$0xff]  }
 0x1c9   : > { %7283 = vmatpush1.bf16.msra.mxu0 %v10503_v63  ;;  %7980 = vmatpush1.bf16.msra.mxu1 %v10506_v0  ;;  %v10587_v63 = vld [vmem:[%s12027_s29 + $0xc80] ss:$16 sps:$4 sm:$0xff]   ;;  %v10590_v0 = vld [vmem:[%s12027_s29 + $0xc88] ss:$16 sps:$4 sm:$0xff]  }
 0x1ca   : > { %7284 = vmatprep.subr.bf16.mxu0 %v10511_v1  ;;  %7981 = vmatprep.subr.bf16.mxu1 %v10514_v2  ;;  %v10595_v1 = vld [vmem:[%s12027_s29 + $0xca4] ss:$16 sps:$4 sm:$0xff]   ;;  %v10598_v2 = vld [vmem:[%s12027_s29 + $0xcac] ss:$16 sps:$4 sm:$0xff]  }
 0x1cd   : > { %7285 = vmatpush1.bf16.msra.mxu0 %v10509_v3  ;;  %7982 = vmatpush1.bf16.msra.mxu1 %v10512_v4  ;;  %v10593_v3 = vld [vmem:[%s12027_s29 + $0xca0] ss:$16 sps:$4 sm:$0xff]   ;;  %v10596_v4 = vld [vmem:[%s12027_s29 + $0xca8] ss:$16 sps:$4 sm:$0xff]  }
 0x1ce   : > { %7286 = vmatprep.subr.bf16.mxu0 %v10517_v5  ;;  %7983 = vmatprep.subr.bf16.mxu1 %v10520_v6  ;;  %v10601_v5 = vld [vmem:[%s12027_s29 + $0xcc4] ss:$16 sps:$4 sm:$0xff]   ;;  %v10604_v6 = vld [vmem:[%s12027_s29 + $0xccc] ss:$16 sps:$4 sm:$0xff]  }
 0x1d1   : > { %7287 = vmatpush1.bf16.msra.mxu0 %v10515_v7  ;;  %7984 = vmatpush1.bf16.msra.mxu1 %v10518_v8  ;;  %v10599_v7 = vld [vmem:[%s12027_s29 + $0xcc0] ss:$16 sps:$4 sm:$0xff]   ;;  %v10602_v8 = vld [vmem:[%s12027_s29 + $0xcc8] ss:$16 sps:$4 sm:$0xff]  }
 0x1d2   : > { %7288 = vmatprep.subr.bf16.mxu0 %v10523_v9  ;;  %7985 = vmatprep.subr.bf16.mxu1 %v10526_v10  ;;  %v10607_v9 = vld [vmem:[%s12027_s29 + $0xce4] ss:$16 sps:$4 sm:$0xff]   ;;  %v10610_v10 = vld [vmem:[%s12027_s29 + $0xcec] ss:$16 sps:$4 sm:$0xff]  }
 0x1d5   : > { %7289 = vmatpush1.bf16.msra.mxu0 %v10521_v11  ;;  %7986 = vmatpush1.bf16.msra.mxu1 %v10524_v12  ;;  %v10605_v11 = vld [vmem:[%s12027_s29 + $0xce0] ss:$16 sps:$4 sm:$0xff]   ;;  %v10608_v12 = vld [vmem:[%s12027_s29 + $0xce8] ss:$16 sps:$4 sm:$0xff]  }
 0x1d6   : > { %7290 = vmatprep.subr.bf16.mxu0 %v10529_v13  ;;  %7987 = vmatprep.subr.bf16.mxu1 %v10532_v15  ;;  %v10613_v13 = vld [vmem:[%s12027_s29 + $0xd04] ss:$16 sps:$4 sm:$0xff]   ;;  %v10616_v15 = vld [vmem:[%s12027_s29 + $0xd0c] ss:$16 sps:$4 sm:$0xff]  }
 0x1d9   : > { %7291 = vmatpush1.bf16.msra.mxu0 %v10527_v17  ;;  %7988 = vmatpush1.bf16.msra.mxu1 %v10530_v53  ;;  %v10611_v17 = vld [vmem:[%s12027_s29 + $0xd00] ss:$16 sps:$4 sm:$0xff]   ;;  %v10614_v53 = vld [vmem:[%s12027_s29 + $0xd08] ss:$16 sps:$4 sm:$0xff]  }
 0x1da   : > { %7292 = vmatprep.subr.bf16.mxu0 %v10535_v18  ;;  %7989 = vmatprep.subr.bf16.mxu1 %v10538_v19  ;;  %v10619_v18 = vld [vmem:[%s12027_s29 + $0xd24] ss:$16 sps:$4 sm:$0xff]   ;;  %v10622_v19 = vld [vmem:[%s12027_s29 + $0xd2c] ss:$16 sps:$4 sm:$0xff]  }
 0x1dd   : > { %7293 = vmatpush1.bf16.msra.mxu0 %v10533_v20  ;;  %7990 = vmatpush1.bf16.msra.mxu1 %v10536_v21  ;;  %v10617_v20 = vld [vmem:[%s12027_s29 + $0xd20] ss:$16 sps:$4 sm:$0xff]   ;;  %v10620_v21 = vld [vmem:[%s12027_s29 + $0xd28] ss:$16 sps:$4 sm:$0xff]  }
 0x1de   : > { %7294 = vmatprep.subr.bf16.mxu0 %v10541_v23  ;;  %7991 = vmatprep.subr.bf16.mxu1 %v10544_v24  ;;  %v10625_v23 = vld [vmem:[%s12027_s29 + $0xd44] ss:$16 sps:$4 sm:$0xff]   ;;  %v10628_v24 = vld [vmem:[%s12027_s29 + $0xd4c] ss:$16 sps:$4 sm:$0xff]  }
 0x1e1   : > { %7295 = vmatpush1.bf16.msra.mxu0 %v10539_v25  ;;  %7992 = vmatpush1.bf16.msra.mxu1 %v10542_v27  ;;  %v10623_v25 = vld [vmem:[%s12027_s29 + $0xd40] ss:$16 sps:$4 sm:$0xff]   ;;  %v10626_v27 = vld [vmem:[%s12027_s29 + $0xd48] ss:$16 sps:$4 sm:$0xff]  }
 0x1e2   : > { %7296 = vmatprep.subr.bf16.mxu0 %v10547_v28  ;;  %7993 = vmatprep.subr.bf16.mxu1 %v10550_v29  ;;  %v10631_v28 = vld [vmem:[%s12027_s29 + $0xd64] ss:$16 sps:$4 sm:$0xff]   ;;  %v10634_v29 = vld [vmem:[%s12027_s29 + $0xd6c] ss:$16 sps:$4 sm:$0xff]  }
 0x1e5   : > { %7297 = vmatpush1.bf16.msra.mxu0 %v10545_v30  ;;  %7994 = vmatpush1.bf16.msra.mxu1 %v10548_v31  ;;  %v10629_v30 = vld [vmem:[%s12027_s29 + $0xd60] ss:$16 sps:$4 sm:$0xff]   ;;  %v10632_v31 = vld [vmem:[%s12027_s29 + $0xd68] ss:$16 sps:$4 sm:$0xff]  }
 0x1e6   : > { %7298 = vmatprep.subr.bf16.mxu0 %v10553_v16  ;;  %7995 = vmatprep.subr.bf16.mxu1 %v10556_v32  ;;  %v10637_v16 = vld [vmem:[%s12027_s29 + $0xd84] ss:$16 sps:$4 sm:$0xff]   ;;  %v10640_v32 = vld [vmem:[%s12027_s29 + $0xd8c] ss:$16 sps:$4 sm:$0xff]  }
 0x1e9   : > { %7299 = vmatpush1.bf16.msra.mxu0 %v10551_v26  ;;  %7996 = vmatpush1.bf16.msra.mxu1 %v10554_v35  ;;  %v10643_v26 = vld [vmem:[%s12027_s29 + $0xda4] ss:$16 sps:$4 sm:$0xff]   ;;  %v10646_v35 = vld [vmem:[%s12027_s29 + $0xdac] ss:$16 sps:$4 sm:$0xff]  }
 0x1ea   : > { %7300 = vmatprep.subr.bf16.mxu0 %v10559_v37  ;;  %7997 = vmatprep.subr.bf16.mxu1 %v10562_v38  ;;  %v10641_v37 = vld [vmem:[%s12027_s29 + $0xda0] ss:$16 sps:$4 sm:$0xff]   ;;  %v10644_v38 = vld [vmem:[%s12027_s29 + $0xda8] ss:$16 sps:$4 sm:$0xff]  }
 0x1ed   : > { %7301 = vmatpush1.bf16.msra.mxu0 %v10557_v40  ;;  %7998 = vmatpush1.bf16.msra.mxu1 %v10560_v41  ;;  %v10649_v40 = vld [vmem:[%s12027_s29 + $0xdc4] ss:$16 sps:$4 sm:$0xff]   ;;  %v10652_v41 = vld [vmem:[%s12027_s29 + $0xdcc] ss:$16 sps:$4 sm:$0xff]  }
 0x1ee   : > { %7311 = vmatprep.subr.bf16.mxu0 %v10565_v22  ;;  %8008 = vmatprep.subr.bf16.mxu1 %v10568_v42  ;;  %v10647_v22 = vld [vmem:[%s12027_s29 + $0xdc0] ss:$16 sps:$4 sm:$0xff]   ;;  %v10650_v42 = vld [vmem:[%s12027_s29 + $0xdc8] ss:$16 sps:$4 sm:$0xff]  }
 0x1f0   : > { %7303 = vmatmul.mubr.bf16.vlgmr.msra.gmra.mrb[0].mxu0 %v1467_v45  ;;  %8000 = vmatmul.mubr.bf16.vlgmr.msra.gmra.mrb[0].mxu1 %v1467_v45  ;;  %v10658_v45 = vld [vmem:[%s12027_s29 + $0xdec] ss:$16 sps:$4 sm:$0xff]  }
 0x1f1   : > { %7312 = vmatpush1.bf16.msra.mxu0 %v10563_v36  ;;  %8009 = vmatpush1.bf16.msra.mxu1 %v10566_v46  ;;  %v10653_v36 = vld [vmem:[%s12027_s29 + $0xde0] ss:$16 sps:$4 sm:$0xff]   ;;  %v10656_v46 = vld [vmem:[%s12027_s29 + $0xde8] ss:$16 sps:$4 sm:$0xff]  }
 0x1f2   : > { %7313 = vmatprep.subr.bf16.mxu0 %v10571_v47  ;;  %8010 = vmatprep.subr.bf16.mxu1 %v10574_v48  ;;  %v10662_v47 = vld [vmem:[%s12027_s29 + $0xe04] ss:$16 sps:$4 sm:$0xff]   ;;  %v10665_v48 = vld [vmem:[%s12027_s29 + $0xe0c] ss:$16 sps:$4 sm:$0xff]  }
 0x1f3   : > { %7343 = vmatprep.mubr.bf16.mxu0 %v12512_v49  ;;  %8040 = vmatprep.mubr.bf16.mxu1 %v12512_v49 }
 0x1f5   : > { %7314 = vmatpush1.bf16.msra.mxu0 %v10569_v14  ;;  %8011 = vmatpush1.bf16.msra.mxu1 %v10572_v51  ;;  %v12578_v14 = vrot.slane %v12497_v39, %v12102_v50  ;;  %v10660_v51 = vld [vmem:[%s12027_s29 + $0xe00] ss:$16 sps:$4 sm:$0xff]  }
 0x1f6   : > { %7315 = vmatprep.subr.bf16.mxu0 %v10577_v52  ;;  %8012 = vmatprep.subr.bf16.mxu1 %v10580_v54  ;;  %v10663_v52 = vld [vmem:[%s12027_s29 + $0xe08] ss:$16 sps:$4 sm:$0xff]   ;;  %v10668_v54 = vld [vmem:[%s12027_s29 + $0xe24] ss:$16 sps:$4 sm:$0xff]   ;;  %v10666_v39 = vld [vmem:[%s12027_s29 + $0xe20] ss:$16 sps:$4 sm:$0xff]  }
 0x1f9   : > { %7316 = vmatpush1.bf16.msra.mxu0 %v10575_v55  ;;  %8013 = vmatpush1.bf16.msra.mxu1 %v10578_v56  ;;  %v10671_v55 = vld [vmem:[%s12027_s29 + $0xe2c] ss:$16 sps:$4 sm:$0xff]   ;;  %v1470_v56 = vcombine.high %v12512_v49, %v12512_v49  ;;  %v10672_v49 = vld [vmem:[%s12027_s29 + $0xe40] ss:$16 sps:$4 sm:$0xff]  }
 0x1fa   : > { %7317 = vmatprep.subr.bf16.mxu0 %v10583_v57  ;;  %8014 = vmatprep.subr.bf16.mxu1 %v10586_v58  ;;  %v10669_v57 = vld [vmem:[%s12027_s29 + $0xe28] ss:$16 sps:$4 sm:$0xff]   ;;  %v10674_v58 = vld [vmem:[%s12027_s29 + $0xe44] ss:$16 sps:$4 sm:$0xff]  }
 0x1fd   : > { %7318 = vmatpush1.bf16.msra.mxu0 %v10581_v59  ;;  %8015 = vmatpush1.bf16.msra.mxu1 %v10584_v60  ;;  %v10677_v59 = vld [vmem:[%s12027_s29 + $0xe4c] ss:$16 sps:$4 sm:$0xff]   ;;  %v10675_v60 = vld [vmem:[%s12027_s29 + $0xe48] ss:$16 sps:$4 sm:$0xff]  }
 0x1fe   : > { %7319 = vmatprep.subr.bf16.mxu0 %v10589_v61  ;;  %8016 = vmatprep.subr.bf16.mxu1 %v10592_v62  ;;  %v10680_v61 = vld [vmem:[%s12027_s29 + $0xe64] ss:$16 sps:$4 sm:$0xff]   ;;  %v10683_v62 = vld [vmem:[%s12027_s29 + $0xe6c] ss:$16 sps:$4 sm:$0xff]  }
 0x201   : > { %7320 = vmatpush1.bf16.msra.mxu0 %v10587_v63  ;;  %8017 = vmatpush1.bf16.msra.mxu1 %v10590_v0  ;;  %v10678_v63 = vld [vmem:[%s12027_s29 + $0xe60] ss:$16 sps:$4 sm:$0xff]   ;;  %v10681_v0 = vld [vmem:[%s12027_s29 + $0xe68] ss:$16 sps:$4 sm:$0xff]  }
 0x202   : > { %7321 = vmatprep.subr.bf16.mxu0 %v10595_v1  ;;  %8018 = vmatprep.subr.bf16.mxu1 %v10598_v2  ;;  %v10686_v1 = vld [vmem:[%s12027_s29 + $0xe84] ss:$16 sps:$4 sm:$0xff]   ;;  %v10689_v2 = vld [vmem:[%s12027_s29 + $0xe8c] ss:$16 sps:$4 sm:$0xff]  }
 0x205   : > { %7322 = vmatpush1.bf16.msra.mxu0 %v10593_v3  ;;  %8019 = vmatpush1.bf16.msra.mxu1 %v10596_v4  ;;  %v10684_v3 = vld [vmem:[%s12027_s29 + $0xe80] ss:$16 sps:$4 sm:$0xff]   ;;  %v10687_v4 = vld [vmem:[%s12027_s29 + $0xe88] ss:$16 sps:$4 sm:$0xff]  }
 0x206   : > { %7323 = vmatprep.subr.bf16.mxu0 %v10601_v5  ;;  %8020 = vmatprep.subr.bf16.mxu1 %v10604_v6  ;;  %v10692_v5 = vld [vmem:[%s12027_s29 + $0xea4] ss:$16 sps:$4 sm:$0xff]   ;;  %v10695_v6 = vld [vmem:[%s12027_s29 + $0xeac] ss:$16 sps:$4 sm:$0xff]  }
 0x209   : > { %7324 = vmatpush1.bf16.msra.mxu0 %v10599_v7  ;;  %8021 = vmatpush1.bf16.msra.mxu1 %v10602_v8  ;;  %v10690_v7 = vld [vmem:[%s12027_s29 + $0xea0] ss:$16 sps:$4 sm:$0xff]   ;;  %v10693_v8 = vld [vmem:[%s12027_s29 + $0xea8] ss:$16 sps:$4 sm:$0xff]  }
 0x20a   : > { %7325 = vmatprep.subr.bf16.mxu0 %v10607_v9  ;;  %8022 = vmatprep.subr.bf16.mxu1 %v10610_v10  ;;  %v10698_v9 = vld [vmem:[%s12027_s29 + $0xec4] ss:$16 sps:$4 sm:$0xff]   ;;  %v10701_v10 = vld [vmem:[%s12027_s29 + $0xecc] ss:$16 sps:$4 sm:$0xff]  }
 0x20d   : > { %7326 = vmatpush1.bf16.msra.mxu0 %v10605_v11  ;;  %8023 = vmatpush1.bf16.msra.mxu1 %v10608_v12  ;;  %v10696_v11 = vld [vmem:[%s12027_s29 + $0xec0] ss:$16 sps:$4 sm:$0xff]   ;;  %v10699_v12 = vld [vmem:[%s12027_s29 + $0xec8] ss:$16 sps:$4 sm:$0xff]  }
 0x20e   : > { %7327 = vmatprep.subr.bf16.mxu0 %v10613_v13  ;;  %8024 = vmatprep.subr.bf16.mxu1 %v10616_v15  ;;  %v10704_v13 = vld [vmem:[%s12027_s29 + $0xee4] ss:$16 sps:$4 sm:$0xff]   ;;  %v10707_v15 = vld [vmem:[%s12027_s29 + $0xeec] ss:$16 sps:$4 sm:$0xff]  }
 0x211   : > { %7328 = vmatpush1.bf16.msra.mxu0 %v10611_v17  ;;  %8025 = vmatpush1.bf16.msra.mxu1 %v10614_v53  ;;  %v10702_v17 = vld [vmem:[%s12027_s29 + $0xee0] ss:$16 sps:$4 sm:$0xff]   ;;  %v10705_v53 = vld [vmem:[%s12027_s29 + $0xee8] ss:$16 sps:$4 sm:$0xff]  }
 0x212   : > { %7329 = vmatprep.subr.bf16.mxu0 %v10619_v18  ;;  %8026 = vmatprep.subr.bf16.mxu1 %v10622_v19  ;;  %v10710_v18 = vld [vmem:[%s12027_s29 + $0xf04] ss:$16 sps:$4 sm:$0xff]   ;;  %v10713_v19 = vld [vmem:[%s12027_s29 + $0xf0c] ss:$16 sps:$4 sm:$0xff]  }
 0x215   : > { %7330 = vmatpush1.bf16.msra.mxu0 %v10617_v20  ;;  %8027 = vmatpush1.bf16.msra.mxu1 %v10620_v21  ;;  %v10708_v20 = vld [vmem:[%s12027_s29 + $0xf00] ss:$16 sps:$4 sm:$0xff]   ;;  %v10711_v21 = vld [vmem:[%s12027_s29 + $0xf08] ss:$16 sps:$4 sm:$0xff]  }
 0x216   : > { %7331 = vmatprep.subr.bf16.mxu0 %v10625_v23  ;;  %8028 = vmatprep.subr.bf16.mxu1 %v10628_v24  ;;  %v10716_v23 = vld [vmem:[%s12027_s29 + $0xf24] ss:$16 sps:$4 sm:$0xff]   ;;  %v10719_v24 = vld [vmem:[%s12027_s29 + $0xf2c] ss:$16 sps:$4 sm:$0xff]  }
 0x219   : > { %7332 = vmatpush1.bf16.msra.mxu0 %v10623_v25  ;;  %8029 = vmatpush1.bf16.msra.mxu1 %v10626_v27  ;;  %v10714_v25 = vld [vmem:[%s12027_s29 + $0xf20] ss:$16 sps:$4 sm:$0xff]   ;;  %v10717_v27 = vld [vmem:[%s12027_s29 + $0xf28] ss:$16 sps:$4 sm:$0xff]  }
 0x21a   : > { %7333 = vmatprep.subr.bf16.mxu0 %v10631_v28  ;;  %8030 = vmatprep.subr.bf16.mxu1 %v10634_v29  ;;  %v10722_v28 = vld [vmem:[%s12027_s29 + $0xf44] ss:$16 sps:$4 sm:$0xff]   ;;  %v10725_v29 = vld [vmem:[%s12027_s29 + $0xf4c] ss:$16 sps:$4 sm:$0xff]  }
 0x21d   : > { %7334 = vmatpush1.bf16.msra.mxu0 %v10629_v30  ;;  %8031 = vmatpush1.bf16.msra.mxu1 %v10632_v31  ;;  %v10720_v30 = vld [vmem:[%s12027_s29 + $0xf40] ss:$16 sps:$4 sm:$0xff]   ;;  %v10723_v31 = vld [vmem:[%s12027_s29 + $0xf48] ss:$16 sps:$4 sm:$0xff]  }
 0x21e   : > { %7335 = vmatprep.subr.bf16.mxu0 %v10637_v16  ;;  %8032 = vmatprep.subr.bf16.mxu1 %v10640_v32  ;;  %v10728_v16 = vld [vmem:[%s12027_s29 + $0xf64] ss:$16 sps:$4 sm:$0xff]   ;;  %v10731_v32 = vld [vmem:[%s12027_s29 + $0xf6c] ss:$16 sps:$4 sm:$0xff]  }
 0x221   : > { %7336 = vmatpush1.bf16.msra.mxu0 %v10635_v33  ;;  %8033 = vmatpush1.bf16.msra.mxu1 %v10638_v34  ;;  %v10726_v33 = vld [vmem:[%s12027_s29 + $0xf60] ss:$16 sps:$4 sm:$0xff]   ;;  %v10729_v34 = vld [vmem:[%s12027_s29 + $0xf68] ss:$16 sps:$4 sm:$0xff]  }
 0x222   : > { %7337 = vmatprep.subr.bf16.mxu0 %v10643_v26  ;;  %8034 = vmatprep.subr.bf16.mxu1 %v10646_v35  ;;  %v10734_v26 = vld [vmem:[%s12027_s29 + $0xf84] ss:$16 sps:$4 sm:$0xff]   ;;  %v10737_v35 = vld [vmem:[%s12027_s29 + $0xf8c] ss:$16 sps:$4 sm:$0xff]  }
 0x225   : > { %7338 = vmatpush1.bf16.msra.mxu0 %v10641_v37  ;;  %8035 = vmatpush1.bf16.msra.mxu1 %v10644_v38  ;;  %v10732_v37 = vld [vmem:[%s12027_s29 + $0xf80] ss:$16 sps:$4 sm:$0xff]   ;;  %v10735_v38 = vld [vmem:[%s12027_s29 + $0xf88] ss:$16 sps:$4 sm:$0xff]  }
 0x226   : > { %7339 = vmatprep.subr.bf16.mxu0 %v10649_v40  ;;  %8036 = vmatprep.subr.bf16.mxu1 %v10652_v41  ;;  %v10740_v40 = vld [vmem:[%s12027_s29 + $0xfa4] ss:$16 sps:$4 sm:$0xff]   ;;  %v10743_v41 = vld [vmem:[%s12027_s29 + $0xfac] ss:$16 sps:$4 sm:$0xff]  }
 0x229   : > { %7340 = vmatpush1.bf16.msra.mxu0 %v10647_v22  ;;  %8037 = vmatpush1.bf16.msra.mxu1 %v10650_v42  ;;  %v10738_v22 = vld [vmem:[%s12027_s29 + $0xfa0] ss:$16 sps:$4 sm:$0xff]   ;;  %v10741_v42 = vld [vmem:[%s12027_s29 + $0xfa8] ss:$16 sps:$4 sm:$0xff]  }
 0x22a   : > { %7341 = vmatprep.subr.bf16.mxu0 %v10655_v43  ;;  %8038 = vmatprep.subr.bf16.mxu1 %v10658_v45  ;;  %v10746_v43 = vld [vmem:[%s12027_s29 + $0xfc4] ss:$16 sps:$4 sm:$0xff]   ;;  %v10749_v45 = vld [vmem:[%s12027_s29 + $0xfcc] ss:$16 sps:$4 sm:$0xff]  }
 0x22d   : > { %7342 = vmatpush1.bf16.msra.mxu0 %v10653_v36  ;;  %8039 = vmatpush1.bf16.msra.mxu1 %v10656_v46  ;;  %v12641_v36 = vld [vmem:[%s12046_s4 + $0x10] sm:$0xff] }
 0x22e   : > { %7352 = vmatprep.subr.bf16.mxu0 %v10662_v47  ;;  %8049 = vmatprep.subr.bf16.mxu1 %v10665_v48  ;;  %v10744_v46 = vld [vmem:[%s12027_s29 + $0xfc0] ss:$16 sps:$4 sm:$0xff]   ;;  %v10747_v47 = vld [vmem:[%s12027_s29 + $0xfc8] ss:$16 sps:$4 sm:$0xff]   ;;  %v10752_v48 = vld [vmem:[%s12027_s29 + $0xfe4] ss:$16 sps:$4 sm:$0xff]  }
 0x230   : > { %7344 = vmatmul.mubr.bf16.vlgmr.msra.gmra.mrb[0].mxu0 %v12578_v14  ;;  %8041 = vmatmul.mubr.bf16.vlgmr.msra.gmra.mrb[0].mxu1 %v12578_v14 }
 0x231   : > { %7353 = vmatpush1.bf16.msra.mxu0 %v10660_v51  ;;  %8050 = vmatpush1.bf16.msra.mxu1 %v10663_v52  ;;  %v10755_v51 = vld [vmem:[%s12027_s29 + $0xfec] ss:$16 sps:$4 sm:$0xff]   ;;  %v12649_v52 = vrot.slane %v12641_v36, %v12102_v50 }
 0x232   : > { %7354 = vmatprep.subr.bf16.mxu0 %v10668_v54  ;;  %8051 = vmatprep.subr.bf16.mxu1 %v10671_v55  ;;  %v10750_v54 = vld [vmem:[%s12027_s29 + $0xfe0] ss:$16 sps:$4 sm:$0xff]   ;;  %v10753_v55 = vld [vmem:[%s12027_s29 + $0xfe8] ss:$16 sps:$4 sm:$0xff]  }
 0x233   : > { %7384 = vmatprep.mubr.bf16.mxu0 %v1470_v56  ;;  %8081 = vmatprep.mubr.bf16.mxu1 %v1470_v56  ;;  %v10758_v56 = vld [vmem:[%s12027_s29 + $0x1004] ss:$16 sps:$4 sm:$0xff]  }
 0x235   : > { %7355 = vmatpush1.bf16.msra.mxu0 %v10666_v39  ;;  %8052 = vmatpush1.bf16.msra.mxu1 %v10669_v57  ;;  %v10761_v39 = vld [vmem:[%s12027_s29 + $0x100c] ss:$16 sps:$4 sm:$0xff]   ;;  %v1486_v57 = vcombine.high %v12649_v52, %v12649_v52 }
 0x236   : > { %7356 = vmatprep.subr.bf16.mxu0 %v10674_v58  ;;  %8053 = vmatprep.subr.bf16.mxu1 %v10677_v59  ;;  %v1468_v58 = vcombine.high %v12578_v14, %v12578_v14  ;;  %v10756_v59 = vld [vmem:[%s12027_s29 + $0x1000] ss:$16 sps:$4 sm:$0xff]  }
 0x237   : > { %v10762_v14 = vld [vmem:[%s12027_s29 + $0x1020] ss:$16 sps:$4 sm:$0xff]  }
 0x239   : > { %7357 = vmatpush1.bf16.msra.mxu0 %v10672_v49  ;;  %8054 = vmatpush1.bf16.msra.mxu1 %v10675_v60  ;;  %v10759_v49 = vld [vmem:[%s12027_s29 + $0x1008] ss:$16 sps:$4 sm:$0xff]   ;;  %v10764_v60 = vld [vmem:[%s12027_s29 + $0x1024] ss:$16 sps:$4 sm:$0xff]  }
 0x23a   : > { %7358 = vmatprep.subr.bf16.mxu0 %v10680_v61  ;;  %8055 = vmatprep.subr.bf16.mxu1 %v10683_v62  ;;  %v10767_v61 = vld [vmem:[%s12027_s29 + $0x102c] ss:$16 sps:$4 sm:$0xff]   ;;  %v12664_v62 = vrot.slane %v1486_v57, %v12102_v50  ;;  %v10843_v57 = vld [vmem:[%s12027_s29 + $0x11c8] ss:$16 sps:$4 sm:$0xff]  }
 0x23d   : > { %7359 = vmatpush1.bf16.msra.mxu0 %v10678_v63  ;;  %8056 = vmatpush1.bf16.msra.mxu1 %v10681_v0  ;;  %v10765_v63 = vld [vmem:[%s12027_s29 + $0x1028] ss:$16 sps:$4 sm:$0xff]   ;;  %v10770_v0 = vld [vmem:[%s12027_s29 + $0x1044] ss:$16 sps:$4 sm:$0xff]  }
 0x23e   : > { %7360 = vmatprep.subr.bf16.mxu0 %v10686_v1  ;;  %8057 = vmatprep.subr.bf16.mxu1 %v10689_v2  ;;  %v10773_v1 = vld [vmem:[%s12027_s29 + $0x104c] ss:$16 sps:$4 sm:$0xff]   ;;  %v10768_v2 = vld [vmem:[%s12027_s29 + $0x1040] ss:$16 sps:$4 sm:$0xff]  }
 0x241   : > { %7361 = vmatpush1.bf16.msra.mxu0 %v10684_v3  ;;  %8058 = vmatpush1.bf16.msra.mxu1 %v10687_v4  ;;  %v10771_v3 = vld [vmem:[%s12027_s29 + $0x1048] ss:$16 sps:$4 sm:$0xff]   ;;  %v10776_v4 = vld [vmem:[%s12027_s29 + $0x1064] ss:$16 sps:$4 sm:$0xff]  }
 0x242   : > { %7362 = vmatprep.subr.bf16.mxu0 %v10692_v5  ;;  %8059 = vmatprep.subr.bf16.mxu1 %v10695_v6  ;;  %v10779_v5 = vld [vmem:[%s12027_s29 + $0x106c] ss:$16 sps:$4 sm:$0xff]   ;;  %v10774_v6 = vld [vmem:[%s12027_s29 + $0x1060] ss:$16 sps:$4 sm:$0xff]  }
 0x245   : > { %7363 = vmatpush1.bf16.msra.mxu0 %v10690_v7  ;;  %8060 = vmatpush1.bf16.msra.mxu1 %v10693_v8  ;;  %v10777_v7 = vld [vmem:[%s12027_s29 + $0x1068] ss:$16 sps:$4 sm:$0xff]   ;;  %v10782_v8 = vld [vmem:[%s12027_s29 + $0x1084] ss:$16 sps:$4 sm:$0xff]  }
 0x246   : > { %7364 = vmatprep.subr.bf16.mxu0 %v10698_v9  ;;  %8061 = vmatprep.subr.bf16.mxu1 %v10701_v10  ;;  %v10785_v9 = vld [vmem:[%s12027_s29 + $0x108c] ss:$16 sps:$4 sm:$0xff]   ;;  %v10780_v10 = vld [vmem:[%s12027_s29 + $0x1080] ss:$16 sps:$4 sm:$0xff]  }
 0x249   : > { %7365 = vmatpush1.bf16.msra.mxu0 %v10696_v11  ;;  %8062 = vmatpush1.bf16.msra.mxu1 %v10699_v12  ;;  %v10783_v11 = vld [vmem:[%s12027_s29 + $0x1088] ss:$16 sps:$4 sm:$0xff]   ;;  %v10788_v12 = vld [vmem:[%s12027_s29 + $0x10a4] ss:$16 sps:$4 sm:$0xff]  }
 0x24a   : > { %7366 = vmatprep.subr.bf16.mxu0 %v10704_v13  ;;  %8063 = vmatprep.subr.bf16.mxu1 %v10707_v15  ;;  %v10791_v13 = vld [vmem:[%s12027_s29 + $0x10ac] ss:$16 sps:$4 sm:$0xff]   ;;  %v10786_v15 = vld [vmem:[%s12027_s29 + $0x10a0] ss:$16 sps:$4 sm:$0xff]  }
 0x24d   : > { %7367 = vmatpush1.bf16.msra.mxu0 %v10702_v17  ;;  %8064 = vmatpush1.bf16.msra.mxu1 %v10705_v53  ;;  %v10789_v17 = vld [vmem:[%s12027_s29 + $0x10a8] ss:$16 sps:$4 sm:$0xff]   ;;  %v10794_v53 = vld [vmem:[%s12027_s29 + $0x10c4] ss:$16 sps:$4 sm:$0xff]  }
 0x24e   : > { %7368 = vmatprep.subr.bf16.mxu0 %v10710_v18  ;;  %8065 = vmatprep.subr.bf16.mxu1 %v10713_v19  ;;  %v10797_v18 = vld [vmem:[%s12027_s29 + $0x10cc] ss:$16 sps:$4 sm:$0xff]   ;;  %v10792_v19 = vld [vmem:[%s12027_s29 + $0x10c0] ss:$16 sps:$4 sm:$0xff]  }
 0x251   : > { %7369 = vmatpush1.bf16.msra.mxu0 %v10708_v20  ;;  %8066 = vmatpush1.bf16.msra.mxu1 %v10711_v21  ;;  %v10795_v20 = vld [vmem:[%s12027_s29 + $0x10c8] ss:$16 sps:$4 sm:$0xff]   ;;  %v10800_v21 = vld [vmem:[%s12027_s29 + $0x10e4] ss:$16 sps:$4 sm:$0xff]  }
 0x252   : > { %7370 = vmatprep.subr.bf16.mxu0 %v10716_v23  ;;  %8067 = vmatprep.subr.bf16.mxu1 %v10719_v24  ;;  %v10803_v23 = vld [vmem:[%s12027_s29 + $0x10ec] ss:$16 sps:$4 sm:$0xff]   ;;  %v10798_v24 = vld [vmem:[%s12027_s29 + $0x10e0] ss:$16 sps:$4 sm:$0xff]  }
 0x255   : > { %7371 = vmatpush1.bf16.msra.mxu0 %v10714_v25  ;;  %8068 = vmatpush1.bf16.msra.mxu1 %v10717_v27  ;;  %v10801_v25 = vld [vmem:[%s12027_s29 + $0x10e8] ss:$16 sps:$4 sm:$0xff]   ;;  %v10806_v27 = vld [vmem:[%s12027_s29 + $0x1104] ss:$16 sps:$4 sm:$0xff]  }
 0x256   : > { %7372 = vmatprep.subr.bf16.mxu0 %v10722_v28  ;;  %8069 = vmatprep.subr.bf16.mxu1 %v10725_v29  ;;  %v10809_v28 = vld [vmem:[%s12027_s29 + $0x110c] ss:$16 sps:$4 sm:$0xff]   ;;  %v10804_v29 = vld [vmem:[%s12027_s29 + $0x1100] ss:$16 sps:$4 sm:$0xff]  }
 0x259   : > { %7373 = vmatpush1.bf16.msra.mxu0 %v10720_v30  ;;  %8070 = vmatpush1.bf16.msra.mxu1 %v10723_v31  ;;  %v10807_v30 = vld [vmem:[%s12027_s29 + $0x1108] ss:$16 sps:$4 sm:$0xff]   ;;  %v10812_v31 = vld [vmem:[%s12027_s29 + $0x1124] ss:$16 sps:$4 sm:$0xff]  }
 0x25a   : > { %7374 = vmatprep.subr.bf16.mxu0 %v10728_v16  ;;  %8071 = vmatprep.subr.bf16.mxu1 %v10731_v32  ;;  %v10815_v16 = vld [vmem:[%s12027_s29 + $0x112c] ss:$16 sps:$4 sm:$0xff]   ;;  %v10810_v32 = vld [vmem:[%s12027_s29 + $0x1120] ss:$16 sps:$4 sm:$0xff]  }
 0x25d   : > { %7375 = vmatpush1.bf16.msra.mxu0 %v10726_v33  ;;  %8072 = vmatpush1.bf16.msra.mxu1 %v10729_v34  ;;  %v10813_v33 = vld [vmem:[%s12027_s29 + $0x1128] ss:$16 sps:$4 sm:$0xff]   ;;  %v10818_v34 = vld [vmem:[%s12027_s29 + $0x1144] ss:$16 sps:$4 sm:$0xff]  }
 0x25e   : > { %7376 = vmatprep.subr.bf16.mxu0 %v10734_v26  ;;  %8073 = vmatprep.subr.bf16.mxu1 %v10737_v35  ;;  %v10821_v26 = vld [vmem:[%s12027_s29 + $0x114c] ss:$16 sps:$4 sm:$0xff]   ;;  %v10816_v35 = vld [vmem:[%s12027_s29 + $0x1140] ss:$16 sps:$4 sm:$0xff]  }
 0x261   : > { %7377 = vmatpush1.bf16.msra.mxu0 %v10732_v37  ;;  %8074 = vmatpush1.bf16.msra.mxu1 %v10735_v38  ;;  %v10819_v37 = vld [vmem:[%s12027_s29 + $0x1148] ss:$16 sps:$4 sm:$0xff]   ;;  %v10824_v38 = vld [vmem:[%s12027_s29 + $0x1164] ss:$16 sps:$4 sm:$0xff]  }
 0x262   : > { %7378 = vmatprep.subr.bf16.mxu0 %v10740_v40  ;;  %8075 = vmatprep.subr.bf16.mxu1 %v10743_v41  ;;  %v10827_v40 = vld [vmem:[%s12027_s29 + $0x116c] ss:$16 sps:$4 sm:$0xff]   ;;  %v10822_v41 = vld [vmem:[%s12027_s29 + $0x1160] ss:$16 sps:$4 sm:$0xff]  }
 0x265   : > { %7379 = vmatpush1.bf16.msra.mxu0 %v10738_v22  ;;  %8076 = vmatpush1.bf16.msra.mxu1 %v10741_v42  ;;  %v10825_v22 = vld [vmem:[%s12027_s29 + $0x1168] ss:$16 sps:$4 sm:$0xff]   ;;  %v10830_v42 = vld [vmem:[%s12027_s29 + $0x1184] ss:$16 sps:$4 sm:$0xff]  }
 0x266   : > { %7380 = vmatprep.subr.bf16.mxu0 %v10746_v43  ;;  %8077 = vmatprep.subr.bf16.mxu1 %v10749_v45  ;;  %v10833_v43 = vld [vmem:[%s12027_s29 + $0x118c] ss:$16 sps:$4 sm:$0xff]   ;;  %v10828_v45 = vld [vmem:[%s12027_s29 + $0x1180] ss:$16 sps:$4 sm:$0xff]  }
 0x269   : > { %7381 = vmatpush1.bf16.msra.mxu0 %v10744_v46  ;;  %8078 = vmatpush1.bf16.msra.mxu1 %v10747_v47  ;;  %v10831_v46 = vld [vmem:[%s12027_s29 + $0x1188] ss:$16 sps:$4 sm:$0xff]   ;;  %v10836_v47 = vld [vmem:[%s12027_s29 + $0x11a4] ss:$16 sps:$4 sm:$0xff]  }
 0x26a   : > { %7382 = vmatprep.subr.bf16.mxu0 %v10752_v48  ;;  %8079 = vmatprep.subr.bf16.mxu1 %v10755_v51  ;;  %v10839_v48 = vld [vmem:[%s12027_s29 + $0x11ac] ss:$16 sps:$4 sm:$0xff]   ;;  %v10834_v51 = vld [vmem:[%s12027_s29 + $0x11a0] ss:$16 sps:$4 sm:$0xff]  }
 0x26d   : > { %7383 = vmatpush1.bf16.msra.mxu0 %v10750_v54  ;;  %8080 = vmatpush1.bf16.msra.mxu1 %v10753_v55  ;;  %v10837_v54 = vld [vmem:[%s12027_s29 + $0x11a8] ss:$16 sps:$4 sm:$0xff]   ;;  %v10842_v55 = vld [vmem:[%s12027_s29 + $0x11c4] ss:$16 sps:$4 sm:$0xff]  }
 0x26e   : > { %7393 = vmatprep.subr.bf16.mxu0 %v10758_v56  ;;  %8090 = vmatprep.subr.bf16.mxu1 %v10761_v39  ;;  %v10845_v56 = vld [vmem:[%s12027_s29 + $0x11cc] ss:$16 sps:$4 sm:$0xff]   ;;  %v10840_v39 = vld [vmem:[%s12027_s29 + $0x11c0] ss:$16 sps:$4 sm:$0xff]  }
 0x270   : > { %7385 = vmatmul.mubr.bf16.vlgmr.msra.gmra.mrb[0].mxu0 %v1468_v58  ;;  %8082 = vmatmul.mubr.bf16.vlgmr.msra.gmra.mrb[0].mxu1 %v1468_v58  ;;  %v10848_v58 = vld [vmem:[%s12027_s29 + $0x11e4] ss:$16 sps:$4 sm:$0xff]  }
 0x271   : > { %7394 = vmatpush1.bf16.msra.mxu0 %v10756_v59  ;;  %8091 = vmatpush1.bf16.msra.mxu1 %v10759_v49  ;;  %v10851_v59 = vld [vmem:[%s12027_s29 + $0x11ec] ss:$16 sps:$4 sm:$0xff]   ;;  %v10846_v49 = vld [vmem:[%s12027_s29 + $0x11e0] ss:$16 sps:$4 sm:$0xff]  }
 0x272   : > { %7395 = vmatprep.subr.bf16.mxu0 %v10764_v60  ;;  %8092 = vmatprep.subr.bf16.mxu1 %v10767_v61  ;;  %v10849_v60 = vld [vmem:[%s12027_s29 + $0x11e8] ss:$16 sps:$4 sm:$0xff]   ;;  %v10854_v61 = vld [vmem:[%s12027_s29 + $0x1204] ss:$16 sps:$4 sm:$0xff]  }
 0x273   : > { %7425 = vmatprep.mubr.bf16.mxu0 %v12664_v62  ;;  %8122 = vmatprep.mubr.bf16.mxu1 %v12664_v62 }
 0x275   : > { %7396 = vmatpush1.bf16.msra.mxu0 %v10762_v14  ;;  %8093 = vmatpush1.bf16.msra.mxu1 %v10765_v63  ;;  %v10857_v14 = vld [vmem:[%s12027_s29 + $0x120c] ss:$16 sps:$4 sm:$0xff]   ;;  %v12730_v63 = vrot.slane %v12649_v52, %v12102_v50  ;;  %v10858_v52 = vld [vmem:[%s12027_s29 + $0x1220] ss:$16 sps:$4 sm:$0xff]  }
 0x276   : > { %7397 = vmatprep.subr.bf16.mxu0 %v10770_v0  ;;  %8094 = vmatprep.subr.bf16.mxu1 %v10773_v1  ;;  %v10852_v0 = vld [vmem:[%s12027_s29 + $0x1200] ss:$16 sps:$4 sm:$0xff]   ;;  %v10855_v1 = vld [vmem:[%s12027_s29 + $0x1208] ss:$16 sps:$4 sm:$0xff]  }
 0x279   : > { %7398 = vmatpush1.bf16.msra.mxu0 %v10768_v2  ;;  %8095 = vmatpush1.bf16.msra.mxu1 %v10771_v3  ;;  %v10860_v2 = vld [vmem:[%s12027_s29 + $0x1224] ss:$16 sps:$4 sm:$0xff]   ;;  %v10863_v3 = vld [vmem:[%s12027_s29 + $0x122c] ss:$16 sps:$4 sm:$0xff]  }
 0x27a   : > { %7399 = vmatprep.subr.bf16.mxu0 %v10776_v4  ;;  %8096 = vmatprep.subr.bf16.mxu1 %v10779_v5  ;;  %v1518_v4 = vcombine.high %v12664_v62, %v12664_v62  ;;  %v10861_v5 = vld [vmem:[%s12027_s29 + $0x1228] ss:$16 sps:$4 sm:$0xff]   ;;  %v10864_v62 = vld [vmem:[%s12027_s29 + $0x1240] ss:$16 sps:$4 sm:$0xff]  }
 0x27d   : > { %7400 = vmatpush1.bf16.msra.mxu0 %v10774_v6  ;;  %8097 = vmatpush1.bf16.msra.mxu1 %v10777_v7  ;;  %v10866_v6 = vld [vmem:[%s12027_s29 + $0x1244] ss:$16 sps:$4 sm:$0xff]   ;;  %v10869_v7 = vld [vmem:[%s12027_s29 + $0x124c] ss:$16 sps:$4 sm:$0xff]  }
 0x27e   : > { %7401 = vmatprep.subr.bf16.mxu0 %v10782_v8  ;;  %8098 = vmatprep.subr.bf16.mxu1 %v10785_v9  ;;  %v10867_v8 = vld [vmem:[%s12027_s29 + $0x1248] ss:$16 sps:$4 sm:$0xff]   ;;  %v10872_v9 = vld [vmem:[%s12027_s29 + $0x1264] ss:$16 sps:$4 sm:$0xff]  }
 0x281   : > { %7402 = vmatpush1.bf16.msra.mxu0 %v10780_v10  ;;  %8099 = vmatpush1.bf16.msra.mxu1 %v10783_v11  ;;  %v10875_v10 = vld [vmem:[%s12027_s29 + $0x126c] ss:$16 sps:$4 sm:$0xff]   ;;  %v10870_v11 = vld [vmem:[%s12027_s29 + $0x1260] ss:$16 sps:$4 sm:$0xff]  }
 0x282   : > { %7403 = vmatprep.subr.bf16.mxu0 %v10788_v12  ;;  %8100 = vmatprep.subr.bf16.mxu1 %v10791_v13  ;;  %v10873_v12 = vld [vmem:[%s12027_s29 + $0x1268] ss:$16 sps:$4 sm:$0xff]   ;;  %v10878_v13 = vld [vmem:[%s12027_s29 + $0x1284] ss:$16 sps:$4 sm:$0xff]  }
 0x285   : > { %7404 = vmatpush1.bf16.msra.mxu0 %v10786_v15  ;;  %8101 = vmatpush1.bf16.msra.mxu1 %v10789_v17  ;;  %v10881_v15 = vld [vmem:[%s12027_s29 + $0x128c] ss:$16 sps:$4 sm:$0xff]   ;;  %v10876_v17 = vld [vmem:[%s12027_s29 + $0x1280] ss:$16 sps:$4 sm:$0xff]  }
 0x286   : > { %7405 = vmatprep.subr.bf16.mxu0 %v10794_v53  ;;  %8102 = vmatprep.subr.bf16.mxu1 %v10797_v18  ;;  %v10879_v53 = vld [vmem:[%s12027_s29 + $0x1288] ss:$16 sps:$4 sm:$0xff]   ;;  %v10884_v18 = vld [vmem:[%s12027_s29 + $0x12a4] ss:$16 sps:$4 sm:$0xff]  }
 0x289   : > { %7406 = vmatpush1.bf16.msra.mxu0 %v10792_v19  ;;  %8103 = vmatpush1.bf16.msra.mxu1 %v10795_v20  ;;  %v10887_v19 = vld [vmem:[%s12027_s29 + $0x12ac] ss:$16 sps:$4 sm:$0xff]   ;;  %v10882_v20 = vld [vmem:[%s12027_s29 + $0x12a0] ss:$16 sps:$4 sm:$0xff]  }
 0x28a   : > { %7407 = vmatprep.subr.bf16.mxu0 %v10800_v21  ;;  %8104 = vmatprep.subr.bf16.mxu1 %v10803_v23  ;;  %v10885_v21 = vld [vmem:[%s12027_s29 + $0x12a8] ss:$16 sps:$4 sm:$0xff]   ;;  %v10890_v23 = vld [vmem:[%s12027_s29 + $0x12c4] ss:$16 sps:$4 sm:$0xff]  }
 0x28d   : > { %7408 = vmatpush1.bf16.msra.mxu0 %v10798_v24  ;;  %8105 = vmatpush1.bf16.msra.mxu1 %v10801_v25  ;;  %v10893_v24 = vld [vmem:[%s12027_s29 + $0x12cc] ss:$16 sps:$4 sm:$0xff]   ;;  %v10888_v25 = vld [vmem:[%s12027_s29 + $0x12c0] ss:$16 sps:$4 sm:$0xff]  }
 0x28e   : > { %7409 = vmatprep.subr.bf16.mxu0 %v10806_v27  ;;  %8106 = vmatprep.subr.bf16.mxu1 %v10809_v28  ;;  %v10891_v27 = vld [vmem:[%s12027_s29 + $0x12c8] ss:$16 sps:$4 sm:$0xff]   ;;  %v10896_v28 = vld [vmem:[%s12027_s29 + $0x12e4] ss:$16 sps:$4 sm:$0xff]  }
 0x291   : > { %7410 = vmatpush1.bf16.msra.mxu0 %v10804_v29  ;;  %8107 = vmatpush1.bf16.msra.mxu1 %v10807_v30  ;;  %v10899_v29 = vld [vmem:[%s12027_s29 + $0x12ec] ss:$16 sps:$4 sm:$0xff]   ;;  %v10894_v30 = vld [vmem:[%s12027_s29 + $0x12e0] ss:$16 sps:$4 sm:$0xff]  }
 0x292   : > { %7411 = vmatprep.subr.bf16.mxu0 %v10812_v31  ;;  %8108 = vmatprep.subr.bf16.mxu1 %v10815_v16  ;;  %v10897_v31 = vld [vmem:[%s12027_s29 + $0x12e8] ss:$16 sps:$4 sm:$0xff]   ;;  %v10902_v16 = vld [vmem:[%s12027_s29 + $0x1304] ss:$16 sps:$4 sm:$0xff]  }
 0x295   : > { %7412 = vmatpush1.bf16.msra.mxu0 %v10810_v32  ;;  %8109 = vmatpush1.bf16.msra.mxu1 %v10813_v33  ;;  %v10905_v32 = vld [vmem:[%s12027_s29 + $0x130c] ss:$16 sps:$4 sm:$0xff]   ;;  %v10900_v33 = vld [vmem:[%s12027_s29 + $0x1300] ss:$16 sps:$4 sm:$0xff]  }
 0x296   : > { %7413 = vmatprep.subr.bf16.mxu0 %v10818_v34  ;;  %8110 = vmatprep.subr.bf16.mxu1 %v10821_v26  ;;  %v10903_v34 = vld [vmem:[%s12027_s29 + $0x1308] ss:$16 sps:$4 sm:$0xff]   ;;  %v10908_v26 = vld [vmem:[%s12027_s29 + $0x1324] ss:$16 sps:$4 sm:$0xff]  }
 0x299   : > { %7414 = vmatpush1.bf16.msra.mxu0 %v10816_v35  ;;  %8111 = vmatpush1.bf16.msra.mxu1 %v10819_v37  ;;  %v10911_v35 = vld [vmem:[%s12027_s29 + $0x132c] ss:$16 sps:$4 sm:$0xff]   ;;  %v10906_v37 = vld [vmem:[%s12027_s29 + $0x1320] ss:$16 sps:$4 sm:$0xff]  }
 0x29a   : > { %7415 = vmatprep.subr.bf16.mxu0 %v10824_v38  ;;  %8112 = vmatprep.subr.bf16.mxu1 %v10827_v40  ;;  %v10909_v38 = vld [vmem:[%s12027_s29 + $0x1328] ss:$16 sps:$4 sm:$0xff]   ;;  %v10914_v40 = vld [vmem:[%s12027_s29 + $0x1344] ss:$16 sps:$4 sm:$0xff]  }
 0x29d   : > { %7416 = vmatpush1.bf16.msra.mxu0 %v10822_v41  ;;  %8113 = vmatpush1.bf16.msra.mxu1 %v10825_v22  ;;  %v10917_v41 = vld [vmem:[%s12027_s29 + $0x134c] ss:$16 sps:$4 sm:$0xff]   ;;  %v10912_v22 = vld [vmem:[%s12027_s29 + $0x1340] ss:$16 sps:$4 sm:$0xff]  }
 0x29e   : > { %7417 = vmatprep.subr.bf16.mxu0 %v10830_v42  ;;  %8114 = vmatprep.subr.bf16.mxu1 %v10833_v43  ;;  %v10915_v42 = vld [vmem:[%s12027_s29 + $0x1348] ss:$16 sps:$4 sm:$0xff]   ;;  %v10920_v43 = vld [vmem:[%s12027_s29 + $0x1364] ss:$16 sps:$4 sm:$0xff]  }
 0x2a1   : > { %7418 = vmatpush1.bf16.msra.mxu0 %v10828_v45  ;;  %8115 = vmatpush1.bf16.msra.mxu1 %v10831_v46  ;;  %v10923_v45 = vld [vmem:[%s12027_s29 + $0x136c] ss:$16 sps:$4 sm:$0xff]   ;;  %v10918_v46 = vld [vmem:[%s12027_s29 + $0x1360] ss:$16 sps:$4 sm:$0xff]  }
 0x2a2   : > { %7419 = vmatprep.subr.bf16.mxu0 %v10836_v47  ;;  %8116 = vmatprep.subr.bf16.mxu1 %v10839_v48  ;;  %v10921_v47 = vld [vmem:[%s12027_s29 + $0x1368] ss:$16 sps:$4 sm:$0xff]   ;;  %v10926_v48 = vld [vmem:[%s12027_s29 + $0x1384] ss:$16 sps:$4 sm:$0xff]  }
 0x2a5   : > { %7420 = vmatpush1.bf16.msra.mxu0 %v10834_v51  ;;  %8117 = vmatpush1.bf16.msra.mxu1 %v10837_v54  ;;  %v10929_v51 = vld [vmem:[%s12027_s29 + $0x138c] ss:$16 sps:$4 sm:$0xff]   ;;  %v10924_v54 = vld [vmem:[%s12027_s29 + $0x1380] ss:$16 sps:$4 sm:$0xff]  }
 0x2a6   : > { %7421 = vmatprep.subr.bf16.mxu0 %v10842_v55  ;;  %8118 = vmatprep.subr.bf16.mxu1 %v10845_v56  ;;  %v10927_v55 = vld [vmem:[%s12027_s29 + $0x1388] ss:$16 sps:$4 sm:$0xff]   ;;  %v10932_v56 = vld [vmem:[%s12027_s29 + $0x13a4] ss:$16 sps:$4 sm:$0xff]  }
 0x2a9   : > { %7422 = vmatpush1.bf16.msra.mxu0 %v10840_v39  ;;  %8119 = vmatpush1.bf16.msra.mxu1 %v10843_v57  ;;  %v10935_v39 = vld [vmem:[%s12027_s29 + $0x13ac] ss:$16 sps:$4 sm:$0xff]   ;;  %v10930_v57 = vld [vmem:[%s12027_s29 + $0x13a0] ss:$16 sps:$4 sm:$0xff]  }
 0x2aa   : > { %7423 = vmatprep.subr.bf16.mxu0 %v10848_v58  ;;  %8120 = vmatprep.subr.bf16.mxu1 %v10851_v59  ;;  %v10933_v58 = vld [vmem:[%s12027_s29 + $0x13a8] ss:$16 sps:$4 sm:$0xff]   ;;  %v10938_v59 = vld [vmem:[%s12027_s29 + $0x13c4] ss:$16 sps:$4 sm:$0xff]  }
 0x2ad   : > { %7424 = vmatpush1.bf16.msra.mxu0 %v10846_v49  ;;  %8121 = vmatpush1.bf16.msra.mxu1 %v10849_v60  ;;  %v10941_v49 = vld [vmem:[%s12027_s29 + $0x13cc] ss:$16 sps:$4 sm:$0xff]   ;;  %v1471_v60 = vcombine.high %v12641_v36, %v12641_v36  ;;  %v10942_v36 = vld [vmem:[%s12027_s29 + $0x13e0] ss:$16 sps:$4 sm:$0xff]  }
 0x2ae   : > { %7434 = vmatprep.subr.bf16.mxu0 %v10854_v61  ;;  %8131 = vmatprep.subr.bf16.mxu1 %v10857_v14  ;;  %v10936_v61 = vld [vmem:[%s12027_s29 + $0x13c0] ss:$16 sps:$4 sm:$0xff]   ;;  %v10939_v14 = vld [vmem:[%s12027_s29 + $0x13c8] ss:$16 sps:$4 sm:$0xff]  }
 0x2b0   : > { %7426 = vmatmul.mubr.bf16.vlgmr.msra.gmra.mrb[0].mxu0 %v12730_v63  ;;  %8123 = vmatmul.mubr.bf16.vlgmr.msra.gmra.mrb[0].mxu1 %v12730_v63 }
 0x2b1   : > { %7435 = vmatpush1.bf16.msra.mxu0 %v10852_v0  ;;  %8132 = vmatpush1.bf16.msra.mxu1 %v10855_v1  ;;  %v10944_v0 = vld [vmem:[%s12027_s29 + $0x13e4] ss:$16 sps:$4 sm:$0xff]   ;;  %v10947_v1 = vld [vmem:[%s12027_s29 + $0x13ec] ss:$16 sps:$4 sm:$0xff]  }
 0x2b2   : > { %7436 = vmatprep.subr.bf16.mxu0 %v10860_v2  ;;  %8133 = vmatprep.subr.bf16.mxu1 %v10863_v3  ;;  %v12799_v2 = vrot.slane %v1471_v60, %v12102_v50  ;;  %v10945_v3 = vld [vmem:[%s12027_s29 + $0x13e8] ss:$16 sps:$4 sm:$0xff]  }
 0x2b3   : > { %7466 = vmatprep.mubr.bf16.mxu0 %v1518_v4  ;;  %8163 = vmatprep.mubr.bf16.mxu1 %v1518_v4  ;;  %v10950_v4 = vld [vmem:[%s12027_s29 + $0x1404] ss:$16 sps:$4 sm:$0xff]   ;;  %v11023_v60 = vld [vmem:[%s12027_s29 + $0x1588] ss:$16 sps:$4 sm:$0xff]  }
 0x2b5   : > { %7437 = vmatpush1.bf16.msra.mxu0 %v10858_v52  ;;  %8134 = vmatpush1.bf16.msra.mxu1 %v10861_v5  ;;  %v10953_v52 = vld [vmem:[%s12027_s29 + $0x140c] ss:$16 sps:$4 sm:$0xff]   ;;  %v1487_v5 = vcombine.high %v12799_v2, %v12799_v2 }
 0x2b6   : > { %7438 = vmatprep.subr.bf16.mxu0 %v10866_v6  ;;  %8135 = vmatprep.subr.bf16.mxu1 %v10869_v7  ;;  %v1516_v6 = vcombine.high %v12730_v63, %v12730_v63  ;;  %v10948_v7 = vld [vmem:[%s12027_s29 + $0x1400] ss:$16 sps:$4 sm:$0xff]  }
 0x2b7   : > { %v10954_v63 = vld [vmem:[%s12027_s29 + $0x1420] ss:$16 sps:$4 sm:$0xff]  }
 0x2b9   : > { %7439 = vmatpush1.bf16.msra.mxu0 %v10864_v62  ;;  %8136 = vmatpush1.bf16.msra.mxu1 %v10867_v8  ;;  %v10951_v62 = vld [vmem:[%s12027_s29 + $0x1408] ss:$16 sps:$4 sm:$0xff]   ;;  %v10956_v8 = vld [vmem:[%s12027_s29 + $0x1424] ss:$16 sps:$4 sm:$0xff]  }
 0x2ba   : > { %7440 = vmatprep.subr.bf16.mxu0 %v10872_v9  ;;  %8137 = vmatprep.subr.bf16.mxu1 %v10875_v10  ;;  %v10959_v9 = vld [vmem:[%s12027_s29 + $0x142c] ss:$16 sps:$4 sm:$0xff]   ;;  %v12814_v10 = vrot.slane %v1487_v5, %v12102_v50  ;;  %v11040_v5 = vld [vmem:[%s12027_s29 + $0x15e4] ss:$16 sps:$4 sm:$0xff]  }
 0x2bd   : > { %7441 = vmatpush1.bf16.msra.mxu0 %v10870_v11  ;;  %8138 = vmatpush1.bf16.msra.mxu1 %v10873_v12  ;;  %v10957_v11 = vld [vmem:[%s12027_s29 + $0x1428] ss:$16 sps:$4 sm:$0xff]   ;;  %v10962_v12 = vld [vmem:[%s12027_s29 + $0x1444] ss:$16 sps:$4 sm:$0xff]  }
 0x2be   : > { %7442 = vmatprep.subr.bf16.mxu0 %v10878_v13  ;;  %8139 = vmatprep.subr.bf16.mxu1 %v10881_v15  ;;  %v10965_v13 = vld [vmem:[%s12027_s29 + $0x144c] ss:$16 sps:$4 sm:$0xff]   ;;  %v10960_v15 = vld [vmem:[%s12027_s29 + $0x1440] ss:$16 sps:$4 sm:$0xff]  }
 0x2c1   : > { %7443 = vmatpush1.bf16.msra.mxu0 %v10876_v17  ;;  %8140 = vmatpush1.bf16.msra.mxu1 %v10879_v53  ;;  %v10963_v17 = vld [vmem:[%s12027_s29 + $0x1448] ss:$16 sps:$4 sm:$0xff]   ;;  %v10968_v53 = vld [vmem:[%s12027_s29 + $0x1464] ss:$16 sps:$4 sm:$0xff]  }
 0x2c2   : > { %7444 = vmatprep.subr.bf16.mxu0 %v10884_v18  ;;  %8141 = vmatprep.subr.bf16.mxu1 %v10887_v19  ;;  %v10971_v18 = vld [vmem:[%s12027_s29 + $0x146c] ss:$16 sps:$4 sm:$0xff]   ;;  %v10966_v19 = vld [vmem:[%s12027_s29 + $0x1460] ss:$16 sps:$4 sm:$0xff]  }
 0x2c5   : > { %7445 = vmatpush1.bf16.msra.mxu0 %v10882_v20  ;;  %8142 = vmatpush1.bf16.msra.mxu1 %v10885_v21  ;;  %v10969_v20 = vld [vmem:[%s12027_s29 + $0x1468] ss:$16 sps:$4 sm:$0xff]   ;;  %v10974_v21 = vld [vmem:[%s12027_s29 + $0x1484] ss:$16 sps:$4 sm:$0xff]  }
 0x2c6   : > { %7446 = vmatprep.subr.bf16.mxu0 %v10890_v23  ;;  %8143 = vmatprep.subr.bf16.mxu1 %v10893_v24  ;;  %v10977_v23 = vld [vmem:[%s12027_s29 + $0x148c] ss:$16 sps:$4 sm:$0xff]   ;;  %v10972_v24 = vld [vmem:[%s12027_s29 + $0x1480] ss:$16 sps:$4 sm:$0xff]  }
 0x2c9   : > { %7447 = vmatpush1.bf16.msra.mxu0 %v10888_v25  ;;  %8144 = vmatpush1.bf16.msra.mxu1 %v10891_v27  ;;  %v10975_v25 = vld [vmem:[%s12027_s29 + $0x1488] ss:$16 sps:$4 sm:$0xff]   ;;  %v10980_v27 = vld [vmem:[%s12027_s29 + $0x14a4] ss:$16 sps:$4 sm:$0xff]  }
 0x2ca   : > { %7448 = vmatprep.subr.bf16.mxu0 %v10896_v28  ;;  %8145 = vmatprep.subr.bf16.mxu1 %v10899_v29  ;;  %v10983_v28 = vld [vmem:[%s12027_s29 + $0x14ac] ss:$16 sps:$4 sm:$0xff]   ;;  %v10978_v29 = vld [vmem:[%s12027_s29 + $0x14a0] ss:$16 sps:$4 sm:$0xff]  }
 0x2cd   : > { %7449 = vmatpush1.bf16.msra.mxu0 %v10894_v30  ;;  %8146 = vmatpush1.bf16.msra.mxu1 %v10897_v31  ;;  %v10981_v30 = vld [vmem:[%s12027_s29 + $0x14a8] ss:$16 sps:$4 sm:$0xff]   ;;  %v10986_v31 = vld [vmem:[%s12027_s29 + $0x14c4] ss:$16 sps:$4 sm:$0xff]  }
 0x2ce   : > { %7450 = vmatprep.subr.bf16.mxu0 %v10902_v16  ;;  %8147 = vmatprep.subr.bf16.mxu1 %v10905_v32  ;;  %v10989_v16 = vld [vmem:[%s12027_s29 + $0x14cc] ss:$16 sps:$4 sm:$0xff]   ;;  %v10984_v32 = vld [vmem:[%s12027_s29 + $0x14c0] ss:$16 sps:$4 sm:$0xff]  }
 0x2d1   : > { %7451 = vmatpush1.bf16.msra.mxu0 %v10900_v33  ;;  %8148 = vmatpush1.bf16.msra.mxu1 %v10903_v34  ;;  %v10987_v33 = vld [vmem:[%s12027_s29 + $0x14c8] ss:$16 sps:$4 sm:$0xff]   ;;  %v10992_v34 = vld [vmem:[%s12027_s29 + $0x14e4] ss:$16 sps:$4 sm:$0xff]  }
 0x2d2   : > { %7452 = vmatprep.subr.bf16.mxu0 %v10908_v26  ;;  %8149 = vmatprep.subr.bf16.mxu1 %v10911_v35  ;;  %v10995_v26 = vld [vmem:[%s12027_s29 + $0x14ec] ss:$16 sps:$4 sm:$0xff]   ;;  %v10990_v35 = vld [vmem:[%s12027_s29 + $0x14e0] ss:$16 sps:$4 sm:$0xff]  }
 0x2d5   : > { %7453 = vmatpush1.bf16.msra.mxu0 %v10906_v37  ;;  %8150 = vmatpush1.bf16.msra.mxu1 %v10909_v38  ;;  %v10993_v37 = vld [vmem:[%s12027_s29 + $0x14e8] ss:$16 sps:$4 sm:$0xff]   ;;  %v10998_v38 = vld [vmem:[%s12027_s29 + $0x1504] ss:$16 sps:$4 sm:$0xff]  }
 0x2d6   : > { %7454 = vmatprep.subr.bf16.mxu0 %v10914_v40  ;;  %8151 = vmatprep.subr.bf16.mxu1 %v10917_v41  ;;  %v11001_v40 = vld [vmem:[%s12027_s29 + $0x150c] ss:$16 sps:$4 sm:$0xff]   ;;  %v10996_v41 = vld [vmem:[%s12027_s29 + $0x1500] ss:$16 sps:$4 sm:$0xff]  }
 0x2d9   : > { %7455 = vmatpush1.bf16.msra.mxu0 %v10912_v22  ;;  %8152 = vmatpush1.bf16.msra.mxu1 %v10915_v42  ;;  %v10999_v22 = vld [vmem:[%s12027_s29 + $0x1508] ss:$16 sps:$4 sm:$0xff]   ;;  %v11004_v42 = vld [vmem:[%s12027_s29 + $0x1524] ss:$16 sps:$4 sm:$0xff]  }
 0x2da   : > { %7456 = vmatprep.subr.bf16.mxu0 %v10920_v43  ;;  %8153 = vmatprep.subr.bf16.mxu1 %v10923_v45  ;;  %v11007_v43 = vld [vmem:[%s12027_s29 + $0x152c] ss:$16 sps:$4 sm:$0xff]   ;;  %v11002_v45 = vld [vmem:[%s12027_s29 + $0x1520] ss:$16 sps:$4 sm:$0xff]  }
 0x2dd   : > { %7457 = vmatpush1.bf16.msra.mxu0 %v10918_v46  ;;  %8154 = vmatpush1.bf16.msra.mxu1 %v10921_v47  ;;  %v11005_v46 = vld [vmem:[%s12027_s29 + $0x1528] ss:$16 sps:$4 sm:$0xff]   ;;  %v11010_v47 = vld [vmem:[%s12027_s29 + $0x1544] ss:$16 sps:$4 sm:$0xff]  }
 0x2de   : > { %7458 = vmatprep.subr.bf16.mxu0 %v10926_v48  ;;  %8155 = vmatprep.subr.bf16.mxu1 %v10929_v51  ;;  %v11013_v48 = vld [vmem:[%s12027_s29 + $0x154c] ss:$16 sps:$4 sm:$0xff]   ;;  %v11008_v51 = vld [vmem:[%s12027_s29 + $0x1540] ss:$16 sps:$4 sm:$0xff]  }
 0x2e1   : > { %7459 = vmatpush1.bf16.msra.mxu0 %v10924_v54  ;;  %8156 = vmatpush1.bf16.msra.mxu1 %v10927_v55  ;;  %v11011_v54 = vld [vmem:[%s12027_s29 + $0x1548] ss:$16 sps:$4 sm:$0xff]   ;;  %v11016_v55 = vld [vmem:[%s12027_s29 + $0x1564] ss:$16 sps:$4 sm:$0xff]  }
 0x2e2   : > { %7460 = vmatprep.subr.bf16.mxu0 %v10932_v56  ;;  %8157 = vmatprep.subr.bf16.mxu1 %v10935_v39  ;;  %v11019_v56 = vld [vmem:[%s12027_s29 + $0x156c] ss:$16 sps:$4 sm:$0xff]   ;;  %v11014_v39 = vld [vmem:[%s12027_s29 + $0x1560] ss:$16 sps:$4 sm:$0xff]  }
 0x2e5   : > { %7461 = vmatpush1.bf16.msra.mxu0 %v10930_v57  ;;  %8158 = vmatpush1.bf16.msra.mxu1 %v10933_v58  ;;  %v11017_v57 = vld [vmem:[%s12027_s29 + $0x1568] ss:$16 sps:$4 sm:$0xff]   ;;  %v11022_v58 = vld [vmem:[%s12027_s29 + $0x1584] ss:$16 sps:$4 sm:$0xff]  }
 0x2e6   : > { %7462 = vmatprep.subr.bf16.mxu0 %v10938_v59  ;;  %8159 = vmatprep.subr.bf16.mxu1 %v10941_v49  ;;  %v11025_v59 = vld [vmem:[%s12027_s29 + $0x158c] ss:$16 sps:$4 sm:$0xff]   ;;  %v11020_v49 = vld [vmem:[%s12027_s29 + $0x1580] ss:$16 sps:$4 sm:$0xff]  }
 0x2e9   : > { %7463 = vmatpush1.bf16.msra.mxu0 %v10936_v61  ;;  %8160 = vmatpush1.bf16.msra.mxu1 %v10939_v14  ;;  %v11028_v61 = vld [vmem:[%s12027_s29 + $0x15a4] ss:$16 sps:$4 sm:$0xff]   ;;  %v11031_v14 = vld [vmem:[%s12027_s29 + $0x15ac] ss:$16 sps:$4 sm:$0xff]  }
 0x2ea   : > { %7464 = vmatprep.subr.bf16.mxu0 %v10944_v0  ;;  %8161 = vmatprep.subr.bf16.mxu1 %v10947_v1  ;;  %v11026_v0 = vld [vmem:[%s12027_s29 + $0x15a0] ss:$16 sps:$4 sm:$0xff]   ;;  %v11029_v1 = vld [vmem:[%s12027_s29 + $0x15a8] ss:$16 sps:$4 sm:$0xff]  }
 0x2ed   : > { %7465 = vmatpush1.bf16.msra.mxu0 %v10942_v36  ;;  %8162 = vmatpush1.bf16.msra.mxu1 %v10945_v3  ;;  %v11034_v36 = vld [vmem:[%s12027_s29 + $0x15c4] ss:$16 sps:$4 sm:$0xff]   ;;  %v11037_v3 = vld [vmem:[%s12027_s29 + $0x15cc] ss:$16 sps:$4 sm:$0xff]  }
 0x2ee   : > { %7475 = vmatprep.subr.bf16.mxu0 %v10950_v4  ;;  %8172 = vmatprep.subr.bf16.mxu1 %v10953_v52  ;;  %v11032_v4 = vld [vmem:[%s12027_s29 + $0x15c0] ss:$16 sps:$4 sm:$0xff]   ;;  %v11035_v52 = vld [vmem:[%s12027_s29 + $0x15c8] ss:$16 sps:$4 sm:$0xff]  }
 0x2f0   : > { %7467 = vmatmul.mubr.bf16.vlgmr.msra.gmra.mrb[0].mxu0 %v1516_v6  ;;  %8164 = vmatmul.mubr.bf16.vlgmr.msra.gmra.mrb[0].mxu1 %v1516_v6  ;;  %v11043_v6 = vld [vmem:[%s12027_s29 + $0x15ec] ss:$16 sps:$4 sm:$0xff]  }
 0x2f1   : > { %7476 = vmatpush1.bf16.msra.mxu0 %v10948_v7  ;;  %8173 = vmatpush1.bf16.msra.mxu1 %v10951_v62  ;;  %v11038_v7 = vld [vmem:[%s12027_s29 + $0x15e0] ss:$16 sps:$4 sm:$0xff]   ;;  %v11041_v62 = vld [vmem:[%s12027_s29 + $0x15e8] ss:$16 sps:$4 sm:$0xff]  }
 0x2f2   : > { %7477 = vmatprep.subr.bf16.mxu0 %v10956_v8  ;;  %8174 = vmatprep.subr.bf16.mxu1 %v10959_v9  ;;  %v11047_v8 = vld [vmem:[%s12027_s29 + $0x1604] ss:$16 sps:$4 sm:$0xff]   ;;  %v11050_v9 = vld [vmem:[%s12027_s29 + $0x160c] ss:$16 sps:$4 sm:$0xff]  }
 0x2f3   : > { %7507 = vmatprep.mubr.bf16.mxu0 %v12814_v10  ;;  %8204 = vmatprep.mubr.bf16.mxu1 %v12814_v10 }
 0x2f5   : > { %7478 = vmatpush1.bf16.msra.mxu0 %v10954_v63  ;;  %8175 = vmatpush1.bf16.msra.mxu1 %v10957_v11  ;;  %v12880_v63 = vrot.slane %v12799_v2, %v12102_v50  ;;  %v11045_v11 = vld [vmem:[%s12027_s29 + $0x1600] ss:$16 sps:$4 sm:$0xff]  }
 0x2f6   : > { %7479 = vmatprep.subr.bf16.mxu0 %v10962_v12  ;;  %8176 = vmatprep.subr.bf16.mxu1 %v10965_v13  ;;  %v11048_v12 = vld [vmem:[%s12027_s29 + $0x1608] ss:$16 sps:$4 sm:$0xff]   ;;  %v11053_v13 = vld [vmem:[%s12027_s29 + $0x1624] ss:$16 sps:$4 sm:$0xff]   ;;  %v11051_v2 = vld [vmem:[%s12027_s29 + $0x1620] ss:$16 sps:$4 sm:$0xff]  }
 0x2f9   : > { %7480 = vmatpush1.bf16.msra.mxu0 %v10960_v15  ;;  %8177 = vmatpush1.bf16.msra.mxu1 %v10963_v17  ;;  %v11056_v15 = vld [vmem:[%s12027_s29 + $0x162c] ss:$16 sps:$4 sm:$0xff]   ;;  %v1519_v17 = vcombine.high %v12814_v10, %v12814_v10  ;;  %v11057_v10 = vld [vmem:[%s12027_s29 + $0x1640] ss:$16 sps:$4 sm:$0xff]  }
 0x2fa   : > { %7481 = vmatprep.subr.bf16.mxu0 %v10968_v53  ;;  %8178 = vmatprep.subr.bf16.mxu1 %v10971_v18  ;;  %v11054_v53 = vld [vmem:[%s12027_s29 + $0x1628] ss:$16 sps:$4 sm:$0xff]   ;;  %v11059_v18 = vld [vmem:[%s12027_s29 + $0x1644] ss:$16 sps:$4 sm:$0xff]  }
 0x2fd   : > { %7482 = vmatpush1.bf16.msra.mxu0 %v10966_v19  ;;  %8179 = vmatpush1.bf16.msra.mxu1 %v10969_v20  ;;  %v11062_v19 = vld [vmem:[%s12027_s29 + $0x164c] ss:$16 sps:$4 sm:$0xff]   ;;  %v11060_v20 = vld [vmem:[%s12027_s29 + $0x1648] ss:$16 sps:$4 sm:$0xff]  }
 0x2fe   : > { %7483 = vmatprep.subr.bf16.mxu0 %v10974_v21  ;;  %8180 = vmatprep.subr.bf16.mxu1 %v10977_v23  ;;  %v11065_v21 = vld [vmem:[%s12027_s29 + $0x1664] ss:$16 sps:$4 sm:$0xff]   ;;  %v11068_v23 = vld [vmem:[%s12027_s29 + $0x166c] ss:$16 sps:$4 sm:$0xff]  }
 0x301   : > { %7484 = vmatpush1.bf16.msra.mxu0 %v10972_v24  ;;  %8181 = vmatpush1.bf16.msra.mxu1 %v10975_v25  ;;  %v11063_v24 = vld [vmem:[%s12027_s29 + $0x1660] ss:$16 sps:$4 sm:$0xff]   ;;  %v11066_v25 = vld [vmem:[%s12027_s29 + $0x1668] ss:$16 sps:$4 sm:$0xff]  }
 0x302   : > { %7485 = vmatprep.subr.bf16.mxu0 %v10980_v27  ;;  %8182 = vmatprep.subr.bf16.mxu1 %v10983_v28  ;;  %v11071_v27 = vld [vmem:[%s12027_s29 + $0x1684] ss:$16 sps:$4 sm:$0xff]   ;;  %v11074_v28 = vld [vmem:[%s12027_s29 + $0x168c] ss:$16 sps:$4 sm:$0xff]  }
 0x305   : > { %7486 = vmatpush1.bf16.msra.mxu0 %v10978_v29  ;;  %8183 = vmatpush1.bf16.msra.mxu1 %v10981_v30  ;;  %v11069_v29 = vld [vmem:[%s12027_s29 + $0x1680] ss:$16 sps:$4 sm:$0xff]   ;;  %v11072_v30 = vld [vmem:[%s12027_s29 + $0x1688] ss:$16 sps:$4 sm:$0xff]  }
 0x306   : > { %7487 = vmatprep.subr.bf16.mxu0 %v10986_v31  ;;  %8184 = vmatprep.subr.bf16.mxu1 %v10989_v16  ;;  %v11077_v31 = vld [vmem:[%s12027_s29 + $0x16a4] ss:$16 sps:$4 sm:$0xff]   ;;  %v11080_v16 = vld [vmem:[%s12027_s29 + $0x16ac] ss:$16 sps:$4 sm:$0xff]  }
 0x309   : > { %7488 = vmatpush1.bf16.msra.mxu0 %v10984_v32  ;;  %8185 = vmatpush1.bf16.msra.mxu1 %v10987_v33  ;;  %v11075_v32 = vld [vmem:[%s12027_s29 + $0x16a0] ss:$16 sps:$4 sm:$0xff]   ;;  %v11078_v33 = vld [vmem:[%s12027_s29 + $0x16a8] ss:$16 sps:$4 sm:$0xff]  }
 0x30a   : > { %7489 = vmatprep.subr.bf16.mxu0 %v10992_v34  ;;  %8186 = vmatprep.subr.bf16.mxu1 %v10995_v26  ;;  %v11083_v34 = vld [vmem:[%s12027_s29 + $0x16c4] ss:$16 sps:$4 sm:$0xff]   ;;  %v11086_v26 = vld [vmem:[%s12027_s29 + $0x16cc] ss:$16 sps:$4 sm:$0xff]  }
 0x30d   : > { %7490 = vmatpush1.bf16.msra.mxu0 %v10990_v35  ;;  %8187 = vmatpush1.bf16.msra.mxu1 %v10993_v37  ;;  %v11081_v35 = vld [vmem:[%s12027_s29 + $0x16c0] ss:$16 sps:$4 sm:$0xff]   ;;  %v11084_v37 = vld [vmem:[%s12027_s29 + $0x16c8] ss:$16 sps:$4 sm:$0xff]  }
 0x30e   : > { %7491 = vmatprep.subr.bf16.mxu0 %v10998_v38  ;;  %8188 = vmatprep.subr.bf16.mxu1 %v11001_v40  ;;  %v11089_v38 = vld [vmem:[%s12027_s29 + $0x16e4] ss:$16 sps:$4 sm:$0xff]   ;;  %v11092_v40 = vld [vmem:[%s12027_s29 + $0x16ec] ss:$16 sps:$4 sm:$0xff]  }
 0x311   : > { %7492 = vmatpush1.bf16.msra.mxu0 %v10996_v41  ;;  %8189 = vmatpush1.bf16.msra.mxu1 %v10999_v22  ;;  %v11087_v41 = vld [vmem:[%s12027_s29 + $0x16e0] ss:$16 sps:$4 sm:$0xff]   ;;  %v11090_v22 = vld [vmem:[%s12027_s29 + $0x16e8] ss:$16 sps:$4 sm:$0xff]  }
 0x312   : > { %7493 = vmatprep.subr.bf16.mxu0 %v11004_v42  ;;  %8190 = vmatprep.subr.bf16.mxu1 %v11007_v43  ;;  %v11095_v42 = vld [vmem:[%s12027_s29 + $0x1704] ss:$16 sps:$4 sm:$0xff]   ;;  %v11098_v43 = vld [vmem:[%s12027_s29 + $0x170c] ss:$16 sps:$4 sm:$0xff]  }
 0x315   : > { %7494 = vmatpush1.bf16.msra.mxu0 %v11002_v45  ;;  %8191 = vmatpush1.bf16.msra.mxu1 %v11005_v46  ;;  %v11093_v45 = vld [vmem:[%s12027_s29 + $0x1700] ss:$16 sps:$4 sm:$0xff]   ;;  %v11096_v46 = vld [vmem:[%s12027_s29 + $0x1708] ss:$16 sps:$4 sm:$0xff]  }
 0x316   : > { %7495 = vmatprep.subr.bf16.mxu0 %v11010_v47  ;;  %8192 = vmatprep.subr.bf16.mxu1 %v11013_v48  ;;  %v11101_v47 = vld [vmem:[%s12027_s29 + $0x1724] ss:$16 sps:$4 sm:$0xff]   ;;  %v11104_v48 = vld [vmem:[%s12027_s29 + $0x172c] ss:$16 sps:$4 sm:$0xff]  }
 0x319   : > { %7496 = vmatpush1.bf16.msra.mxu0 %v11008_v51  ;;  %8193 = vmatpush1.bf16.msra.mxu1 %v11011_v54  ;;  %v11099_v51 = vld [vmem:[%s12027_s29 + $0x1720] ss:$16 sps:$4 sm:$0xff]   ;;  %v11102_v54 = vld [vmem:[%s12027_s29 + $0x1728] ss:$16 sps:$4 sm:$0xff]  }
 0x31a   : > { %7497 = vmatprep.subr.bf16.mxu0 %v11016_v55  ;;  %8194 = vmatprep.subr.bf16.mxu1 %v11019_v56  ;;  %v11107_v55 = vld [vmem:[%s12027_s29 + $0x1744] ss:$16 sps:$4 sm:$0xff]   ;;  %v11110_v56 = vld [vmem:[%s12027_s29 + $0x174c] ss:$16 sps:$4 sm:$0xff]  }
 0x31d   : > { %7498 = vmatpush1.bf16.msra.mxu0 %v11014_v39  ;;  %8195 = vmatpush1.bf16.msra.mxu1 %v11017_v57  ;;  %v11105_v39 = vld [vmem:[%s12027_s29 + $0x1740] ss:$16 sps:$4 sm:$0xff]   ;;  %v11108_v57 = vld [vmem:[%s12027_s29 + $0x1748] ss:$16 sps:$4 sm:$0xff]  }
 0x31e   : > { %7499 = vmatprep.subr.bf16.mxu0 %v11022_v58  ;;  %8196 = vmatprep.subr.bf16.mxu1 %v11025_v59  ;;  %v11113_v58 = vld [vmem:[%s12027_s29 + $0x1764] ss:$16 sps:$4 sm:$0xff]   ;;  %v11116_v59 = vld [vmem:[%s12027_s29 + $0x176c] ss:$16 sps:$4 sm:$0xff]  }
 0x321   : > { %7500 = vmatpush1.bf16.msra.mxu0 %v11020_v49  ;;  %8197 = vmatpush1.bf16.msra.mxu1 %v11023_v60  ;;  %v11111_v49 = vld [vmem:[%s12027_s29 + $0x1760] ss:$16 sps:$4 sm:$0xff]   ;;  %v11114_v60 = vld [vmem:[%s12027_s29 + $0x1768] ss:$16 sps:$4 sm:$0xff]  }
 0x322   : > { %7501 = vmatprep.subr.bf16.mxu0 %v11028_v61  ;;  %8198 = vmatprep.subr.bf16.mxu1 %v11031_v14  ;;  %v11119_v61 = vld [vmem:[%s12027_s29 + $0x1784] ss:$16 sps:$4 sm:$0xff]   ;;  %v11122_v14 = vld [vmem:[%s12027_s29 + $0x178c] ss:$16 sps:$4 sm:$0xff]  }
 0x325   : > { %7502 = vmatpush1.bf16.msra.mxu0 %v11026_v0  ;;  %8199 = vmatpush1.bf16.msra.mxu1 %v11029_v1  ;;  %v11117_v0 = vld [vmem:[%s12027_s29 + $0x1780] ss:$16 sps:$4 sm:$0xff]   ;;  %v11120_v1 = vld [vmem:[%s12027_s29 + $0x1788] ss:$16 sps:$4 sm:$0xff]  }
 0x326   : > { %7503 = vmatprep.subr.bf16.mxu0 %v11034_v36  ;;  %8200 = vmatprep.subr.bf16.mxu1 %v11037_v3  ;;  %v11125_v36 = vld [vmem:[%s12027_s29 + $0x17a4] ss:$16 sps:$4 sm:$0xff]   ;;  %v11128_v3 = vld [vmem:[%s12027_s29 + $0x17ac] ss:$16 sps:$4 sm:$0xff]  }
 0x329   : > { %7504 = vmatpush1.bf16.msra.mxu0 %v11032_v4  ;;  %8201 = vmatpush1.bf16.msra.mxu1 %v11035_v52  ;;  %v11123_v4 = vld [vmem:[%s12027_s29 + $0x17a0] ss:$16 sps:$4 sm:$0xff]   ;;  %v11126_v52 = vld [vmem:[%s12027_s29 + $0x17a8] ss:$16 sps:$4 sm:$0xff]  }
 0x32a   : > { %7505 = vmatprep.subr.bf16.mxu0 %v11040_v5  ;;  %8202 = vmatprep.subr.bf16.mxu1 %v11043_v6  ;;  %v11131_v5 = vld [vmem:[%s12027_s29 + $0x17c4] ss:$16 sps:$4 sm:$0xff]   ;;  %v11134_v6 = vld [vmem:[%s12027_s29 + $0x17cc] ss:$16 sps:$4 sm:$0xff]  }
 0x32d   : > { %7506 = vmatpush1.bf16.msra.mxu0 %v11038_v7  ;;  %8203 = vmatpush1.bf16.msra.mxu1 %v11041_v62  ;;  %v12943_v7 = vld [vmem:[%s12046_s4 + $0x18] sm:$0xff]  ;;  %v11129_v62 = vld [vmem:[%s12027_s29 + $0x17c0] ss:$16 sps:$4 sm:$0xff]  }
 0x32e   : > { %7516 = vmatprep.subr.bf16.mxu0 %v11047_v8  ;;  %8213 = vmatprep.subr.bf16.mxu1 %v11050_v9  ;;  %v11132_v8 = vld [vmem:[%s12027_s29 + $0x17c8] ss:$16 sps:$4 sm:$0xff]   ;;  %v11137_v9 = vld [vmem:[%s12027_s29 + $0x17e4] ss:$16 sps:$4 sm:$0xff]  }
 0x330   : > { %7508 = vmatmul.mubr.bf16.vlgmr.msra.gmra.mrb[0].mxu0 %v12880_v63  ;;  %8205 = vmatmul.mubr.bf16.vlgmr.msra.gmra.mrb[0].mxu1 %v12880_v63 }
 0x331   : > { %7517 = vmatpush1.bf16.msra.mxu0 %v11045_v11  ;;  %8214 = vmatpush1.bf16.msra.mxu1 %v11048_v12  ;;  %v11140_v11 = vld [vmem:[%s12027_s29 + $0x17ec] ss:$16 sps:$4 sm:$0xff]   ;;  %v12951_v12 = vrot.slane %v12943_v7, %v12102_v50 }
 0x332   : > { %7518 = vmatprep.subr.bf16.mxu0 %v11053_v13  ;;  %8215 = vmatprep.subr.bf16.mxu1 %v11056_v15  ;;  %v11135_v13 = vld [vmem:[%s12027_s29 + $0x17e0] ss:$16 sps:$4 sm:$0xff]   ;;  %v11138_v15 = vld [vmem:[%s12027_s29 + $0x17e8] ss:$16 sps:$4 sm:$0xff]  }
 0x333   : > { %7548 = vmatprep.mubr.bf16.mxu0 %v1519_v17  ;;  %8245 = vmatprep.mubr.bf16.mxu1 %v1519_v17  ;;  %v11143_v17 = vld [vmem:[%s12027_s29 + $0x1804] ss:$16 sps:$4 sm:$0xff]  }
 0x335   : > { %7519 = vmatpush1.bf16.msra.mxu0 %v11051_v2  ;;  %8216 = vmatpush1.bf16.msra.mxu1 %v11054_v53  ;;  %v11146_v2 = vld [vmem:[%s12027_s29 + $0x180c] ss:$16 sps:$4 sm:$0xff]   ;;  %v1535_v53 = vcombine.high %v12951_v12, %v12951_v12 }
 0x336   : > { %7520 = vmatprep.subr.bf16.mxu0 %v11059_v18  ;;  %8217 = vmatprep.subr.bf16.mxu1 %v11062_v19  ;;  %v1517_v18 = vcombine.high %v12880_v63, %v12880_v63  ;;  %v11141_v19 = vld [vmem:[%s12027_s29 + $0x1800] ss:$16 sps:$4 sm:$0xff]  }
 0x337   : > { %v11147_v63 = vld [vmem:[%s12027_s29 + $0x1820] ss:$16 sps:$4 sm:$0xff]  }
 0x339   : > { %7521 = vmatpush1.bf16.msra.mxu0 %v11057_v10  ;;  %8218 = vmatpush1.bf16.msra.mxu1 %v11060_v20  ;;  %v11144_v10 = vld [vmem:[%s12027_s29 + $0x1808] ss:$16 sps:$4 sm:$0xff]   ;;  %v11149_v20 = vld [vmem:[%s12027_s29 + $0x1824] ss:$16 sps:$4 sm:$0xff]  }
 0x33a   : > { %7522 = vmatprep.subr.bf16.mxu0 %v11065_v21  ;;  %8219 = vmatprep.subr.bf16.mxu1 %v11068_v23  ;;  %v11152_v21 = vld [vmem:[%s12027_s29 + $0x182c] ss:$16 sps:$4 sm:$0xff]   ;;  %v12966_v23 = vrot.slane %v1535_v53, %v12102_v50  ;;  %v11228_v53 = vld [vmem:[%s12027_s29 + $0x19c8] ss:$16 sps:$4 sm:$0xff]  }
 0x33d   : > { %7523 = vmatpush1.bf16.msra.mxu0 %v11063_v24  ;;  %8220 = vmatpush1.bf16.msra.mxu1 %v11066_v25  ;;  %v11150_v24 = vld [vmem:[%s12027_s29 + $0x1828] ss:$16 sps:$4 sm:$0xff]   ;;  %v11155_v25 = vld [vmem:[%s12027_s29 + $0x1844] ss:$16 sps:$4 sm:$0xff]  }
 0x33e   : > { %7524 = vmatprep.subr.bf16.mxu0 %v11071_v27  ;;  %8221 = vmatprep.subr.bf16.mxu1 %v11074_v28  ;;  %v11158_v27 = vld [vmem:[%s12027_s29 + $0x184c] ss:$16 sps:$4 sm:$0xff]   ;;  %v11153_v28 = vld [vmem:[%s12027_s29 + $0x1840] ss:$16 sps:$4 sm:$0xff]  }
 0x341   : > { %7525 = vmatpush1.bf16.msra.mxu0 %v11069_v29  ;;  %8222 = vmatpush1.bf16.msra.mxu1 %v11072_v30  ;;  %v11156_v29 = vld [vmem:[%s12027_s29 + $0x1848] ss:$16 sps:$4 sm:$0xff]   ;;  %v11161_v30 = vld [vmem:[%s12027_s29 + $0x1864] ss:$16 sps:$4 sm:$0xff]  }
 0x342   : > { %7526 = vmatprep.subr.bf16.mxu0 %v11077_v31  ;;  %8223 = vmatprep.subr.bf16.mxu1 %v11080_v16  ;;  %v11164_v31 = vld [vmem:[%s12027_s29 + $0x186c] ss:$16 sps:$4 sm:$0xff]   ;;  %v11159_v16 = vld [vmem:[%s12027_s29 + $0x1860] ss:$16 sps:$4 sm:$0xff]  }
 0x345   : > { %7527 = vmatpush1.bf16.msra.mxu0 %v11075_v32  ;;  %8224 = vmatpush1.bf16.msra.mxu1 %v11078_v33  ;;  %v11162_v32 = vld [vmem:[%s12027_s29 + $0x1868] ss:$16 sps:$4 sm:$0xff]   ;;  %v11167_v33 = vld [vmem:[%s12027_s29 + $0x1884] ss:$16 sps:$4 sm:$0xff]  }
 0x346   : > { %7528 = vmatprep.subr.bf16.mxu0 %v11083_v34  ;;  %8225 = vmatprep.subr.bf16.mxu1 %v11086_v26  ;;  %v11170_v34 = vld [vmem:[%s12027_s29 + $0x188c] ss:$16 sps:$4 sm:$0xff]   ;;  %v11165_v26 = vld [vmem:[%s12027_s29 + $0x1880] ss:$16 sps:$4 sm:$0xff]  }
 0x349   : > { %7529 = vmatpush1.bf16.msra.mxu0 %v11081_v35  ;;  %8226 = vmatpush1.bf16.msra.mxu1 %v11084_v37  ;;  %v11168_v35 = vld [vmem:[%s12027_s29 + $0x1888] ss:$16 sps:$4 sm:$0xff]   ;;  %v11173_v37 = vld [vmem:[%s12027_s29 + $0x18a4] ss:$16 sps:$4 sm:$0xff]  }
 0x34a   : > { %7530 = vmatprep.subr.bf16.mxu0 %v11089_v38  ;;  %8227 = vmatprep.subr.bf16.mxu1 %v11092_v40  ;;  %v11176_v38 = vld [vmem:[%s12027_s29 + $0x18ac] ss:$16 sps:$4 sm:$0xff]   ;;  %v11171_v40 = vld [vmem:[%s12027_s29 + $0x18a0] ss:$16 sps:$4 sm:$0xff]  }
 0x34d   : > { %7531 = vmatpush1.bf16.msra.mxu0 %v11087_v41  ;;  %8228 = vmatpush1.bf16.msra.mxu1 %v11090_v22  ;;  %v11174_v41 = vld [vmem:[%s12027_s29 + $0x18a8] ss:$16 sps:$4 sm:$0xff]   ;;  %v11179_v22 = vld [vmem:[%s12027_s29 + $0x18c4] ss:$16 sps:$4 sm:$0xff]  }
 0x34e   : > { %7532 = vmatprep.subr.bf16.mxu0 %v11095_v42  ;;  %8229 = vmatprep.subr.bf16.mxu1 %v11098_v43  ;;  %v11182_v42 = vld [vmem:[%s12027_s29 + $0x18cc] ss:$16 sps:$4 sm:$0xff]   ;;  %v11177_v43 = vld [vmem:[%s12027_s29 + $0x18c0] ss:$16 sps:$4 sm:$0xff]  }
 0x351   : > { %7533 = vmatpush1.bf16.msra.mxu0 %v11093_v45  ;;  %8230 = vmatpush1.bf16.msra.mxu1 %v11096_v46  ;;  %v11180_v45 = vld [vmem:[%s12027_s29 + $0x18c8] ss:$16 sps:$4 sm:$0xff]   ;;  %v11185_v46 = vld [vmem:[%s12027_s29 + $0x18e4] ss:$16 sps:$4 sm:$0xff]  }
 0x352   : > { %7534 = vmatprep.subr.bf16.mxu0 %v11101_v47  ;;  %8231 = vmatprep.subr.bf16.mxu1 %v11104_v48  ;;  %v11188_v47 = vld [vmem:[%s12027_s29 + $0x18ec] ss:$16 sps:$4 sm:$0xff]   ;;  %v11183_v48 = vld [vmem:[%s12027_s29 + $0x18e0] ss:$16 sps:$4 sm:$0xff]  }
 0x355   : > { %7535 = vmatpush1.bf16.msra.mxu0 %v11099_v51  ;;  %8232 = vmatpush1.bf16.msra.mxu1 %v11102_v54  ;;  %v11186_v51 = vld [vmem:[%s12027_s29 + $0x18e8] ss:$16 sps:$4 sm:$0xff]   ;;  %v11191_v54 = vld [vmem:[%s12027_s29 + $0x1904] ss:$16 sps:$4 sm:$0xff]  }
 0x356   : > { %7536 = vmatprep.subr.bf16.mxu0 %v11107_v55  ;;  %8233 = vmatprep.subr.bf16.mxu1 %v11110_v56  ;;  %v11194_v55 = vld [vmem:[%s12027_s29 + $0x190c] ss:$16 sps:$4 sm:$0xff]   ;;  %v11189_v56 = vld [vmem:[%s12027_s29 + $0x1900] ss:$16 sps:$4 sm:$0xff]  }
 0x359   : > { %7537 = vmatpush1.bf16.msra.mxu0 %v11105_v39  ;;  %8234 = vmatpush1.bf16.msra.mxu1 %v11108_v57  ;;  %v11192_v39 = vld [vmem:[%s12027_s29 + $0x1908] ss:$16 sps:$4 sm:$0xff]   ;;  %v11197_v57 = vld [vmem:[%s12027_s29 + $0x1924] ss:$16 sps:$4 sm:$0xff]  }
 0x35a   : > { %7538 = vmatprep.subr.bf16.mxu0 %v11113_v58  ;;  %8235 = vmatprep.subr.bf16.mxu1 %v11116_v59  ;;  %v11200_v58 = vld [vmem:[%s12027_s29 + $0x192c] ss:$16 sps:$4 sm:$0xff]   ;;  %v11195_v59 = vld [vmem:[%s12027_s29 + $0x1920] ss:$16 sps:$4 sm:$0xff]  }
 0x35d   : > { %7539 = vmatpush1.bf16.msra.mxu0 %v11111_v49  ;;  %8236 = vmatpush1.bf16.msra.mxu1 %v11114_v60  ;;  %v11198_v49 = vld [vmem:[%s12027_s29 + $0x1928] ss:$16 sps:$4 sm:$0xff]   ;;  %v11203_v60 = vld [vmem:[%s12027_s29 + $0x1944] ss:$16 sps:$4 sm:$0xff]  }
 0x35e   : > { %7540 = vmatprep.subr.bf16.mxu0 %v11119_v61  ;;  %8237 = vmatprep.subr.bf16.mxu1 %v11122_v14  ;;  %v11206_v61 = vld [vmem:[%s12027_s29 + $0x194c] ss:$16 sps:$4 sm:$0xff]   ;;  %v11201_v14 = vld [vmem:[%s12027_s29 + $0x1940] ss:$16 sps:$4 sm:$0xff]  }
 0x361   : > { %7541 = vmatpush1.bf16.msra.mxu0 %v11117_v0  ;;  %8238 = vmatpush1.bf16.msra.mxu1 %v11120_v1  ;;  %v11204_v0 = vld [vmem:[%s12027_s29 + $0x1948] ss:$16 sps:$4 sm:$0xff]   ;;  %v11209_v1 = vld [vmem:[%s12027_s29 + $0x1964] ss:$16 sps:$4 sm:$0xff]  }
 0x362   : > { %7542 = vmatprep.subr.bf16.mxu0 %v11125_v36  ;;  %8239 = vmatprep.subr.bf16.mxu1 %v11128_v3  ;;  %v11212_v36 = vld [vmem:[%s12027_s29 + $0x196c] ss:$16 sps:$4 sm:$0xff]   ;;  %v11207_v3 = vld [vmem:[%s12027_s29 + $0x1960] ss:$16 sps:$4 sm:$0xff]  }
 0x365   : > { %7543 = vmatpush1.bf16.msra.mxu0 %v11123_v4  ;;  %8240 = vmatpush1.bf16.msra.mxu1 %v11126_v52  ;;  %v11210_v4 = vld [vmem:[%s12027_s29 + $0x1968] ss:$16 sps:$4 sm:$0xff]   ;;  %v11215_v52 = vld [vmem:[%s12027_s29 + $0x1984] ss:$16 sps:$4 sm:$0xff]  }
 0x366   : > { %7544 = vmatprep.subr.bf16.mxu0 %v11131_v5  ;;  %8241 = vmatprep.subr.bf16.mxu1 %v11134_v6  ;;  %v11218_v5 = vld [vmem:[%s12027_s29 + $0x198c] ss:$16 sps:$4 sm:$0xff]   ;;  %v11213_v6 = vld [vmem:[%s12027_s29 + $0x1980] ss:$16 sps:$4 sm:$0xff]  }
 0x369   : > { %7545 = vmatpush1.bf16.msra.mxu0 %v11129_v62  ;;  %8242 = vmatpush1.bf16.msra.mxu1 %v11132_v8  ;;  %v11216_v62 = vld [vmem:[%s12027_s29 + $0x1988] ss:$16 sps:$4 sm:$0xff]   ;;  %v11221_v8 = vld [vmem:[%s12027_s29 + $0x19a4] ss:$16 sps:$4 sm:$0xff]  }
 0x36a   : > { %7546 = vmatprep.subr.bf16.mxu0 %v11137_v9  ;;  %8243 = vmatprep.subr.bf16.mxu1 %v11140_v11  ;;  %v11224_v9 = vld [vmem:[%s12027_s29 + $0x19ac] ss:$16 sps:$4 sm:$0xff]   ;;  %v11219_v11 = vld [vmem:[%s12027_s29 + $0x19a0] ss:$16 sps:$4 sm:$0xff]  }
 0x36d   : > { %7547 = vmatpush1.bf16.msra.mxu0 %v11135_v13  ;;  %8244 = vmatpush1.bf16.msra.mxu1 %v11138_v15  ;;  %v11222_v13 = vld [vmem:[%s12027_s29 + $0x19a8] ss:$16 sps:$4 sm:$0xff]   ;;  %v11227_v15 = vld [vmem:[%s12027_s29 + $0x19c4] ss:$16 sps:$4 sm:$0xff]  }
 0x36e   : > { %7557 = vmatprep.subr.bf16.mxu0 %v11143_v17  ;;  %8254 = vmatprep.subr.bf16.mxu1 %v11146_v2  ;;  %v11230_v17 = vld [vmem:[%s12027_s29 + $0x19cc] ss:$16 sps:$4 sm:$0xff]   ;;  %v11225_v2 = vld [vmem:[%s12027_s29 + $0x19c0] ss:$16 sps:$4 sm:$0xff]  }
 0x370   : > { %7549 = vmatmul.mubr.bf16.vlgmr.msra.gmra.mrb[0].mxu0 %v1517_v18  ;;  %8246 = vmatmul.mubr.bf16.vlgmr.msra.gmra.mrb[0].mxu1 %v1517_v18  ;;  %v11233_v18 = vld [vmem:[%s12027_s29 + $0x19e4] ss:$16 sps:$4 sm:$0xff]  }
 0x371   : > { %7558 = vmatpush1.bf16.msra.mxu0 %v11141_v19  ;;  %8255 = vmatpush1.bf16.msra.mxu1 %v11144_v10  ;;  %v11236_v19 = vld [vmem:[%s12027_s29 + $0x19ec] ss:$16 sps:$4 sm:$0xff]   ;;  %v11231_v10 = vld [vmem:[%s12027_s29 + $0x19e0] ss:$16 sps:$4 sm:$0xff]  }
 0x372   : > { %7559 = vmatprep.subr.bf16.mxu0 %v11149_v20  ;;  %8256 = vmatprep.subr.bf16.mxu1 %v11152_v21  ;;  %v11234_v20 = vld [vmem:[%s12027_s29 + $0x19e8] ss:$16 sps:$4 sm:$0xff]   ;;  %v11239_v21 = vld [vmem:[%s12027_s29 + $0x1a04] ss:$16 sps:$4 sm:$0xff]  }
 0x373   : > { %7589 = vmatprep.mubr.bf16.mxu0 %v12966_v23  ;;  %8286 = vmatprep.mubr.bf16.mxu1 %v12966_v23 }
 0x375   : > { %7560 = vmatpush1.bf16.msra.mxu0 %v11147_v63  ;;  %8257 = vmatpush1.bf16.msra.mxu1 %v11150_v24  ;;  %v11242_v63 = vld [vmem:[%s12027_s29 + $0x1a0c] ss:$16 sps:$4 sm:$0xff]   ;;  %v13032_v24 = vrot.slane %v12951_v12, %v12102_v50  ;;  %v11243_v12 = vld [vmem:[%s12027_s29 + $0x1a20] ss:$16 sps:$4 sm:$0xff]  }
 0x376   : > { %7561 = vmatprep.subr.bf16.mxu0 %v11155_v25  ;;  %8258 = vmatprep.subr.bf16.mxu1 %v11158_v27  ;;  %v11237_v25 = vld [vmem:[%s12027_s29 + $0x1a00] ss:$16 sps:$4 sm:$0xff]   ;;  %v11240_v27 = vld [vmem:[%s12027_s29 + $0x1a08] ss:$16 sps:$4 sm:$0xff]  }
 0x379   : > { %7562 = vmatpush1.bf16.msra.mxu0 %v11153_v28  ;;  %8259 = vmatpush1.bf16.msra.mxu1 %v11156_v29  ;;  %v11245_v28 = vld [vmem:[%s12027_s29 + $0x1a24] ss:$16 sps:$4 sm:$0xff]   ;;  %v11248_v29 = vld [vmem:[%s12027_s29 + $0x1a2c] ss:$16 sps:$4 sm:$0xff]  }
 0x37a   : > { %7563 = vmatprep.subr.bf16.mxu0 %v11161_v30  ;;  %8260 = vmatprep.subr.bf16.mxu1 %v11164_v31  ;;  %v1567_v30 = vcombine.high %v12966_v23, %v12966_v23  ;;  %v11246_v31 = vld [vmem:[%s12027_s29 + $0x1a28] ss:$16 sps:$4 sm:$0xff]   ;;  %v11249_v23 = vld [vmem:[%s12027_s29 + $0x1a40] ss:$16 sps:$4 sm:$0xff]  }
 0x37d   : > { %7564 = vmatpush1.bf16.msra.mxu0 %v11159_v16  ;;  %8261 = vmatpush1.bf16.msra.mxu1 %v11162_v32  ;;  %v11251_v16 = vld [vmem:[%s12027_s29 + $0x1a44] ss:$16 sps:$4 sm:$0xff]   ;;  %v11254_v32 = vld [vmem:[%s12027_s29 + $0x1a4c] ss:$16 sps:$4 sm:$0xff]  }
 0x37e   : > { %7565 = vmatprep.subr.bf16.mxu0 %v11167_v33  ;;  %8262 = vmatprep.subr.bf16.mxu1 %v11170_v34  ;;  %v11252_v33 = vld [vmem:[%s12027_s29 + $0x1a48] ss:$16 sps:$4 sm:$0xff]   ;;  %v11257_v34 = vld [vmem:[%s12027_s29 + $0x1a64] ss:$16 sps:$4 sm:$0xff]  }
 0x381   : > { %7566 = vmatpush1.bf16.msra.mxu0 %v11165_v26  ;;  %8263 = vmatpush1.bf16.msra.mxu1 %v11168_v35  ;;  %v11260_v26 = vld [vmem:[%s12027_s29 + $0x1a6c] ss:$16 sps:$4 sm:$0xff]   ;;  %v11255_v35 = vld [vmem:[%s12027_s29 + $0x1a60] ss:$16 sps:$4 sm:$0xff]  }
 0x382   : > { %7567 = vmatprep.subr.bf16.mxu0 %v11173_v37  ;;  %8264 = vmatprep.subr.bf16.mxu1 %v11176_v38  ;;  %v11258_v37 = vld [vmem:[%s12027_s29 + $0x1a68] ss:$16 sps:$4 sm:$0xff]   ;;  %v11263_v38 = vld [vmem:[%s12027_s29 + $0x1a84] ss:$16 sps:$4 sm:$0xff]  }
 0x385   : > { %7568 = vmatpush1.bf16.msra.mxu0 %v11171_v40  ;;  %8265 = vmatpush1.bf16.msra.mxu1 %v11174_v41  ;;  %v11266_v40 = vld [vmem:[%s12027_s29 + $0x1a8c] ss:$16 sps:$4 sm:$0xff]   ;;  %v11261_v41 = vld [vmem:[%s12027_s29 + $0x1a80] ss:$16 sps:$4 sm:$0xff]  }
 0x386   : > { %7569 = vmatprep.subr.bf16.mxu0 %v11179_v22  ;;  %8266 = vmatprep.subr.bf16.mxu1 %v11182_v42  ;;  %v11264_v22 = vld [vmem:[%s12027_s29 + $0x1a88] ss:$16 sps:$4 sm:$0xff]   ;;  %v11269_v42 = vld [vmem:[%s12027_s29 + $0x1aa4] ss:$16 sps:$4 sm:$0xff]  }
 0x389   : > { %7570 = vmatpush1.bf16.msra.mxu0 %v11177_v43  ;;  %8267 = vmatpush1.bf16.msra.mxu1 %v11180_v45  ;;  %v11272_v43 = vld [vmem:[%s12027_s29 + $0x1aac] ss:$16 sps:$4 sm:$0xff]   ;;  %v11267_v45 = vld [vmem:[%s12027_s29 + $0x1aa0] ss:$16 sps:$4 sm:$0xff]  }
 0x38a   : > { %7571 = vmatprep.subr.bf16.mxu0 %v11185_v46  ;;  %8268 = vmatprep.subr.bf16.mxu1 %v11188_v47  ;;  %v11270_v46 = vld [vmem:[%s12027_s29 + $0x1aa8] ss:$16 sps:$4 sm:$0xff]   ;;  %v11275_v47 = vld [vmem:[%s12027_s29 + $0x1ac4] ss:$16 sps:$4 sm:$0xff]  }
 0x38d   : > { %7572 = vmatpush1.bf16.msra.mxu0 %v11183_v48  ;;  %8269 = vmatpush1.bf16.msra.mxu1 %v11186_v51  ;;  %v11278_v48 = vld [vmem:[%s12027_s29 + $0x1acc] ss:$16 sps:$4 sm:$0xff]   ;;  %v11273_v51 = vld [vmem:[%s12027_s29 + $0x1ac0] ss:$16 sps:$4 sm:$0xff]  }
 0x38e   : > { %7573 = vmatprep.subr.bf16.mxu0 %v11191_v54  ;;  %8270 = vmatprep.subr.bf16.mxu1 %v11194_v55  ;;  %v11276_v54 = vld [vmem:[%s12027_s29 + $0x1ac8] ss:$16 sps:$4 sm:$0xff]   ;;  %v11281_v55 = vld [vmem:[%s12027_s29 + $0x1ae4] ss:$16 sps:$4 sm:$0xff]  }
 0x391   : > { %7574 = vmatpush1.bf16.msra.mxu0 %v11189_v56  ;;  %8271 = vmatpush1.bf16.msra.mxu1 %v11192_v39  ;;  %v11284_v56 = vld [vmem:[%s12027_s29 + $0x1aec] ss:$16 sps:$4 sm:$0xff]   ;;  %v11279_v39 = vld [vmem:[%s12027_s29 + $0x1ae0] ss:$16 sps:$4 sm:$0xff]  }
 0x392   : > { %7575 = vmatprep.subr.bf16.mxu0 %v11197_v57  ;;  %8272 = vmatprep.subr.bf16.mxu1 %v11200_v58  ;;  %v11282_v57 = vld [vmem:[%s12027_s29 + $0x1ae8] ss:$16 sps:$4 sm:$0xff]   ;;  %v11287_v58 = vld [vmem:[%s12027_s29 + $0x1b04] ss:$16 sps:$4 sm:$0xff]  }
 0x395   : > { %7576 = vmatpush1.bf16.msra.mxu0 %v11195_v59  ;;  %8273 = vmatpush1.bf16.msra.mxu1 %v11198_v49  ;;  %v11290_v59 = vld [vmem:[%s12027_s29 + $0x1b0c] ss:$16 sps:$4 sm:$0xff]   ;;  %v11285_v49 = vld [vmem:[%s12027_s29 + $0x1b00] ss:$16 sps:$4 sm:$0xff]  }
 0x396   : > { %7577 = vmatprep.subr.bf16.mxu0 %v11203_v60  ;;  %8274 = vmatprep.subr.bf16.mxu1 %v11206_v61  ;;  %v11288_v60 = vld [vmem:[%s12027_s29 + $0x1b08] ss:$16 sps:$4 sm:$0xff]   ;;  %v11293_v61 = vld [vmem:[%s12027_s29 + $0x1b24] ss:$16 sps:$4 sm:$0xff]  }
 0x399   : > { %7578 = vmatpush1.bf16.msra.mxu0 %v11201_v14  ;;  %8275 = vmatpush1.bf16.msra.mxu1 %v11204_v0  ;;  %v11296_v14 = vld [vmem:[%s12027_s29 + $0x1b2c] ss:$16 sps:$4 sm:$0xff]   ;;  %v11291_v0 = vld [vmem:[%s12027_s29 + $0x1b20] ss:$16 sps:$4 sm:$0xff]  }
 0x39a   : > { %7579 = vmatprep.subr.bf16.mxu0 %v11209_v1  ;;  %8276 = vmatprep.subr.bf16.mxu1 %v11212_v36  ;;  %v11294_v1 = vld [vmem:[%s12027_s29 + $0x1b28] ss:$16 sps:$4 sm:$0xff]   ;;  %v11299_v36 = vld [vmem:[%s12027_s29 + $0x1b44] ss:$16 sps:$4 sm:$0xff]  }
 0x39d   : > { %7580 = vmatpush1.bf16.msra.mxu0 %v11207_v3  ;;  %8277 = vmatpush1.bf16.msra.mxu1 %v11210_v4  ;;  %v11302_v3 = vld [vmem:[%s12027_s29 + $0x1b4c] ss:$16 sps:$4 sm:$0xff]   ;;  %v11297_v4 = vld [vmem:[%s12027_s29 + $0x1b40] ss:$16 sps:$4 sm:$0xff]  }
 0x39e   : > { %7581 = vmatprep.subr.bf16.mxu0 %v11215_v52  ;;  %8278 = vmatprep.subr.bf16.mxu1 %v11218_v5  ;;  %v11300_v52 = vld [vmem:[%s12027_s29 + $0x1b48] ss:$16 sps:$4 sm:$0xff]   ;;  %v11305_v5 = vld [vmem:[%s12027_s29 + $0x1b64] ss:$16 sps:$4 sm:$0xff]  }
 0x3a1   : > { %7582 = vmatpush1.bf16.msra.mxu0 %v11213_v6  ;;  %8279 = vmatpush1.bf16.msra.mxu1 %v11216_v62  ;;  %v11308_v6 = vld [vmem:[%s12027_s29 + $0x1b6c] ss:$16 sps:$4 sm:$0xff]   ;;  %v11303_v62 = vld [vmem:[%s12027_s29 + $0x1b60] ss:$16 sps:$4 sm:$0xff]  }
 0x3a2   : > { %7583 = vmatprep.subr.bf16.mxu0 %v11221_v8  ;;  %8280 = vmatprep.subr.bf16.mxu1 %v11224_v9  ;;  %v11306_v8 = vld [vmem:[%s12027_s29 + $0x1b68] ss:$16 sps:$4 sm:$0xff]   ;;  %v11311_v9 = vld [vmem:[%s12027_s29 + $0x1b84] ss:$16 sps:$4 sm:$0xff]  }
 0x3a5   : > { %7584 = vmatpush1.bf16.msra.mxu0 %v11219_v11  ;;  %8281 = vmatpush1.bf16.msra.mxu1 %v11222_v13  ;;  %v11314_v11 = vld [vmem:[%s12027_s29 + $0x1b8c] ss:$16 sps:$4 sm:$0xff]   ;;  %v11309_v13 = vld [vmem:[%s12027_s29 + $0x1b80] ss:$16 sps:$4 sm:$0xff]  }
 0x3a6   : > { %7585 = vmatprep.subr.bf16.mxu0 %v11227_v15  ;;  %8282 = vmatprep.subr.bf16.mxu1 %v11230_v17  ;;  %v11312_v15 = vld [vmem:[%s12027_s29 + $0x1b88] ss:$16 sps:$4 sm:$0xff]   ;;  %v11317_v17 = vld [vmem:[%s12027_s29 + $0x1ba4] ss:$16 sps:$4 sm:$0xff]  }
 0x3a9   : > { %7586 = vmatpush1.bf16.msra.mxu0 %v11225_v2  ;;  %8283 = vmatpush1.bf16.msra.mxu1 %v11228_v53  ;;  %v11320_v2 = vld [vmem:[%s12027_s29 + $0x1bac] ss:$16 sps:$4 sm:$0xff]   ;;  %v11315_v53 = vld [vmem:[%s12027_s29 + $0x1ba0] ss:$16 sps:$4 sm:$0xff]  }
 0x3aa   : > { %7587 = vmatprep.subr.bf16.mxu0 %v11233_v18  ;;  %8284 = vmatprep.subr.bf16.mxu1 %v11236_v19  ;;  %v11318_v18 = vld [vmem:[%s12027_s29 + $0x1ba8] ss:$16 sps:$4 sm:$0xff]   ;;  %v11323_v19 = vld [vmem:[%s12027_s29 + $0x1bc4] ss:$16 sps:$4 sm:$0xff]  }
 0x3ad   : > { %7588 = vmatpush1.bf16.msra.mxu0 %v11231_v10  ;;  %8285 = vmatpush1.bf16.msra.mxu1 %v11234_v20  ;;  %v11326_v10 = vld [vmem:[%s12027_s29 + $0x1bcc] ss:$16 sps:$4 sm:$0xff]   ;;  %v1520_v20 = vcombine.high %v12943_v7, %v12943_v7  ;;  %v11327_v7 = vld [vmem:[%s12027_s29 + $0x1be0] ss:$16 sps:$4 sm:$0xff]  }
 0x3ae   : > { %7598 = vmatprep.subr.bf16.mxu0 %v11239_v21  ;;  %8295 = vmatprep.subr.bf16.mxu1 %v11242_v63  ;;  %v11321_v21 = vld [vmem:[%s12027_s29 + $0x1bc0] ss:$16 sps:$4 sm:$0xff]   ;;  %v11324_v63 = vld [vmem:[%s12027_s29 + $0x1bc8] ss:$16 sps:$4 sm:$0xff]  }
 0x3b0   : > { %7590 = vmatmul.mubr.bf16.vlgmr.msra.gmra.mrb[0].mxu0 %v13032_v24  ;;  %8287 = vmatmul.mubr.bf16.vlgmr.msra.gmra.mrb[0].mxu1 %v13032_v24 }
 0x3b1   : > { %7599 = vmatpush1.bf16.msra.mxu0 %v11237_v25  ;;  %8296 = vmatpush1.bf16.msra.mxu1 %v11240_v27  ;;  %v11329_v25 = vld [vmem:[%s12027_s29 + $0x1be4] ss:$16 sps:$4 sm:$0xff]   ;;  %v11332_v27 = vld [vmem:[%s12027_s29 + $0x1bec] ss:$16 sps:$4 sm:$0xff]  }
 0x3b2   : > { %7600 = vmatprep.subr.bf16.mxu0 %v11245_v28  ;;  %8297 = vmatprep.subr.bf16.mxu1 %v11248_v29  ;;  %v13101_v28 = vrot.slane %v1520_v20, %v12102_v50  ;;  %v11330_v29 = vld [vmem:[%s12027_s29 + $0x1be8] ss:$16 sps:$4 sm:$0xff]  }
 0x3b3   : > { %7630 = vmatprep.mubr.bf16.mxu0 %v1567_v30  ;;  %8327 = vmatprep.mubr.bf16.mxu1 %v1567_v30  ;;  %v11335_v30 = vld [vmem:[%s12027_s29 + $0x1c04] ss:$16 sps:$4 sm:$0xff]   ;;  %v11408_v20 = vld [vmem:[%s12027_s29 + $0x1d88] ss:$16 sps:$4 sm:$0xff]  }
 0x3b5   : > { %7601 = vmatpush1.bf16.msra.mxu0 %v11243_v12  ;;  %8298 = vmatpush1.bf16.msra.mxu1 %v11246_v31  ;;  %v11338_v12 = vld [vmem:[%s12027_s29 + $0x1c0c] ss:$16 sps:$4 sm:$0xff]   ;;  %v1536_v31 = vcombine.high %v13101_v28, %v13101_v28 }
 0x3b6   : > { %7602 = vmatprep.subr.bf16.mxu0 %v11251_v16  ;;  %8299 = vmatprep.subr.bf16.mxu1 %v11254_v32  ;;  %v1565_v16 = vcombine.high %v13032_v24, %v13032_v24  ;;  %v11333_v32 = vld [vmem:[%s12027_s29 + $0x1c00] ss:$16 sps:$4 sm:$0xff]  }
 0x3b7   : > { %v11339_v24 = vld [vmem:[%s12027_s29 + $0x1c20] ss:$16 sps:$4 sm:$0xff]  }
 0x3b9   : > { %7603 = vmatpush1.bf16.msra.mxu0 %v11249_v23  ;;  %8300 = vmatpush1.bf16.msra.mxu1 %v11252_v33  ;;  %v11336_v23 = vld [vmem:[%s12027_s29 + $0x1c08] ss:$16 sps:$4 sm:$0xff]   ;;  %v11341_v33 = vld [vmem:[%s12027_s29 + $0x1c24] ss:$16 sps:$4 sm:$0xff]  }
 0x3ba   : > { %7604 = vmatprep.subr.bf16.mxu0 %v11257_v34  ;;  %8301 = vmatprep.subr.bf16.mxu1 %v11260_v26  ;;  %v11344_v34 = vld [vmem:[%s12027_s29 + $0x1c2c] ss:$16 sps:$4 sm:$0xff]   ;;  %v13116_v26 = vrot.slane %v1536_v31, %v12102_v50  ;;  %v11425_v31 = vld [vmem:[%s12027_s29 + $0x1de4] ss:$16 sps:$4 sm:$0xff]  }
 0x3bd   : > { %7605 = vmatpush1.bf16.msra.mxu0 %v11255_v35  ;;  %8302 = vmatpush1.bf16.msra.mxu1 %v11258_v37  ;;  %v11342_v35 = vld [vmem:[%s12027_s29 + $0x1c28] ss:$16 sps:$4 sm:$0xff]   ;;  %v11347_v37 = vld [vmem:[%s12027_s29 + $0x1c44] ss:$16 sps:$4 sm:$0xff]  }
 0x3be   : > { %7606 = vmatprep.subr.bf16.mxu0 %v11263_v38  ;;  %8303 = vmatprep.subr.bf16.mxu1 %v11266_v40  ;;  %v11350_v38 = vld [vmem:[%s12027_s29 + $0x1c4c] ss:$16 sps:$4 sm:$0xff]   ;;  %v11345_v40 = vld [vmem:[%s12027_s29 + $0x1c40] ss:$16 sps:$4 sm:$0xff]  }
 0x3c1   : > { %7607 = vmatpush1.bf16.msra.mxu0 %v11261_v41  ;;  %8304 = vmatpush1.bf16.msra.mxu1 %v11264_v22  ;;  %v11348_v41 = vld [vmem:[%s12027_s29 + $0x1c48] ss:$16 sps:$4 sm:$0xff]   ;;  %v11353_v22 = vld [vmem:[%s12027_s29 + $0x1c64] ss:$16 sps:$4 sm:$0xff]  }
 0x3c2   : > { %7608 = vmatprep.subr.bf16.mxu0 %v11269_v42  ;;  %8305 = vmatprep.subr.bf16.mxu1 %v11272_v43  ;;  %v11356_v42 = vld [vmem:[%s12027_s29 + $0x1c6c] ss:$16 sps:$4 sm:$0xff]   ;;  %v11351_v43 = vld [vmem:[%s12027_s29 + $0x1c60] ss:$16 sps:$4 sm:$0xff]  }
 0x3c5   : > { %7609 = vmatpush1.bf16.msra.mxu0 %v11267_v45  ;;  %8306 = vmatpush1.bf16.msra.mxu1 %v11270_v46  ;;  %v11354_v45 = vld [vmem:[%s12027_s29 + $0x1c68] ss:$16 sps:$4 sm:$0xff]   ;;  %v11359_v46 = vld [vmem:[%s12027_s29 + $0x1c84] ss:$16 sps:$4 sm:$0xff]  }
 0x3c6   : > { %7610 = vmatprep.subr.bf16.mxu0 %v11275_v47  ;;  %8307 = vmatprep.subr.bf16.mxu1 %v11278_v48  ;;  %v11362_v47 = vld [vmem:[%s12027_s29 + $0x1c8c] ss:$16 sps:$4 sm:$0xff]   ;;  %v11357_v48 = vld [vmem:[%s12027_s29 + $0x1c80] ss:$16 sps:$4 sm:$0xff]  }
 0x3c9   : > { %7611 = vmatpush1.bf16.msra.mxu0 %v11273_v51  ;;  %8308 = vmatpush1.bf16.msra.mxu1 %v11276_v54  ;;  %v11360_v51 = vld [vmem:[%s12027_s29 + $0x1c88] ss:$16 sps:$4 sm:$0xff]   ;;  %v11365_v54 = vld [vmem:[%s12027_s29 + $0x1ca4] ss:$16 sps:$4 sm:$0xff]  }
 0x3ca   : > { %7612 = vmatprep.subr.bf16.mxu0 %v11281_v55  ;;  %8309 = vmatprep.subr.bf16.mxu1 %v11284_v56  ;;  %v11368_v55 = vld [vmem:[%s12027_s29 + $0x1cac] ss:$16 sps:$4 sm:$0xff]   ;;  %v11363_v56 = vld [vmem:[%s12027_s29 + $0x1ca0] ss:$16 sps:$4 sm:$0xff]  }
 0x3cd   : > { %7613 = vmatpush1.bf16.msra.mxu0 %v11279_v39  ;;  %8310 = vmatpush1.bf16.msra.mxu1 %v11282_v57  ;;  %v11366_v39 = vld [vmem:[%s12027_s29 + $0x1ca8] ss:$16 sps:$4 sm:$0xff]   ;;  %v11371_v57 = vld [vmem:[%s12027_s29 + $0x1cc4] ss:$16 sps:$4 sm:$0xff]  }
 0x3ce   : > { %7614 = vmatprep.subr.bf16.mxu0 %v11287_v58  ;;  %8311 = vmatprep.subr.bf16.mxu1 %v11290_v59  ;;  %v11374_v58 = vld [vmem:[%s12027_s29 + $0x1ccc] ss:$16 sps:$4 sm:$0xff]   ;;  %v11369_v59 = vld [vmem:[%s12027_s29 + $0x1cc0] ss:$16 sps:$4 sm:$0xff]  }
 0x3d1   : > { %7615 = vmatpush1.bf16.msra.mxu0 %v11285_v49  ;;  %8312 = vmatpush1.bf16.msra.mxu1 %v11288_v60  ;;  %v11372_v49 = vld [vmem:[%s12027_s29 + $0x1cc8] ss:$16 sps:$4 sm:$0xff]   ;;  %v11377_v60 = vld [vmem:[%s12027_s29 + $0x1ce4] ss:$16 sps:$4 sm:$0xff]  }
 0x3d2   : > { %7616 = vmatprep.subr.bf16.mxu0 %v11293_v61  ;;  %8313 = vmatprep.subr.bf16.mxu1 %v11296_v14  ;;  %v11380_v61 = vld [vmem:[%s12027_s29 + $0x1cec] ss:$16 sps:$4 sm:$0xff]   ;;  %v11375_v14 = vld [vmem:[%s12027_s29 + $0x1ce0] ss:$16 sps:$4 sm:$0xff]  }
 0x3d5   : > { %7617 = vmatpush1.bf16.msra.mxu0 %v11291_v0  ;;  %8314 = vmatpush1.bf16.msra.mxu1 %v11294_v1  ;;  %v11378_v0 = vld [vmem:[%s12027_s29 + $0x1ce8] ss:$16 sps:$4 sm:$0xff]   ;;  %v11383_v1 = vld [vmem:[%s12027_s29 + $0x1d04] ss:$16 sps:$4 sm:$0xff]  }
 0x3d6   : > { %7618 = vmatprep.subr.bf16.mxu0 %v11299_v36  ;;  %8315 = vmatprep.subr.bf16.mxu1 %v11302_v3  ;;  %v11386_v36 = vld [vmem:[%s12027_s29 + $0x1d0c] ss:$16 sps:$4 sm:$0xff]   ;;  %v11381_v3 = vld [vmem:[%s12027_s29 + $0x1d00] ss:$16 sps:$4 sm:$0xff]  }
 0x3d9   : > { %7619 = vmatpush1.bf16.msra.mxu0 %v11297_v4  ;;  %8316 = vmatpush1.bf16.msra.mxu1 %v11300_v52  ;;  %v11384_v4 = vld [vmem:[%s12027_s29 + $0x1d08] ss:$16 sps:$4 sm:$0xff]   ;;  %v11389_v52 = vld [vmem:[%s12027_s29 + $0x1d24] ss:$16 sps:$4 sm:$0xff]  }
 0x3da   : > { %7620 = vmatprep.subr.bf16.mxu0 %v11305_v5  ;;  %8317 = vmatprep.subr.bf16.mxu1 %v11308_v6  ;;  %v11392_v5 = vld [vmem:[%s12027_s29 + $0x1d2c] ss:$16 sps:$4 sm:$0xff]   ;;  %v11387_v6 = vld [vmem:[%s12027_s29 + $0x1d20] ss:$16 sps:$4 sm:$0xff]  }
 0x3dd   : > { %7621 = vmatpush1.bf16.msra.mxu0 %v11303_v62  ;;  %8318 = vmatpush1.bf16.msra.mxu1 %v11306_v8  ;;  %v11390_v62 = vld [vmem:[%s12027_s29 + $0x1d28] ss:$16 sps:$4 sm:$0xff]   ;;  %v11395_v8 = vld [vmem:[%s12027_s29 + $0x1d44] ss:$16 sps:$4 sm:$0xff]  }
 0x3de   : > { %7622 = vmatprep.subr.bf16.mxu0 %v11311_v9  ;;  %8319 = vmatprep.subr.bf16.mxu1 %v11314_v11  ;;  %v11398_v9 = vld [vmem:[%s12027_s29 + $0x1d4c] ss:$16 sps:$4 sm:$0xff]   ;;  %v11393_v11 = vld [vmem:[%s12027_s29 + $0x1d40] ss:$16 sps:$4 sm:$0xff]  }
 0x3e1   : > { %7623 = vmatpush1.bf16.msra.mxu0 %v11309_v13  ;;  %8320 = vmatpush1.bf16.msra.mxu1 %v11312_v15  ;;  %v11396_v13 = vld [vmem:[%s12027_s29 + $0x1d48] ss:$16 sps:$4 sm:$0xff]   ;;  %v11401_v15 = vld [vmem:[%s12027_s29 + $0x1d64] ss:$16 sps:$4 sm:$0xff]  }
 0x3e2   : > { %7624 = vmatprep.subr.bf16.mxu0 %v11317_v17  ;;  %8321 = vmatprep.subr.bf16.mxu1 %v11320_v2  ;;  %v11404_v17 = vld [vmem:[%s12027_s29 + $0x1d6c] ss:$16 sps:$4 sm:$0xff]   ;;  %v11399_v2 = vld [vmem:[%s12027_s29 + $0x1d60] ss:$16 sps:$4 sm:$0xff]  }
 0x3e5   : > { %7625 = vmatpush1.bf16.msra.mxu0 %v11315_v53  ;;  %8322 = vmatpush1.bf16.msra.mxu1 %v11318_v18  ;;  %v11402_v53 = vld [vmem:[%s12027_s29 + $0x1d68] ss:$16 sps:$4 sm:$0xff]   ;;  %v11407_v18 = vld [vmem:[%s12027_s29 + $0x1d84] ss:$16 sps:$4 sm:$0xff]  }
 0x3e6   : > { %7626 = vmatprep.subr.bf16.mxu0 %v11323_v19  ;;  %8323 = vmatprep.subr.bf16.mxu1 %v11326_v10  ;;  %v11410_v19 = vld [vmem:[%s12027_s29 + $0x1d8c] ss:$16 sps:$4 sm:$0xff]   ;;  %v11405_v10 = vld [vmem:[%s12027_s29 + $0x1d80] ss:$16 sps:$4 sm:$0xff]  }
 0x3e9   : > { %7627 = vmatpush1.bf16.msra.mxu0 %v11321_v21  ;;  %8324 = vmatpush1.bf16.msra.mxu1 %v11324_v63  ;;  %v11413_v21 = vld [vmem:[%s12027_s29 + $0x1da4] ss:$16 sps:$4 sm:$0xff]   ;;  %v11416_v63 = vld [vmem:[%s12027_s29 + $0x1dac] ss:$16 sps:$4 sm:$0xff]  }
 0x3ea   : > { %7628 = vmatprep.subr.bf16.mxu0 %v11329_v25  ;;  %8325 = vmatprep.subr.bf16.mxu1 %v11332_v27  ;;  %v11411_v25 = vld [vmem:[%s12027_s29 + $0x1da0] ss:$16 sps:$4 sm:$0xff]   ;;  %v11414_v27 = vld [vmem:[%s12027_s29 + $0x1da8] ss:$16 sps:$4 sm:$0xff]  }
 0x3ed   : > { %7629 = vmatpush1.bf16.msra.mxu0 %v11327_v7  ;;  %8326 = vmatpush1.bf16.msra.mxu1 %v11330_v29  ;;  %v11419_v7 = vld [vmem:[%s12027_s29 + $0x1dc4] ss:$16 sps:$4 sm:$0xff]   ;;  %v11422_v29 = vld [vmem:[%s12027_s29 + $0x1dcc] ss:$16 sps:$4 sm:$0xff]  }
 0x3ee   : > { %7639 = vmatprep.subr.bf16.mxu0 %v11335_v30  ;;  %8336 = vmatprep.subr.bf16.mxu1 %v11338_v12  ;;  %v11417_v30 = vld [vmem:[%s12027_s29 + $0x1dc0] ss:$16 sps:$4 sm:$0xff]   ;;  %v11420_v12 = vld [vmem:[%s12027_s29 + $0x1dc8] ss:$16 sps:$4 sm:$0xff]  }
 0x3f0   : > { %7631 = vmatmul.mubr.bf16.vlgmr.msra.gmra.mrb[0].mxu0 %v1565_v16  ;;  %8328 = vmatmul.mubr.bf16.vlgmr.msra.gmra.mrb[0].mxu1 %v1565_v16  ;;  %v11428_v16 = vld [vmem:[%s12027_s29 + $0x1dec] ss:$16 sps:$4 sm:$0xff]  }
 0x3f1   : > { %7640 = vmatpush1.bf16.msra.mxu0 %v11333_v32  ;;  %8337 = vmatpush1.bf16.msra.mxu1 %v11336_v23  ;;  %v11423_v32 = vld [vmem:[%s12027_s29 + $0x1de0] ss:$16 sps:$4 sm:$0xff]   ;;  %v11426_v23 = vld [vmem:[%s12027_s29 + $0x1de8] ss:$16 sps:$4 sm:$0xff]  }
 0x3f2   : > { %7641 = vmatprep.subr.bf16.mxu0 %v11341_v33  ;;  %8338 = vmatprep.subr.bf16.mxu1 %v11344_v34  ;;  %v11432_v33 = vld [vmem:[%s12027_s29 + $0x1e04] ss:$16 sps:$4 sm:$0xff]   ;;  %v11435_v34 = vld [vmem:[%s12027_s29 + $0x1e0c] ss:$16 sps:$4 sm:$0xff]  }
 0x3f3   : > { %7671 = vmatprep.mubr.bf16.mxu0 %v13116_v26  ;;  %8368 = vmatprep.mubr.bf16.mxu1 %v13116_v26 }
 0x3f5   : > { %7642 = vmatpush1.bf16.msra.mxu0 %v11339_v24  ;;  %8339 = vmatpush1.bf16.msra.mxu1 %v11342_v35  ;;  %v13182_v24 = vrot.slane %v13101_v28, %v12102_v50  ;;  %v11430_v35 = vld [vmem:[%s12027_s29 + $0x1e00] ss:$16 sps:$4 sm:$0xff]  }
 0x3f6   : > { %7643 = vmatprep.subr.bf16.mxu0 %v11347_v37  ;;  %8340 = vmatprep.subr.bf16.mxu1 %v11350_v38  ;;  %v11433_v37 = vld [vmem:[%s12027_s29 + $0x1e08] ss:$16 sps:$4 sm:$0xff]   ;;  %v11438_v38 = vld [vmem:[%s12027_s29 + $0x1e24] ss:$16 sps:$4 sm:$0xff]   ;;  %v11436_v28 = vld [vmem:[%s12027_s29 + $0x1e20] ss:$16 sps:$4 sm:$0xff]  }
 0x3f9   : > { %7644 = vmatpush1.bf16.msra.mxu0 %v11345_v40  ;;  %8341 = vmatpush1.bf16.msra.mxu1 %v11348_v41  ;;  %v11441_v40 = vld [vmem:[%s12027_s29 + $0x1e2c] ss:$16 sps:$4 sm:$0xff]   ;;  %v1568_v41 = vcombine.high %v13116_v26, %v13116_v26  ;;  %v11442_v26 = vld [vmem:[%s12027_s29 + $0x1e40] ss:$16 sps:$4 sm:$0xff]  }
 0x3fa   : > { %7645 = vmatprep.subr.bf16.mxu0 %v11353_v22  ;;  %8342 = vmatprep.subr.bf16.mxu1 %v11356_v42  ;;  %v11439_v22 = vld [vmem:[%s12027_s29 + $0x1e28] ss:$16 sps:$4 sm:$0xff]   ;;  %v11444_v42 = vld [vmem:[%s12027_s29 + $0x1e44] ss:$16 sps:$4 sm:$0xff]  }
 0x3fd   : > { %7646 = vmatpush1.bf16.msra.mxu0 %v11351_v43  ;;  %8343 = vmatpush1.bf16.msra.mxu1 %v11354_v45  ;;  %v11447_v43 = vld [vmem:[%s12027_s29 + $0x1e4c] ss:$16 sps:$4 sm:$0xff]   ;;  %v11445_v45 = vld [vmem:[%s12027_s29 + $0x1e48] ss:$16 sps:$4 sm:$0xff]  }
 0x3fe   : > { %7647 = vmatprep.subr.bf16.mxu0 %v11359_v46  ;;  %8344 = vmatprep.subr.bf16.mxu1 %v11362_v47  ;;  %v11450_v46 = vld [vmem:[%s12027_s29 + $0x1e64] ss:$16 sps:$4 sm:$0xff]   ;;  %v11453_v47 = vld [vmem:[%s12027_s29 + $0x1e6c] ss:$16 sps:$4 sm:$0xff]  }
 0x401   : > { %7648 = vmatpush1.bf16.msra.mxu0 %v11357_v48  ;;  %8345 = vmatpush1.bf16.msra.mxu1 %v11360_v51  ;;  %v11448_v48 = vld [vmem:[%s12027_s29 + $0x1e60] ss:$16 sps:$4 sm:$0xff]   ;;  %v11451_v51 = vld [vmem:[%s12027_s29 + $0x1e68] ss:$16 sps:$4 sm:$0xff]  }
 0x402   : > { %7649 = vmatprep.subr.bf16.mxu0 %v11365_v54  ;;  %8346 = vmatprep.subr.bf16.mxu1 %v11368_v55  ;;  %v11456_v54 = vld [vmem:[%s12027_s29 + $0x1e84] ss:$16 sps:$4 sm:$0xff]   ;;  %v11459_v55 = vld [vmem:[%s12027_s29 + $0x1e8c] ss:$16 sps:$4 sm:$0xff]  }
 0x405   : > { %7650 = vmatpush1.bf16.msra.mxu0 %v11363_v56  ;;  %8347 = vmatpush1.bf16.msra.mxu1 %v11366_v39  ;;  %v11454_v56 = vld [vmem:[%s12027_s29 + $0x1e80] ss:$16 sps:$4 sm:$0xff]   ;;  %v11457_v39 = vld [vmem:[%s12027_s29 + $0x1e88] ss:$16 sps:$4 sm:$0xff]  }
 0x406   : > { %7651 = vmatprep.subr.bf16.mxu0 %v11371_v57  ;;  %8348 = vmatprep.subr.bf16.mxu1 %v11374_v58  ;;  %v11462_v57 = vld [vmem:[%s12027_s29 + $0x1ea4] ss:$16 sps:$4 sm:$0xff]   ;;  %v11465_v58 = vld [vmem:[%s12027_s29 + $0x1eac] ss:$16 sps:$4 sm:$0xff]  }
 0x409   : > { %7652 = vmatpush1.bf16.msra.mxu0 %v11369_v59  ;;  %8349 = vmatpush1.bf16.msra.mxu1 %v11372_v49  ;;  %v11460_v59 = vld [vmem:[%s12027_s29 + $0x1ea0] ss:$16 sps:$4 sm:$0xff]   ;;  %v11463_v49 = vld [vmem:[%s12027_s29 + $0x1ea8] ss:$16 sps:$4 sm:$0xff]  }
 0x40a   : > { %7653 = vmatprep.subr.bf16.mxu0 %v11377_v60  ;;  %8350 = vmatprep.subr.bf16.mxu1 %v11380_v61  ;;  %v11468_v60 = vld [vmem:[%s12027_s29 + $0x1ec4] ss:$16 sps:$4 sm:$0xff]   ;;  %v11471_v61 = vld [vmem:[%s12027_s29 + $0x1ecc] ss:$16 sps:$4 sm:$0xff]  }
 0x40d   : > { %7654 = vmatpush1.bf16.msra.mxu0 %v11375_v14  ;;  %8351 = vmatpush1.bf16.msra.mxu1 %v11378_v0  ;;  %v11466_v14 = vld [vmem:[%s12027_s29 + $0x1ec0] ss:$16 sps:$4 sm:$0xff]   ;;  %v11469_v0 = vld [vmem:[%s12027_s29 + $0x1ec8] ss:$16 sps:$4 sm:$0xff]  }
 0x40e   : > { %7655 = vmatprep.subr.bf16.mxu0 %v11383_v1  ;;  %8352 = vmatprep.subr.bf16.mxu1 %v11386_v36  ;;  %v11474_v1 = vld [vmem:[%s12027_s29 + $0x1ee4] ss:$16 sps:$4 sm:$0xff]   ;;  %v11477_v36 = vld [vmem:[%s12027_s29 + $0x1eec] ss:$16 sps:$4 sm:$0xff]  }
 0x411   : > { %7656 = vmatpush1.bf16.msra.mxu0 %v11381_v3  ;;  %8353 = vmatpush1.bf16.msra.mxu1 %v11384_v4  ;;  %v11472_v3 = vld [vmem:[%s12027_s29 + $0x1ee0] ss:$16 sps:$4 sm:$0xff]   ;;  %v11475_v4 = vld [vmem:[%s12027_s29 + $0x1ee8] ss:$16 sps:$4 sm:$0xff]  }
 0x412   : > { %7657 = vmatprep.subr.bf16.mxu0 %v11389_v52  ;;  %8354 = vmatprep.subr.bf16.mxu1 %v11392_v5  ;;  %v11480_v52 = vld [vmem:[%s12027_s29 + $0x1f04] ss:$16 sps:$4 sm:$0xff]   ;;  %v11483_v5 = vld [vmem:[%s12027_s29 + $0x1f0c] ss:$16 sps:$4 sm:$0xff]  }
 0x415   : > { %7658 = vmatpush1.bf16.msra.mxu0 %v11387_v6  ;;  %8355 = vmatpush1.bf16.msra.mxu1 %v11390_v62  ;;  %v11478_v6 = vld [vmem:[%s12027_s29 + $0x1f00] ss:$16 sps:$4 sm:$0xff]   ;;  %v11481_v62 = vld [vmem:[%s12027_s29 + $0x1f08] ss:$16 sps:$4 sm:$0xff]  }
 0x416   : > { %7659 = vmatprep.subr.bf16.mxu0 %v11395_v8  ;;  %8356 = vmatprep.subr.bf16.mxu1 %v11398_v9  ;;  %v11486_v8 = vld [vmem:[%s12027_s29 + $0x1f24] ss:$16 sps:$4 sm:$0xff]   ;;  %v11489_v9 = vld [vmem:[%s12027_s29 + $0x1f2c] ss:$16 sps:$4 sm:$0xff]  }
 0x419   : > { %7660 = vmatpush1.bf16.msra.mxu0 %v11393_v11  ;;  %8357 = vmatpush1.bf16.msra.mxu1 %v11396_v13  ;;  %v11484_v11 = vld [vmem:[%s12027_s29 + $0x1f20] ss:$16 sps:$4 sm:$0xff]   ;;  %v11487_v13 = vld [vmem:[%s12027_s29 + $0x1f28] ss:$16 sps:$4 sm:$0xff]  }
 0x41a   : > { %7661 = vmatprep.subr.bf16.mxu0 %v11401_v15  ;;  %8358 = vmatprep.subr.bf16.mxu1 %v11404_v17  ;;  %v11492_v15 = vld [vmem:[%s12027_s29 + $0x1f44] ss:$16 sps:$4 sm:$0xff]   ;;  %v11495_v17 = vld [vmem:[%s12027_s29 + $0x1f4c] ss:$16 sps:$4 sm:$0xff]  }
 0x41d   : > { %7662 = vmatpush1.bf16.msra.mxu0 %v11399_v2  ;;  %8359 = vmatpush1.bf16.msra.mxu1 %v11402_v53  ;;  %v11490_v2 = vld [vmem:[%s12027_s29 + $0x1f40] ss:$16 sps:$4 sm:$0xff]   ;;  %v11493_v53 = vld [vmem:[%s12027_s29 + $0x1f48] ss:$16 sps:$4 sm:$0xff]  }
 0x41e   : > { %7663 = vmatprep.subr.bf16.mxu0 %v11407_v18  ;;  %8360 = vmatprep.subr.bf16.mxu1 %v11410_v19  ;;  %v11498_v18 = vld [vmem:[%s12027_s29 + $0x1f64] ss:$16 sps:$4 sm:$0xff]   ;;  %v11501_v19 = vld [vmem:[%s12027_s29 + $0x1f6c] ss:$16 sps:$4 sm:$0xff]  }
 0x421   : > { %7664 = vmatpush1.bf16.msra.mxu0 %v11405_v10  ;;  %8361 = vmatpush1.bf16.msra.mxu1 %v11408_v20  ;;  %v11496_v10 = vld [vmem:[%s12027_s29 + $0x1f60] ss:$16 sps:$4 sm:$0xff]   ;;  %v11499_v20 = vld [vmem:[%s12027_s29 + $0x1f68] ss:$16 sps:$4 sm:$0xff]  }
 0x422   : > { %7665 = vmatprep.subr.bf16.mxu0 %v11413_v21  ;;  %8362 = vmatprep.subr.bf16.mxu1 %v11416_v63  ;;  %v11504_v21 = vld [vmem:[%s12027_s29 + $0x1f84] ss:$16 sps:$4 sm:$0xff]   ;;  %v11507_v63 = vld [vmem:[%s12027_s29 + $0x1f8c] ss:$16 sps:$4 sm:$0xff]  }
 0x425   : > { %7666 = vmatpush1.bf16.msra.mxu0 %v11411_v25  ;;  %8363 = vmatpush1.bf16.msra.mxu1 %v11414_v27  ;;  %v11502_v25 = vld [vmem:[%s12027_s29 + $0x1f80] ss:$16 sps:$4 sm:$0xff]   ;;  %v11505_v27 = vld [vmem:[%s12027_s29 + $0x1f88] ss:$16 sps:$4 sm:$0xff]  }
 0x426   : > { %7667 = vmatprep.subr.bf16.mxu0 %v11419_v7  ;;  %8364 = vmatprep.subr.bf16.mxu1 %v11422_v29  ;;  %v11510_v7 = vld [vmem:[%s12027_s29 + $0x1fa4] ss:$16 sps:$4 sm:$0xff]   ;;  %v11513_v29 = vld [vmem:[%s12027_s29 + $0x1fac] ss:$16 sps:$4 sm:$0xff]  }
 0x429   : > { %7668 = vmatpush1.bf16.msra.mxu0 %v11417_v30  ;;  %8365 = vmatpush1.bf16.msra.mxu1 %v11420_v12  ;;  %v11508_v30 = vld [vmem:[%s12027_s29 + $0x1fa0] ss:$16 sps:$4 sm:$0xff]   ;;  %v11511_v12 = vld [vmem:[%s12027_s29 + $0x1fa8] ss:$16 sps:$4 sm:$0xff]  }
 0x42a   : > { %7669 = vmatprep.subr.bf16.mxu0 %v11425_v31  ;;  %8366 = vmatprep.subr.bf16.mxu1 %v11428_v16  ;;  %v11516_v31 = vld [vmem:[%s12027_s29 + $0x1fc4] ss:$16 sps:$4 sm:$0xff]   ;;  %v11519_v16 = vld [vmem:[%s12027_s29 + $0x1fcc] ss:$16 sps:$4 sm:$0xff]  }
 0x42d   : > { %7670 = vmatpush1.bf16.msra.mxu0 %v11423_v32  ;;  %8367 = vmatpush1.bf16.msra.mxu1 %v11426_v23  ;;  %v11514_v32 = vld [vmem:[%s12027_s29 + $0x1fc0] ss:$16 sps:$4 sm:$0xff]   ;;  %v11517_v23 = vld [vmem:[%s12027_s29 + $0x1fc8] ss:$16 sps:$4 sm:$0xff]  }
 0x42e   : > { %7680 = vmatprep.subr.bf16.mxu0 %v11432_v33  ;;  %8377 = vmatprep.subr.bf16.mxu1 %v11435_v34  ;;  %v11522_v33 = vld [vmem:[%s12027_s29 + $0x1fe4] ss:$16 sps:$4 sm:$0xff]   ;;  %v11525_v34 = vld [vmem:[%s12027_s29 + $0x1fec] ss:$16 sps:$4 sm:$0xff]  }
 0x430   : > { %7672 = vmatmul.mubr.bf16.vlgmr.msra.gmra.mrb[0].mxu0 %v13182_v24  ;;  %8369 = vmatmul.mubr.bf16.vlgmr.msra.gmra.mrb[0].mxu1 %v13182_v24 }
 0x431   : > { %7681 = vmatpush1.bf16.msra.mxu0 %v11430_v35  ;;  %8378 = vmatpush1.bf16.msra.mxu1 %v11433_v37  ;;  %v13249_v35 = vld.sshfl [vmem:[%s12046_s4 + $0x20] sm:$0x11 pattern:$0x75316420] }
 0x432   : > { %7682 = vmatprep.subr.bf16.mxu0 %v11438_v38  ;;  %8379 = vmatprep.subr.bf16.mxu1 %v11441_v40  ;;  %v11520_v37 = vld [vmem:[%s12027_s29 + $0x1fe0] ss:$16 sps:$4 sm:$0xff]   ;;  %v11523_v38 = vld [vmem:[%s12027_s29 + $0x1fe8] ss:$16 sps:$4 sm:$0xff]   ;;  %v11528_v40 = vld [vmem:[%s12027_s29 + $0x2004] ss:$16 sps:$4 sm:$0xff]  }
 0x433   : > { %7712 = vmatprep.mubr.bf16.mxu0 %v1568_v41  ;;  %8409 = vmatprep.mubr.bf16.mxu1 %v1568_v41  ;;  %v11531_v41 = vld [vmem:[%s12027_s29 + $0x200c] ss:$16 sps:$4 sm:$0xff]  }
 0x435   : > { %7683 = vmatpush1.bf16.msra.mxu0 %v11436_v28  ;;  %8380 = vmatpush1.bf16.msra.mxu1 %v11439_v22  ;;  %v1576_v28 = vcombine.high %v13249_v35, %v13249_v35  ;;  %v1566_v22 = vcombine.high %v13182_v24, %v13182_v24  ;;  %v11532_v24 = vld [vmem:[%s12027_s29 + $0x2020] ss:$16 sps:$4 sm:$0xff]  }
 0x436   : > { %7684 = vmatprep.subr.bf16.mxu0 %v11444_v42  ;;  %8381 = vmatprep.subr.bf16.mxu1 %v11447_v43  ;;  %v11526_v42 = vld [vmem:[%s12027_s29 + $0x2000] ss:$16 sps:$4 sm:$0xff]   ;;  %v11529_v43 = vld [vmem:[%s12027_s29 + $0x2008] ss:$16 sps:$4 sm:$0xff]  }
 0x439   : > { %7685 = vmatpush1.bf16.msra.mxu0 %v11442_v26  ;;  %8382 = vmatpush1.bf16.msra.mxu1 %v11445_v45  ;;  %v11534_v26 = vld [vmem:[%s12027_s29 + $0x2024] ss:$16 sps:$4 sm:$0xff]   ;;  %v11537_v45 = vld [vmem:[%s12027_s29 + $0x202c] ss:$16 sps:$4 sm:$0xff]  }
 0x43a   : > { %7686 = vmatprep.subr.bf16.mxu0 %v11450_v46  ;;  %8383 = vmatprep.subr.bf16.mxu1 %v11453_v47  ;;  %v1590_v46 = vrot.slane %v1576_v28, %v12102_v50  ;;  %v11535_v47 = vld [vmem:[%s12027_s29 + $0x2028] ss:$16 sps:$4 sm:$0xff]   ;;  %v11618_v28 = vld [vmem:[%s12027_s29 + $0x21e4] ss:$16 sps:$4 sm:$0xff]  }
 0x43d   : > { %7687 = vmatpush1.bf16.msra.mxu0 %v11448_v48  ;;  %8384 = vmatpush1.bf16.msra.mxu1 %v11451_v51  ;;  %v11540_v48 = vld [vmem:[%s12027_s29 + $0x2044] ss:$16 sps:$4 sm:$0xff]   ;;  %v11543_v51 = vld [vmem:[%s12027_s29 + $0x204c] ss:$16 sps:$4 sm:$0xff]  }
 0x43e   : > { %7688 = vmatprep.subr.bf16.mxu0 %v11456_v54  ;;  %8385 = vmatprep.subr.bf16.mxu1 %v11459_v55  ;;  %v11538_v54 = vld [vmem:[%s12027_s29 + $0x2040] ss:$16 sps:$4 sm:$0xff]   ;;  %v11541_v55 = vld [vmem:[%s12027_s29 + $0x2048] ss:$16 sps:$4 sm:$0xff]  }
 0x441   : > { %7689 = vmatpush1.bf16.msra.mxu0 %v11454_v56  ;;  %8386 = vmatpush1.bf16.msra.mxu1 %v11457_v39  ;;  %v11546_v56 = vld [vmem:[%s12027_s29 + $0x2064] ss:$16 sps:$4 sm:$0xff]   ;;  %v11549_v39 = vld [vmem:[%s12027_s29 + $0x206c] ss:$16 sps:$4 sm:$0xff]  }
 0x442   : > { %7690 = vmatprep.subr.bf16.mxu0 %v11462_v57  ;;  %8387 = vmatprep.subr.bf16.mxu1 %v11465_v58  ;;  %v11544_v57 = vld [vmem:[%s12027_s29 + $0x2060] ss:$16 sps:$4 sm:$0xff]   ;;  %v11547_v58 = vld [vmem:[%s12027_s29 + $0x2068] ss:$16 sps:$4 sm:$0xff]  }
 0x445   : > { %7691 = vmatpush1.bf16.msra.mxu0 %v11460_v59  ;;  %8388 = vmatpush1.bf16.msra.mxu1 %v11463_v49  ;;  %v11552_v59 = vld [vmem:[%s12027_s29 + $0x2084] ss:$16 sps:$4 sm:$0xff]   ;;  %v11555_v49 = vld [vmem:[%s12027_s29 + $0x208c] ss:$16 sps:$4 sm:$0xff]  }
 0x446   : > { %7692 = vmatprep.subr.bf16.mxu0 %v11468_v60  ;;  %8389 = vmatprep.subr.bf16.mxu1 %v11471_v61  ;;  %v11550_v60 = vld [vmem:[%s12027_s29 + $0x2080] ss:$16 sps:$4 sm:$0xff]   ;;  %v11553_v61 = vld [vmem:[%s12027_s29 + $0x2088] ss:$16 sps:$4 sm:$0xff]  }
 0x449   : > { %7693 = vmatpush1.bf16.msra.mxu0 %v11466_v14  ;;  %8390 = vmatpush1.bf16.msra.mxu1 %v11469_v0  ;;  %v11558_v14 = vld [vmem:[%s12027_s29 + $0x20a4] ss:$16 sps:$4 sm:$0xff]   ;;  %v11561_v0 = vld [vmem:[%s12027_s29 + $0x20ac] ss:$16 sps:$4 sm:$0xff]  }
 0x44a   : > { %7694 = vmatprep.subr.bf16.mxu0 %v11474_v1  ;;  %8391 = vmatprep.subr.bf16.mxu1 %v11477_v36  ;;  %v11556_v1 = vld [vmem:[%s12027_s29 + $0x20a0] ss:$16 sps:$4 sm:$0xff]   ;;  %v11559_v36 = vld [vmem:[%s12027_s29 + $0x20a8] ss:$16 sps:$4 sm:$0xff]  }
 0x44d   : > { %7695 = vmatpush1.bf16.msra.mxu0 %v11472_v3  ;;  %8392 = vmatpush1.bf16.msra.mxu1 %v11475_v4  ;;  %v11564_v3 = vld [vmem:[%s12027_s29 + $0x20c4] ss:$16 sps:$4 sm:$0xff]   ;;  %v11567_v4 = vld [vmem:[%s12027_s29 + $0x20cc] ss:$16 sps:$4 sm:$0xff]  }
 0x44e   : > { %7696 = vmatprep.subr.bf16.mxu0 %v11480_v52  ;;  %8393 = vmatprep.subr.bf16.mxu1 %v11483_v5  ;;  %v11562_v52 = vld [vmem:[%s12027_s29 + $0x20c0] ss:$16 sps:$4 sm:$0xff]   ;;  %v11565_v5 = vld [vmem:[%s12027_s29 + $0x20c8] ss:$16 sps:$4 sm:$0xff]  }
 0x451   : > { %7697 = vmatpush1.bf16.msra.mxu0 %v11478_v6  ;;  %8394 = vmatpush1.bf16.msra.mxu1 %v11481_v62  ;;  %v11570_v6 = vld [vmem:[%s12027_s29 + $0x20e4] ss:$16 sps:$4 sm:$0xff]   ;;  %v11573_v62 = vld [vmem:[%s12027_s29 + $0x20ec] ss:$16 sps:$4 sm:$0xff]  }
 0x452   : > { %7698 = vmatprep.subr.bf16.mxu0 %v11486_v8  ;;  %8395 = vmatprep.subr.bf16.mxu1 %v11489_v9  ;;  %v11568_v8 = vld [vmem:[%s12027_s29 + $0x20e0] ss:$16 sps:$4 sm:$0xff]   ;;  %v11571_v9 = vld [vmem:[%s12027_s29 + $0x20e8] ss:$16 sps:$4 sm:$0xff]  }
 0x455   : > { %7699 = vmatpush1.bf16.msra.mxu0 %v11484_v11  ;;  %8396 = vmatpush1.bf16.msra.mxu1 %v11487_v13  ;;  %v11576_v11 = vld [vmem:[%s12027_s29 + $0x2104] ss:$16 sps:$4 sm:$0xff]   ;;  %v11579_v13 = vld [vmem:[%s12027_s29 + $0x210c] ss:$16 sps:$4 sm:$0xff]  }
 0x456   : > { %7700 = vmatprep.subr.bf16.mxu0 %v11492_v15  ;;  %8397 = vmatprep.subr.bf16.mxu1 %v11495_v17  ;;  %v11574_v15 = vld [vmem:[%s12027_s29 + $0x2100] ss:$16 sps:$4 sm:$0xff]   ;;  %v11577_v17 = vld [vmem:[%s12027_s29 + $0x2108] ss:$16 sps:$4 sm:$0xff]  }
 0x459   : > { %7701 = vmatpush1.bf16.msra.mxu0 %v11490_v2  ;;  %8398 = vmatpush1.bf16.msra.mxu1 %v11493_v53  ;;  %v11582_v2 = vld [vmem:[%s12027_s29 + $0x2124] ss:$16 sps:$4 sm:$0xff]   ;;  %v11585_v53 = vld [vmem:[%s12027_s29 + $0x212c] ss:$16 sps:$4 sm:$0xff]  }
 0x45a   : > { %7702 = vmatprep.subr.bf16.mxu0 %v11498_v18  ;;  %8399 = vmatprep.subr.bf16.mxu1 %v11501_v19  ;;  %v11580_v18 = vld [vmem:[%s12027_s29 + $0x2120] ss:$16 sps:$4 sm:$0xff]   ;;  %v11583_v19 = vld [vmem:[%s12027_s29 + $0x2128] ss:$16 sps:$4 sm:$0xff]  }
 0x45d   : > { %7703 = vmatpush1.bf16.msra.mxu0 %v11496_v10  ;;  %8400 = vmatpush1.bf16.msra.mxu1 %v11499_v20  ;;  %v11588_v10 = vld [vmem:[%s12027_s29 + $0x2144] ss:$16 sps:$4 sm:$0xff]   ;;  %v11591_v20 = vld [vmem:[%s12027_s29 + $0x214c] ss:$16 sps:$4 sm:$0xff]  }
 0x45e   : > { %7704 = vmatprep.subr.bf16.mxu0 %v11504_v21  ;;  %8401 = vmatprep.subr.bf16.mxu1 %v11507_v63  ;;  %v11586_v21 = vld [vmem:[%s12027_s29 + $0x2140] ss:$16 sps:$4 sm:$0xff]   ;;  %v11589_v63 = vld [vmem:[%s12027_s29 + $0x2148] ss:$16 sps:$4 sm:$0xff]  }
 0x461   : > { %7705 = vmatpush1.bf16.msra.mxu0 %v11502_v25  ;;  %8402 = vmatpush1.bf16.msra.mxu1 %v11505_v27  ;;  %v11594_v25 = vld [vmem:[%s12027_s29 + $0x2164] ss:$16 sps:$4 sm:$0xff]   ;;  %v11597_v27 = vld [vmem:[%s12027_s29 + $0x216c] ss:$16 sps:$4 sm:$0xff]  }
 0x462   : > { %7706 = vmatprep.subr.bf16.mxu0 %v11510_v7  ;;  %8403 = vmatprep.subr.bf16.mxu1 %v11513_v29  ;;  %v11592_v7 = vld [vmem:[%s12027_s29 + $0x2160] ss:$16 sps:$4 sm:$0xff]   ;;  %v11595_v29 = vld [vmem:[%s12027_s29 + $0x2168] ss:$16 sps:$4 sm:$0xff]  }
 0x465   : > { %7707 = vmatpush1.bf16.msra.mxu0 %v11508_v30  ;;  %8404 = vmatpush1.bf16.msra.mxu1 %v11511_v12  ;;  %v11600_v30 = vld [vmem:[%s12027_s29 + $0x2184] ss:$16 sps:$4 sm:$0xff]   ;;  %v11603_v12 = vld [vmem:[%s12027_s29 + $0x218c] ss:$16 sps:$4 sm:$0xff]  }
 0x466   : > { %7708 = vmatprep.subr.bf16.mxu0 %v11516_v31  ;;  %8405 = vmatprep.subr.bf16.mxu1 %v11519_v16  ;;  %v11598_v31 = vld [vmem:[%s12027_s29 + $0x2180] ss:$16 sps:$4 sm:$0xff]   ;;  %v11601_v16 = vld [vmem:[%s12027_s29 + $0x2188] ss:$16 sps:$4 sm:$0xff]  }
 0x469   : > { %7709 = vmatpush1.bf16.msra.mxu0 %v11514_v32  ;;  %8406 = vmatpush1.bf16.msra.mxu1 %v11517_v23  ;;  %v11606_v32 = vld [vmem:[%s12027_s29 + $0x21a4] ss:$16 sps:$4 sm:$0xff]   ;;  %v11609_v23 = vld [vmem:[%s12027_s29 + $0x21ac] ss:$16 sps:$4 sm:$0xff]  }
 0x46a   : > { %7710 = vmatprep.subr.bf16.mxu0 %v11522_v33  ;;  %8407 = vmatprep.subr.bf16.mxu1 %v11525_v34  ;;  %v11604_v33 = vld [vmem:[%s12027_s29 + $0x21a0] ss:$16 sps:$4 sm:$0xff]   ;;  %v11607_v34 = vld [vmem:[%s12027_s29 + $0x21a8] ss:$16 sps:$4 sm:$0xff]  }
 0x46d   : > { %7711 = vmatpush1.bf16.msra.mxu0 %v11520_v37  ;;  %8408 = vmatpush1.bf16.msra.mxu1 %v11523_v38  ;;  %v11612_v37 = vld [vmem:[%s12027_s29 + $0x21c4] ss:$16 sps:$4 sm:$0xff]   ;;  %v11615_v38 = vld [vmem:[%s12027_s29 + $0x21cc] ss:$16 sps:$4 sm:$0xff]  }
 0x46e   : > { %7721 = vmatprep.subr.bf16.mxu0 %v11528_v40  ;;  %8418 = vmatprep.subr.bf16.mxu1 %v11531_v41  ;;  %v11610_v40 = vld [vmem:[%s12027_s29 + $0x21c0] ss:$16 sps:$4 sm:$0xff]   ;;  %v11613_v41 = vld [vmem:[%s12027_s29 + $0x21c8] ss:$16 sps:$4 sm:$0xff]  }
 0x470   : > { %7713 = vmatmul.mubr.bf16.vlgmr.msra.gmra.mrb[0].mxu0 %v1566_v22  ;;  %8410 = vmatmul.mubr.bf16.vlgmr.msra.gmra.mrb[0].mxu1 %v1566_v22  ;;  %v11621_v22 = vld [vmem:[%s12027_s29 + $0x21ec] ss:$16 sps:$4 sm:$0xff]  }
 0x471   : > { %7722 = vmatpush1.bf16.msra.mxu0 %v11526_v42  ;;  %8419 = vmatpush1.bf16.msra.mxu1 %v11529_v43  ;;  %v11616_v42 = vld [vmem:[%s12027_s29 + $0x21e0] ss:$16 sps:$4 sm:$0xff]   ;;  %v11619_v43 = vld [vmem:[%s12027_s29 + $0x21e8] ss:$16 sps:$4 sm:$0xff]  }
 0x472   : > { %7723 = vmatprep.subr.bf16.mxu0 %v11534_v26  ;;  %8420 = vmatprep.subr.bf16.mxu1 %v11537_v45  ;;  %v1583_v26 = vrot.slane %v13249_v35, %v12102_v50  ;;  %v11787_v45 = vmov 1983009808  }
 0x473   : > { %7753 = vmatprep.mubr.bf16.mxu0 %v1590_v46  ;;  %8450 = vmatprep.mubr.bf16.mxu1 %v1590_v46  ;;  %v8466_v46 = vunpack.c.l.s4 %v11787_v45 }
 0x475   : > { %7724 = vmatpush1.bf16.msra.mxu0 %v11532_v24  ;;  %8421 = vmatpush1.bf16.msra.mxu1 %v11535_v47  ;;  %v8467_v24 = vunpack.c.0.s8 %v8466_v46 }
 0x476   : > { %7725 = vmatprep.subr.bf16.mxu0 %v11540_v48  ;;  %8422 = vmatprep.subr.bf16.mxu1 %v11543_v51 }
 0x477   : > { %v8470_v51 = vsub.s32 %v8467_v24, %v12094_v44 }
 0x479   : > { %7726 = vmatpush1.bf16.msra.mxu0 %v11538_v54  ;;  %8423 = vmatpush1.bf16.msra.mxu1 %v11541_v55 }
 0x47a   : > { %7727 = vmatprep.subr.bf16.mxu0 %v11546_v56  ;;  %8424 = vmatprep.subr.bf16.mxu1 %v11549_v39 }
 0x47d   : > { %7728 = vmatpush1.bf16.msra.mxu0 %v11544_v57  ;;  %8425 = vmatpush1.bf16.msra.mxu1 %v11547_v58 }
 0x47e   : > { %7729 = vmatprep.subr.bf16.mxu0 %v11552_v59  ;;  %8426 = vmatprep.subr.bf16.mxu1 %v11555_v49 }
 0x481   : > { %7730 = vmatpush1.bf16.msra.mxu0 %v11550_v60  ;;  %8427 = vmatpush1.bf16.msra.mxu1 %v11553_v61  ;;  %v274_v60 = vld [vmem:[%s12051_s26] sm:$0xff] }
 0x482   : > { %7731 = vmatprep.subr.bf16.mxu0 %v11558_v14  ;;  %8428 = vmatprep.subr.bf16.mxu1 %v11561_v0  ;;  %v8488_v0 = vld [vmem:[%s223_s6] sm:$0xf] (!%p9745_p3) }
 0x485   : > { %7732 = vmatpush1.bf16.msra.mxu0 %v11556_v1  ;;  %8429 = vmatpush1.bf16.msra.mxu1 %v11559_v36  ;;  %v8492_v1 = vsub.s32 (!%p9745_p3), 0, %v12094_v44  ;;  %v8496_v36 = vsub.s32 (!%p9745_p3), 1, %v12094_v44 }
 0x486   : > { %7733 = vmatprep.subr.bf16.mxu0 %v11564_v3  ;;  %8430 = vmatprep.subr.bf16.mxu1 %v11567_v4  ;;  %v8500_v3 = vsub.s32 (!%p9745_p3), 2, %v12094_v44  ;;  %v8504_v4 = vsub.s32 (!%p9745_p3), 3, %v12094_v44 }
 0x489   : > { %7734 = vmatpush1.bf16.msra.mxu0 %v11562_v52  ;;  %8431 = vmatpush1.bf16.msra.mxu1 %v11565_v5  ;;  %v8493_v52 = vrot.slane (!%p9745_p3), %v8488_v0, %v8492_v1  ;;  %v8497_v5 = vrot.slane (!%p9745_p3), %v8488_v0, %v8496_v36 }
 0x48a   : > { %7735 = vmatprep.subr.bf16.mxu0 %v11570_v6  ;;  %8432 = vmatprep.subr.bf16.mxu1 %v11573_v62  ;;  %v8501_v6 = vrot.slane (!%p9745_p3), %v8488_v0, %v8500_v3  ;;  %v8505_v62 = vrot.slane (!%p9745_p3), %v8488_v0, %v8504_v4 }
 0x48d   : > { %7736 = vmatpush1.bf16.msra.mxu0 %v11568_v8  ;;  %8433 = vmatpush1.bf16.msra.mxu1 %v11571_v9  ;;  %v8506_v8 = vcombine.low (!%p9745_p3), %v8493_v52, %v8497_v5  ;;  %v8507_v9 = vcombine.low (!%p9745_p3), %v8501_v6, %v8505_v62 }
 0x48e   : > { %7737 = vmatprep.subr.bf16.mxu0 %v11576_v11  ;;  %8434 = vmatprep.subr.bf16.mxu1 %v11579_v13 }
 0x48f   : > { %v8514_v11 = vrot.slane (!%p9745_p3), %v8506_v8, %v8470_v51  ;;  %v8521_v13 = vrot.slane (!%p9745_p3), %v8507_v9, %v8470_v51 }
 0x491   : > { %7738 = vmatpush1.bf16.msra.mxu0 %v11574_v15  ;;  %8435 = vmatpush1.bf16.msra.mxu1 %v11577_v17  ;;  %v8522_v17 = vcombine.low (!%p9745_p3), %v8514_v11, %v8521_v13 }
 0x492   : > { %7739 = vmatprep.subr.bf16.mxu0 %v11582_v2  ;;  %8436 = vmatprep.subr.bf16.mxu1 %v11585_v53 }
 0x495   : > { %7740 = vmatpush1.bf16.msra.mxu0 %v11580_v18  ;;  %8437 = vmatpush1.bf16.msra.mxu1 %v11583_v19 }
 0x496   : > { %7741 = vmatprep.subr.bf16.mxu0 %v11588_v10  ;;  %8438 = vmatprep.subr.bf16.mxu1 %v11591_v20 }
 0x499   : > { %7742 = vmatpush1.bf16.msra.mxu0 %v11586_v21  ;;  %8439 = vmatpush1.bf16.msra.mxu1 %v11589_v63 }
 0x49a   : > { %7743 = vmatprep.subr.bf16.mxu0 %v11594_v25  ;;  %8440 = vmatprep.subr.bf16.mxu1 %v11597_v27 }
 0x49d   : > { %7744 = vmatpush1.bf16.msra.mxu0 %v11592_v7  ;;  %8441 = vmatpush1.bf16.msra.mxu1 %v11595_v29 }
 0x49e   : > { %7745 = vmatprep.subr.bf16.mxu0 %v11600_v30  ;;  %8442 = vmatprep.subr.bf16.mxu1 %v11603_v12 }
 0x4a1   : > { %7746 = vmatpush1.bf16.msra.mxu0 %v11598_v31  ;;  %8443 = vmatpush1.bf16.msra.mxu1 %v11601_v16 }
 0x4a2   : > { %7747 = vmatprep.subr.bf16.mxu0 %v11606_v32  ;;  %8444 = vmatprep.subr.bf16.mxu1 %v11609_v23 }
 0x4a5   : > { %7748 = vmatpush1.bf16.msra.mxu0 %v11604_v33  ;;  %8445 = vmatpush1.bf16.msra.mxu1 %v11607_v34 }
 0x4a6   : > { %7749 = vmatprep.subr.bf16.mxu0 %v11612_v37  ;;  %8446 = vmatprep.subr.bf16.mxu1 %v11615_v38 }
 0x4a9   : > { %7750 = vmatpush1.bf16.msra.mxu0 %v11610_v40  ;;  %8447 = vmatpush1.bf16.msra.mxu1 %v11613_v41 }
 0x4aa   : > { %7751 = vmatprep.subr.bf16.mxu0 %v11618_v28  ;;  %8448 = vmatprep.subr.bf16.mxu1 %v11621_v22 }
 0x4ad   : > { %7752 = vmatpush1.bf16.msra.mxu0 %v11616_v42  ;;  %8449 = vmatpush1.bf16.msra.mxu1 %v11619_v43 }
 0x4b0   : > { %7754 = vmatmul.mubr.bf16.vlgmr.msra.gmra.mrb[0].mxu0 %v1583_v26  ;;  %8451 = vmatmul.mubr.bf16.vlgmr.msra.gmra.mrb[0].mxu1 %v1583_v26 }
 0x583   : > { %v7755_v47 = vpop.f32.mrb[0].mxu0  ;;  %v8452_v48 = vpop.f32.mrb[0].mxu1 }
 0x584   : > { %v7757_v54 = vpop.f32.mrb[1].mxu0  ;;  %v8454_v55 = vpop.f32.mrb[1].mxu1 }
 0x585   : > { %v8463_v56 = vcombine.low %v7755_v47, %v7757_v54  ;;  %v8464_v39 = vcombine.low %v8452_v48, %v8454_v55  ;;  %v7759_v57 = vpop.f32.mrb[2].mxu0  ;;  %v8456_v58 = vpop.f32.mrb[2].mxu1 }
 0x586   : > { %v7760_v50 = vpop.f32.mrb[3].mxu0  ;;  %v8457_v35 = vpop.f32.mrb[3].mxu1 }
 0x587   : > { %v8471_v59 = vrot.slane %v8463_v56, %v8470_v51  ;;  %v8478_v49 = vrot.slane %v8464_v39, %v8470_v51  ;;  %8486 = sbr.rel (%p9745_p3) target bundleno = 1434 (0x59a), region = 48 }
 0x589   : > { %v8479_v61 = vcombine.low %v8471_v59, %v8478_v49 }
 0x58b   : > { %v8481_v14 = vadd.f32 %v8479_v61, %v274_v60 }
 0x58d   : > { %8482 = vst [vmem:[%s12051_s26] sm:$0xff] %v8481_v14 }
 0x594   : > { %v8487_v15 = vld [vmem:[%s12051_s26] sm:$0xff] }
 0x595   : > { %v8524_v2 = vadd.f32 %v8522_v17, %v8487_v15 }
 0x597   : > { %v8525_v53 = vmax.f32 %v8524_v2, 0.0 }
 0x599   : > { %8526 = vst [vmem:[%s12051_s26] sm:$0xff] %v8525_v53 }
 0x59a PF: > { %s19_s22 = sadd.s32 1, %s11778_s22   ;;  %s13396_s9 = sld [smem:[#allocation8_spill]] }
 0x59b   : > { %p16_p11 = scmp.ge.s32.totalorder %s19_s22, 22   ;;  %s13397_s12 = smov %s11742_s13 }
 0x59c   : > { %s13398_s13 = smov %s11746_s14  ;;  %s13399_s14 = smov %s11976_s10 }
 0x59d   : > { %s13400_s15 = smov %s11754_s16  ;;  %s13401_s16 = smov %s11758_s17 }
 0x59e   : > { %s13402_s17 = smov %s11981_s28  ;;  %s13403_s18 = smov %s11770_s20 }
 0x59f   : > { %s13404_s19 = smov %s11774_s21  ;;  %s13405_s20 = smov %s13408_s23 }
 0x5a0   : > { %s13406_s21 = smov %s13396_s9  ;;  %18 = sbr.rel (!%p16_p11) target bundleno = 11 (0xb), region = 96 }
 0x5a7   :  { %8549 = vsyncpa [#allocation3], 1 }
 0x5a8   :  { %8551 = vsyncpa [#allocation3 + $0x1], 1 }
 0x5a9   :  { %8552 = vsyncpa [#allocation5], 1 }
 0x5aa   :  { %8554 = vsyncpa [#allocation5 + $0x1], 1 }

// kernel: char_cnn_forward.5
= control target key start
LH: loop header
LB: loop body
LE: loop exit
PB: predicated region body
PF: predicated region fallthrough
CT: control target
= control target key end

     0   :  { %v4651_v32 = vmov 1983009808   ;;  %v38_v34 = vlaneseq  ;;  %vm4055_vm0 = vcmask 1041408   ;;  %vm4081_vm1 = vcmask 1024   ;;  %s6368_s1 = inlined_call_operand.vmem [shape: bf16[1024,1024], index: 1, kind: input, shape index: {}]   ;;  %s6369_s0 = inlined_call_operand.vmem [shape: f32[2,1024], index: 0, kind: input, shape index: {}]   ;;  %s6370_s4 = inlined_call_operand.<no memory space> [shape: f32[1,1], index: 4, kind: input, shape index: {}]   ;;  %s6371_s2 = inlined_call_operand.vmem [shape: f32[1,1024], index: 2, kind: input, shape index: {}]   ;;  %s6372_s3 = inlined_call_operand.vmem [shape: f32[1,1024], index: 3, kind: input, shape index: {}]   ;;  %s6373_s5 = inlined_call_operand.vmem [shape: f32[2,1], index: 5, kind: output, shape index: {}]  }
   0x1   :  { %v84_v0 = vld [vmem:[%s6368_s1] sm:$0xff]  ;;  %v85_v2 = vld [vmem:[%s6368_s1 + $0x8] sm:$0xff]  ;;  %v36_v33 = vunpack.c.l.s4 %v4651_v32 }
   0x2   :  { %v88_v1 = vld [vmem:[%s6368_s1 + $0x20] sm:$0xff]  ;;  %v89_v4 = vld [vmem:[%s6368_s1 + $0x28] sm:$0xff]  ;;  %v4748_v44 = vshrl.u32 %v38_v34, 7 }
   0x3   :  { %v4088_v3 = vcombine.high %v84_v0, %v88_v1  ;;  %v4087_v5 = vcombine.low %v84_v0, %v88_v1  ;;  %v92_v6 = vld [vmem:[%s6368_s1 + $0x40] sm:$0xff]  ;;  %v4090_v8 = vcombine.high %v85_v2, %v89_v4  ;;  %v4089_v9 = vcombine.low %v85_v2, %v89_v4  ;;  %v93_v11 = vld [vmem:[%s6368_s1 + $0x48] sm:$0xff] }
   0x4   :  { %v96_v7 = vld [vmem:[%s6368_s1 + $0x60] sm:$0xff]  ;;  %v97_v12 = vld [vmem:[%s6368_s1 + $0x68] sm:$0xff]  ;;  %v37_v43 = vunpack.c.0.s8 %v36_v33 }
   0x5   :  { %v4096_v10 = vcombine.high %v92_v6, %v96_v7  ;;  %v100_v13 = vld [vmem:[%s6368_s1 + $0x80] sm:$0xff]  ;;  %3156 = vmatprep.subr.bf16.mxu0 %v4088_v3  ;;  %v4098_v14 = vcombine.high %v93_v11, %v97_v12  ;;  %v101_v16 = vld [vmem:[%s6368_s1 + $0x88] sm:$0xff]  ;;  %3320 = vmatprep.subr.bf16.mxu1 %v4090_v8  ;;  %v4095_v18 = vcombine.low %v92_v6, %v96_v7 }
   0x6   :  { %v104_v15 = vld [vmem:[%s6368_s1 + $0xa0] sm:$0xff]  ;;  %v105_v17 = vld [vmem:[%s6368_s1 + $0xa8] sm:$0xff]  ;;  %3157 = vmatpush1.bf16.msra.mxu0 %v4087_v5  ;;  %3321 = vmatpush1.bf16.msra.mxu1 %v4089_v9  ;;  %v4097_v19 = vcombine.low %v93_v11, %v97_v12  ;;  %v4763_v53 = vsub.s32 %v37_v43, %v4748_v44 }
   0x7   :  { %3158 = vmatprep.subr.bf16.mxu0 %v4096_v10  ;;  %v4104_v20 = vcombine.high %v100_v13, %v104_v15  ;;  %3322 = vmatprep.subr.bf16.mxu1 %v4098_v14  ;;  %v4106_v21 = vcombine.high %v101_v16, %v105_v17  ;;  %v108_v22 = vld [vmem:[%s6368_s1 + $0xc0] sm:$0xff]  ;;  %v109_v24 = vld [vmem:[%s6368_s1 + $0xc8] sm:$0xff]  ;;  %v4103_v26 = vcombine.low %v100_v13, %v104_v15 }
   0x8   :  { %v112_v23 = vld [vmem:[%s6368_s1 + $0xe0] sm:$0xff]  ;;  %v113_v25 = vld [vmem:[%s6368_s1 + $0xe8] sm:$0xff]  ;;  %v4105_v27 = vcombine.low %v101_v16, %v105_v17 }
   0x9   :  { %v4112_v28 = vcombine.high %v108_v22, %v112_v23  ;;  %v4114_v29 = vcombine.high %v109_v24, %v113_v25  ;;  %v116_v30 = vld [vmem:[%s6368_s1 + $0x100] sm:$0xff]  ;;  %v117_v35 = vld [vmem:[%s6368_s1 + $0x108] sm:$0xff]  ;;  %v4111_v37 = vcombine.low %v108_v22, %v112_v23  ;;  %v4113_v38 = vcombine.low %v109_v24, %v113_v25 }
   0xa   :  { %3159 = vmatpush1.bf16.msra.mxu0 %v4095_v18  ;;  %3323 = vmatpush1.bf16.msra.mxu1 %v4097_v19  ;;  %v120_v31 = vld [vmem:[%s6368_s1 + $0x120] sm:$0xff]  ;;  %v121_v36 = vld [vmem:[%s6368_s1 + $0x128] sm:$0xff] }
   0xb   :  { %3160 = vmatprep.subr.bf16.mxu0 %v4104_v20  ;;  %3324 = vmatprep.subr.bf16.mxu1 %v4106_v21  ;;  %v4120_v39 = vcombine.high %v116_v30, %v120_v31  ;;  %v4122_v40 = vcombine.high %v117_v35, %v121_v36  ;;  %v124_v41 = vld [vmem:[%s6368_s1 + $0x140] sm:$0xff]  ;;  %v125_v45 = vld [vmem:[%s6368_s1 + $0x148] sm:$0xff]  ;;  %v4119_v47 = vcombine.low %v116_v30, %v120_v31 }
   0xc   :  { %v128_v42 = vld [vmem:[%s6368_s1 + $0x160] sm:$0xff]  ;;  %v129_v46 = vld [vmem:[%s6368_s1 + $0x168] sm:$0xff]  ;;  %v4121_v48 = vcombine.low %v117_v35, %v121_v36 }
   0xd   :  { %v4128_v49 = vcombine.high %v124_v41, %v128_v42  ;;  %v4130_v50 = vcombine.high %v125_v45, %v129_v46  ;;  %v132_v51 = vld [vmem:[%s6368_s1 + $0x180] sm:$0xff]  ;;  %v133_v54 = vld [vmem:[%s6368_s1 + $0x188] sm:$0xff]  ;;  %v4127_v56 = vcombine.low %v124_v41, %v128_v42  ;;  %v4129_v57 = vcombine.low %v125_v45, %v129_v46 }
   0xe   :  { %3161 = vmatpush1.bf16.msra.mxu0 %v4103_v26  ;;  %3325 = vmatpush1.bf16.msra.mxu1 %v4105_v27  ;;  %v136_v52 = vld [vmem:[%s6368_s1 + $0x1a0] sm:$0xff]  ;;  %v137_v55 = vld [vmem:[%s6368_s1 + $0x1a8] sm:$0xff] }
   0xf   :  { %3162 = vmatprep.subr.bf16.mxu0 %v4112_v28  ;;  %3326 = vmatprep.subr.bf16.mxu1 %v4114_v29  ;;  %v4136_v58 = vcombine.high %v132_v51, %v136_v52  ;;  %v4774_v59 = vld [vmem:[%s6369_s0] sm:$0xff]  ;;  %v4138_v60 = vcombine.high %v133_v54, %v137_v55  ;;  %v141_v0 = vld [vmem:[%s6368_s1 + $0x1c8] sm:$0xff]  ;;  %v4135_v2 = vcombine.low %v132_v51, %v136_v52 }
  0x10   :  { %v140_v61 = vld [vmem:[%s6368_s1 + $0x1c0] sm:$0xff]  ;;  %v4784_v63 = vrot.slane %v4774_v59, %v4763_v53  ;;  %v145_v1 = vld [vmem:[%s6368_s1 + $0x1e8] sm:$0xff]  ;;  %v4137_v4 = vcombine.low %v133_v54, %v137_v55 }
  0x11   :  { %v144_v62 = vld [vmem:[%s6368_s1 + $0x1e0] sm:$0xff]  ;;  %v4146_v6 = vcombine.high %v141_v0, %v145_v1  ;;  %v149_v10 = vld [vmem:[%s6368_s1 + $0x208] sm:$0xff]  ;;  %v4145_v13 = vcombine.low %v141_v0, %v145_v1 }
  0x12   :  { %3163 = vmatpush1.bf16.msra.mxu0 %v4111_v37  ;;  %3327 = vmatpush1.bf16.msra.mxu1 %v4113_v38  ;;  %v49_v3 = vcombine.high %v4784_v63, %v4784_v63  ;;  %v4144_v5 = vcombine.high %v140_v61, %v144_v62  ;;  %v148_v7 = vld [vmem:[%s6368_s1 + $0x200] sm:$0xff]  ;;  %v153_v11 = vld [vmem:[%s6368_s1 + $0x228] sm:$0xff]  ;;  %v4143_v12 = vcombine.low %v140_v61, %v144_v62 }
  0x13   :  { %3164 = vmatprep.subr.bf16.mxu0 %v4120_v39  ;;  %3328 = vmatprep.subr.bf16.mxu1 %v4122_v40  ;;  %v152_v8 = vld [vmem:[%s6368_s1 + $0x220] sm:$0xff]  ;;  %v4154_v15 = vcombine.high %v149_v10, %v153_v11  ;;  %v157_v18 = vld [vmem:[%s6368_s1 + $0x248] sm:$0xff]  ;;  %v4153_v21 = vcombine.low %v149_v10, %v153_v11 }
  0x14   :  { %v4800_v9 = vpack.c.bf16 %v49_v3, %v49_v3  ;;  %v4152_v14 = vcombine.high %v148_v7, %v152_v8  ;;  %v156_v16 = vld [vmem:[%s6368_s1 + $0x240] sm:$0xff]  ;;  %v161_v19 = vld [vmem:[%s6368_s1 + $0x268] sm:$0xff]  ;;  %v4151_v20 = vcombine.low %v148_v7, %v152_v8 }
  0x15   :  { %v160_v17 = vld [vmem:[%s6368_s1 + $0x260] sm:$0xff]  ;;  %v4162_v23 = vcombine.high %v157_v18, %v161_v19  ;;  %v165_v26 = vld [vmem:[%s6368_s1 + $0x288] sm:$0xff]  ;;  %v4161_v29 = vcombine.low %v157_v18, %v161_v19 }
  0x16   :  { %3165 = vmatpush1.bf16.msra.mxu0 %v4119_v47  ;;  %3329 = vmatpush1.bf16.msra.mxu1 %v4121_v48  ;;  %v4160_v22 = vcombine.high %v156_v16, %v160_v17  ;;  %v164_v24 = vld [vmem:[%s6368_s1 + $0x280] sm:$0xff]  ;;  %v169_v27 = vld [vmem:[%s6368_s1 + $0x2a8] sm:$0xff]  ;;  %v4159_v28 = vcombine.low %v156_v16, %v160_v17 }
  0x17   :  { %3166 = vmatprep.subr.bf16.mxu0 %v4128_v49  ;;  %3330 = vmatprep.subr.bf16.mxu1 %v4130_v50  ;;  %v168_v25 = vld [vmem:[%s6368_s1 + $0x2a0] sm:$0xff]  ;;  %v4170_v31 = vcombine.high %v165_v26, %v169_v27  ;;  %v173_v34 = vld [vmem:[%s6368_s1 + $0x2c8] sm:$0xff]  ;;  %v4169_v37 = vcombine.low %v165_v26, %v169_v27 }
  0x18   :  { %3188 = vmatprep.mubr.bf16.mxu0 %v4800_v9  ;;  %3352 = vmatprep.mubr.bf16.mxu1 %v4800_v9  ;;  %v4168_v30 = vcombine.high %v164_v24, %v168_v25  ;;  %v172_v32 = vld [vmem:[%s6368_s1 + $0x2c0] sm:$0xff]  ;;  %v177_v35 = vld [vmem:[%s6368_s1 + $0x2e8] sm:$0xff]  ;;  %v4167_v36 = vcombine.low %v164_v24, %v168_v25  ;;  %v4921_v25 = vpack.c.bf16 %v4784_v63, %v4784_v63 }
  0x19   :  { %v176_v33 = vld [vmem:[%s6368_s1 + $0x2e0] sm:$0xff]  ;;  %v4178_v39 = vcombine.high %v173_v34, %v177_v35  ;;  %v181_v42 = vld [vmem:[%s6368_s1 + $0x308] sm:$0xff]  ;;  %v4177_v46 = vcombine.low %v173_v34, %v177_v35 }
  0x1a   :  { %3167 = vmatpush1.bf16.msra.mxu0 %v4127_v56  ;;  %3331 = vmatpush1.bf16.msra.mxu1 %v4129_v57  ;;  %v4176_v38 = vcombine.high %v172_v32, %v176_v33  ;;  %v180_v40 = vld [vmem:[%s6368_s1 + $0x300] sm:$0xff]  ;;  %v185_v43 = vld [vmem:[%s6368_s1 + $0x328] sm:$0xff]  ;;  %v4175_v45 = vcombine.low %v172_v32, %v176_v33 }
  0x1b   :  { %3168 = vmatprep.subr.bf16.mxu0 %v4136_v58  ;;  %3332 = vmatprep.subr.bf16.mxu1 %v4138_v60  ;;  %v184_v41 = vld [vmem:[%s6368_s1 + $0x320] sm:$0xff]  ;;  %v4186_v48 = vcombine.high %v181_v42, %v185_v43  ;;  %v189_v51 = vld [vmem:[%s6368_s1 + $0x348] sm:$0xff]  ;;  %v4185_v55 = vcombine.low %v181_v42, %v185_v43 }
  0x1c   :  { %v4184_v47 = vcombine.high %v180_v40, %v184_v41  ;;  %v188_v49 = vld [vmem:[%s6368_s1 + $0x340] sm:$0xff]  ;;  %v193_v52 = vld [vmem:[%s6368_s1 + $0x368] sm:$0xff]  ;;  %v4183_v54 = vcombine.low %v180_v40, %v184_v41 }
  0x1d   :  { %v192_v50 = vld [vmem:[%s6368_s1 + $0x360] sm:$0xff]  ;;  %v4194_v57 = vcombine.high %v189_v51, %v193_v52  ;;  %v197_v61 = vld [vmem:[%s6368_s1 + $0x388] sm:$0xff]  ;;  %v4193_v1 = vcombine.low %v189_v51, %v193_v52 }
  0x1e   :  { %3169 = vmatpush1.bf16.msra.mxu0 %v4135_v2  ;;  %3333 = vmatpush1.bf16.msra.mxu1 %v4137_v4  ;;  %v4192_v56 = vcombine.high %v188_v49, %v192_v50  ;;  %v196_v58 = vld [vmem:[%s6368_s1 + $0x380] sm:$0xff]  ;;  %v201_v62 = vld [vmem:[%s6368_s1 + $0x3a8] sm:$0xff]  ;;  %v4191_v0 = vcombine.low %v188_v49, %v192_v50 }
  0x1f   :  { %3170 = vmatprep.subr.bf16.mxu0 %v4144_v5  ;;  %3334 = vmatprep.subr.bf16.mxu1 %v4146_v6  ;;  %v200_v60 = vld [vmem:[%s6368_s1 + $0x3a0] sm:$0xff]  ;;  %v4202_v3 = vcombine.high %v197_v61, %v201_v62  ;;  %v34_v6 = vcombine.high %v4774_v59, %v4774_v59  ;;  %v205_v7 = vld [vmem:[%s6368_s1 + $0x3c8] sm:$0xff]  ;;  %v4201_v11 = vcombine.low %v197_v61, %v201_v62 }
  0x20   :  { %v4200_v2 = vcombine.high %v196_v58, %v200_v60  ;;  %v204_v4 = vld [vmem:[%s6368_s1 + $0x3c0] sm:$0xff]  ;;  %v209_v8 = vld [vmem:[%s6368_s1 + $0x3e8] sm:$0xff]  ;;  %v4199_v10 = vcombine.low %v196_v58, %v200_v60 }
  0x21   :  { %v208_v5 = vld [vmem:[%s6368_s1 + $0x3e0] sm:$0xff]  ;;  %v213_v16 = vld [vmem:[%s6368_s1 + $0x408] sm:$0xff]  ;;  %v4209_v19 = vcombine.low %v205_v7, %v209_v8 }
  0x22   :  { %3171 = vmatpush1.bf16.msra.mxu0 %v4143_v12  ;;  %3335 = vmatpush1.bf16.msra.mxu1 %v4145_v13  ;;  %v4208_v12 = vcombine.high %v204_v4, %v208_v5  ;;  %v4210_v13 = vcombine.high %v205_v7, %v209_v8  ;;  %v212_v59 = vld [vmem:[%s6368_s1 + $0x400] sm:$0xff]  ;;  %v217_v17 = vld [vmem:[%s6368_s1 + $0x428] sm:$0xff]  ;;  %v4207_v18 = vcombine.low %v204_v4, %v208_v5 }
  0x23   :  { %3172 = vmatprep.subr.bf16.mxu0 %v4152_v14  ;;  %3336 = vmatprep.subr.bf16.mxu1 %v4154_v15  ;;  %v216_v14 = vld [vmem:[%s6368_s1 + $0x420] sm:$0xff]  ;;  %v4903_v15 = vrot.slane %v34_v6, %v4763_v53  ;;  %v221_v26 = vld [vmem:[%s6368_s1 + $0x448] sm:$0xff] }
  0x24   :  { %v225_v27 = vld [vmem:[%s6368_s1 + $0x468] sm:$0xff]  ;;  %v228_v63 = vld [vmem:[%s6368_s1 + $0x480] sm:$0xff] }
  0x25   :  { %v50_v24 = vcombine.high %v4903_v15, %v4903_v15  ;;  %v232_v32 = vld [vmem:[%s6368_s1 + $0x4a0] sm:$0xff]  ;;  %v229_v34 = vld [vmem:[%s6368_s1 + $0x488] sm:$0xff] }
  0x26   :  { %3173 = vmatpush1.bf16.msra.mxu0 %v4151_v20  ;;  %3337 = vmatpush1.bf16.msra.mxu1 %v4153_v21  ;;  %v4216_v20 = vcombine.high %v212_v59, %v216_v14  ;;  %v4218_v21 = vcombine.high %v213_v16, %v217_v17  ;;  %v233_v35 = vld [vmem:[%s6368_s1 + $0x4a8] sm:$0xff]  ;;  %v236_v40 = vld [vmem:[%s6368_s1 + $0x4c0] sm:$0xff] }
  0x27   :  { %3174 = vmatprep.subr.bf16.mxu0 %v4160_v22  ;;  %3338 = vmatprep.subr.bf16.mxu1 %v4162_v23  ;;  %v220_v22 = vld [vmem:[%s6368_s1 + $0x440] sm:$0xff]  ;;  %v4935_v33 = vpack.c.bf16 %v50_v24, %v50_v24  ;;  %v237_v42 = vld [vmem:[%s6368_s1 + $0x4c8] sm:$0xff] }
  0x28   :  { %v224_v23 = vld [vmem:[%s6368_s1 + $0x460] sm:$0xff]  ;;  %v241_v43 = vld [vmem:[%s6368_s1 + $0x4e8] sm:$0xff] }
  0x29   :  { %v240_v41 = vld [vmem:[%s6368_s1 + $0x4e0] sm:$0xff]  ;;  %v245_v51 = vld [vmem:[%s6368_s1 + $0x508] sm:$0xff] }
  0x2a   :  { %3175 = vmatpush1.bf16.msra.mxu0 %v4159_v28  ;;  %3339 = vmatpush1.bf16.msra.mxu1 %v4161_v29  ;;  %v4215_v28 = vcombine.low %v212_v59, %v216_v14  ;;  %v4217_v29 = vcombine.low %v213_v16, %v217_v17  ;;  %v244_v49 = vld [vmem:[%s6368_s1 + $0x500] sm:$0xff]  ;;  %v249_v52 = vld [vmem:[%s6368_s1 + $0x528] sm:$0xff] }
  0x2b   :  { %3176 = vmatprep.subr.bf16.mxu0 %v4168_v30  ;;  %3340 = vmatprep.subr.bf16.mxu1 %v4170_v31  ;;  %v4224_v30 = vcombine.high %v220_v22, %v224_v23  ;;  %v4226_v31 = vcombine.high %v221_v26, %v225_v27  ;;  %v248_v50 = vld [vmem:[%s6368_s1 + $0x520] sm:$0xff]  ;;  %v253_v61 = vld [vmem:[%s6368_s1 + $0x548] sm:$0xff] }
  0x2c   :  { %v252_v58 = vld [vmem:[%s6368_s1 + $0x540] sm:$0xff]  ;;  %v257_v62 = vld [vmem:[%s6368_s1 + $0x568] sm:$0xff] }
  0x2d   :  { %v256_v60 = vld [vmem:[%s6368_s1 + $0x560] sm:$0xff]  ;;  %v261_v6 = vld [vmem:[%s6368_s1 + $0x588] sm:$0xff] }
  0x2e   :  { %3177 = vmatpush1.bf16.msra.mxu0 %v4167_v36  ;;  %3341 = vmatpush1.bf16.msra.mxu1 %v4169_v37  ;;  %v4223_v36 = vcombine.low %v220_v22, %v224_v23  ;;  %v4225_v37 = vcombine.low %v221_v26, %v225_v27  ;;  %v260_v4 = vld [vmem:[%s6368_s1 + $0x580] sm:$0xff]  ;;  %v265_v7 = vld [vmem:[%s6368_s1 + $0x5a8] sm:$0xff]  ;;  %v4255_v8 = vcombine.low %v252_v58, %v256_v60 }
  0x2f   :  { %3178 = vmatprep.subr.bf16.mxu0 %v4176_v38  ;;  %3342 = vmatprep.subr.bf16.mxu1 %v4178_v39  ;;  %v4232_v38 = vcombine.high %v228_v63, %v232_v32  ;;  %v4234_v39 = vcombine.high %v229_v34, %v233_v35  ;;  %v264_v5 = vld [vmem:[%s6368_s1 + $0x5a0] sm:$0xff]  ;;  %v269_v14 = vld [vmem:[%s6368_s1 + $0x5c8] sm:$0xff] }
  0x30   :  { %v272_v59 = vld [vmem:[%s6368_s1 + $0x5e0] sm:$0xff]  ;;  %v273_v16 = vld [vmem:[%s6368_s1 + $0x5e8] sm:$0xff]  ;;  %v4263_v17 = vcombine.low %v260_v4, %v264_v5 }
  0x31   :  { %v280_v22 = vld [vmem:[%s6368_s1 + $0x620] sm:$0xff]  ;;  %v277_v23 = vld [vmem:[%s6368_s1 + $0x608] sm:$0xff]  ;;  %v4273_v27 = vcombine.low %v269_v14, %v273_v16 }
  0x32   :  { %3179 = vmatpush1.bf16.msra.mxu0 %v4175_v45  ;;  %3343 = vmatpush1.bf16.msra.mxu1 %v4177_v46  ;;  %v4231_v45 = vcombine.low %v228_v63, %v232_v32  ;;  %v4233_v46 = vcombine.low %v229_v34, %v233_v35  ;;  %v281_v24 = vld [vmem:[%s6368_s1 + $0x628] sm:$0xff] }
  0x33   :  { %3180 = vmatprep.subr.bf16.mxu0 %v4184_v47  ;;  %3344 = vmatprep.subr.bf16.mxu1 %v4186_v48  ;;  %v4240_v47 = vcombine.high %v236_v40, %v240_v41  ;;  %v4242_v48 = vcombine.high %v237_v42, %v241_v43  ;;  %v285_v63 = vld [vmem:[%s6368_s1 + $0x648] sm:$0xff]  ;;  %v4281_v35 = vcombine.low %v277_v23, %v281_v24 }
  0x34   :  { %v289_v32 = vld [vmem:[%s6368_s1 + $0x668] sm:$0xff] }
  0x36   :  { %3181 = vmatpush1.bf16.msra.mxu0 %v4183_v54  ;;  %3345 = vmatpush1.bf16.msra.mxu1 %v4185_v55  ;;  %v4239_v54 = vcombine.low %v236_v40, %v240_v41  ;;  %v4241_v55 = vcombine.low %v237_v42, %v241_v43  ;;  %v293_v40 = vld [vmem:[%s6368_s1 + $0x688] sm:$0xff]  ;;  %v4289_v43 = vcombine.low %v285_v63, %v289_v32 }
  0x37   :  { %3182 = vmatprep.subr.bf16.mxu0 %v4192_v56  ;;  %3346 = vmatprep.subr.bf16.mxu1 %v4194_v57  ;;  %v4248_v56 = vcombine.high %v244_v49, %v248_v50  ;;  %v4250_v57 = vcombine.high %v245_v51, %v249_v52  ;;  %v297_v41 = vld [vmem:[%s6368_s1 + $0x6a8] sm:$0xff] }
  0x3a   :  { %3183 = vmatpush1.bf16.msra.mxu0 %v4191_v0  ;;  %3347 = vmatpush1.bf16.msra.mxu1 %v4193_v1  ;;  %v4247_v0 = vcombine.low %v244_v49, %v248_v50  ;;  %v4249_v1 = vcombine.low %v245_v51, %v249_v52  ;;  %v301_v49 = vld [vmem:[%s6368_s1 + $0x6c8] sm:$0xff]  ;;  %v4297_v52 = vcombine.low %v293_v40, %v297_v41 }
  0x3b   :  { %3184 = vmatprep.subr.bf16.mxu0 %v4200_v2  ;;  %3348 = vmatprep.subr.bf16.mxu1 %v4202_v3  ;;  %v4256_v2 = vcombine.high %v252_v58, %v256_v60  ;;  %v4258_v3 = vcombine.high %v253_v61, %v257_v62  ;;  %v305_v50 = vld [vmem:[%s6368_s1 + $0x6e8] sm:$0xff] }
  0x3c   :  { %v309_v58 = vld [vmem:[%s6368_s1 + $0x708] sm:$0xff] }
  0x3d   :  { %v313_v60 = vld [vmem:[%s6368_s1 + $0x728] sm:$0xff] }
  0x3e   :  { %3185 = vmatpush1.bf16.msra.mxu0 %v4199_v10  ;;  %3349 = vmatpush1.bf16.msra.mxu1 %v4201_v11  ;;  %v4257_v10 = vcombine.low %v253_v61, %v257_v62  ;;  %v4264_v11 = vcombine.high %v260_v4, %v264_v5  ;;  %v4305_v62 = vcombine.low %v301_v49, %v305_v50  ;;  %v317_v4 = vld [vmem:[%s6368_s1 + $0x748] sm:$0xff] }
  0x3f   :  { %3186 = vmatprep.subr.bf16.mxu0 %v4208_v12  ;;  %3350 = vmatprep.subr.bf16.mxu1 %v4210_v13  ;;  %v4266_v12 = vcombine.high %v261_v6, %v265_v7  ;;  %v268_v13 = vld [vmem:[%s6368_s1 + $0x5c0] sm:$0xff]  ;;  %v321_v5 = vld [vmem:[%s6368_s1 + $0x768] sm:$0xff] }
  0x40   :  { %v4271_v26 = vcombine.low %v268_v13, %v272_v59 }
  0x42   :  { %3187 = vmatpush1.bf16.msra.mxu0 %v4207_v18  ;;  %3351 = vmatpush1.bf16.msra.mxu1 %v4209_v19  ;;  %v4265_v18 = vcombine.low %v261_v6, %v265_v7  ;;  %v4272_v19 = vcombine.high %v268_v13, %v272_v59  ;;  %v4313_v7 = vcombine.low %v309_v58, %v313_v60  ;;  %v325_v13 = vld [vmem:[%s6368_s1 + $0x788] sm:$0xff] }
  0x43   :  { %3197 = vmatprep.subr.bf16.mxu0 %v4216_v20  ;;  %3361 = vmatprep.subr.bf16.mxu1 %v4218_v21  ;;  %v4274_v20 = vcombine.high %v269_v14, %v273_v16  ;;  %v276_v21 = vld [vmem:[%s6368_s1 + $0x600] sm:$0xff]  ;;  %v329_v59 = vld [vmem:[%s6368_s1 + $0x7a8] sm:$0xff]  ;;  %v4321_v16 = vcombine.low %v317_v4, %v321_v5 }
  0x44   :  { %v4279_v34 = vcombine.low %v276_v21, %v280_v22 }
  0x45   :  { %3189 = vmatmul.mubr.bf16.vlgmr.msra.gmra.mrb[0].mxu0 %v4921_v25  ;;  %3353 = vmatmul.mubr.bf16.vlgmr.msra.gmra.mrb[0].mxu1 %v4921_v25 }
  0x46   :  { %3198 = vmatpush1.bf16.msra.mxu0 %v4215_v28  ;;  %3362 = vmatpush1.bf16.msra.mxu1 %v4217_v29  ;;  %v4280_v28 = vcombine.high %v276_v21, %v280_v22  ;;  %v4282_v29 = vcombine.high %v277_v23, %v281_v24  ;;  %v333_v21 = vld [vmem:[%s6368_s1 + $0x7c8] sm:$0xff] }
  0x47   :  { %3199 = vmatprep.subr.bf16.mxu0 %v4224_v30  ;;  %3363 = vmatprep.subr.bf16.mxu1 %v4226_v31  ;;  %v284_v30 = vld [vmem:[%s6368_s1 + $0x640] sm:$0xff]  ;;  %v337_v22 = vld [vmem:[%s6368_s1 + $0x7e8] sm:$0xff] }
  0x48   :  { %3229 = vmatprep.mubr.bf16.mxu0 %v4935_v33  ;;  %3393 = vmatprep.mubr.bf16.mxu1 %v4935_v33  ;;  %v288_v31 = vld [vmem:[%s6368_s1 + $0x660] sm:$0xff]  ;;  %v5106_v23 = vld [vmem:[%s6369_s0 + $0x8] sm:$0xff] }
  0x49   :  { %v4287_v42 = vcombine.low %v284_v30, %v288_v31 }
  0x4a   :  { %3200 = vmatpush1.bf16.msra.mxu0 %v4223_v36  ;;  %3364 = vmatpush1.bf16.msra.mxu1 %v4225_v37  ;;  %v4288_v36 = vcombine.high %v284_v30, %v288_v31  ;;  %v4290_v37 = vcombine.high %v285_v63, %v289_v32  ;;  %v344_v30 = vld [vmem:[%s6368_s1 + $0x820] sm:$0xff]  ;;  %v5116_v31 = vrot.slane %v5106_v23, %v4763_v53  ;;  %v341_v63 = vld [vmem:[%s6368_s1 + $0x808] sm:$0xff] }
  0x4b   :  { %3201 = vmatprep.subr.bf16.mxu0 %v4232_v38  ;;  %3365 = vmatprep.subr.bf16.mxu1 %v4234_v39  ;;  %v292_v38 = vld [vmem:[%s6368_s1 + $0x680] sm:$0xff]  ;;  %v345_v32 = vld [vmem:[%s6368_s1 + $0x828] sm:$0xff] }
  0x4c   :  { %v296_v39 = vld [vmem:[%s6368_s1 + $0x6a0] sm:$0xff] }
  0x4d   :  { %v4295_v51 = vcombine.low %v292_v38, %v296_v39 }
  0x4e   :  { %3202 = vmatpush1.bf16.msra.mxu0 %v4231_v45  ;;  %3366 = vmatpush1.bf16.msra.mxu1 %v4233_v46  ;;  %v4296_v45 = vcombine.high %v292_v38, %v296_v39  ;;  %v4298_v46 = vcombine.high %v293_v40, %v297_v41  ;;  %v348_v38 = vld [vmem:[%s6368_s1 + $0x840] sm:$0xff]  ;;  %v66_v40 = vcombine.high %v5116_v31, %v5116_v31 }
  0x4f   :  { %3203 = vmatprep.subr.bf16.mxu0 %v4240_v47  ;;  %3367 = vmatprep.subr.bf16.mxu1 %v4242_v48  ;;  %v300_v47 = vld [vmem:[%s6368_s1 + $0x6c0] sm:$0xff]  ;;  %v5134_v41 = vpack.c.bf16 %v4903_v15, %v4903_v15 }
  0x50   :  { %v304_v48 = vld [vmem:[%s6368_s1 + $0x6e0] sm:$0xff] }
  0x51   :  { %v4303_v61 = vcombine.low %v300_v47, %v304_v48  ;;  %v352_v39 = vld [vmem:[%s6368_s1 + $0x860] sm:$0xff] }
  0x52   :  { %3204 = vmatpush1.bf16.msra.mxu0 %v4239_v54  ;;  %3368 = vmatpush1.bf16.msra.mxu1 %v4241_v55  ;;  %v4304_v54 = vcombine.high %v300_v47, %v304_v48  ;;  %v4306_v55 = vcombine.high %v301_v49, %v305_v50  ;;  %v4352_v47 = vcombine.high %v348_v38, %v352_v39  ;;  %v356_v15 = vld [vmem:[%s6368_s1 + $0x880] sm:$0xff] }
  0x53   :  { %3205 = vmatprep.subr.bf16.mxu0 %v4248_v56  ;;  %3369 = vmatprep.subr.bf16.mxu1 %v4250_v57  ;;  %v308_v56 = vld [vmem:[%s6368_s1 + $0x700] sm:$0xff]  ;;  %v5148_v50 = vpack.c.bf16 %v66_v40, %v66_v40 }
  0x54   :  { %v312_v57 = vld [vmem:[%s6368_s1 + $0x720] sm:$0xff] }
  0x55   :  { %v4311_v6 = vcombine.low %v308_v56, %v312_v57  ;;  %v360_v49 = vld [vmem:[%s6368_s1 + $0x8a0] sm:$0xff] }
  0x56   :  { %3206 = vmatpush1.bf16.msra.mxu0 %v4247_v0  ;;  %3370 = vmatpush1.bf16.msra.mxu1 %v4249_v1  ;;  %v4312_v0 = vcombine.high %v308_v56, %v312_v57  ;;  %v4314_v1 = vcombine.high %v309_v58, %v313_v60  ;;  %v4360_v56 = vcombine.high %v356_v15, %v360_v49  ;;  %v364_v58 = vld [vmem:[%s6368_s1 + $0x8c0] sm:$0xff] }
  0x57   :  { %3207 = vmatprep.subr.bf16.mxu0 %v4256_v2  ;;  %3371 = vmatprep.subr.bf16.mxu1 %v4258_v3  ;;  %v316_v2 = vld [vmem:[%s6368_s1 + $0x740] sm:$0xff] }
  0x58   :  { %v320_v3 = vld [vmem:[%s6368_s1 + $0x760] sm:$0xff] }
  0x59   :  { %v4319_v14 = vcombine.low %v316_v2, %v320_v3  ;;  %v368_v60 = vld [vmem:[%s6368_s1 + $0x8e0] sm:$0xff] }
  0x5a   :  { %3208 = vmatpush1.bf16.msra.mxu0 %v4255_v8  ;;  %3372 = vmatpush1.bf16.msra.mxu1 %v4257_v10  ;;  %v4320_v8 = vcombine.high %v316_v2, %v320_v3  ;;  %v4322_v10 = vcombine.high %v317_v4, %v321_v5  ;;  %v4368_v2 = vcombine.high %v364_v58, %v368_v60  ;;  %v372_v4 = vld [vmem:[%s6368_s1 + $0x900] sm:$0xff] }
  0x5b   :  { %3209 = vmatprep.subr.bf16.mxu0 %v4264_v11  ;;  %3373 = vmatprep.subr.bf16.mxu1 %v4266_v12  ;;  %v324_v11 = vld [vmem:[%s6368_s1 + $0x780] sm:$0xff] }
  0x5c   :  { %v328_v12 = vld [vmem:[%s6368_s1 + $0x7a0] sm:$0xff] }
  0x5d   :  { %v4327_v24 = vcombine.low %v324_v11, %v328_v12  ;;  %v376_v5 = vld [vmem:[%s6368_s1 + $0x920] sm:$0xff] }
  0x5e   :  { %3210 = vmatpush1.bf16.msra.mxu0 %v4263_v17  ;;  %3374 = vmatpush1.bf16.msra.mxu1 %v4265_v18  ;;  %v4328_v17 = vcombine.high %v324_v11, %v328_v12  ;;  %v4330_v18 = vcombine.high %v325_v13, %v329_v59  ;;  %v4376_v11 = vcombine.high %v372_v4, %v376_v5  ;;  %v404_v40 = vld [vmem:[%s6368_s1 + $0xa00] sm:$0xff] }
  0x5f   :  { %3211 = vmatprep.subr.bf16.mxu0 %v4272_v19  ;;  %3375 = vmatprep.subr.bf16.mxu1 %v4274_v20  ;;  %v332_v19 = vld [vmem:[%s6368_s1 + $0x7c0] sm:$0xff] }
  0x60   :  { %v336_v20 = vld [vmem:[%s6368_s1 + $0x7e0] sm:$0xff] }
  0x62   :  { %3212 = vmatpush1.bf16.msra.mxu0 %v4271_v26  ;;  %3376 = vmatpush1.bf16.msra.mxu1 %v4273_v27  ;;  %v4329_v26 = vcombine.low %v325_v13, %v329_v59  ;;  %v4336_v27 = vcombine.high %v332_v19, %v336_v20  ;;  %v380_v13 = vld [vmem:[%s6368_s1 + $0x940] sm:$0xff] }
  0x63   :  { %3213 = vmatprep.subr.bf16.mxu0 %v4280_v28  ;;  %3377 = vmatprep.subr.bf16.mxu1 %v4282_v29  ;;  %v4338_v28 = vcombine.high %v333_v21, %v337_v22  ;;  %v340_v29 = vld [vmem:[%s6368_s1 + $0x800] sm:$0xff] }
  0x64   :  { %v384_v59 = vld [vmem:[%s6368_s1 + $0x960] sm:$0xff] }
  0x66   :  { %3214 = vmatpush1.bf16.msra.mxu0 %v4279_v34  ;;  %3378 = vmatpush1.bf16.msra.mxu1 %v4281_v35  ;;  %v4335_v34 = vcombine.low %v332_v19, %v336_v20  ;;  %v4337_v35 = vcombine.low %v333_v21, %v337_v22  ;;  %v4384_v19 = vcombine.high %v380_v13, %v384_v59  ;;  %v388_v21 = vld [vmem:[%s6368_s1 + $0x980] sm:$0xff] }
  0x67   :  { %3215 = vmatprep.subr.bf16.mxu0 %v4288_v36  ;;  %3379 = vmatprep.subr.bf16.mxu1 %v4290_v37  ;;  %v4344_v36 = vcombine.high %v340_v29, %v344_v30  ;;  %v4346_v37 = vcombine.high %v341_v63, %v345_v32  ;;  %v392_v22 = vld [vmem:[%s6368_s1 + $0x9a0] sm:$0xff] }
  0x6a   :  { %3216 = vmatpush1.bf16.msra.mxu0 %v4287_v42  ;;  %3380 = vmatpush1.bf16.msra.mxu1 %v4289_v43  ;;  %v349_v42 = vld [vmem:[%s6368_s1 + $0x848] sm:$0xff] }
  0x6b   :  { %3217 = vmatprep.subr.bf16.mxu0 %v4296_v45  ;;  %3381 = vmatprep.subr.bf16.mxu1 %v4298_v46  ;;  %v353_v43 = vld [vmem:[%s6368_s1 + $0x868] sm:$0xff]  ;;  %v4343_v45 = vcombine.low %v340_v29, %v344_v30  ;;  %v4345_v46 = vcombine.low %v341_v63, %v345_v32  ;;  %v4392_v29 = vcombine.high %v388_v21, %v392_v22  ;;  %v396_v63 = vld [vmem:[%s6368_s1 + $0x9c0] sm:$0xff] }
  0x6c   :  { %v4354_v48 = vcombine.high %v349_v42, %v353_v43  ;;  %v400_v32 = vld [vmem:[%s6368_s1 + $0x9e0] sm:$0xff] }
  0x6e   :  { %3218 = vmatpush1.bf16.msra.mxu0 %v4295_v51  ;;  %3382 = vmatpush1.bf16.msra.mxu1 %v4297_v52  ;;  %v357_v51 = vld [vmem:[%s6368_s1 + $0x888] sm:$0xff] }
  0x6f   :  { %3219 = vmatprep.subr.bf16.mxu0 %v4304_v54  ;;  %3383 = vmatprep.subr.bf16.mxu1 %v4306_v55  ;;  %v361_v52 = vld [vmem:[%s6368_s1 + $0x8a8] sm:$0xff]  ;;  %v4351_v54 = vcombine.low %v348_v38, %v352_v39  ;;  %v4353_v55 = vcombine.low %v349_v42, %v353_v43  ;;  %v4400_v38 = vcombine.high %v396_v63, %v400_v32  ;;  %v408_v42 = vld [vmem:[%s6368_s1 + $0xa20] sm:$0xff] }
  0x70   :  { %v4362_v57 = vcombine.high %v357_v51, %v361_v52  ;;  %v405_v43 = vld [vmem:[%s6368_s1 + $0xa08] sm:$0xff] }
  0x72   :  { %3220 = vmatpush1.bf16.msra.mxu0 %v4303_v61  ;;  %3384 = vmatpush1.bf16.msra.mxu1 %v4305_v62  ;;  %v365_v61 = vld [vmem:[%s6368_s1 + $0x8c8] sm:$0xff] }
  0x73   :  { %3221 = vmatprep.subr.bf16.mxu0 %v4312_v0  ;;  %3385 = vmatprep.subr.bf16.mxu1 %v4314_v1  ;;  %v369_v62 = vld [vmem:[%s6368_s1 + $0x8e8] sm:$0xff]  ;;  %v4359_v0 = vcombine.low %v356_v15, %v360_v49  ;;  %v4361_v1 = vcombine.low %v357_v51, %v361_v52  ;;  %v412_v49 = vld [vmem:[%s6368_s1 + $0xa40] sm:$0xff] }
  0x74   :  { %v4370_v3 = vcombine.high %v365_v61, %v369_v62  ;;  %v416_v51 = vld [vmem:[%s6368_s1 + $0xa60] sm:$0xff]  ;;  %v413_v52 = vld [vmem:[%s6368_s1 + $0xa48] sm:$0xff] }
  0x76   :  { %3222 = vmatpush1.bf16.msra.mxu0 %v4311_v6  ;;  %3386 = vmatpush1.bf16.msra.mxu1 %v4313_v7  ;;  %v373_v6 = vld [vmem:[%s6368_s1 + $0x908] sm:$0xff] }
  0x77   :  { %3223 = vmatprep.subr.bf16.mxu0 %v4320_v8  ;;  %3387 = vmatprep.subr.bf16.mxu1 %v4322_v10  ;;  %v377_v7 = vld [vmem:[%s6368_s1 + $0x928] sm:$0xff]  ;;  %v4367_v8 = vcombine.low %v364_v58, %v368_v60  ;;  %v4369_v10 = vcombine.low %v365_v61, %v369_v62  ;;  %v420_v60 = vld [vmem:[%s6368_s1 + $0xa80] sm:$0xff] }
  0x78   :  { %v4378_v12 = vcombine.high %v373_v6, %v377_v7  ;;  %v424_v61 = vld [vmem:[%s6368_s1 + $0xaa0] sm:$0xff]  ;;  %v421_v62 = vld [vmem:[%s6368_s1 + $0xa88] sm:$0xff] }
  0x7a   :  { %3224 = vmatpush1.bf16.msra.mxu0 %v4319_v14  ;;  %3388 = vmatpush1.bf16.msra.mxu1 %v4321_v16  ;;  %v381_v14 = vld [vmem:[%s6368_s1 + $0x948] sm:$0xff] }
  0x7b   :  { %3225 = vmatprep.subr.bf16.mxu0 %v4328_v17  ;;  %3389 = vmatprep.subr.bf16.mxu1 %v4330_v18  ;;  %v385_v16 = vld [vmem:[%s6368_s1 + $0x968] sm:$0xff]  ;;  %v4375_v17 = vcombine.low %v372_v4, %v376_v5  ;;  %v4377_v18 = vcombine.low %v373_v6, %v377_v7  ;;  %v428_v5 = vld [vmem:[%s6368_s1 + $0xac0] sm:$0xff] }
  0x7c   :  { %v4386_v20 = vcombine.high %v381_v14, %v385_v16  ;;  %v432_v6 = vld [vmem:[%s6368_s1 + $0xae0] sm:$0xff]  ;;  %v429_v7 = vld [vmem:[%s6368_s1 + $0xac8] sm:$0xff] }
  0x7e   :  { %3226 = vmatpush1.bf16.msra.mxu0 %v4327_v24  ;;  %3390 = vmatpush1.bf16.msra.mxu1 %v4329_v26  ;;  %v389_v24 = vld [vmem:[%s6368_s1 + $0x988] sm:$0xff] }
  0x7f   :  { %3227 = vmatprep.subr.bf16.mxu0 %v4336_v27  ;;  %3391 = vmatprep.subr.bf16.mxu1 %v4338_v28  ;;  %v393_v26 = vld [vmem:[%s6368_s1 + $0x9a8] sm:$0xff]  ;;  %v4383_v27 = vcombine.low %v380_v13, %v384_v59  ;;  %v4385_v28 = vcombine.low %v381_v14, %v385_v16  ;;  %v436_v59 = vld [vmem:[%s6368_s1 + $0xb00] sm:$0xff] }
  0x80   :  { %v4394_v30 = vcombine.high %v389_v24, %v393_v26  ;;  %v440_v14 = vld [vmem:[%s6368_s1 + $0xb20] sm:$0xff]  ;;  %v437_v16 = vld [vmem:[%s6368_s1 + $0xb08] sm:$0xff] }
  0x82   :  { %3228 = vmatpush1.bf16.msra.mxu0 %v4335_v34  ;;  %3392 = vmatpush1.bf16.msra.mxu1 %v4337_v35  ;;  %v397_v34 = vld [vmem:[%s6368_s1 + $0x9c8] sm:$0xff] }
  0x83   :  { %3238 = vmatprep.subr.bf16.mxu0 %v4344_v36  ;;  %3402 = vmatprep.subr.bf16.mxu1 %v4346_v37  ;;  %v401_v35 = vld [vmem:[%s6368_s1 + $0x9e8] sm:$0xff]  ;;  %v4391_v36 = vcombine.low %v388_v21, %v392_v22  ;;  %v4393_v37 = vcombine.low %v389_v24, %v393_v26  ;;  %v444_v22 = vld [vmem:[%s6368_s1 + $0xb40] sm:$0xff] }
  0x84   :  { %v4402_v39 = vcombine.high %v397_v34, %v401_v35  ;;  %v448_v24 = vld [vmem:[%s6368_s1 + $0xb60] sm:$0xff]  ;;  %v445_v26 = vld [vmem:[%s6368_s1 + $0xb48] sm:$0xff] }
  0x85   :  { %3230 = vmatmul.mubr.bf16.vlgmr.msra.gmra.mrb[0].mxu0 %v5134_v41  ;;  %3394 = vmatmul.mubr.bf16.vlgmr.msra.gmra.mrb[0].mxu1 %v5134_v41 }
  0x86   :  { %3239 = vmatpush1.bf16.msra.mxu0 %v4343_v45  ;;  %3403 = vmatpush1.bf16.msra.mxu1 %v4345_v46  ;;  %v409_v45 = vld [vmem:[%s6368_s1 + $0xa28] sm:$0xff]  ;;  %v4399_v46 = vcombine.low %v396_v63, %v400_v32  ;;  %v452_v32 = vld [vmem:[%s6368_s1 + $0xb80] sm:$0xff] }
  0x87   :  { %3240 = vmatprep.subr.bf16.mxu0 %v4352_v47  ;;  %3404 = vmatprep.subr.bf16.mxu1 %v4354_v48  ;;  %v4401_v47 = vcombine.low %v397_v34, %v401_v35  ;;  %v4408_v48 = vcombine.high %v404_v40, %v408_v42  ;;  %v4410_v15 = vcombine.high %v405_v43, %v409_v45  ;;  %v456_v34 = vld [vmem:[%s6368_s1 + $0xba0] sm:$0xff]  ;;  %v453_v35 = vld [vmem:[%s6368_s1 + $0xb88] sm:$0xff] }
  0x88   :  { %3270 = vmatprep.mubr.bf16.mxu0 %v5148_v50  ;;  %3434 = vmatprep.mubr.bf16.mxu1 %v5148_v50 }
  0x8a   :  { %3241 = vmatpush1.bf16.msra.mxu0 %v4351_v54  ;;  %3405 = vmatpush1.bf16.msra.mxu1 %v4353_v55  ;;  %v417_v54 = vld [vmem:[%s6368_s1 + $0xa68] sm:$0xff]  ;;  %v4407_v55 = vcombine.low %v404_v40, %v408_v42  ;;  %v460_v42 = vld [vmem:[%s6368_s1 + $0xbc0] sm:$0xff] }
  0x8b   :  { %3242 = vmatprep.subr.bf16.mxu0 %v4360_v56  ;;  %3406 = vmatprep.subr.bf16.mxu1 %v4362_v57  ;;  %v4409_v56 = vcombine.low %v405_v43, %v409_v45  ;;  %v4416_v57 = vcombine.high %v412_v49, %v416_v51  ;;  %v4418_v58 = vcombine.high %v413_v52, %v417_v54  ;;  %v464_v43 = vld [vmem:[%s6368_s1 + $0xbe0] sm:$0xff] }
  0x8c   :  { %v51_v45 = vcombine.high %v5106_v23, %v5106_v23  ;;  %v468_v23 = vld [vmem:[%s6368_s1 + $0xc00] sm:$0xff] }
  0x8e   :  { %3243 = vmatpush1.bf16.msra.mxu0 %v4359_v0  ;;  %3407 = vmatpush1.bf16.msra.mxu1 %v4361_v1  ;;  %v425_v0 = vld [vmem:[%s6368_s1 + $0xaa8] sm:$0xff]  ;;  %v4415_v1 = vcombine.low %v412_v49, %v416_v51  ;;  %v4464_v49 = vcombine.high %v460_v42, %v464_v43 }
  0x8f   :  { %3244 = vmatprep.subr.bf16.mxu0 %v4368_v2  ;;  %3408 = vmatprep.subr.bf16.mxu1 %v4370_v3  ;;  %v4417_v2 = vcombine.low %v413_v52, %v417_v54  ;;  %v4424_v3 = vcombine.high %v420_v60, %v424_v61  ;;  %v4426_v4 = vcombine.high %v421_v62, %v425_v0  ;;  %v472_v52 = vld [vmem:[%s6368_s1 + $0xc20] sm:$0xff] }
  0x90   :  { %v5325_v54 = vrot.slane %v51_v45, %v4763_v53 }
  0x92   :  { %3245 = vmatpush1.bf16.msra.mxu0 %v4367_v8  ;;  %3409 = vmatpush1.bf16.msra.mxu1 %v4369_v10  ;;  %v433_v8 = vld [vmem:[%s6368_s1 + $0xae8] sm:$0xff]  ;;  %v4423_v10 = vcombine.low %v420_v60, %v424_v61  ;;  %v4472_v60 = vcombine.high %v468_v23, %v472_v52 }
  0x93   :  { %3246 = vmatprep.subr.bf16.mxu0 %v4376_v11  ;;  %3410 = vmatprep.subr.bf16.mxu1 %v4378_v12  ;;  %v4425_v11 = vcombine.low %v421_v62, %v425_v0  ;;  %v4432_v12 = vcombine.high %v428_v5, %v432_v6  ;;  %v4434_v13 = vcombine.high %v429_v7, %v433_v8  ;;  %v476_v62 = vld [vmem:[%s6368_s1 + $0xc40] sm:$0xff] }
  0x94   :  { %v480_v0 = vld [vmem:[%s6368_s1 + $0xc60] sm:$0xff] }
  0x96   :  { %3247 = vmatpush1.bf16.msra.mxu0 %v4375_v17  ;;  %3411 = vmatpush1.bf16.msra.mxu1 %v4377_v18  ;;  %v441_v17 = vld [vmem:[%s6368_s1 + $0xb28] sm:$0xff]  ;;  %v4431_v18 = vcombine.low %v428_v5, %v432_v6  ;;  %v4471_v5 = vcombine.low %v468_v23, %v472_v52 }
  0x97   :  { %3248 = vmatprep.subr.bf16.mxu0 %v4384_v19  ;;  %3412 = vmatprep.subr.bf16.mxu1 %v4386_v20  ;;  %v4433_v19 = vcombine.low %v429_v7, %v433_v8  ;;  %v4440_v20 = vcombine.high %v436_v59, %v440_v14  ;;  %v4442_v21 = vcombine.high %v437_v16, %v441_v17 }
  0x98   :  { %v4480_v7 = vcombine.high %v476_v62, %v480_v0 }
  0x9a   :  { %3249 = vmatpush1.bf16.msra.mxu0 %v4383_v27  ;;  %3413 = vmatpush1.bf16.msra.mxu1 %v4385_v28  ;;  %v449_v27 = vld [vmem:[%s6368_s1 + $0xb68] sm:$0xff]  ;;  %v4439_v28 = vcombine.low %v436_v59, %v440_v14  ;;  %v4479_v59 = vcombine.low %v476_v62, %v480_v0 }
  0x9b   :  { %3250 = vmatprep.subr.bf16.mxu0 %v4392_v29  ;;  %3414 = vmatprep.subr.bf16.mxu1 %v4394_v30  ;;  %v4441_v29 = vcombine.low %v437_v16, %v441_v17  ;;  %v4448_v30 = vcombine.high %v444_v22, %v448_v24  ;;  %v4450_v63 = vcombine.high %v445_v26, %v449_v27 }
  0x9e   :  { %3251 = vmatpush1.bf16.msra.mxu0 %v4391_v36  ;;  %3415 = vmatpush1.bf16.msra.mxu1 %v4393_v37  ;;  %v457_v36 = vld [vmem:[%s6368_s1 + $0xba8] sm:$0xff]  ;;  %v4447_v37 = vcombine.low %v444_v22, %v448_v24 }
  0x9f   :  { %3252 = vmatprep.subr.bf16.mxu0 %v4400_v38  ;;  %3416 = vmatprep.subr.bf16.mxu1 %v4402_v39  ;;  %v4449_v38 = vcombine.low %v445_v26, %v449_v27  ;;  %v4456_v39 = vcombine.high %v452_v32, %v456_v34  ;;  %v4458_v40 = vcombine.high %v453_v35, %v457_v36 }
  0xa2   :  { %3253 = vmatpush1.bf16.msra.mxu0 %v4399_v46  ;;  %3417 = vmatpush1.bf16.msra.mxu1 %v4401_v47  ;;  %v461_v46 = vld [vmem:[%s6368_s1 + $0xbc8] sm:$0xff] }
  0xa3   :  { %3254 = vmatprep.subr.bf16.mxu0 %v4408_v48  ;;  %3418 = vmatprep.subr.bf16.mxu1 %v4410_v15  ;;  %v465_v47 = vld [vmem:[%s6368_s1 + $0xbe8] sm:$0xff]  ;;  %v4455_v48 = vcombine.low %v452_v32, %v456_v34  ;;  %v4457_v15 = vcombine.low %v453_v35, %v457_v36 }
  0xa4   :  { %v4466_v51 = vcombine.high %v461_v46, %v465_v47 }
  0xa6   :  { %3255 = vmatpush1.bf16.msra.mxu0 %v4407_v55  ;;  %3419 = vmatpush1.bf16.msra.mxu1 %v4409_v56  ;;  %v469_v55 = vld [vmem:[%s6368_s1 + $0xc08] sm:$0xff] }
  0xa7   :  { %3256 = vmatprep.subr.bf16.mxu0 %v4416_v57  ;;  %3420 = vmatprep.subr.bf16.mxu1 %v4418_v58  ;;  %v473_v56 = vld [vmem:[%s6368_s1 + $0xc28] sm:$0xff]  ;;  %v4463_v57 = vcombine.low %v460_v42, %v464_v43  ;;  %v4465_v58 = vcombine.low %v461_v46, %v465_v47  ;;  %v516_v47 = vld [vmem:[%s6368_s1 + $0xd80] sm:$0xff] }
  0xa8   :  { %v4474_v61 = vcombine.high %v469_v55, %v473_v56  ;;  %v4473_v6 = vcombine.low %v469_v55, %v473_v56  ;;  %v524_v56 = vld [vmem:[%s6368_s1 + $0xdc0] sm:$0xff] }
  0xaa   :  { %3257 = vmatpush1.bf16.msra.mxu0 %v4415_v1  ;;  %3421 = vmatpush1.bf16.msra.mxu1 %v4417_v2  ;;  %v67_v1 = vcombine.high %v5325_v54, %v5325_v54  ;;  %v5343_v2 = vpack.c.bf16 %v5116_v31, %v5116_v31  ;;  %v484_v31 = vld [vmem:[%s6368_s1 + $0xc80] sm:$0xff] }
  0xab   :  { %3258 = vmatprep.subr.bf16.mxu0 %v4424_v3  ;;  %3422 = vmatprep.subr.bf16.mxu1 %v4426_v4  ;;  %v477_v3 = vld [vmem:[%s6368_s1 + $0xc48] sm:$0xff] }
  0xac   :  { %v481_v4 = vld [vmem:[%s6368_s1 + $0xc68] sm:$0xff] }
  0xad   :  { %v4482_v8 = vcombine.high %v477_v3, %v481_v4  ;;  %v4481_v14 = vcombine.low %v477_v3, %v481_v4  ;;  %v532_v3 = vld [vmem:[%s6368_s1 + $0xe00] sm:$0xff] }
  0xae   :  { %3259 = vmatpush1.bf16.msra.mxu0 %v4423_v10  ;;  %3423 = vmatpush1.bf16.msra.mxu1 %v4425_v11  ;;  %v488_v10 = vld [vmem:[%s6368_s1 + $0xca0] sm:$0xff]  ;;  %v5357_v11 = vpack.c.bf16 %v67_v1, %v67_v1 }
  0xaf   :  { %3260 = vmatprep.subr.bf16.mxu0 %v4432_v12  ;;  %3424 = vmatprep.subr.bf16.mxu1 %v4434_v13  ;;  %v485_v12 = vld [vmem:[%s6368_s1 + $0xc88] sm:$0xff]  ;;  %v4488_v16 = vcombine.high %v484_v31, %v488_v10  ;;  %v4487_v22 = vcombine.low %v484_v31, %v488_v10  ;;  %v536_v4 = vld [vmem:[%s6368_s1 + $0xe20] sm:$0xff] }
  0xb0   :  { %v489_v13 = vld [vmem:[%s6368_s1 + $0xca8] sm:$0xff]  ;;  %v4536_v31 = vcombine.high %v532_v3, %v536_v4 }
  0xb1   :  { %v4490_v17 = vcombine.high %v485_v12, %v489_v13  ;;  %v4489_v24 = vcombine.low %v485_v12, %v489_v13  ;;  %v540_v12 = vld [vmem:[%s6368_s1 + $0xe40] sm:$0xff] }
  0xb2   :  { %3261 = vmatpush1.bf16.msra.mxu0 %v4431_v18  ;;  %3425 = vmatpush1.bf16.msra.mxu1 %v4433_v19  ;;  %v492_v18 = vld [vmem:[%s6368_s1 + $0xcc0] sm:$0xff] }
  0xb3   :  { %3262 = vmatprep.subr.bf16.mxu0 %v4440_v20  ;;  %3426 = vmatprep.subr.bf16.mxu1 %v4442_v21  ;;  %v496_v19 = vld [vmem:[%s6368_s1 + $0xce0] sm:$0xff]  ;;  %v493_v20 = vld [vmem:[%s6368_s1 + $0xcc8] sm:$0xff] }
  0xb4   :  { %v497_v21 = vld [vmem:[%s6368_s1 + $0xce8] sm:$0xff]  ;;  %v4496_v26 = vcombine.high %v492_v18, %v496_v19  ;;  %v4495_v32 = vcombine.low %v492_v18, %v496_v19  ;;  %v544_v13 = vld [vmem:[%s6368_s1 + $0xe60] sm:$0xff] }
  0xb5   :  { %v4498_v27 = vcombine.high %v493_v20, %v497_v21  ;;  %v4497_v34 = vcombine.low %v493_v20, %v497_v21  ;;  %v4544_v18 = vcombine.high %v540_v12, %v544_v13  ;;  %v548_v20 = vld [vmem:[%s6368_s1 + $0xe80] sm:$0xff] }
  0xb6   :  { %3263 = vmatpush1.bf16.msra.mxu0 %v4439_v28  ;;  %3427 = vmatpush1.bf16.msra.mxu1 %v4441_v29  ;;  %v500_v28 = vld [vmem:[%s6368_s1 + $0xd00] sm:$0xff] }
  0xb7   :  { %3264 = vmatprep.subr.bf16.mxu0 %v4448_v30  ;;  %3428 = vmatprep.subr.bf16.mxu1 %v4450_v63  ;;  %v504_v29 = vld [vmem:[%s6368_s1 + $0xd20] sm:$0xff]  ;;  %v501_v30 = vld [vmem:[%s6368_s1 + $0xd08] sm:$0xff] }
  0xb8   :  { %v505_v63 = vld [vmem:[%s6368_s1 + $0xd28] sm:$0xff]  ;;  %v4504_v35 = vcombine.high %v500_v28, %v504_v29  ;;  %v4503_v42 = vcombine.low %v500_v28, %v504_v29  ;;  %v552_v21 = vld [vmem:[%s6368_s1 + $0xea0] sm:$0xff] }
  0xb9   :  { %v4506_v36 = vcombine.high %v501_v30, %v505_v63  ;;  %v4505_v43 = vcombine.low %v501_v30, %v505_v63  ;;  %v4552_v28 = vcombine.high %v548_v20, %v552_v21  ;;  %v556_v30 = vld [vmem:[%s6368_s1 + $0xec0] sm:$0xff] }
  0xba   :  { %3265 = vmatpush1.bf16.msra.mxu0 %v4447_v37  ;;  %3429 = vmatpush1.bf16.msra.mxu1 %v4449_v38  ;;  %v508_v37 = vld [vmem:[%s6368_s1 + $0xd40] sm:$0xff] }
  0xbb   :  { %3266 = vmatprep.subr.bf16.mxu0 %v4456_v39  ;;  %3430 = vmatprep.subr.bf16.mxu1 %v4458_v40  ;;  %v512_v38 = vld [vmem:[%s6368_s1 + $0xd60] sm:$0xff]  ;;  %v509_v39 = vld [vmem:[%s6368_s1 + $0xd48] sm:$0xff] }
  0xbc   :  { %v513_v40 = vld [vmem:[%s6368_s1 + $0xd68] sm:$0xff]  ;;  %v4512_v45 = vcombine.high %v508_v37, %v512_v38  ;;  %v560_v63 = vld [vmem:[%s6368_s1 + $0xee0] sm:$0xff] }
  0xbd   :  { %v4514_v46 = vcombine.high %v509_v39, %v513_v40  ;;  %v4513_v23 = vcombine.low %v509_v39, %v513_v40  ;;  %v564_v39 = vld [vmem:[%s6368_s1 + $0xf00] sm:$0xff] }
  0xbe   :  { %3267 = vmatpush1.bf16.msra.mxu0 %v4455_v48  ;;  %3431 = vmatpush1.bf16.msra.mxu1 %v4457_v15  ;;  %v520_v48 = vld [vmem:[%s6368_s1 + $0xda0] sm:$0xff]  ;;  %v517_v15 = vld [vmem:[%s6368_s1 + $0xd88] sm:$0xff] }
  0xbf   :  { %3268 = vmatprep.subr.bf16.mxu0 %v4464_v49  ;;  %3432 = vmatprep.subr.bf16.mxu1 %v4466_v51  ;;  %v521_v49 = vld [vmem:[%s6368_s1 + $0xda8] sm:$0xff]  ;;  %v4511_v51 = vcombine.low %v508_v37, %v512_v38  ;;  %v4520_v52 = vcombine.high %v516_v47, %v520_v48  ;;  %v4560_v37 = vcombine.high %v556_v30, %v560_v63  ;;  %v568_v40 = vld [vmem:[%s6368_s1 + $0xf20] sm:$0xff] }
  0xc0   :  { %v4522_v55 = vcombine.high %v517_v15, %v521_v49  ;;  %v4521_v62 = vcombine.low %v517_v15, %v521_v49  ;;  %v572_v15 = vld [vmem:[%s6368_s1 + $0xf40] sm:$0xff] }
  0xc1   :  { %v576_v49 = vld [vmem:[%s6368_s1 + $0xf60] sm:$0xff] }
  0xc2   :  { %3269 = vmatpush1.bf16.msra.mxu0 %v4463_v57  ;;  %3433 = vmatpush1.bf16.msra.mxu1 %v4465_v58  ;;  %v528_v57 = vld [vmem:[%s6368_s1 + $0xde0] sm:$0xff]  ;;  %v525_v58 = vld [vmem:[%s6368_s1 + $0xdc8] sm:$0xff] }
  0xc3   :  { %3279 = vmatprep.subr.bf16.mxu0 %v4472_v60  ;;  %3443 = vmatprep.subr.bf16.mxu1 %v4474_v61  ;;  %v529_v60 = vld [vmem:[%s6368_s1 + $0xde8] sm:$0xff]  ;;  %v4519_v61 = vcombine.low %v516_v47, %v520_v48  ;;  %v4528_v0 = vcombine.high %v524_v56, %v528_v57  ;;  %v4568_v47 = vcombine.high %v564_v39, %v568_v40 }
  0xc4   :  { %v4530_v1 = vcombine.high %v525_v58, %v529_v60 }
  0xc5   :  { %3271 = vmatmul.mubr.bf16.vlgmr.msra.gmra.mrb[0].mxu0 %v5343_v2  ;;  %3435 = vmatmul.mubr.bf16.vlgmr.msra.gmra.mrb[0].mxu1 %v5343_v2 }
  0xc6   :  { %3280 = vmatpush1.bf16.msra.mxu0 %v4471_v5  ;;  %3444 = vmatpush1.bf16.msra.mxu1 %v4473_v6  ;;  %v533_v5 = vld [vmem:[%s6368_s1 + $0xe08] sm:$0xff] }
  0xc7   :  { %3281 = vmatprep.subr.bf16.mxu0 %v4480_v7  ;;  %3445 = vmatprep.subr.bf16.mxu1 %v4482_v8  ;;  %v537_v6 = vld [vmem:[%s6368_s1 + $0xe28] sm:$0xff]  ;;  %v4527_v7 = vcombine.low %v524_v56, %v528_v57  ;;  %v4529_v8 = vcombine.low %v525_v58, %v529_v60  ;;  %v4576_v56 = vcombine.high %v572_v15, %v576_v49  ;;  %v580_v58 = vld [vmem:[%s6368_s1 + $0xf80] sm:$0xff] }
  0xc8   :  { %3311 = vmatprep.mubr.bf16.mxu0 %v5357_v11  ;;  %3475 = vmatprep.mubr.bf16.mxu1 %v5357_v11  ;;  %v4538_v10 = vcombine.high %v533_v5, %v537_v6  ;;  %v584_v60 = vld [vmem:[%s6368_s1 + $0xfa0] sm:$0xff] }
  0xca   :  { %3282 = vmatpush1.bf16.msra.mxu0 %v4479_v59  ;;  %3446 = vmatpush1.bf16.msra.mxu1 %v4481_v14  ;;  %v541_v59 = vld [vmem:[%s6368_s1 + $0xe48] sm:$0xff] }
  0xcb   :  { %3283 = vmatprep.subr.bf16.mxu0 %v4488_v16  ;;  %3447 = vmatprep.subr.bf16.mxu1 %v4490_v17  ;;  %v545_v14 = vld [vmem:[%s6368_s1 + $0xe68] sm:$0xff]  ;;  %v4535_v16 = vcombine.low %v532_v3, %v536_v4  ;;  %v4537_v17 = vcombine.low %v533_v5, %v537_v6  ;;  %v4584_v3 = vcombine.high %v580_v58, %v584_v60  ;;  %v588_v5 = vld [vmem:[%s6368_s1 + $0xfc0] sm:$0xff] }
  0xcc   :  { %v4546_v19 = vcombine.high %v541_v59, %v545_v14  ;;  %v592_v6 = vld [vmem:[%s6368_s1 + $0xfe0] sm:$0xff] }
  0xce   :  { %3284 = vmatpush1.bf16.msra.mxu0 %v4487_v22  ;;  %3448 = vmatpush1.bf16.msra.mxu1 %v4489_v24  ;;  %v549_v22 = vld [vmem:[%s6368_s1 + $0xe88] sm:$0xff] }
  0xcf   :  { %3285 = vmatprep.subr.bf16.mxu0 %v4496_v26  ;;  %3449 = vmatprep.subr.bf16.mxu1 %v4498_v27  ;;  %v553_v24 = vld [vmem:[%s6368_s1 + $0xea8] sm:$0xff]  ;;  %v4543_v26 = vcombine.low %v540_v12, %v544_v13  ;;  %v4545_v27 = vcombine.low %v541_v59, %v545_v14  ;;  %v4592_v12 = vcombine.high %v588_v5, %v592_v6  ;;  %v86_v59 = vld [vmem:[%s6368_s1 + $0x10] sm:$0xff] }
  0xd0   :  { %v4554_v29 = vcombine.high %v549_v22, %v553_v24  ;;  %v90_v14 = vld [vmem:[%s6368_s1 + $0x30] sm:$0xff] }
  0xd2   :  { %3286 = vmatpush1.bf16.msra.mxu0 %v4495_v32  ;;  %3450 = vmatpush1.bf16.msra.mxu1 %v4497_v34  ;;  %v557_v32 = vld [vmem:[%s6368_s1 + $0xec8] sm:$0xff] }
  0xd3   :  { %3287 = vmatprep.subr.bf16.mxu0 %v4504_v35  ;;  %3451 = vmatprep.subr.bf16.mxu1 %v4506_v36  ;;  %v561_v34 = vld [vmem:[%s6368_s1 + $0xee8] sm:$0xff]  ;;  %v4551_v35 = vcombine.low %v548_v20, %v552_v21  ;;  %v4553_v36 = vcombine.low %v549_v22, %v553_v24  ;;  %v4092_v20 = vcombine.high %v86_v59, %v90_v14  ;;  %v94_v22 = vld [vmem:[%s6368_s1 + $0x50] sm:$0xff] }
  0xd4   :  { %v4562_v38 = vcombine.high %v557_v32, %v561_v34  ;;  %v98_v24 = vld [vmem:[%s6368_s1 + $0x70] sm:$0xff] }
  0xd6   :  { %3288 = vmatpush1.bf16.msra.mxu0 %v4503_v42  ;;  %3452 = vmatpush1.bf16.msra.mxu1 %v4505_v43  ;;  %v565_v42 = vld [vmem:[%s6368_s1 + $0xf08] sm:$0xff] }
  0xd7   :  { %3289 = vmatprep.subr.bf16.mxu0 %v4512_v45  ;;  %3453 = vmatprep.subr.bf16.mxu1 %v4514_v46  ;;  %v569_v43 = vld [vmem:[%s6368_s1 + $0xf28] sm:$0xff]  ;;  %v4559_v45 = vcombine.low %v556_v30, %v560_v63  ;;  %v4561_v46 = vcombine.low %v557_v32, %v561_v34  ;;  %v4100_v63 = vcombine.high %v94_v22, %v98_v24  ;;  %v106_v34 = vld [vmem:[%s6368_s1 + $0xb0] sm:$0xff] }
  0xd8   :  { %v4570_v48 = vcombine.high %v565_v42, %v569_v43 }
  0xda   :  { %3290 = vmatpush1.bf16.msra.mxu0 %v4511_v51  ;;  %3454 = vmatpush1.bf16.msra.mxu1 %v4513_v23  ;;  %v573_v51 = vld [vmem:[%s6368_s1 + $0xf48] sm:$0xff] }
  0xdb   :  { %3291 = vmatprep.subr.bf16.mxu0 %v4520_v52  ;;  %3455 = vmatprep.subr.bf16.mxu1 %v4522_v55  ;;  %v577_v23 = vld [vmem:[%s6368_s1 + $0xf68] sm:$0xff]  ;;  %v4567_v52 = vcombine.low %v564_v39, %v568_v40  ;;  %v4569_v55 = vcombine.low %v565_v42, %v569_v43  ;;  %v110_v42 = vld [vmem:[%s6368_s1 + $0xd0] sm:$0xff] }
  0xdc   :  { %v4578_v57 = vcombine.high %v573_v51, %v577_v23  ;;  %v114_v43 = vld [vmem:[%s6368_s1 + $0xf0] sm:$0xff] }
  0xde   :  { %3292 = vmatpush1.bf16.msra.mxu0 %v4519_v61  ;;  %3456 = vmatpush1.bf16.msra.mxu1 %v4521_v62  ;;  %v581_v61 = vld [vmem:[%s6368_s1 + $0xf88] sm:$0xff] }
  0xdf   :  { %3293 = vmatprep.subr.bf16.mxu0 %v4528_v0  ;;  %3457 = vmatprep.subr.bf16.mxu1 %v4530_v1  ;;  %v585_v62 = vld [vmem:[%s6368_s1 + $0xfa8] sm:$0xff]  ;;  %v4575_v0 = vcombine.low %v572_v15, %v576_v49  ;;  %v4577_v1 = vcombine.low %v573_v51, %v577_v23  ;;  %v4116_v15 = vcombine.high %v110_v42, %v114_v43  ;;  %v118_v51 = vld [vmem:[%s6368_s1 + $0x110] sm:$0xff] }
  0xe0   :  { %v4586_v4 = vcombine.high %v581_v61, %v585_v62  ;;  %v122_v23 = vld [vmem:[%s6368_s1 + $0x130] sm:$0xff] }
  0xe2   :  { %3294 = vmatpush1.bf16.msra.mxu0 %v4527_v7  ;;  %3458 = vmatpush1.bf16.msra.mxu1 %v4529_v8  ;;  %v589_v7 = vld [vmem:[%s6368_s1 + $0xfc8] sm:$0xff] }
  0xe3   :  { %3295 = vmatprep.subr.bf16.mxu0 %v4536_v31  ;;  %3459 = vmatprep.subr.bf16.mxu1 %v4538_v10  ;;  %v593_v8 = vld [vmem:[%s6368_s1 + $0xfe8] sm:$0xff]  ;;  %v4583_v31 = vcombine.low %v580_v58, %v584_v60  ;;  %v4585_v10 = vcombine.low %v581_v61, %v585_v62  ;;  %v126_v60 = vld [vmem:[%s6368_s1 + $0x150] sm:$0xff]  ;;  %v127_v62 = vld [vmem:[%s6368_s1 + $0x158] sm:$0xff] }
  0xe4   :  { %v4594_v13 = vcombine.high %v589_v7, %v593_v8  ;;  %v130_v61 = vld [vmem:[%s6368_s1 + $0x170] sm:$0xff] }
  0xe6   :  { %3296 = vmatpush1.bf16.msra.mxu0 %v4535_v16  ;;  %3460 = vmatpush1.bf16.msra.mxu1 %v4537_v17  ;;  %v87_v16 = vld [vmem:[%s6368_s1 + $0x18] sm:$0xff] }
  0xe7   :  { %3297 = vmatprep.subr.bf16.mxu0 %v4544_v18  ;;  %3461 = vmatprep.subr.bf16.mxu1 %v4546_v19  ;;  %v91_v17 = vld [vmem:[%s6368_s1 + $0x38] sm:$0xff]  ;;  %v4591_v18 = vcombine.low %v588_v5, %v592_v6  ;;  %v4593_v19 = vcombine.low %v589_v7, %v593_v8  ;;  %v134_v6 = vld [vmem:[%s6368_s1 + $0x190] sm:$0xff] }
  0xe8   :  { %v4094_v21 = vcombine.high %v87_v16, %v91_v17  ;;  %v4093_v30 = vcombine.low %v87_v16, %v91_v17  ;;  %v138_v7 = vld [vmem:[%s6368_s1 + $0x1b0] sm:$0xff]  ;;  %v135_v8 = vld [vmem:[%s6368_s1 + $0x198] sm:$0xff] }
  0xe9   :  { %v146_v16 = vld [vmem:[%s6368_s1 + $0x1f0] sm:$0xff]  ;;  %v143_v17 = vld [vmem:[%s6368_s1 + $0x1d8] sm:$0xff] }
  0xea   :  { %3298 = vmatpush1.bf16.msra.mxu0 %v4543_v26  ;;  %3462 = vmatpush1.bf16.msra.mxu1 %v4545_v27  ;;  %v5545_v26 = vpack.c.bf16 %v5325_v54, %v5325_v54  ;;  %v95_v27 = vld [vmem:[%s6368_s1 + $0x58] sm:$0xff]  ;;  %v102_v54 = vld [vmem:[%s6368_s1 + $0x90] sm:$0xff] }
  0xeb   :  { %3299 = vmatprep.subr.bf16.mxu0 %v4552_v28  ;;  %3463 = vmatprep.subr.bf16.mxu1 %v4554_v29  ;;  %v99_v28 = vld [vmem:[%s6368_s1 + $0x78] sm:$0xff]  ;;  %v4091_v29 = vcombine.low %v86_v59, %v90_v14  ;;  %v4108_v39 = vcombine.high %v102_v54, %v106_v34  ;;  %v142_v14 = vld [vmem:[%s6368_s1 + $0x1d0] sm:$0xff] }
  0xec   :  { %v4102_v32 = vcombine.high %v95_v27, %v99_v28 }
  0xee   :  { %3300 = vmatpush1.bf16.msra.mxu0 %v4551_v35  ;;  %3464 = vmatpush1.bf16.msra.mxu1 %v4553_v36  ;;  %v103_v35 = vld [vmem:[%s6368_s1 + $0x98] sm:$0xff] }
  0xef   :  { %3301 = vmatprep.subr.bf16.mxu0 %v4560_v37  ;;  %3465 = vmatprep.subr.bf16.mxu1 %v4562_v38  ;;  %v107_v36 = vld [vmem:[%s6368_s1 + $0xb8] sm:$0xff]  ;;  %v4099_v37 = vcombine.low %v94_v22, %v98_v24  ;;  %v4101_v38 = vcombine.low %v95_v27, %v99_v28  ;;  %v150_v24 = vld [vmem:[%s6368_s1 + $0x210] sm:$0xff] }
  0xf0   :  { %v4110_v40 = vcombine.high %v103_v35, %v107_v36  ;;  %v154_v27 = vld [vmem:[%s6368_s1 + $0x230] sm:$0xff]  ;;  %v151_v28 = vld [vmem:[%s6368_s1 + $0x218] sm:$0xff] }
  0xf2   :  { %3302 = vmatpush1.bf16.msra.mxu0 %v4559_v45  ;;  %3466 = vmatpush1.bf16.msra.mxu1 %v4561_v46  ;;  %v111_v45 = vld [vmem:[%s6368_s1 + $0xd8] sm:$0xff] }
  0xf3   :  { %3303 = vmatprep.subr.bf16.mxu0 %v4568_v47  ;;  %3467 = vmatprep.subr.bf16.mxu1 %v4570_v48  ;;  %v115_v46 = vld [vmem:[%s6368_s1 + $0xf8] sm:$0xff]  ;;  %v4107_v47 = vcombine.low %v102_v54, %v106_v34  ;;  %v4109_v48 = vcombine.low %v103_v35, %v107_v36  ;;  %v158_v34 = vld [vmem:[%s6368_s1 + $0x250] sm:$0xff] }
  0xf4   :  { %v4118_v49 = vcombine.high %v111_v45, %v115_v46  ;;  %v162_v35 = vld [vmem:[%s6368_s1 + $0x270] sm:$0xff]  ;;  %v159_v36 = vld [vmem:[%s6368_s1 + $0x258] sm:$0xff] }
  0xf6   :  { %3304 = vmatpush1.bf16.msra.mxu0 %v4567_v52  ;;  %3468 = vmatpush1.bf16.msra.mxu1 %v4569_v55  ;;  %v123_v52 = vld [vmem:[%s6368_s1 + $0x138] sm:$0xff]  ;;  %v4115_v55 = vcombine.low %v110_v42, %v114_v43  ;;  %v166_v43 = vld [vmem:[%s6368_s1 + $0x290] sm:$0xff] }
  0xf7   :  { %3305 = vmatprep.subr.bf16.mxu0 %v4576_v56  ;;  %3469 = vmatprep.subr.bf16.mxu1 %v4578_v57  ;;  %v4117_v56 = vcombine.low %v111_v45, %v115_v46  ;;  %v4124_v57 = vcombine.high %v118_v51, %v122_v23  ;;  %v170_v45 = vld [vmem:[%s6368_s1 + $0x2b0] sm:$0xff]  ;;  %v167_v46 = vld [vmem:[%s6368_s1 + $0x298] sm:$0xff] }
  0xfa   :  { %3306 = vmatpush1.bf16.msra.mxu0 %v4575_v0  ;;  %3470 = vmatpush1.bf16.msra.mxu1 %v4577_v1  ;;  %v131_v0 = vld [vmem:[%s6368_s1 + $0x178] sm:$0xff]  ;;  %v4123_v1 = vcombine.low %v118_v51, %v122_v23  ;;  %v174_v23 = vld [vmem:[%s6368_s1 + $0x2d0] sm:$0xff] }
  0xfb   :  { %3307 = vmatprep.subr.bf16.mxu0 %v4584_v3  ;;  %3471 = vmatprep.subr.bf16.mxu1 %v4586_v4  ;;  %v4132_v4 = vcombine.high %v126_v60, %v130_v61  ;;  %v4134_v5 = vcombine.high %v127_v62, %v131_v0 }
  0xfe   :  { %3308 = vmatpush1.bf16.msra.mxu0 %v4583_v31  ;;  %3472 = vmatpush1.bf16.msra.mxu1 %v4585_v10  ;;  %v139_v31 = vld [vmem:[%s6368_s1 + $0x1b8] sm:$0xff]  ;;  %v4131_v10 = vcombine.low %v126_v60, %v130_v61  ;;  %v182_v61 = vld [vmem:[%s6368_s1 + $0x310] sm:$0xff] }
  0xff   :  { %3309 = vmatprep.subr.bf16.mxu0 %v4592_v12  ;;  %3473 = vmatprep.subr.bf16.mxu1 %v4594_v13  ;;  %v4133_v12 = vcombine.low %v127_v62, %v131_v0  ;;  %v4140_v13 = vcombine.high %v134_v6, %v138_v7  ;;  %v4142_v59 = vcombine.high %v135_v8, %v139_v31  ;;  %v186_v62 = vld [vmem:[%s6368_s1 + $0x330] sm:$0xff]  ;;  %v183_v0 = vld [vmem:[%s6368_s1 + $0x318] sm:$0xff] }
 0x102   :  { %3310 = vmatpush1.bf16.msra.mxu0 %v4591_v18  ;;  %3474 = vmatpush1.bf16.msra.mxu1 %v4593_v19  ;;  %v147_v18 = vld [vmem:[%s6368_s1 + $0x1f8] sm:$0xff]  ;;  %v4139_v19 = vcombine.low %v134_v6, %v138_v7  ;;  %v190_v7 = vld [vmem:[%s6368_s1 + $0x350] sm:$0xff] }
 0x103   :  { %3484 = vmatprep.subr.bf16.mxu0 %v4092_v20  ;;  %3648 = vmatprep.subr.bf16.mxu1 %v4094_v21  ;;  %v4141_v20 = vcombine.low %v135_v8, %v139_v31  ;;  %v4148_v21 = vcombine.high %v142_v14, %v146_v16  ;;  %v4150_v22 = vcombine.high %v143_v17, %v147_v18  ;;  %v194_v8 = vld [vmem:[%s6368_s1 + $0x370] sm:$0xff]  ;;  %v191_v31 = vld [vmem:[%s6368_s1 + $0x358] sm:$0xff] }
 0x105   :  { %3312 = vmatmul.mubr.bf16.vlgmr.msra.gmra.mrb[0].mxu0 %v5545_v26  ;;  %3476 = vmatmul.mubr.bf16.vlgmr.msra.gmra.mrb[0].mxu1 %v5545_v26 }
 0x106   :  { %3485 = vmatpush1.bf16.msra.mxu0 %v4091_v29  ;;  %3649 = vmatpush1.bf16.msra.mxu1 %v4093_v30  ;;  %v155_v29 = vld [vmem:[%s6368_s1 + $0x238] sm:$0xff]  ;;  %v4147_v30 = vcombine.low %v142_v14, %v146_v16  ;;  %v198_v16 = vld [vmem:[%s6368_s1 + $0x390] sm:$0xff] }
 0x107   :  { %3486 = vmatprep.subr.bf16.mxu0 %v4100_v63  ;;  %3650 = vmatprep.subr.bf16.mxu1 %v4102_v32  ;;  %v4149_v63 = vcombine.low %v143_v17, %v147_v18  ;;  %v4156_v32 = vcombine.high %v150_v24, %v154_v27  ;;  %v4158_v54 = vcombine.high %v151_v28, %v155_v29  ;;  %v202_v17 = vld [vmem:[%s6368_s1 + $0x3b0] sm:$0xff]  ;;  %v199_v18 = vld [vmem:[%s6368_s1 + $0x398] sm:$0xff] }
 0x108   :  { %3516 = vmatprep.mubr.bf16.mxu0 %v4800_v9  ;;  %3680 = vmatprep.mubr.bf16.mxu1 %v4800_v9  ;;  %v119_v9 = vld [vmem:[%s6368_s1 + $0x118] sm:$0xff] }
 0x109   :  { %v4126_v58 = vcombine.high %v119_v9, %v123_v52  ;;  %v4125_v3 = vcombine.low %v119_v9, %v123_v52  ;;  %v178_v9 = vld [vmem:[%s6368_s1 + $0x2f0] sm:$0xff]  ;;  %v175_v52 = vld [vmem:[%s6368_s1 + $0x2d8] sm:$0xff] }
 0x10a   :  { %3487 = vmatpush1.bf16.msra.mxu0 %v4099_v37  ;;  %3651 = vmatpush1.bf16.msra.mxu1 %v4101_v38  ;;  %v163_v37 = vld [vmem:[%s6368_s1 + $0x278] sm:$0xff]  ;;  %v4155_v38 = vcombine.low %v150_v24, %v154_v27  ;;  %v206_v27 = vld [vmem:[%s6368_s1 + $0x3d0] sm:$0xff] }
 0x10b   :  { %3488 = vmatprep.subr.bf16.mxu0 %v4108_v39  ;;  %3652 = vmatprep.subr.bf16.mxu1 %v4110_v40  ;;  %v4157_v39 = vcombine.low %v151_v28, %v155_v29  ;;  %v4164_v40 = vcombine.high %v158_v34, %v162_v35  ;;  %v4166_v42 = vcombine.high %v159_v36, %v163_v37  ;;  %v210_v28 = vld [vmem:[%s6368_s1 + $0x3f0] sm:$0xff]  ;;  %v207_v29 = vld [vmem:[%s6368_s1 + $0x3d8] sm:$0xff] }
 0x10e   :  { %3489 = vmatpush1.bf16.msra.mxu0 %v4107_v47  ;;  %3653 = vmatpush1.bf16.msra.mxu1 %v4109_v48  ;;  %v171_v47 = vld [vmem:[%s6368_s1 + $0x2b8] sm:$0xff]  ;;  %v4163_v48 = vcombine.low %v158_v34, %v162_v35  ;;  %v214_v35 = vld [vmem:[%s6368_s1 + $0x410] sm:$0xff] }
 0x10f   :  { %3490 = vmatprep.subr.bf16.mxu0 %v4116_v15  ;;  %3654 = vmatprep.subr.bf16.mxu1 %v4118_v49  ;;  %v4165_v15 = vcombine.low %v159_v36, %v163_v37  ;;  %v4172_v49 = vcombine.high %v166_v43, %v170_v45  ;;  %v4174_v51 = vcombine.high %v167_v46, %v171_v47  ;;  %v218_v36 = vld [vmem:[%s6368_s1 + $0x430] sm:$0xff]  ;;  %v215_v37 = vld [vmem:[%s6368_s1 + $0x418] sm:$0xff] }
 0x112   :  { %3491 = vmatpush1.bf16.msra.mxu0 %v4115_v55  ;;  %3655 = vmatpush1.bf16.msra.mxu1 %v4117_v56  ;;  %v179_v55 = vld [vmem:[%s6368_s1 + $0x2f8] sm:$0xff]  ;;  %v4171_v56 = vcombine.low %v166_v43, %v170_v45  ;;  %v222_v45 = vld [vmem:[%s6368_s1 + $0x450] sm:$0xff] }
 0x113   :  { %3492 = vmatprep.subr.bf16.mxu0 %v4124_v57  ;;  %3656 = vmatprep.subr.bf16.mxu1 %v4126_v58  ;;  %v4173_v57 = vcombine.low %v167_v46, %v171_v47  ;;  %v4180_v58 = vcombine.high %v174_v23, %v178_v9  ;;  %v4182_v60 = vcombine.high %v175_v52, %v179_v55  ;;  %v226_v46 = vld [vmem:[%s6368_s1 + $0x470] sm:$0xff]  ;;  %v223_v47 = vld [vmem:[%s6368_s1 + $0x458] sm:$0xff] }
 0x116   :  { %3493 = vmatpush1.bf16.msra.mxu0 %v4123_v1  ;;  %3657 = vmatpush1.bf16.msra.mxu1 %v4125_v3  ;;  %v187_v1 = vld [vmem:[%s6368_s1 + $0x338] sm:$0xff]  ;;  %v4179_v3 = vcombine.low %v174_v23, %v178_v9  ;;  %v230_v9 = vld [vmem:[%s6368_s1 + $0x490] sm:$0xff] }
 0x117   :  { %3494 = vmatprep.subr.bf16.mxu0 %v4132_v4  ;;  %3658 = vmatprep.subr.bf16.mxu1 %v4134_v5  ;;  %v4181_v4 = vcombine.low %v175_v52, %v179_v55  ;;  %v4188_v5 = vcombine.high %v182_v61, %v186_v62  ;;  %v4190_v6 = vcombine.high %v183_v0, %v187_v1  ;;  %v234_v52 = vld [vmem:[%s6368_s1 + $0x4b0] sm:$0xff]  ;;  %v231_v55 = vld [vmem:[%s6368_s1 + $0x498] sm:$0xff] }
 0x11a   :  { %3495 = vmatpush1.bf16.msra.mxu0 %v4131_v10  ;;  %3659 = vmatpush1.bf16.msra.mxu1 %v4133_v12  ;;  %v195_v10 = vld [vmem:[%s6368_s1 + $0x378] sm:$0xff]  ;;  %v4187_v12 = vcombine.low %v182_v61, %v186_v62  ;;  %v238_v62 = vld [vmem:[%s6368_s1 + $0x4d0] sm:$0xff] }
 0x11b   :  { %3496 = vmatprep.subr.bf16.mxu0 %v4140_v13  ;;  %3660 = vmatprep.subr.bf16.mxu1 %v4142_v59  ;;  %v4189_v13 = vcombine.low %v183_v0, %v187_v1  ;;  %v4196_v59 = vcombine.high %v190_v7, %v194_v8  ;;  %v4198_v14 = vcombine.high %v191_v31, %v195_v10  ;;  %v242_v0 = vld [vmem:[%s6368_s1 + $0x4f0] sm:$0xff]  ;;  %v243_v1 = vld [vmem:[%s6368_s1 + $0x4f8] sm:$0xff] }
 0x11e   :  { %3497 = vmatpush1.bf16.msra.mxu0 %v4139_v19  ;;  %3661 = vmatpush1.bf16.msra.mxu1 %v4141_v20  ;;  %v203_v19 = vld [vmem:[%s6368_s1 + $0x3b8] sm:$0xff]  ;;  %v4195_v20 = vcombine.low %v190_v7, %v194_v8  ;;  %v246_v7 = vld [vmem:[%s6368_s1 + $0x510] sm:$0xff] }
 0x11f   :  { %3498 = vmatprep.subr.bf16.mxu0 %v4148_v21  ;;  %3662 = vmatprep.subr.bf16.mxu1 %v4150_v22  ;;  %v4197_v21 = vcombine.low %v191_v31, %v195_v10  ;;  %v4204_v22 = vcombine.high %v198_v16, %v202_v17  ;;  %v4206_v24 = vcombine.high %v199_v18, %v203_v19  ;;  %v250_v8 = vld [vmem:[%s6368_s1 + $0x530] sm:$0xff]  ;;  %v251_v31 = vld [vmem:[%s6368_s1 + $0x538] sm:$0xff] }
 0x120   :  { %v4243_v10 = vcombine.low %v238_v62, %v242_v0 }
 0x122   :  { %3499 = vmatpush1.bf16.msra.mxu0 %v4147_v30  ;;  %3663 = vmatpush1.bf16.msra.mxu1 %v4149_v63  ;;  %v211_v30 = vld [vmem:[%s6368_s1 + $0x3f8] sm:$0xff]  ;;  %v4203_v63 = vcombine.low %v198_v16, %v202_v17  ;;  %v258_v16 = vld [vmem:[%s6368_s1 + $0x570] sm:$0xff] }
 0x123   :  { %3500 = vmatprep.subr.bf16.mxu0 %v4156_v32  ;;  %3664 = vmatprep.subr.bf16.mxu1 %v4158_v54  ;;  %v4205_v32 = vcombine.low %v199_v18, %v203_v19  ;;  %v4212_v54 = vcombine.high %v206_v27, %v210_v28  ;;  %v4214_v34 = vcombine.high %v207_v29, %v211_v30  ;;  %v255_v17 = vld [vmem:[%s6368_s1 + $0x558] sm:$0xff] }
 0x124   :  { %v259_v18 = vld [vmem:[%s6368_s1 + $0x578] sm:$0xff]  ;;  %v4251_v19 = vcombine.low %v246_v7, %v250_v8 }
 0x126   :  { %3501 = vmatpush1.bf16.msra.mxu0 %v4155_v38  ;;  %3665 = vmatpush1.bf16.msra.mxu1 %v4157_v39  ;;  %v219_v38 = vld [vmem:[%s6368_s1 + $0x438] sm:$0xff]  ;;  %v4211_v39 = vcombine.low %v206_v27, %v210_v28  ;;  %v266_v27 = vld [vmem:[%s6368_s1 + $0x5b0] sm:$0xff] }
 0x127   :  { %3502 = vmatprep.subr.bf16.mxu0 %v4164_v40  ;;  %3666 = vmatprep.subr.bf16.mxu1 %v4166_v42  ;;  %v4213_v40 = vcombine.low %v207_v29, %v211_v30  ;;  %v4220_v42 = vcombine.high %v214_v35, %v218_v36  ;;  %v4222_v43 = vcombine.high %v215_v37, %v219_v38  ;;  %v263_v28 = vld [vmem:[%s6368_s1 + $0x598] sm:$0xff] }
 0x128   :  { %v267_v29 = vld [vmem:[%s6368_s1 + $0x5b8] sm:$0xff] }
 0x12a   :  { %3503 = vmatpush1.bf16.msra.mxu0 %v4163_v48  ;;  %3667 = vmatpush1.bf16.msra.mxu1 %v4165_v15  ;;  %v227_v48 = vld [vmem:[%s6368_s1 + $0x478] sm:$0xff]  ;;  %v4219_v15 = vcombine.low %v214_v35, %v218_v36  ;;  %v274_v35 = vld [vmem:[%s6368_s1 + $0x5f0] sm:$0xff] }
 0x12b   :  { %3504 = vmatprep.subr.bf16.mxu0 %v4172_v49  ;;  %3668 = vmatprep.subr.bf16.mxu1 %v4174_v51  ;;  %v4221_v49 = vcombine.low %v215_v37, %v219_v38  ;;  %v4228_v51 = vcombine.high %v222_v45, %v226_v46  ;;  %v4230_v23 = vcombine.high %v223_v47, %v227_v48  ;;  %v271_v36 = vld [vmem:[%s6368_s1 + $0x5d8] sm:$0xff] }
 0x12c   :  { %v275_v37 = vld [vmem:[%s6368_s1 + $0x5f8] sm:$0xff] }
 0x12e   :  { %3505 = vmatpush1.bf16.msra.mxu0 %v4171_v56  ;;  %3669 = vmatpush1.bf16.msra.mxu1 %v4173_v57  ;;  %v235_v56 = vld [vmem:[%s6368_s1 + $0x4b8] sm:$0xff]  ;;  %v4227_v57 = vcombine.low %v222_v45, %v226_v46  ;;  %v282_v45 = vld [vmem:[%s6368_s1 + $0x630] sm:$0xff] }
 0x12f   :  { %3506 = vmatprep.subr.bf16.mxu0 %v4180_v58  ;;  %3670 = vmatprep.subr.bf16.mxu1 %v4182_v60  ;;  %v4229_v58 = vcombine.low %v223_v47, %v227_v48  ;;  %v4236_v60 = vcombine.high %v230_v9, %v234_v52  ;;  %v4238_v61 = vcombine.high %v231_v55, %v235_v56  ;;  %v279_v46 = vld [vmem:[%s6368_s1 + $0x618] sm:$0xff] }
 0x130   :  { %v283_v47 = vld [vmem:[%s6368_s1 + $0x638] sm:$0xff] }
 0x132   :  { %3507 = vmatpush1.bf16.msra.mxu0 %v4179_v3  ;;  %3671 = vmatpush1.bf16.msra.mxu1 %v4181_v4  ;;  %v4235_v3 = vcombine.low %v230_v9, %v234_v52  ;;  %v4237_v4 = vcombine.low %v231_v55, %v235_v56  ;;  %v290_v9 = vld [vmem:[%s6368_s1 + $0x670] sm:$0xff]  ;;  %v287_v52 = vld [vmem:[%s6368_s1 + $0x658] sm:$0xff] }
 0x133   :  { %3508 = vmatprep.subr.bf16.mxu0 %v4188_v5  ;;  %3672 = vmatprep.subr.bf16.mxu1 %v4190_v6  ;;  %v4244_v5 = vcombine.high %v238_v62, %v242_v0  ;;  %v291_v55 = vld [vmem:[%s6368_s1 + $0x678] sm:$0xff]  ;;  %v298_v62 = vld [vmem:[%s6368_s1 + $0x6b0] sm:$0xff] }
 0x134   :  { %v295_v0 = vld [vmem:[%s6368_s1 + $0x698] sm:$0xff] }
 0x136   :  { %3509 = vmatpush1.bf16.msra.mxu0 %v4187_v12  ;;  %3673 = vmatpush1.bf16.msra.mxu1 %v4189_v13  ;;  %v4252_v13 = vcombine.high %v246_v7, %v250_v8  ;;  %v306_v7 = vld [vmem:[%s6368_s1 + $0x6f0] sm:$0xff]  ;;  %v303_v8 = vld [vmem:[%s6368_s1 + $0x6d8] sm:$0xff] }
 0x137   :  { %3510 = vmatprep.subr.bf16.mxu0 %v4196_v59  ;;  %3674 = vmatprep.subr.bf16.mxu1 %v4198_v14  ;;  %v254_v14 = vld [vmem:[%s6368_s1 + $0x550] sm:$0xff] }
 0x138   :  { %v4259_v30 = vcombine.low %v254_v14, %v258_v16 }
 0x13a   :  { %3511 = vmatpush1.bf16.msra.mxu0 %v4195_v20  ;;  %3675 = vmatpush1.bf16.msra.mxu1 %v4197_v21  ;;  %v4260_v21 = vcombine.high %v254_v14, %v258_v16  ;;  %v314_v14 = vld [vmem:[%s6368_s1 + $0x730] sm:$0xff]  ;;  %v311_v16 = vld [vmem:[%s6368_s1 + $0x718] sm:$0xff] }
 0x13b   :  { %3512 = vmatprep.subr.bf16.mxu0 %v4204_v22  ;;  %3676 = vmatprep.subr.bf16.mxu1 %v4206_v24  ;;  %v4262_v22 = vcombine.high %v255_v17, %v259_v18  ;;  %v262_v24 = vld [vmem:[%s6368_s1 + $0x590] sm:$0xff] }
 0x13c   :  { %v4267_v38 = vcombine.low %v262_v24, %v266_v27 }
 0x13e   :  { %3513 = vmatpush1.bf16.msra.mxu0 %v4203_v63  ;;  %3677 = vmatpush1.bf16.msra.mxu1 %v4205_v32  ;;  %v4261_v63 = vcombine.low %v255_v17, %v259_v18  ;;  %v4268_v32 = vcombine.high %v262_v24, %v266_v27  ;;  %v315_v17 = vld [vmem:[%s6368_s1 + $0x738] sm:$0xff]  ;;  %v322_v24 = vld [vmem:[%s6368_s1 + $0x770] sm:$0xff] }
 0x13f   :  { %3514 = vmatprep.subr.bf16.mxu0 %v4212_v54  ;;  %3678 = vmatprep.subr.bf16.mxu1 %v4214_v34  ;;  %v4270_v54 = vcombine.high %v263_v28, %v267_v29  ;;  %v270_v34 = vld [vmem:[%s6368_s1 + $0x5d0] sm:$0xff]  ;;  %v319_v27 = vld [vmem:[%s6368_s1 + $0x758] sm:$0xff] }
 0x140   :  { %v4275_v48 = vcombine.low %v270_v34, %v274_v35 }
 0x142   :  { %3515 = vmatpush1.bf16.msra.mxu0 %v4211_v39  ;;  %3679 = vmatpush1.bf16.msra.mxu1 %v4213_v40  ;;  %v4269_v39 = vcombine.low %v263_v28, %v267_v29  ;;  %v4276_v40 = vcombine.high %v270_v34, %v274_v35  ;;  %v323_v28 = vld [vmem:[%s6368_s1 + $0x778] sm:$0xff]  ;;  %v330_v34 = vld [vmem:[%s6368_s1 + $0x7b0] sm:$0xff] }
 0x143   :  { %3525 = vmatprep.subr.bf16.mxu0 %v4220_v42  ;;  %3689 = vmatprep.subr.bf16.mxu1 %v4222_v43  ;;  %v4278_v42 = vcombine.high %v271_v36, %v275_v37  ;;  %v278_v43 = vld [vmem:[%s6368_s1 + $0x610] sm:$0xff]  ;;  %v327_v35 = vld [vmem:[%s6368_s1 + $0x798] sm:$0xff] }
 0x144   :  { %v4283_v56 = vcombine.low %v278_v43, %v282_v45 }
 0x145   :  { %3517 = vmatmul.mubr.bf16.vlgmr.msra.gmra.mrb[4].mxu0 %v4921_v25  ;;  %3681 = vmatmul.mubr.bf16.vlgmr.msra.gmra.mrb[4].mxu1 %v4921_v25  ;;  %v239_v25 = vld [vmem:[%s6368_s1 + $0x4d8] sm:$0xff] }
 0x146   :  { %3526 = vmatpush1.bf16.msra.mxu0 %v4219_v15  ;;  %3690 = vmatpush1.bf16.msra.mxu1 %v4221_v49  ;;  %v4246_v6 = vcombine.high %v239_v25, %v243_v1  ;;  %v4245_v12 = vcombine.low %v239_v25, %v243_v1  ;;  %v4277_v15 = vcombine.low %v271_v36, %v275_v37  ;;  %v299_v25 = vld [vmem:[%s6368_s1 + $0x6b8] sm:$0xff] }
 0x147   :  { %3527 = vmatprep.subr.bf16.mxu0 %v4228_v51  ;;  %3691 = vmatprep.subr.bf16.mxu1 %v4230_v23  ;;  %v4284_v49 = vcombine.high %v278_v43, %v282_v45  ;;  %v4286_v51 = vcombine.high %v279_v46, %v283_v47  ;;  %v286_v23 = vld [vmem:[%s6368_s1 + $0x650] sm:$0xff]  ;;  %v331_v36 = vld [vmem:[%s6368_s1 + $0x7b8] sm:$0xff] }
 0x148   :  { %3557 = vmatprep.mubr.bf16.mxu0 %v4935_v33  ;;  %3721 = vmatprep.mubr.bf16.mxu1 %v4935_v33  ;;  %v247_v33 = vld [vmem:[%s6368_s1 + $0x518] sm:$0xff]  ;;  %v4291_v1 = vcombine.low %v286_v23, %v290_v9  ;;  %v338_v43 = vld [vmem:[%s6368_s1 + $0x7f0] sm:$0xff] }
 0x149   :  { %v4254_v59 = vcombine.high %v247_v33, %v251_v31  ;;  %v4253_v20 = vcombine.low %v247_v33, %v251_v31  ;;  %v307_v33 = vld [vmem:[%s6368_s1 + $0x6f8] sm:$0xff] }
 0x14a   :  { %3528 = vmatpush1.bf16.msra.mxu0 %v4227_v57  ;;  %3692 = vmatpush1.bf16.msra.mxu1 %v4229_v58  ;;  %v4285_v57 = vcombine.low %v279_v46, %v283_v47  ;;  %v4292_v58 = vcombine.high %v286_v23, %v290_v9  ;;  %v335_v45 = vld [vmem:[%s6368_s1 + $0x7d8] sm:$0xff]  ;;  %v346_v23 = vld [vmem:[%s6368_s1 + $0x830] sm:$0xff] }
 0x14b   :  { %3529 = vmatprep.subr.bf16.mxu0 %v4236_v60  ;;  %3693 = vmatprep.subr.bf16.mxu1 %v4238_v61  ;;  %v4294_v60 = vcombine.high %v287_v52, %v291_v55  ;;  %v294_v61 = vld [vmem:[%s6368_s1 + $0x690] sm:$0xff]  ;;  %v339_v46 = vld [vmem:[%s6368_s1 + $0x7f8] sm:$0xff] }
 0x14c   :  { %v4299_v31 = vcombine.low %v294_v61, %v298_v62  ;;  %v343_v9 = vld [vmem:[%s6368_s1 + $0x818] sm:$0xff] }
 0x14e   :  { %3530 = vmatpush1.bf16.msra.mxu0 %v4235_v3  ;;  %3694 = vmatpush1.bf16.msra.mxu1 %v4237_v4  ;;  %v4293_v3 = vcombine.low %v287_v52, %v291_v55  ;;  %v4300_v4 = vcombine.high %v294_v61, %v298_v62  ;;  %v347_v52 = vld [vmem:[%s6368_s1 + $0x838] sm:$0xff]  ;;  %v354_v61 = vld [vmem:[%s6368_s1 + $0x870] sm:$0xff] }
 0x14f   :  { %3531 = vmatprep.subr.bf16.mxu0 %v4244_v5  ;;  %3695 = vmatprep.subr.bf16.mxu1 %v4246_v6  ;;  %v4302_v5 = vcombine.high %v295_v0, %v299_v25  ;;  %v302_v6 = vld [vmem:[%s6368_s1 + $0x6d0] sm:$0xff]  ;;  %v351_v62 = vld [vmem:[%s6368_s1 + $0x858] sm:$0xff] }
 0x150   :  { %v4307_v18 = vcombine.low %v302_v6, %v306_v7 }
 0x152   :  { %3532 = vmatpush1.bf16.msra.mxu0 %v4243_v10  ;;  %3696 = vmatpush1.bf16.msra.mxu1 %v4245_v12  ;;  %v4301_v10 = vcombine.low %v295_v0, %v299_v25  ;;  %v4308_v12 = vcombine.high %v302_v6, %v306_v7  ;;  %v355_v0 = vld [vmem:[%s6368_s1 + $0x878] sm:$0xff]  ;;  %v362_v6 = vld [vmem:[%s6368_s1 + $0x8b0] sm:$0xff] }
 0x153   :  { %3533 = vmatprep.subr.bf16.mxu0 %v4252_v13  ;;  %3697 = vmatprep.subr.bf16.mxu1 %v4254_v59  ;;  %v4310_v13 = vcombine.high %v303_v8, %v307_v33  ;;  %v310_v59 = vld [vmem:[%s6368_s1 + $0x710] sm:$0xff]  ;;  %v359_v7 = vld [vmem:[%s6368_s1 + $0x898] sm:$0xff] }
 0x154   :  { %v4315_v29 = vcombine.low %v310_v59, %v314_v14 }
 0x156   :  { %3534 = vmatpush1.bf16.msra.mxu0 %v4251_v19  ;;  %3698 = vmatpush1.bf16.msra.mxu1 %v4253_v20  ;;  %v4309_v19 = vcombine.low %v303_v8, %v307_v33  ;;  %v4316_v20 = vcombine.high %v310_v59, %v314_v14  ;;  %v363_v8 = vld [vmem:[%s6368_s1 + $0x8b8] sm:$0xff]  ;;  %v370_v59 = vld [vmem:[%s6368_s1 + $0x8f0] sm:$0xff] }
 0x157   :  { %3535 = vmatprep.subr.bf16.mxu0 %v4260_v21  ;;  %3699 = vmatprep.subr.bf16.mxu1 %v4262_v22  ;;  %v4318_v21 = vcombine.high %v311_v16, %v315_v17  ;;  %v318_v22 = vld [vmem:[%s6368_s1 + $0x750] sm:$0xff]  ;;  %v371_v14 = vld [vmem:[%s6368_s1 + $0x8f8] sm:$0xff] }
 0x158   :  { %v4323_v37 = vcombine.low %v318_v22, %v322_v24 }
 0x15a   :  { %3536 = vmatpush1.bf16.msra.mxu0 %v4259_v30  ;;  %3700 = vmatpush1.bf16.msra.mxu1 %v4261_v63  ;;  %v4317_v30 = vcombine.low %v311_v16, %v315_v17  ;;  %v4324_v63 = vcombine.high %v318_v22, %v322_v24  ;;  %v4365_v17 = vcombine.low %v359_v7, %v363_v8  ;;  %v379_v22 = vld [vmem:[%s6368_s1 + $0x938] sm:$0xff] }
 0x15b   :  { %3537 = vmatprep.subr.bf16.mxu0 %v4268_v32  ;;  %3701 = vmatprep.subr.bf16.mxu1 %v4270_v54  ;;  %v4326_v32 = vcombine.high %v319_v27, %v323_v28  ;;  %v326_v54 = vld [vmem:[%s6368_s1 + $0x790] sm:$0xff] }
 0x15c   :  { %v4331_v47 = vcombine.low %v326_v54, %v330_v34 }
 0x15e   :  { %3538 = vmatpush1.bf16.msra.mxu0 %v4267_v38  ;;  %3702 = vmatpush1.bf16.msra.mxu1 %v4269_v39  ;;  %v4325_v38 = vcombine.low %v319_v27, %v323_v28  ;;  %v4332_v39 = vcombine.high %v326_v54, %v330_v34  ;;  %v387_v54 = vld [vmem:[%s6368_s1 + $0x978] sm:$0xff] }
 0x15f   :  { %3539 = vmatprep.subr.bf16.mxu0 %v4276_v40  ;;  %3703 = vmatprep.subr.bf16.mxu1 %v4278_v42  ;;  %v4334_v40 = vcombine.high %v327_v35, %v331_v36  ;;  %v334_v42 = vld [vmem:[%s6368_s1 + $0x7d0] sm:$0xff] }
 0x160   :  { %v4339_v55 = vcombine.low %v334_v42, %v338_v43 }
 0x162   :  { %3540 = vmatpush1.bf16.msra.mxu0 %v4275_v48  ;;  %3704 = vmatpush1.bf16.msra.mxu1 %v4277_v15  ;;  %v4333_v48 = vcombine.low %v327_v35, %v331_v36  ;;  %v4340_v15 = vcombine.high %v334_v42, %v338_v43  ;;  %v395_v42 = vld [vmem:[%s6368_s1 + $0x9b8] sm:$0xff] }
 0x163   :  { %3541 = vmatprep.subr.bf16.mxu0 %v4284_v49  ;;  %3705 = vmatprep.subr.bf16.mxu1 %v4286_v51  ;;  %v4342_v49 = vcombine.high %v335_v45, %v339_v46  ;;  %v342_v51 = vld [vmem:[%s6368_s1 + $0x810] sm:$0xff] }
 0x164   :  { %v4347_v25 = vcombine.low %v342_v51, %v346_v23 }
 0x166   :  { %3542 = vmatpush1.bf16.msra.mxu0 %v4283_v56  ;;  %3706 = vmatpush1.bf16.msra.mxu1 %v4285_v57  ;;  %v4341_v56 = vcombine.low %v335_v45, %v339_v46  ;;  %v4348_v57 = vcombine.high %v342_v51, %v346_v23  ;;  %v403_v51 = vld [vmem:[%s6368_s1 + $0x9f8] sm:$0xff] }
 0x167   :  { %3543 = vmatprep.subr.bf16.mxu0 %v4292_v58  ;;  %3707 = vmatprep.subr.bf16.mxu1 %v4294_v60  ;;  %v4350_v58 = vcombine.high %v343_v9, %v347_v52  ;;  %v350_v60 = vld [vmem:[%s6368_s1 + $0x850] sm:$0xff] }
 0x168   :  { %v4355_v33 = vcombine.low %v350_v60, %v354_v61 }
 0x16a   :  { %3544 = vmatpush1.bf16.msra.mxu0 %v4291_v1  ;;  %3708 = vmatpush1.bf16.msra.mxu1 %v4293_v3  ;;  %v4349_v1 = vcombine.low %v343_v9, %v347_v52  ;;  %v4356_v3 = vcombine.high %v350_v60, %v354_v61  ;;  %v411_v60 = vld [vmem:[%s6368_s1 + $0xa38] sm:$0xff] }
 0x16b   :  { %3545 = vmatprep.subr.bf16.mxu0 %v4300_v4  ;;  %3709 = vmatprep.subr.bf16.mxu1 %v4302_v5  ;;  %v4358_v4 = vcombine.high %v351_v62, %v355_v0  ;;  %v358_v5 = vld [vmem:[%s6368_s1 + $0x890] sm:$0xff] }
 0x16c   :  { %v4363_v16 = vcombine.low %v358_v5, %v362_v6 }
 0x16e   :  { %3546 = vmatpush1.bf16.msra.mxu0 %v4299_v31  ;;  %3710 = vmatpush1.bf16.msra.mxu1 %v4301_v10  ;;  %v4357_v31 = vcombine.low %v351_v62, %v355_v0  ;;  %v4364_v10 = vcombine.high %v358_v5, %v362_v6  ;;  %v419_v5 = vld [vmem:[%s6368_s1 + $0xa78] sm:$0xff] }
 0x16f   :  { %3547 = vmatprep.subr.bf16.mxu0 %v4308_v12  ;;  %3711 = vmatprep.subr.bf16.mxu1 %v4310_v13  ;;  %v4366_v12 = vcombine.high %v359_v7, %v363_v8  ;;  %v366_v13 = vld [vmem:[%s6368_s1 + $0x8d0] sm:$0xff] }
 0x170   :  { %v4371_v24 = vcombine.low %v366_v13, %v370_v59 }
 0x172   :  { %3548 = vmatpush1.bf16.msra.mxu0 %v4307_v18  ;;  %3712 = vmatpush1.bf16.msra.mxu1 %v4309_v19  ;;  %v4372_v18 = vcombine.high %v366_v13, %v370_v59  ;;  %v427_v13 = vld [vmem:[%s6368_s1 + $0xab8] sm:$0xff] }
 0x173   :  { %3549 = vmatprep.subr.bf16.mxu0 %v4316_v20  ;;  %3713 = vmatprep.subr.bf16.mxu1 %v4318_v21  ;;  %v374_v20 = vld [vmem:[%s6368_s1 + $0x910] sm:$0xff] }
 0x174   :  { %v378_v21 = vld [vmem:[%s6368_s1 + $0x930] sm:$0xff] }
 0x175   :  { %v4380_v28 = vcombine.high %v374_v20, %v378_v21  ;;  %v4379_v34 = vcombine.low %v374_v20, %v378_v21  ;;  %v435_v20 = vld [vmem:[%s6368_s1 + $0xaf8] sm:$0xff] }
 0x176   :  { %3550 = vmatpush1.bf16.msra.mxu0 %v4315_v29  ;;  %3714 = vmatpush1.bf16.msra.mxu1 %v4317_v30  ;;  %v382_v30 = vld [vmem:[%s6368_s1 + $0x950] sm:$0xff] }
 0x177   :  { %3551 = vmatprep.subr.bf16.mxu0 %v4324_v63  ;;  %3715 = vmatprep.subr.bf16.mxu1 %v4326_v32  ;;  %v386_v63 = vld [vmem:[%s6368_s1 + $0x970] sm:$0xff]  ;;  %v383_v32 = vld [vmem:[%s6368_s1 + $0x958] sm:$0xff] }
 0x178   :  { %v4388_v36 = vcombine.high %v382_v30, %v386_v63  ;;  %v4387_v43 = vcombine.low %v382_v30, %v386_v63  ;;  %v4389_v45 = vcombine.low %v383_v32, %v387_v54  ;;  %v443_v30 = vld [vmem:[%s6368_s1 + $0xb38] sm:$0xff] }
 0x17a   :  { %3552 = vmatpush1.bf16.msra.mxu0 %v4323_v37  ;;  %3716 = vmatpush1.bf16.msra.mxu1 %v4325_v38  ;;  %v4390_v37 = vcombine.high %v383_v32, %v387_v54  ;;  %v390_v38 = vld [vmem:[%s6368_s1 + $0x990] sm:$0xff] }
 0x17b   :  { %3553 = vmatprep.subr.bf16.mxu0 %v4332_v39  ;;  %3717 = vmatprep.subr.bf16.mxu1 %v4334_v40  ;;  %v394_v39 = vld [vmem:[%s6368_s1 + $0x9b0] sm:$0xff]  ;;  %v391_v40 = vld [vmem:[%s6368_s1 + $0x998] sm:$0xff] }
 0x17c   :  { %v4396_v46 = vcombine.high %v390_v38, %v394_v39  ;;  %v4395_v23 = vcombine.low %v390_v38, %v394_v39  ;;  %v4397_v9 = vcombine.low %v391_v40, %v395_v42  ;;  %v451_v38 = vld [vmem:[%s6368_s1 + $0xb78] sm:$0xff] }
 0x17e   :  { %3554 = vmatpush1.bf16.msra.mxu0 %v4331_v47  ;;  %3718 = vmatpush1.bf16.msra.mxu1 %v4333_v48  ;;  %v4398_v47 = vcombine.high %v391_v40, %v395_v42  ;;  %v398_v48 = vld [vmem:[%s6368_s1 + $0x9d0] sm:$0xff] }
 0x17f   :  { %3555 = vmatprep.subr.bf16.mxu0 %v4340_v15  ;;  %3719 = vmatprep.subr.bf16.mxu1 %v4342_v49  ;;  %v402_v15 = vld [vmem:[%s6368_s1 + $0x9f0] sm:$0xff]  ;;  %v399_v49 = vld [vmem:[%s6368_s1 + $0x9d8] sm:$0xff] }
 0x180   :  { %v4404_v52 = vcombine.high %v398_v48, %v402_v15  ;;  %v4403_v61 = vcombine.low %v398_v48, %v402_v15  ;;  %v4405_v62 = vcombine.low %v399_v49, %v403_v51  ;;  %v459_v48 = vld [vmem:[%s6368_s1 + $0xbb8] sm:$0xff] }
 0x182   :  { %3556 = vmatpush1.bf16.msra.mxu0 %v4339_v55  ;;  %3720 = vmatpush1.bf16.msra.mxu1 %v4341_v56  ;;  %v4406_v55 = vcombine.high %v399_v49, %v403_v51  ;;  %v406_v56 = vld [vmem:[%s6368_s1 + $0xa10] sm:$0xff] }
 0x183   :  { %3566 = vmatprep.subr.bf16.mxu0 %v4348_v57  ;;  %3730 = vmatprep.subr.bf16.mxu1 %v4350_v58  ;;  %v410_v57 = vld [vmem:[%s6368_s1 + $0xa30] sm:$0xff]  ;;  %v407_v58 = vld [vmem:[%s6368_s1 + $0xa18] sm:$0xff] }
 0x184   :  { %v4412_v0 = vcombine.high %v406_v56, %v410_v57  ;;  %v4411_v6 = vcombine.low %v406_v56, %v410_v57  ;;  %v4413_v7 = vcombine.low %v407_v58, %v411_v60  ;;  %v467_v56 = vld [vmem:[%s6368_s1 + $0xbf8] sm:$0xff] }
 0x185   :  { %3558 = vmatmul.mubr.bf16.vlgmr.msra.gmra.mrb[4].mxu0 %v5134_v41  ;;  %3722 = vmatmul.mubr.bf16.vlgmr.msra.gmra.mrb[4].mxu1 %v5134_v41  ;;  %v367_v41 = vld [vmem:[%s6368_s1 + $0x8d8] sm:$0xff] }
 0x186   :  { %3567 = vmatpush1.bf16.msra.mxu0 %v4347_v25  ;;  %3731 = vmatpush1.bf16.msra.mxu1 %v4349_v1  ;;  %v4374_v19 = vcombine.high %v367_v41, %v371_v14  ;;  %v4373_v27 = vcombine.low %v367_v41, %v371_v14  ;;  %v4414_v25 = vcombine.high %v407_v58, %v411_v60  ;;  %v414_v1 = vld [vmem:[%s6368_s1 + $0xa50] sm:$0xff] }
 0x187   :  { %3568 = vmatprep.subr.bf16.mxu0 %v4356_v3  ;;  %3732 = vmatprep.subr.bf16.mxu1 %v4358_v4  ;;  %v418_v3 = vld [vmem:[%s6368_s1 + $0xa70] sm:$0xff]  ;;  %v415_v4 = vld [vmem:[%s6368_s1 + $0xa58] sm:$0xff] }
 0x188   :  { %3598 = vmatprep.mubr.bf16.mxu0 %v5148_v50  ;;  %3762 = vmatprep.mubr.bf16.mxu1 %v5148_v50  ;;  %v375_v50 = vld [vmem:[%s6368_s1 + $0x918] sm:$0xff]  ;;  %v4420_v8 = vcombine.high %v414_v1, %v418_v3  ;;  %v4419_v59 = vcombine.low %v414_v1, %v418_v3  ;;  %v4421_v41 = vcombine.low %v415_v4, %v419_v5 }
 0x189   :  { %v4382_v29 = vcombine.high %v375_v50, %v379_v22  ;;  %v4381_v35 = vcombine.low %v375_v50, %v379_v22  ;;  %v475_v1 = vld [vmem:[%s6368_s1 + $0xc38] sm:$0xff] }
 0x18a   :  { %3569 = vmatpush1.bf16.msra.mxu0 %v4355_v33  ;;  %3733 = vmatpush1.bf16.msra.mxu1 %v4357_v31  ;;  %v4422_v33 = vcombine.high %v415_v4, %v419_v5  ;;  %v422_v31 = vld [vmem:[%s6368_s1 + $0xa90] sm:$0xff] }
 0x18b   :  { %3570 = vmatprep.subr.bf16.mxu0 %v4364_v10  ;;  %3734 = vmatprep.subr.bf16.mxu1 %v4366_v12  ;;  %v426_v10 = vld [vmem:[%s6368_s1 + $0xab0] sm:$0xff]  ;;  %v423_v12 = vld [vmem:[%s6368_s1 + $0xa98] sm:$0xff] }
 0x18c   :  { %v4428_v14 = vcombine.high %v422_v31, %v426_v10  ;;  %v4427_v21 = vcombine.low %v422_v31, %v426_v10  ;;  %v4429_v50 = vcombine.low %v423_v12, %v427_v13  ;;  %v483_v31 = vld [vmem:[%s6368_s1 + $0xc78] sm:$0xff] }
 0x18e   :  { %3571 = vmatpush1.bf16.msra.mxu0 %v4363_v16  ;;  %3735 = vmatpush1.bf16.msra.mxu1 %v4365_v17  ;;  %v4430_v16 = vcombine.high %v423_v12, %v427_v13  ;;  %v430_v17 = vld [vmem:[%s6368_s1 + $0xad0] sm:$0xff] }
 0x18f   :  { %3572 = vmatprep.subr.bf16.mxu0 %v4372_v18  ;;  %3736 = vmatprep.subr.bf16.mxu1 %v4374_v19  ;;  %v434_v18 = vld [vmem:[%s6368_s1 + $0xaf0] sm:$0xff]  ;;  %v431_v19 = vld [vmem:[%s6368_s1 + $0xad8] sm:$0xff] }
 0x190   :  { %v4436_v22 = vcombine.high %v430_v17, %v434_v18  ;;  %v4435_v63 = vcombine.low %v430_v17, %v434_v18  ;;  %v4437_v32 = vcombine.low %v431_v19, %v435_v20  ;;  %v491_v17 = vld [vmem:[%s6368_s1 + $0xcb8] sm:$0xff] }
 0x192   :  { %3573 = vmatpush1.bf16.msra.mxu0 %v4371_v24  ;;  %3737 = vmatpush1.bf16.msra.mxu1 %v4373_v27  ;;  %v4438_v24 = vcombine.high %v431_v19, %v435_v20  ;;  %v438_v27 = vld [vmem:[%s6368_s1 + $0xb10] sm:$0xff] }
 0x193   :  { %3574 = vmatprep.subr.bf16.mxu0 %v4380_v28  ;;  %3738 = vmatprep.subr.bf16.mxu1 %v4382_v29  ;;  %v442_v28 = vld [vmem:[%s6368_s1 + $0xb30] sm:$0xff]  ;;  %v439_v29 = vld [vmem:[%s6368_s1 + $0xb18] sm:$0xff] }
 0x194   :  { %v4444_v54 = vcombine.high %v438_v27, %v442_v28  ;;  %v4443_v39 = vcombine.low %v438_v27, %v442_v28  ;;  %v4445_v40 = vcombine.low %v439_v29, %v443_v30 }
 0x196   :  { %3575 = vmatpush1.bf16.msra.mxu0 %v4379_v34  ;;  %3739 = vmatpush1.bf16.msra.mxu1 %v4381_v35  ;;  %v4446_v34 = vcombine.high %v439_v29, %v443_v30  ;;  %v446_v35 = vld [vmem:[%s6368_s1 + $0xb50] sm:$0xff] }
 0x197   :  { %3576 = vmatprep.subr.bf16.mxu0 %v4388_v36  ;;  %3740 = vmatprep.subr.bf16.mxu1 %v4390_v37  ;;  %v450_v36 = vld [vmem:[%s6368_s1 + $0xb70] sm:$0xff]  ;;  %v447_v37 = vld [vmem:[%s6368_s1 + $0xb58] sm:$0xff] }
 0x198   :  { %v4452_v42 = vcombine.high %v446_v35, %v450_v36  ;;  %v4451_v15 = vcombine.low %v446_v35, %v450_v36  ;;  %v4453_v49 = vcombine.low %v447_v37, %v451_v38 }
 0x19a   :  { %3577 = vmatpush1.bf16.msra.mxu0 %v4387_v43  ;;  %3741 = vmatpush1.bf16.msra.mxu1 %v4389_v45  ;;  %v4454_v43 = vcombine.high %v447_v37, %v451_v38  ;;  %v454_v45 = vld [vmem:[%s6368_s1 + $0xb90] sm:$0xff] }
 0x19b   :  { %3578 = vmatprep.subr.bf16.mxu0 %v4396_v46  ;;  %3742 = vmatprep.subr.bf16.mxu1 %v4398_v47  ;;  %v458_v46 = vld [vmem:[%s6368_s1 + $0xbb0] sm:$0xff]  ;;  %v455_v47 = vld [vmem:[%s6368_s1 + $0xb98] sm:$0xff] }
 0x19c   :  { %v4460_v51 = vcombine.high %v454_v45, %v458_v46  ;;  %v4459_v57 = vcombine.low %v454_v45, %v458_v46  ;;  %v4461_v58 = vcombine.low %v455_v47, %v459_v48  ;;  %v510_v38 = vld [vmem:[%s6368_s1 + $0xd50] sm:$0xff] }
 0x19e   :  { %3579 = vmatpush1.bf16.msra.mxu0 %v4395_v23  ;;  %3743 = vmatpush1.bf16.msra.mxu1 %v4397_v9  ;;  %v4462_v23 = vcombine.high %v455_v47, %v459_v48  ;;  %v462_v9 = vld [vmem:[%s6368_s1 + $0xbd0] sm:$0xff] }
 0x19f   :  { %3580 = vmatprep.subr.bf16.mxu0 %v4404_v52  ;;  %3744 = vmatprep.subr.bf16.mxu1 %v4406_v55  ;;  %v466_v52 = vld [vmem:[%s6368_s1 + $0xbf0] sm:$0xff]  ;;  %v463_v55 = vld [vmem:[%s6368_s1 + $0xbd8] sm:$0xff] }
 0x1a0   :  { %v4468_v60 = vcombine.high %v462_v9, %v466_v52  ;;  %v4467_v3 = vcombine.low %v462_v9, %v466_v52  ;;  %v4469_v4 = vcombine.low %v463_v55, %v467_v56  ;;  %v518_v48 = vld [vmem:[%s6368_s1 + $0xd90] sm:$0xff] }
 0x1a2   :  { %3581 = vmatpush1.bf16.msra.mxu0 %v4403_v61  ;;  %3745 = vmatpush1.bf16.msra.mxu1 %v4405_v62  ;;  %v4470_v61 = vcombine.high %v463_v55, %v467_v56  ;;  %v470_v62 = vld [vmem:[%s6368_s1 + $0xc10] sm:$0xff] }
 0x1a3   :  { %3582 = vmatprep.subr.bf16.mxu0 %v4412_v0  ;;  %3746 = vmatprep.subr.bf16.mxu1 %v4414_v25  ;;  %v474_v0 = vld [vmem:[%s6368_s1 + $0xc30] sm:$0xff]  ;;  %v471_v25 = vld [vmem:[%s6368_s1 + $0xc18] sm:$0xff] }
 0x1a4   :  { %v4476_v5 = vcombine.high %v470_v62, %v474_v0  ;;  %v4475_v10 = vcombine.low %v470_v62, %v474_v0  ;;  %v4477_v12 = vcombine.low %v471_v25, %v475_v1  ;;  %v527_v62 = vld [vmem:[%s6368_s1 + $0xdd8] sm:$0xff] }
 0x1a5   :  { %v531_v0 = vld [vmem:[%s6368_s1 + $0xdf8] sm:$0xff] }
 0x1a6   :  { %3583 = vmatpush1.bf16.msra.mxu0 %v4411_v6  ;;  %3747 = vmatpush1.bf16.msra.mxu1 %v4413_v7  ;;  %v4478_v6 = vcombine.high %v471_v25, %v475_v1  ;;  %v478_v7 = vld [vmem:[%s6368_s1 + $0xc50] sm:$0xff] }
 0x1a7   :  { %3584 = vmatprep.subr.bf16.mxu0 %v4420_v8  ;;  %3748 = vmatprep.subr.bf16.mxu1 %v4422_v33  ;;  %v482_v8 = vld [vmem:[%s6368_s1 + $0xc70] sm:$0xff]  ;;  %v479_v33 = vld [vmem:[%s6368_s1 + $0xc58] sm:$0xff] }
 0x1a8   :  { %v4484_v13 = vcombine.high %v478_v7, %v482_v8  ;;  %v4483_v18 = vcombine.low %v478_v7, %v482_v8  ;;  %v4485_v19 = vcombine.low %v479_v33, %v483_v31 }
 0x1aa   :  { %3585 = vmatpush1.bf16.msra.mxu0 %v4419_v59  ;;  %3749 = vmatpush1.bf16.msra.mxu1 %v4421_v41  ;;  %v4486_v59 = vcombine.high %v479_v33, %v483_v31  ;;  %v486_v41 = vld [vmem:[%s6368_s1 + $0xc90] sm:$0xff] }
 0x1ab   :  { %3586 = vmatprep.subr.bf16.mxu0 %v4428_v14  ;;  %3750 = vmatprep.subr.bf16.mxu1 %v4430_v16  ;;  %v490_v14 = vld [vmem:[%s6368_s1 + $0xcb0] sm:$0xff]  ;;  %v487_v16 = vld [vmem:[%s6368_s1 + $0xc98] sm:$0xff] }
 0x1ac   :  { %v4492_v20 = vcombine.high %v486_v41, %v490_v14  ;;  %v4491_v27 = vcombine.low %v486_v41, %v490_v14  ;;  %v4493_v28 = vcombine.low %v487_v16, %v491_v17  ;;  %v535_v14 = vld [vmem:[%s6368_s1 + $0xe18] sm:$0xff] }
 0x1ae   :  { %3587 = vmatpush1.bf16.msra.mxu0 %v4427_v21  ;;  %3751 = vmatpush1.bf16.msra.mxu1 %v4429_v50  ;;  %v4494_v21 = vcombine.high %v487_v16, %v491_v17  ;;  %v494_v50 = vld [vmem:[%s6368_s1 + $0xcd0] sm:$0xff]  ;;  %v539_v16 = vld [vmem:[%s6368_s1 + $0xe38] sm:$0xff] }
 0x1af   :  { %3588 = vmatprep.subr.bf16.mxu0 %v4436_v22  ;;  %3752 = vmatprep.subr.bf16.mxu1 %v4438_v24  ;;  %v498_v22 = vld [vmem:[%s6368_s1 + $0xcf0] sm:$0xff]  ;;  %v499_v24 = vld [vmem:[%s6368_s1 + $0xcf8] sm:$0xff] }
 0x1b0   :  { %v4500_v29 = vcombine.high %v494_v50, %v498_v22 }
 0x1b2   :  { %3589 = vmatpush1.bf16.msra.mxu0 %v4435_v63  ;;  %3753 = vmatpush1.bf16.msra.mxu1 %v4437_v32  ;;  %v502_v63 = vld [vmem:[%s6368_s1 + $0xd10] sm:$0xff] }
 0x1b3   :  { %3590 = vmatprep.subr.bf16.mxu0 %v4444_v54  ;;  %3754 = vmatprep.subr.bf16.mxu1 %v4446_v34  ;;  %v506_v32 = vld [vmem:[%s6368_s1 + $0xd30] sm:$0xff]  ;;  %v507_v54 = vld [vmem:[%s6368_s1 + $0xd38] sm:$0xff]  ;;  %v4499_v34 = vcombine.low %v494_v50, %v498_v22 }
 0x1b4   :  { %v4508_v36 = vcombine.high %v502_v63, %v506_v32  ;;  %v542_v50 = vld [vmem:[%s6368_s1 + $0xe50] sm:$0xff] }
 0x1b5   :  { %v546_v22 = vld [vmem:[%s6368_s1 + $0xe70] sm:$0xff] }
 0x1b6   :  { %3591 = vmatpush1.bf16.msra.mxu0 %v4443_v39  ;;  %3755 = vmatpush1.bf16.msra.mxu1 %v4445_v40  ;;  %v514_v39 = vld [vmem:[%s6368_s1 + $0xd70] sm:$0xff]  ;;  %v511_v40 = vld [vmem:[%s6368_s1 + $0xd58] sm:$0xff] }
 0x1b7   :  { %3592 = vmatprep.subr.bf16.mxu0 %v4452_v42  ;;  %3756 = vmatprep.subr.bf16.mxu1 %v4454_v43  ;;  %v515_v42 = vld [vmem:[%s6368_s1 + $0xd78] sm:$0xff]  ;;  %v4507_v43 = vcombine.low %v502_v63, %v506_v32  ;;  %v4516_v46 = vcombine.high %v510_v38, %v514_v39  ;;  %v550_v63 = vld [vmem:[%s6368_s1 + $0xe90] sm:$0xff] }
 0x1b8   :  { %v4518_v47 = vcombine.high %v511_v40, %v515_v42  ;;  %v4517_v9 = vcombine.low %v511_v40, %v515_v42  ;;  %v554_v32 = vld [vmem:[%s6368_s1 + $0xeb0] sm:$0xff]  ;;  %v559_v40 = vld [vmem:[%s6368_s1 + $0xed8] sm:$0xff] }
 0x1b9   :  { %v563_v42 = vld [vmem:[%s6368_s1 + $0xef8] sm:$0xff] }
 0x1ba   :  { %3593 = vmatpush1.bf16.msra.mxu0 %v4451_v15  ;;  %3757 = vmatpush1.bf16.msra.mxu1 %v4453_v49  ;;  %v522_v15 = vld [vmem:[%s6368_s1 + $0xdb0] sm:$0xff]  ;;  %v519_v49 = vld [vmem:[%s6368_s1 + $0xd98] sm:$0xff] }
 0x1bb   :  { %3594 = vmatprep.subr.bf16.mxu0 %v4460_v51  ;;  %3758 = vmatprep.subr.bf16.mxu1 %v4462_v23  ;;  %v523_v51 = vld [vmem:[%s6368_s1 + $0xdb8] sm:$0xff]  ;;  %v4515_v23 = vcombine.low %v510_v38, %v514_v39  ;;  %v4524_v52 = vcombine.high %v518_v48, %v522_v15  ;;  %v558_v38 = vld [vmem:[%s6368_s1 + $0xed0] sm:$0xff] }
 0x1bc   :  { %v4526_v56 = vcombine.high %v519_v49, %v523_v51  ;;  %v4525_v8 = vcombine.low %v519_v49, %v523_v51  ;;  %v562_v39 = vld [vmem:[%s6368_s1 + $0xef0] sm:$0xff]  ;;  %v567_v49 = vld [vmem:[%s6368_s1 + $0xf18] sm:$0xff] }
 0x1bd   :  { %v571_v51 = vld [vmem:[%s6368_s1 + $0xf38] sm:$0xff] }
 0x1be   :  { %3595 = vmatpush1.bf16.msra.mxu0 %v4459_v57  ;;  %3759 = vmatpush1.bf16.msra.mxu1 %v4461_v58  ;;  %v526_v57 = vld [vmem:[%s6368_s1 + $0xdd0] sm:$0xff] }
 0x1bf   :  { %3596 = vmatprep.subr.bf16.mxu0 %v4468_v60  ;;  %3760 = vmatprep.subr.bf16.mxu1 %v4470_v61  ;;  %v530_v58 = vld [vmem:[%s6368_s1 + $0xdf0] sm:$0xff] }
 0x1c0   :  { %v4532_v33 = vcombine.high %v526_v57, %v530_v58  ;;  %v4531_v17 = vcombine.low %v526_v57, %v530_v58  ;;  %v578_v57 = vld [vmem:[%s6368_s1 + $0xf70] sm:$0xff]  ;;  %v575_v58 = vld [vmem:[%s6368_s1 + $0xf58] sm:$0xff] }
 0x1c2   :  { %3597 = vmatpush1.bf16.msra.mxu0 %v4467_v3  ;;  %3761 = vmatpush1.bf16.msra.mxu1 %v4469_v4  ;;  %v4523_v4 = vcombine.low %v518_v48, %v522_v15  ;;  %v566_v48 = vld [vmem:[%s6368_s1 + $0xf10] sm:$0xff] }
 0x1c3   :  { %3607 = vmatprep.subr.bf16.mxu0 %v4476_v5  ;;  %3771 = vmatprep.subr.bf16.mxu1 %v4478_v6  ;;  %v570_v15 = vld [vmem:[%s6368_s1 + $0xf30] sm:$0xff] }
 0x1c5   :  { %3599 = vmatmul.mubr.bf16.vlgmr.msra.gmra.mrb[4].mxu0 %v5343_v2  ;;  %3763 = vmatmul.mubr.bf16.vlgmr.msra.gmra.mrb[4].mxu1 %v5343_v2  ;;  %v495_v2 = vld [vmem:[%s6368_s1 + $0xcd8] sm:$0xff] }
 0x1c6   :  { %3608 = vmatpush1.bf16.msra.mxu0 %v4475_v10  ;;  %3772 = vmatpush1.bf16.msra.mxu1 %v4477_v12  ;;  %v4502_v30 = vcombine.high %v495_v2, %v499_v24  ;;  %v4501_v35 = vcombine.low %v495_v2, %v499_v24  ;;  %v4534_v12 = vcombine.high %v527_v62, %v531_v0  ;;  %v543_v2 = vld [vmem:[%s6368_s1 + $0xe58] sm:$0xff] }
 0x1c7   :  { %3609 = vmatprep.subr.bf16.mxu0 %v4484_v13  ;;  %3773 = vmatprep.subr.bf16.mxu1 %v4486_v59  ;;  %v534_v13 = vld [vmem:[%s6368_s1 + $0xe10] sm:$0xff]  ;;  %v547_v24 = vld [vmem:[%s6368_s1 + $0xe78] sm:$0xff] }
 0x1c8   :  { %3639 = vmatprep.mubr.bf16.mxu0 %v5357_v11  ;;  %3803 = vmatprep.mubr.bf16.mxu1 %v5357_v11  ;;  %v503_v11 = vld [vmem:[%s6368_s1 + $0xd18] sm:$0xff]  ;;  %v538_v59 = vld [vmem:[%s6368_s1 + $0xe30] sm:$0xff] }
 0x1c9   :  { %v4510_v37 = vcombine.high %v503_v11, %v507_v54  ;;  %v4509_v45 = vcombine.low %v503_v11, %v507_v54  ;;  %v551_v11 = vld [vmem:[%s6368_s1 + $0xe98] sm:$0xff] }
 0x1ca   :  { %3610 = vmatpush1.bf16.msra.mxu0 %v4483_v18  ;;  %3774 = vmatpush1.bf16.msra.mxu1 %v4485_v19  ;;  %v4533_v19 = vcombine.low %v527_v62, %v531_v0  ;;  %v555_v54 = vld [vmem:[%s6368_s1 + $0xeb8] sm:$0xff]  ;;  %v4573_v62 = vcombine.low %v567_v49, %v571_v51 }
 0x1cb   :  { %3611 = vmatprep.subr.bf16.mxu0 %v4492_v20  ;;  %3775 = vmatprep.subr.bf16.mxu1 %v4494_v21  ;;  %v4540_v20 = vcombine.high %v534_v13, %v538_v59  ;;  %v4542_v21 = vcombine.high %v535_v14, %v539_v16 }
 0x1ce   :  { %3612 = vmatpush1.bf16.msra.mxu0 %v4491_v27  ;;  %3776 = vmatpush1.bf16.msra.mxu1 %v4493_v28  ;;  %v4539_v27 = vcombine.low %v534_v13, %v538_v59  ;;  %v4541_v28 = vcombine.low %v535_v14, %v539_v16  ;;  %v591_v13 = vld [vmem:[%s6368_s1 + $0xfd8] sm:$0xff] }
 0x1cf   :  { %3613 = vmatprep.subr.bf16.mxu0 %v4500_v29  ;;  %3777 = vmatprep.subr.bf16.mxu1 %v4502_v30  ;;  %v4548_v29 = vcombine.high %v542_v50, %v546_v22  ;;  %v4550_v30 = vcombine.high %v543_v2, %v547_v24  ;;  %v595_v59 = vld [vmem:[%s6368_s1 + $0xff8] sm:$0xff] }
 0x1d2   :  { %3614 = vmatpush1.bf16.msra.mxu0 %v4499_v34  ;;  %3778 = vmatpush1.bf16.msra.mxu1 %v4501_v35  ;;  %v4547_v34 = vcombine.low %v542_v50, %v546_v22  ;;  %v4549_v35 = vcombine.low %v543_v2, %v547_v24  ;;  %v10_v50 = vstv %s6370_s4  ;;  %v3869_v22 = vsub.s32 0, %v4748_v44 }
 0x1d3   :  { %3615 = vmatprep.subr.bf16.mxu0 %v4508_v36  ;;  %3779 = vmatprep.subr.bf16.mxu1 %v4510_v37  ;;  %v4556_v36 = vcombine.high %v550_v63, %v554_v32  ;;  %v4558_v37 = vcombine.high %v551_v11, %v555_v54  ;;  %11 = vst [vmem:[#allocation3] sm:$0x1] %v10_v50  ;;  %v3873_v2 = vsub.s32 1, %v4748_v44  ;;  %v3877_v24 = vsub.s32 2, %v4748_v44 }
 0x1d6   :  { %3616 = vmatpush1.bf16.msra.mxu0 %v4507_v43  ;;  %3780 = vmatpush1.bf16.msra.mxu1 %v4509_v45  ;;  %v4555_v43 = vcombine.low %v550_v63, %v554_v32  ;;  %v4557_v45 = vcombine.low %v551_v11, %v555_v54  ;;  %v3939_v54 = vld [vmem:[%s6372_s3] sm:$0xff] }
 0x1d7   :  { %3617 = vmatprep.subr.bf16.mxu0 %v4516_v46  ;;  %3781 = vmatprep.subr.bf16.mxu1 %v4518_v47  ;;  %v4564_v46 = vcombine.high %v558_v38, %v562_v39  ;;  %v4566_v47 = vcombine.high %v559_v40, %v563_v42 }
 0x1d8   :  { %v3313_v55 = vpop.f32.mrb[0].mxu0  ;;  %v3477_v60 = vpop.f32.mrb[0].mxu1 }
 0x1d9   :  { %v3315_v61 = vpop.f32.mrb[1].mxu0  ;;  %v3479_v1 = vpop.f32.mrb[1].mxu1 }
 0x1da   :  { %v3820_v25 = vcombine.low %v3313_v55, %v3315_v61  ;;  %v3317_v3 = vpop.f32.mrb[2].mxu0  ;;  %3618 = vmatpush1.bf16.msra.mxu0 %v4515_v23  ;;  %v3821_v5 = vcombine.low %v3477_v60, %v3479_v1  ;;  %v3481_v6 = vpop.f32.mrb[2].mxu1  ;;  %3782 = vmatpush1.bf16.msra.mxu1 %v4517_v9  ;;  %v4563_v23 = vcombine.low %v558_v38, %v562_v39  ;;  %v579_v60 = vld [vmem:[%s6368_s1 + $0xf78] sm:$0xff]  ;;  %v582_v1 = vld [vmem:[%s6368_s1 + $0xf90] sm:$0xff] }
 0x1db   :  { %v3318_v7 = vpop.f32.mrb[3].mxu0  ;;  %3619 = vmatprep.subr.bf16.mxu0 %v4524_v52  ;;  %v3482_v10 = vpop.f32.mrb[3].mxu1  ;;  %3783 = vmatprep.subr.bf16.mxu1 %v4526_v56  ;;  %v4565_v9 = vcombine.low %v559_v40, %v563_v42  ;;  %v4572_v52 = vcombine.high %v566_v48, %v570_v15  ;;  %v4574_v55 = vcombine.high %v567_v49, %v571_v51  ;;  %v574_v56 = vld [vmem:[%s6368_s1 + $0xf50] sm:$0xff]  ;;  %v3885_v49 = vsub.s32 4, %v4748_v44 }
 0x1dc   :  { %v6218_v31 = vrot.slane %v3820_v25, %v4763_v53  ;;  %v6227_v41 = vrot.slane %v3821_v5, %v4763_v53  ;;  %v4571_v61 = vcombine.low %v566_v48, %v570_v15  ;;  %v4580_v0 = vcombine.high %v574_v56, %v578_v57  ;;  %v586_v3 = vld [vmem:[%s6368_s1 + $0xfb0] sm:$0xff]  ;;  %v587_v5 = vld [vmem:[%s6368_s1 + $0xfb8] sm:$0xff] }
 0x1dd   :  { %v4582_v25 = vcombine.high %v575_v58, %v579_v60  ;;  %v4579_v6 = vcombine.low %v574_v56, %v578_v57  ;;  %v4581_v7 = vcombine.low %v575_v58, %v579_v60  ;;  %v590_v10 = vld [vmem:[%s6368_s1 + $0xfd0] sm:$0xff]  ;;  %v4587_v14 = vcombine.low %v582_v1, %v586_v3 }
 0x1de   :  { %3620 = vmatpush1.bf16.msra.mxu0 %v4523_v4  ;;  %v3836_v18 = vcombine.low %v6218_v31, %v6227_v41  ;;  %3784 = vmatpush1.bf16.msra.mxu1 %v4525_v8  ;;  %v583_v4 = vld [vmem:[%s6368_s1 + $0xf98] sm:$0xff]  ;;  %v4588_v8 = vcombine.high %v582_v1, %v586_v3  ;;  %v3952_v38 = vrot.slane %v3939_v54, %v3877_v24  ;;  %v3889_v51 = vsub.s32 5, %v4748_v44 }
 0x1df   :  { %3621 = vmatprep.subr.bf16.mxu0 %v4532_v33  ;;  %3785 = vmatprep.subr.bf16.mxu1 %v4534_v12  ;;  %v4590_v33 = vcombine.high %v583_v4, %v587_v5  ;;  %v594_v12 = vld [vmem:[%s6368_s1 + $0xff0] sm:$0xff]  ;;  %v4589_v16 = vcombine.low %v583_v4, %v587_v5  ;;  %v3960_v60 = vrot.slane %v3939_v54, %v3885_v49 }
 0x1e2   :  { %3622 = vmatpush1.bf16.msra.mxu0 %v4531_v17  ;;  %3786 = vmatpush1.bf16.msra.mxu1 %v4533_v19  ;;  %v4596_v17 = vcombine.high %v590_v10, %v594_v12  ;;  %v4598_v19 = vcombine.high %v591_v13, %v595_v59 }
 0x1e3   :  { %3623 = vmatprep.subr.bf16.mxu0 %v4540_v20  ;;  %3787 = vmatprep.subr.bf16.mxu1 %v4542_v21  ;;  %v4595_v20 = vcombine.low %v590_v10, %v594_v12  ;;  %v4597_v21 = vcombine.low %v591_v13, %v595_v59 }
 0x1e6   :  { %3624 = vmatpush1.bf16.msra.mxu0 %v4539_v27  ;;  %3788 = vmatpush1.bf16.msra.mxu1 %v4541_v28  ;;  %v3881_v27 = vsub.s32 3, %v4748_v44  ;;  %v3865_v28 = vld [vmem:[%s6371_s2] sm:$0xff] }
 0x1e7   :  { %3625 = vmatprep.subr.bf16.mxu0 %v4548_v29  ;;  %3789 = vmatprep.subr.bf16.mxu1 %v4550_v30  ;;  %v3870_v29 = vrot.slane %v3865_v28, %v3869_v22  ;;  %v3874_v30 = vrot.slane %v3865_v28, %v3873_v2  ;;  %v3890_v56 = vrot.slane %v3865_v28, %v3889_v51 }
 0x1e8   :  { %v3882_v63 = vrot.slane %v3865_v28, %v3881_v27  ;;  %v3956_v39 = vrot.slane %v3939_v54, %v3881_v27 }
 0x1e9   :  { %v3899_v32 = vcombine.low %v3870_v29, %v3874_v30 }
 0x1ea   :  { %3626 = vmatpush1.bf16.msra.mxu0 %v4547_v34  ;;  %3790 = vmatpush1.bf16.msra.mxu1 %v4549_v35 }
 0x1eb   :  { %3627 = vmatprep.subr.bf16.mxu0 %v4556_v36  ;;  %3791 = vmatprep.subr.bf16.mxu1 %v4558_v37  ;;  %v3907_v34 = vrot.slane %v3899_v32, %v4763_v53  ;;  %v3944_v36 = vrot.slane %v3939_v54, %v3869_v22  ;;  %v3948_v37 = vrot.slane %v3939_v54, %v3873_v2 }
 0x1ed   :  { %v3973_v42 = vcombine.low %v3944_v36, %v3948_v37 }
 0x1ee   :  { %3628 = vmatpush1.bf16.msra.mxu0 %v4555_v43  ;;  %3792 = vmatpush1.bf16.msra.mxu1 %v4557_v45  ;;  %v3974_v43 = vcombine.low %v3952_v38, %v3956_v39 }
 0x1ef   :  { %3629 = vmatprep.subr.bf16.mxu0 %v4564_v46  ;;  %3793 = vmatprep.subr.bf16.mxu1 %v4566_v47  ;;  %v3981_v46 = vrot.slane %v3973_v42, %v4763_v53 }
 0x1f0   :  { %v3988_v47 = vrot.slane %v3974_v43, %v4763_v53 }
 0x1f2   :  { %3630 = vmatpush1.bf16.msra.mxu0 %v4563_v23  ;;  %3794 = vmatpush1.bf16.msra.mxu1 %v4565_v9  ;;  %v3989_v15 = vcombine.low %v3981_v46, %v3988_v47  ;;  %v3893_v23 = vsub.s32 6, %v4748_v44  ;;  %v3897_v9 = vsub.s32 7, %v4748_v44 }
 0x1f3   :  { %3631 = vmatprep.subr.bf16.mxu0 %v4572_v52  ;;  %3795 = vmatprep.subr.bf16.mxu1 %v4574_v55  ;;  %v3886_v55 = vrot.slane %v3865_v28, %v3885_v49 }
 0x1f4   :  { %v3894_v57 = vrot.slane %v3865_v28, %v3893_v23  ;;  %v3898_v31 = vrot.slane %v3865_v28, %v3897_v9 }
 0x1f6   :  { %3632 = vmatpush1.bf16.msra.mxu0 %v4571_v61  ;;  %3796 = vmatpush1.bf16.msra.mxu1 %v4573_v62  ;;  %v3917_v58 = vcombine.low %v3894_v57, %v3898_v31  ;;  %v3964_v61 = vrot.slane %v3939_v54, %v3889_v51  ;;  %v3968_v62 = vrot.slane %v3939_v54, %v3893_v23  ;;  %v4599_v51 = vld [vmem:[#allocation3] ss:$0 sm:$0xff] }
 0x1f7   :  { %3633 = vmatprep.subr.bf16.mxu0 %v4580_v0  ;;  %3797 = vmatprep.subr.bf16.mxu1 %v4582_v25  ;;  %v3972_v0 = vrot.slane %v3939_v54, %v3897_v9 }
 0x1f8   :  { %v3931_v44 = vrot.slane %v3917_v58, %v4763_v53 }
 0x1fa   :  { %3634 = vmatpush1.bf16.msra.mxu0 %v4579_v6  ;;  %3798 = vmatpush1.bf16.msra.mxu1 %v4581_v7  ;;  %v3990_v6 = vcombine.low %v3960_v60, %v3964_v61  ;;  %v3991_v7 = vcombine.low %v3968_v62, %v3972_v0 }
 0x1fb   :  { %3635 = vmatprep.subr.bf16.mxu0 %v4588_v8  ;;  %3799 = vmatprep.subr.bf16.mxu1 %v4590_v33 }
 0x1fc   :  { %v3998_v50 = vrot.slane %v3990_v6, %v4763_v53  ;;  %v4005_v22 = vrot.slane %v3991_v7, %v4763_v53 }
 0x1fe   :  { %3636 = vmatpush1.bf16.msra.mxu0 %v4587_v14  ;;  %3800 = vmatpush1.bf16.msra.mxu1 %v4589_v16  ;;  %v4006_v30 = vcombine.low %v3998_v50, %v4005_v22 }
 0x1ff   :  { %3637 = vmatprep.subr.bf16.mxu0 %v4596_v17  ;;  %3801 = vmatprep.subr.bf16.mxu1 %v4598_v19 }
 0x202   :  { %3638 = vmatpush1.bf16.msra.mxu0 %v4595_v20  ;;  %3802 = vmatpush1.bf16.msra.mxu1 %v4597_v21 }
 0x205   :  { %3640 = vmatmul.mubr.bf16.vlgmr.msra.gmra.mrb[4].mxu0 %v5545_v26  ;;  %3804 = vmatmul.mubr.bf16.vlgmr.msra.gmra.mrb[4].mxu1 %v5545_v26  ;;  %v3878_v26 = vrot.slane %v3865_v28, %v3877_v24 }
 0x207   :  { %v3900_v11 = vcombine.low %v3878_v26, %v3882_v63 }
 0x209   :  { %v3914_v35 = vrot.slane %v3900_v11, %v4763_v53 }
 0x20b   :  { %v3915_v40 = vcombine.low %v3907_v34, %v3914_v35 }
 0x20d   :  { %v3935_v45 = vadd.f32 %v3915_v40, %v3836_v18  ;;  %v3916_v18 = vcombine.low %v3886_v55, %v3890_v56 }
 0x20f   :  { %v3937_v48 = vmax.f32 %v3935_v45, 0.0  ;;  %v3924_v5 = vrot.slane %v3916_v18, %v4763_v53 }
 0x211   :  { %v4009_v52 = vmul.f32 %v3989_v15, %v3937_v48  ;;  %v3932_v21 = vcombine.low %v3924_v5, %v3931_v44 }
 0x213   :  { %v4020_v41 = vrot.slane %v4009_v52, %v4763_v53  ;;  %v4013_v12 = vcombine.high %v4009_v52, %v4009_v52 }
 0x215   :  { %v4028_v25 = vcombine.high %v4020_v41, %v4020_v41  ;;  %v4027_v24 = vrot.slane %v4013_v12, %v4763_v53  ;;  %v4056_v27 = vsel %vm4055_vm0, %v4020_v41, 0.0 }
 0x217   :  { %v4057_v19 = vsel %vm4055_vm0, %v4028_v25, 0.0  ;;  %v4029_v63 = vcombine.high %v4027_v24, %v4027_v24  ;;  %v4059_v32 = vsel %vm4055_vm0, %v4027_v24, 0.0 }
 0x218   :  { %v4058_v28 = vadd.f32 %v4057_v19, %v4056_v27 }
 0x219   :  { %v4061_v36 = vsel %vm4055_vm0, %v4029_v63, 0.0 }
 0x21a   :  { %v4060_v11 = vadd.f32 %v4059_v32, %v4058_v28 }
 0x21c   :  { %v4062_v37 = vadd.f32 %v4061_v36, %v4060_v11 }
 0x2d8   :  { %v3641_v1 = vpop.f32.mrb[4].mxu0  ;;  %v3805_v3 = vpop.f32.mrb[4].mxu1 }
 0x2d9   :  { %v3643_v4 = vpop.f32.mrb[5].mxu0  ;;  %v3807_v33 = vpop.f32.mrb[5].mxu1 }
 0x2da   :  { %v3837_v8 = vcombine.low %v3641_v1, %v3643_v4  ;;  %v3645_v10 = vpop.f32.mrb[6].mxu0  ;;  %v3838_v13 = vcombine.low %v3805_v3, %v3807_v33  ;;  %v3809_v59 = vpop.f32.mrb[6].mxu1 }
 0x2db   :  { %v3646_v14 = vpop.f32.mrb[7].mxu0  ;;  %v3810_v17 = vpop.f32.mrb[7].mxu1 }
 0x2dc   :  { %v3845_v16 = vrot.slane %v3837_v8, %v4763_v53  ;;  %v3852_v20 = vrot.slane %v3838_v13, %v4763_v53 }
 0x2de   :  { %v3853_v2 = vcombine.low %v3845_v16, %v3852_v20 }
 0x2e0   :  { %v3936_v29 = vadd.f32 %v3932_v21, %v3853_v2 }
 0x2e2   :  { %v3938_v26 = vmax.f32 %v3936_v29, 0.0 }
 0x2e4   :  { %v4010_v54 = vmul.f32 %v4006_v30, %v3938_v26 }
 0x2e6   :  { %v4030_v34 = vcombine.high %v4010_v54, %v4010_v54  ;;  %v4037_v35 = vrot.slane %v4010_v54, %v4763_v53 }
 0x2e8   :  { %v4044_v38 = vrot.slane %v4030_v34, %v4763_v53  ;;  %v4045_v39 = vcombine.high %v4037_v35, %v4037_v35  ;;  %v4063_v40 = vsel %vm4055_vm0, %v4037_v35, 0.0 }
 0x2e9   :  { %v4064_v42 = vadd.f32 %v4063_v40, %v4062_v37 }
 0x2ea   :  { %v4046_v43 = vcombine.high %v4044_v38, %v4044_v38  ;;  %v4065_v45 = vsel %vm4055_vm0, %v4045_v39, 0.0  ;;  %v4067_v47 = vsel %vm4055_vm0, %v4044_v38, 0.0 }
 0x2eb   :  { %v4066_v46 = vadd.f32 %v4065_v45, %v4064_v42 }
 0x2ec   :  { %v4069_v15 = vsel %vm4055_vm0, %v4046_v43, 0.0 }
 0x2ed   :  { %v4068_v48 = vadd.f32 %v4067_v47, %v4066_v46 }
 0x2ef   :  { %v4070_v49 = vadd.f32 %v4069_v15, %v4068_v48 }
 0x2f1   :  { %4071 = vadd.xlane.f32.xlu0 %v4070_v49 }
 0x37e   :  { %v4072_v23 = vpop.xlane.xlu0 %4071 }
 0x37f   :  { %v4080_v9 = vadd.f32 %v4599_v51, %v4072_v23 }
 0x381   :  { %4082 = vst.msk [vmem:[%s6373_s5] sm:$0x3] %vm4081_vm1, %v4080_v9 }

</bundles_post_ra>
